<compile_context>
chip_gen: v5e
topology: v5e:2x2
jax: 0.10.0
libtpu: 0.0.40
codegen_flags: <defaults>
</compile_context>

<pallas_src>
import functools

import jax
import jax.numpy as jnp
from jax import lax
from jax.experimental import pallas as pl
from jax.experimental.pallas import tpu as pltpu


# ----------------------------------------------------------------------------
# glue: normalized pixel grid & precomputed TPS basis matrix
# ----------------------------------------------------------------------------
def get_grid(H, W):
    """(H, W, 2) grid of (x, y) coordinates in [-1, 1]."""
    y = jnp.linspace(-1.0, 1.0, H, dtype=jnp.float32)
    x = jnp.linspace(-1.0, 1.0, W, dtype=jnp.float32)
    yy, xx = jnp.meshgrid(y, x, indexing="ij")
    return jnp.stack([xx, yy], axis=-1)


def _tps_u(r2):
    return jnp.where(r2 <= 0.0, 0.0, r2 * jnp.log(r2 + 1e-12))


def make_tps_matrix(ctrl_pts, grid_pts, reg=1e-6):
    """Precompute M of shape (P, L) such that warp_grid = M @ src_pts."""
    L = ctrl_pts.shape[0]
    P = grid_pts.shape[0]
    d2 = jnp.sum((ctrl_pts[:, None] - ctrl_pts[None, :]) ** 2, axis=-1)
    K = _tps_u(d2) + reg * jnp.eye(L, dtype=jnp.float32)
    Pm = jnp.concatenate([jnp.ones((L, 1), jnp.float32), ctrl_pts], axis=1)
    top = jnp.concatenate([K, Pm], axis=1)
    bot = jnp.concatenate([Pm.T, jnp.zeros((3, 3), jnp.float32)], axis=1)
    Lmat = jnp.concatenate([top, bot], axis=0)                  # (L+3, L+3)
    Linv = jnp.linalg.inv(Lmat)
    dg2 = jnp.sum((grid_pts[:, None] - ctrl_pts[None, :]) ** 2, axis=-1)
    Bmat = jnp.concatenate(
        [_tps_u(dg2), jnp.ones((P, 1), jnp.float32), grid_pts], axis=1)
    return Bmat @ Linv[:, :L]                                   # (P, L)


def _round_up(x, m):
    return ((x + m - 1) // m) * m


_DN_TRANS_B = (((1,), (1,)), ((), ()))   # contract both minor dims (A @ B^T)
_DN_MATMUL = (((1,), (0,)), ((), ()))    # plain A @ B
_VMEM_LIMIT = 40 << 20                   # > all default scoped limits, < v7x 64 MiB


# ----------------------------------------------------------------------------
# Pallas kernel 1: row-tiled batched TPS warp (forward only, invert=False path)
# ----------------------------------------------------------------------------
def _tps_rows_kernel(pts_ref, mat_ref, out_ref):
    # pts_ref: (tm, L) rows = interleaved (x, y) per sample; mat_ref: (po_blk, L)
    out_ref[...] = lax.dot_general(
        pts_ref[...], mat_ref[...], _DN_TRANS_B,
        preferred_element_type=jnp.float32)


def tps_forward(pts, mat, *, tm_cap=256, po_cap=2048,
                vmem_limit_bytes=_VMEM_LIMIT):
    """pts: (N, L, 2); mat: (Po, L). Returns forward warp grid (N, Po, 2)."""
    N, L, _ = pts.shape
    Po = mat.shape[0]
    R = 2 * N
    tm = min(tm_cap, _round_up(R, 8))
    Rpad = _round_up(R, tm)
    # Tile the Po (lane) axis with a second "parallel" grid dim so the
    # resident blocks stay bounded at production Po (review item 10).
    po_blk = min(po_cap, _round_up(Po, 128))
    Po_pad = _round_up(Po, po_blk)

    pts2 = jnp.swapaxes(pts.astype(jnp.float32), 1, 2).reshape(R, L)
    if Rpad != R:
        pts2 = jnp.pad(pts2, ((0, Rpad - R), (0, 0)))
    matf = mat.astype(jnp.float32)
    if Po_pad != Po:
        matf = jnp.pad(matf, ((0, Po_pad - Po), (0, 0)))

    cost = pl.CostEstimate(
        flops=int(2 * Rpad * L * Po_pad), transcendentals=0,
        bytes_accessed=int(4 * (Rpad * L + Po_pad * L + Rpad * Po_pad)))
    out = pl.pallas_call(
        _tps_rows_kernel,
        out_shape=jax.ShapeDtypeStruct((Rpad, Po_pad), jnp.float32),
        grid=(Rpad // tm, Po_pad // po_blk),
        in_specs=[pl.BlockSpec((tm, L), lambda i, j: (i, 0)),
                  pl.BlockSpec((po_blk, L), lambda i, j: (j, 0))],
        out_specs=pl.BlockSpec((tm, po_blk), lambda i, j: (i, j)),
        compiler_params=pltpu.CompilerParams(
            dimension_semantics=("parallel", "parallel"),
            vmem_limit_bytes=vmem_limit_bytes),
        cost_estimate=cost,
    )(pts2, matf)
    return jnp.swapaxes(out[:R, :Po].reshape(N, 2, Po), 1, 2)   # (N, Po, 2)


# ----------------------------------------------------------------------------
# Pallas kernel 2: fused TPS warp + nearest-neighbour grid inversion
#   grid = (sample blocks [parallel], Po tiles [arbitrary])
# ----------------------------------------------------------------------------
def _fused_warp_invert_kernel(ptsT_ref, mat_ref, srcxy_ref,
                              fwd_ref, inv_ref,
                              run_min_ref, run_idx_ref,
                              *, nb, po_tile, po_valid, po_pad, grid_hw):
    # ptsT_ref : (1, L, 2nb)      column 2j = x of local sample j, 2j+1 = y
    # mat_ref  : (po_tile, L)     TPS basis matrix tile (streamed over k)
    # srcxy_ref: (2, Ps)          source pixel coords, lane-dense (constant)
    # fwd_ref  : (1, po_tile, 2nb) forward warp grid tile (written every k)
    # inv_ref  : (2, nb, Ps)      x-plane / y-plane of inverse grid (k == last)
    # run_min_ref / run_idx_ref : (nb, Ps) VMEM scratch, sublane-packed carries
    k = pl.program_id(1)

    @pl.when(k == 0)
    def _init():
        run_min_ref[...] = jnp.full_like(run_min_ref, jnp.inf)
        run_idx_ref[...] = jnp.zeros_like(run_idx_ref)

    ptsT = ptsT_ref[0]                                            # (L, 2nb)
    mat = mat_ref[...]                                            # (po_tile, L)
    sxy = srcxy_ref[...]
    src_x = sxy[0:1, :]                                           # (1, Ps)
    src_y = sxy[1:2, :]

    # Single MXU matmul: forward grid tile for this block of samples.  The
    # same values feed the output and the inversion (no fwd/fwdT ambiguity).
    fwdT = lax.dot_general(mat, ptsT, _DN_MATMUL,
                           preferred_element_type=jnp.float32)    # (po_tile, 2nb)
    fwd_ref[0] = fwdT

    # Hoisted (po_tile, 1) column iota; no (tw, Ps) iota temp is materialised.
    row_iota = lax.broadcasted_iota(
        jnp.int32, (po_tile, 1), 0).astype(jnp.float32)
    base = (k * po_tile).astype(jnp.float32)
    big = jnp.float32(1e9)
    if po_pad != po_valid:
        # Po was padded host-side: mask padded rows out of the argmin via the
        # cheap (po_tile, 1) half-norm column (only the last tile is affected).
        valid_col = (row_iota + base) < jnp.float32(po_valid)
    else:
        valid_col = None

    tmins, gidxs = [], []
    for j in range(nb):                                           # unrolled
        fx = fwdT[:, 2 * j:2 * j + 1]                             # (po_tile, 1)
        fy = fwdT[:, 2 * j + 1:2 * j + 2]
        half = 0.5 * (fx * fx + fy * fy)                          # (po_tile, 1)
        if valid_col is not None:
            half = jnp.where(valid_col, half, big)
        # Expanded distance (per-lane sx^2+sy^2 constant dropped):
        # 4 VPU ops per (po_tile, Ps) element, ordering-equivalent to ||.||^2.
        d = half - (src_x * fx + src_y * fy)                      # (po_tile, Ps)
        tmin = jnp.min(d, axis=0, keepdims=True)                  # (1, Ps)
        # lowest-index tie-break within the tile
        tidx = jnp.min(jnp.where(d <= tmin, row_iota, jnp.float32(po_tile)),
                       axis=0, keepdims=True)                     # (1, Ps)
        tmins.append(tmin)
        gidxs.append(tidx + base)

    # Sublane-packed carry update: one compare + two selects over (nb, Ps).
    tmin_all = jnp.concatenate(tmins, axis=0)                     # (nb, Ps)
    gidx_all = jnp.concatenate(gidxs, axis=0)                     # (nb, Ps)
    prev_min = run_min_ref[...]
    prev_idx = run_idx_ref[...]
    better = tmin_all < prev_min           # strict '<': earlier tile wins ties
    run_min_ref[...] = jnp.where(better, tmin_all, prev_min)
    run_idx_ref[...] = jnp.where(better, gidx_all, prev_idx)

    @pl.when(k == pl.num_programs(1) - 1)
    def _finalize():
        Hg, Wg = grid_hw
        idx = run_idx_ref[...]             # exact integer-valued f32 (< 2^24)
        h = jnp.floor(idx / jnp.float32(Wg))
        w = idx - jnp.float32(Wg) * h
        xs = 2.0 / (Wg - 1) if Wg > 1 else 0.0
        ys = 2.0 / (Hg - 1) if Hg > 1 else 0.0
        inv_ref[0] = w * jnp.float32(xs) - 1.0                    # (nb, Ps) x
        inv_ref[1] = h * jnp.float32(ys) - 1.0                    # (nb, Ps) y


def tps_warp_and_invert(pts, mat, src_xy, grid_hw, *, nb=8, po_tile_cap=256,
                        vmem_limit_bytes=_VMEM_LIMIT):
    """pts: (N, L, 2); mat: (Po, L); src_xy: (2, Ps); grid_hw: (Hg, Wg) with
    Hg * Wg == Po.  Returns (forward grid (N, Po, 2), inverse grid (N, Ps, 2)).

    NOTE (v7x): keep po_tile_cap at 128-256 and size N so the "parallel"
    sample-block axis has an even number of steps for the two TensorCores.
    """
    N, L, _ = pts.shape
    Po = mat.shape[0]
    Ps = src_xy.shape[1]
    Hg, Wg = grid_hw
    assert Hg * Wg == Po, "grid_hw must factor the forward grid size"

    Npad = _round_up(N, nb)
    Nb = Npad // nb
    po_tile = min(po_tile_cap, _round_up(Po, 128))
    Po_pad = _round_up(Po, po_tile)
    Kp = Po_pad // po_tile

    # (Nb, L, 2nb): per block of nb samples, last-dim entry 2j = x_j, 2j+1 = y_j.
    ptsf = pts.astype(jnp.float32)
    if Npad != N:
        ptsf = jnp.concatenate(
            [ptsf, jnp.zeros((Npad - N, L, 2), jnp.float32)], axis=0)
    ptsT = jnp.transpose(ptsf.reshape(Nb, nb, L, 2),
                         (0, 2, 1, 3)).reshape(Nb, L, 2 * nb)

    matf = mat.astype(jnp.float32)
    if Po_pad != Po:
        matf = jnp.pad(matf, ((0, Po_pad - Po), (0, 0)))

    kernel = functools.partial(
        _fused_warp_invert_kernel, nb=nb, po_tile=po_tile,
        po_valid=Po, po_pad=Po_pad, grid_hw=(Hg, Wg))
    cost = pl.CostEstimate(
        flops=int(4 * Npad * L * Po_pad + 6 * Npad * Po_pad * Ps),
        transcendentals=0,
        bytes_accessed=int(4 * (2 * Npad * L + Po_pad * L + 2 * Ps
                                + 2 * Npad * Po_pad + 2 * Npad * Ps)))

    fwd, inv = pl.pallas_call(
        kernel,
        out_shape=(jax.ShapeDtypeStruct((Nb, Po_pad, 2 * nb), jnp.float32),
                   jax.ShapeDtypeStruct((2, Npad, Ps), jnp.float32)),
        grid=(Nb, Kp),
        in_specs=[pl.BlockSpec((1, L, 2 * nb), lambda i, k: (i, 0, 0)),
                  pl.BlockSpec((po_tile, L), lambda i, k: (k, 0)),
                  pl.BlockSpec((2, Ps), lambda i, k: (0, 0))],
        out_specs=(pl.BlockSpec((1, po_tile, 2 * nb), lambda i, k: (i, k, 0)),
                   pl.BlockSpec((2, nb, Ps), lambda i, k: (0, i, 0))),
        scratch_shapes=[pltpu.VMEM((nb, Ps), jnp.float32),
                        pltpu.VMEM((nb, Ps), jnp.float32)],
        compiler_params=pltpu.CompilerParams(
            dimension_semantics=("parallel", "arbitrary"),
            vmem_limit_bytes=vmem_limit_bytes),
        cost_estimate=cost,
    )(ptsT, matf, src_xy.astype(jnp.float32))

    # (Nb, Po_pad, 2nb) -> (N, Po, 2)
    tgt = fwd.reshape(Nb, Po_pad, nb, 2).transpose(0, 2, 1, 3)
    tgt = tgt.reshape(Npad, Po_pad, 2)[:N, :Po]
    # (2, Npad, Ps) -> (N, Ps, 2)
    inv_grid = jnp.moveaxis(inv, 0, -1)[:N]
    return tgt, inv_grid


# ----------------------------------------------------------------------------
# Warper (forward pass of the PyTorch module)
# ----------------------------------------------------------------------------
class WarperPallas:
    def __init__(self, latent_shape, obj_shape, patch_size, scale_factor,
                 dim, aspect_ratio, num_obj):
        self.num_obj = num_obj
        self.latent_obj_size = obj_shape[0] * obj_shape[1]
        self.latent_size = latent_shape[0] * latent_shape[1]
        self.tgt_shape = [int(obj_shape[0] * patch_size * scale_factor),
                          int(obj_shape[1] * patch_size * scale_factor)]
        self.src_shape = [dim, int(dim * aspect_ratio)]
        self.src_pts = get_grid(*latent_shape).reshape(-1, 2)          # (L, 2)
        self.tgt_pts = get_grid(*obj_shape).reshape(-1, 2)             # (Lo, 2)
        self.tgt_grid_pts = get_grid(*self.tgt_shape).reshape(-1, 2)   # (Po_obj, 2)
        self.src_grid_pts = get_grid(*self.src_shape).reshape(-1, 2)   # (Ps, 2)
        # Precomputed, deterministic TPS basis matrices (parameter setup = glue).
        self.tps_mat_obj = make_tps_matrix(self.tgt_pts, self.tgt_grid_pts)
        self.tps_mat_bg = make_tps_matrix(self.src_pts, self.src_grid_pts)
        # Lane-dense source coordinate table shared by both inversion paths.
        self.src_xy = jnp.swapaxes(self.src_grid_pts, 0, 1)            # (2, Ps)
        # TODO(synk): InverseWarp's num_perm_grid permutation search and erode
        # option have no provided reference; a nearest-neighbor grid inversion
        # is implemented instead.

    def __call__(self, obj_pose, bg_pose, invert=True):
        B, T, No, Lo, _ = obj_pose.shape
        L = self.latent_size
        Ho, Wo = self.tgt_shape
        H, W = self.src_shape

        pts_obj = obj_pose.reshape(B * T * No, Lo, 2)
        pts_bg = bg_pose.reshape(B * T, L, 2)

        if invert:
            tgt_obj, src_obj = tps_warp_and_invert(
                pts_obj, self.tps_mat_obj, self.src_xy, (Ho, Wo))
            tgt_bg, src_bg = tps_warp_and_invert(
                pts_bg, self.tps_mat_bg, self.src_xy, (H, W))
            src_obj = src_obj.reshape(B, T, No, H, W, 2)
            src_bg = src_bg.reshape(B, T, H, W, 2)
        else:
            tgt_obj = tps_forward(pts_obj, self.tps_mat_obj)
            tgt_bg = tps_forward(pts_bg, self.tps_mat_bg)
            src_obj, src_bg = None, None

        tgt_obj = tgt_obj.reshape(B, T, No, Ho, Wo, 2)
        tgt_bg = tgt_bg.reshape(B, T, H, W, 2)
        return tgt_obj, src_obj, tgt_bg, src_bg


# ----------------------------------------------------------------------------
def _ref_nn_inverse(tgt_grid, src_coords, tgt_coords):
    """Plain-JAX nearest-neighbour inversion reference. tgt_grid: (N, Po, 2)."""
    d = jnp.sum((src_coords[None, :, None, :] - tgt_grid[:, None, :, :]) ** 2,
                axis=-1)                                        # (N, Ps, Po)
    idx = jnp.argmin(d, axis=-1)
    return tgt_coords[idx]                                      # (N, Ps, 2)


if __name__ == "__main__":
    # Small synthetic "opt": latent_shape=(4,4), obj_shape=(2,2), patch_size=4,
    # scale_factor=1 -> tgt_shape=(8,8); dim=16, aspect_ratio=1 -> src_shape=(16,16)
    B, T, No = 2, 3, 2
    warper = WarperPallas(latent_shape=(4, 4), obj_shape=(2, 2),
                          patch_size=4, scale_factor=1.0,
                          dim=16, aspect_ratio=1.0, num_obj=No)
    Lo, L = warper.latent_obj_size, warper.latent_size
    Ho, Wo = warper.tgt_shape
    H, W = warper.src_shape

    key = jax.random.PRNGKey(0)
    k1, k2 = jax.random.split(key)
    obj_pose = (0.5 * warper.tgt_pts[None, None, None]
                + 0.1 * jax.random.normal(k1, (B, T, No, Lo, 2), jnp.float32))
    bg_pose = (warper.src_pts[None, None]
               + 0.05 * jax.random.normal(k2, (B, T, L, 2), jnp.float32))

    tgt_obj, src_obj, tgt_bg, src_bg = warper(obj_pose, bg_pose, invert=True)
    jax.block_until_ready((tgt_obj, src_obj, tgt_bg, src_bg))

    # --- correctness: forward TPS grids vs plain-JAX reference ---
    ref_tgt_obj = jnp.einsum("pl,nld->npd", warper.tps_mat_obj,
                             obj_pose.reshape(B * T * No, Lo, 2)).reshape(
                                 B, T, No, Ho, Wo, 2)
    ref_tgt_bg = jnp.einsum("pl,nld->npd", warper.tps_mat_bg,
                            bg_pose.reshape(B * T, L, 2)).reshape(
                                B, T, H, W, 2)
    assert jnp.allclose(tgt_obj, ref_tgt_obj, atol=1e-4), "TPS obj mismatch"
    assert jnp.allclose(tgt_bg, ref_tgt_bg, atol=1e-4), "TPS bg mismatch"

    # --- correctness: nearest-neighbour inversion vs plain-JAX reference ---
    assert src_obj.shape == (B, T, No, H, W, 2)
    assert src_bg.shape == (B, T, H, W, 2)
    assert bool(jnp.isfinite(src_obj).all()) and bool(jnp.isfinite(src_bg).all())
    ref_inv_obj = _ref_nn_inverse(tgt_obj.reshape(-1, Ho * Wo, 2),
                                  warper.src_grid_pts, warper.tgt_grid_pts)
    ref_inv_bg = _ref_nn_inverse(tgt_bg.reshape(-1, H * W, 2),
                                 warper.src_grid_pts, warper.src_grid_pts)
    frac_obj = jnp.mean((jnp.abs(src_obj.reshape(-1, H * W, 2) - ref_inv_obj)
                         <= 1e-4).astype(jnp.float32))
    frac_bg = jnp.mean((jnp.abs(src_bg.reshape(-1, H * W, 2) - ref_inv_bg)
                        <= 1e-4).astype(jnp.float32))
    assert float(frac_obj) > 0.98, "inverse obj mismatch"
    assert float(frac_bg) > 0.98, "inverse bg mismatch"

    # --- invert=False path (row-tiled, Po-tiled TPS-only kernel) ---
    tgt_obj2, src_obj2, tgt_bg2, src_bg2 = warper(obj_pose, bg_pose, invert=False)
    jax.block_until_ready((tgt_obj2, tgt_bg2))
    assert src_obj2 is None and src_bg2 is None
    assert jnp.allclose(tgt_obj2, ref_tgt_obj, atol=1e-4)
    assert jnp.allclose(tgt_bg2, ref_tgt_bg, atol=1e-4)

    print("KERNEL_OK")
</pallas_src>

<mosaic_0001>
module attributes {stable_mosaic.version = 11 : i64} {
  func.func @_fused_warp_invert_kernel(%arg0: i32, %arg1: i32, %arg2: memref<1x4x16xf32, #tpu.memory_space<vmem>>, %arg3: memref<128x4xf32, #tpu.memory_space<vmem>>, %arg4: memref<2x256xf32, #tpu.memory_space<vmem>>, %arg5: memref<1x128x16xf32, #tpu.memory_space<vmem>>, %arg6: memref<2x8x256xf32, #tpu.memory_space<vmem>>, %arg7: memref<8x256xf32, #tpu.memory_space<vmem>>, %arg8: memref<8x256xf32, #tpu.memory_space<vmem>>) attributes {dimension_semantics = [#tpu.dimension_semantics<parallel>, #tpu.dimension_semantics<arbitrary>], iteration_bounds = array<i64: 2, 1>, scalar_prefetch = 0 : i64, scratch_operands = 2 : i64, tpu.core_type = #tpu.core_type<tc>, window_params = [{transform_indices = @transform_0, window_bounds = array<i64: 1, 4, 16>}, {transform_indices = @transform_1, window_bounds = array<i64: 128, 4>}, {pipeline_mode = #tpu.pipeline_mode<synchronous>, transform_indices = @transform_2, window_bounds = array<i64: 2, 256>}, {transform_indices = @transform_3, window_bounds = array<i64: 1, 128, 16>}, {transform_indices = @transform_4, window_bounds = array<i64: 2, 8, 256>}]} {
    %c0_i32 = arith.constant 0 : i32
    %0 = arith.cmpi eq, %arg1, %c0_i32 : i32
    %1 = arith.extui %0 : i1 to i32
    %c0_i32_0 = arith.constant 0 : i32
    %2 = arith.cmpi ne, %1, %c0_i32_0 : i32
    scf.if %2 {
      %cst_61 = arith.constant 0x7F800000 : f32
      %273 = vector.broadcast %cst_61 : f32 to vector<8x256xf32>
      %c0_62 = arith.constant 0 : index
      %c0_63 = arith.constant 0 : index
      %274 = vector.load %arg7[%c0_62, %c0_63] : memref<8x256xf32, #tpu.memory_space<vmem>>, vector<8x256xf32>
      tpu.vector_store %arg7[%c0_62, %c0_63], %273 {strides = array<i32>} : memref<8x256xf32, #tpu.memory_space<vmem>>, vector<8x256xf32>,
      %cst_64 = arith.constant 0.000000e+00 : f32
      %275 = vector.broadcast %cst_64 : f32 to vector<8x256xf32>
      %c0_65 = arith.constant 0 : index
      %c0_66 = arith.constant 0 : index
      %276 = vector.load %arg8[%c0_65, %c0_66] : memref<8x256xf32, #tpu.memory_space<vmem>>, vector<8x256xf32>
      tpu.vector_store %arg8[%c0_65, %c0_66], %275 {strides = array<i32>} : memref<8x256xf32, #tpu.memory_space<vmem>>, vector<8x256xf32>,
    } else {
    }
    %c0 = arith.constant 0 : index
    %c0_1 = arith.constant 0 : index
    %c0_2 = arith.constant 0 : index
    %3 = vector.load %arg2[%c0, %c0_1, %c0_2] : memref<1x4x16xf32, #tpu.memory_space<vmem>>, vector<1x4x16xf32>
    %4 = vector.shape_cast %3 : vector<1x4x16xf32> to vector<4x16xf32>
    %c0_3 = arith.constant 0 : index
    %c0_4 = arith.constant 0 : index
    %5 = vector.load %arg3[%c0_3, %c0_4] : memref<128x4xf32, #tpu.memory_space<vmem>>, vector<128x4xf32>
    %c0_5 = arith.constant 0 : index
    %c0_6 = arith.constant 0 : index
    %6 = vector.load %arg4[%c0_5, %c0_6] : memref<2x256xf32, #tpu.memory_space<vmem>>, vector<2x256xf32>
    %7 = vector.extract_strided_slice %6 {offsets = [0, 0], sizes = [1, 256], strides = [1, 1]} : vector<2x256xf32> to vector<1x256xf32>
    %8 = vector.extract_strided_slice %6 {offsets = [1, 0], sizes = [1, 256], strides = [1, 1]} : vector<2x256xf32> to vector<1x256xf32>
    %cst = arith.constant dense<0.000000e+00> : vector<128x16xf32>
    %9 = tpu.matmul %5, %4, %cst {dimension_numbers = #tpu.dot_dimension_numbers<[1], [0], [0], [1], [0, 0, 1, 1], [], []>} : vector<128x4xf32>, vector<4x16xf32>, vector<128x16xf32> -> vector<128x16xf32>
    %c0_7 = arith.constant 0 : index
    %c0_8 = arith.constant 0 : index
    %c0_9 = arith.constant 0 : index
    %10 = vector.load %arg5[%c0_7, %c0_8, %c0_9] : memref<1x128x16xf32, #tpu.memory_space<vmem>>, vector<1x128x16xf32>
    %11 = vector.shape_cast %10 : vector<1x128x16xf32> to vector<128x16xf32>
    %12 = vector.shape_cast %9 : vector<128x16xf32> to vector<1x128x16xf32>
    tpu.vector_store %arg5[%c0_7, %c0_8, %c0_9], %12 {strides = array<i32>} : memref<1x128x16xf32, #tpu.memory_space<vmem>>, vector<1x128x16xf32>,
    %13 = tpu.iota {dimensions = array<i32: 0>} : vector<128x1xi32>
    %14 = arith.sitofp %13 : vector<128x1xi32> to vector<128x1xf32>
    %c128_i32 = arith.constant 128 : i32
    %15 = arith.muli %arg1, %c128_i32 : i32
    %16 = arith.sitofp %15 : i32 to f32
    %17 = vector.broadcast %16 : f32 to vector<128x1xf32>
    %18 = arith.addf %14, %17 : vector<128x1xf32>
    %cst_10 = arith.constant 6.400000e+01 : f32
    %19 = vector.broadcast %cst_10 : f32 to vector<128x1xf32>
    %20 = arith.cmpf olt, %18, %19 : vector<128x1xf32>
    %21 = vector.extract_strided_slice %9 {offsets = [0, 0], sizes = [128, 1], strides = [1, 1]} : vector<128x16xf32> to vector<128x1xf32>
    %22 = vector.extract_strided_slice %9 {offsets = [0, 1], sizes = [128, 1], strides = [1, 1]} : vector<128x16xf32> to vector<128x1xf32>
    %23 = arith.mulf %21, %21 : vector<128x1xf32>
    %24 = arith.mulf %22, %22 : vector<128x1xf32>
    %25 = arith.addf %23, %24 : vector<128x1xf32>
    %cst_11 = arith.constant 5.000000e-01 : f32
    %26 = vector.broadcast %cst_11 : f32 to vector<128x1xf32>
    %27 = arith.mulf %26, %25 : vector<128x1xf32>
    %cst_12 = arith.constant 1.000000e+09 : f32
    %28 = vector.broadcast %cst_12 : f32 to vector<128x1xf32>
    %29 = arith.select %20, %27, %28 : vector<128x1xi1>, vector<128x1xf32>
    %30 = vector.broadcast %7 : vector<1x256xf32> to vector<128x256xf32>
    %31 = vector.broadcast %21 : vector<128x1xf32> to vector<128x256xf32>
    %32 = arith.mulf %30, %31 : vector<128x256xf32>
    %33 = vector.broadcast %8 : vector<1x256xf32> to vector<128x256xf32>
    %34 = vector.broadcast %22 : vector<128x1xf32> to vector<128x256xf32>
    %35 = arith.mulf %33, %34 : vector<128x256xf32>
    %36 = arith.addf %32, %35 : vector<128x256xf32>
    %37 = vector.broadcast %29 : vector<128x1xf32> to vector<128x256xf32>
    %38 = arith.subf %37, %36 : vector<128x256xf32>
    %cst_13 = arith.constant dense<0x7F800000> : vector<256xf32>
    %39 = vector.multi_reduction <minimumf>, %38, %cst_13 [0] : vector<128x256xf32> to vector<256xf32>
    %40 = vector.shape_cast %39 : vector<256xf32> to vector<1x256xf32>
    %41 = vector.broadcast %40 : vector<1x256xf32> to vector<128x256xf32>
    %42 = arith.cmpf ole, %38, %41 : vector<128x256xf32>
    %cst_14 = arith.constant 1.280000e+02 : f32
    %43 = vector.shape_cast %14 : vector<128x1xf32> to vector<128x1xf32>
    %44 = vector.broadcast %43 : vector<128x1xf32> to vector<128x256xf32>
    %45 = vector.broadcast %cst_14 : f32 to vector<128x256xf32>
    %46 = arith.select %42, %44, %45 : vector<128x256xi1>, vector<128x256xf32>
    %cst_15 = arith.constant dense<0x7F800000> : vector<256xf32>
    %47 = vector.multi_reduction <minimumf>, %46, %cst_15 [0] : vector<128x256xf32> to vector<256xf32>
    %48 = vector.shape_cast %47 : vector<256xf32> to vector<1x256xf32>
    %49 = vector.broadcast %16 : f32 to vector<1x256xf32>
    %50 = arith.addf %48, %49 : vector<1x256xf32>
    %51 = vector.extract_strided_slice %9 {offsets = [0, 2], sizes = [128, 1], strides = [1, 1]} : vector<128x16xf32> to vector<128x1xf32>
    %52 = vector.extract_strided_slice %9 {offsets = [0, 3], sizes = [128, 1], strides = [1, 1]} : vector<128x16xf32> to vector<128x1xf32>
    %53 = arith.mulf %51, %51 : vector<128x1xf32>
    %54 = arith.mulf %52, %52 : vector<128x1xf32>
    %55 = arith.addf %53, %54 : vector<128x1xf32>
    %cst_16 = arith.constant 5.000000e-01 : f32
    %56 = vector.broadcast %cst_16 : f32 to vector<128x1xf32>
    %57 = arith.mulf %56, %55 : vector<128x1xf32>
    %cst_17 = arith.constant 1.000000e+09 : f32
    %58 = vector.broadcast %cst_17 : f32 to vector<128x1xf32>
    %59 = arith.select %20, %57, %58 : vector<128x1xi1>, vector<128x1xf32>
    %60 = vector.broadcast %7 : vector<1x256xf32> to vector<128x256xf32>
    %61 = vector.broadcast %51 : vector<128x1xf32> to vector<128x256xf32>
    %62 = arith.mulf %60, %61 : vector<128x256xf32>
    %63 = vector.broadcast %8 : vector<1x256xf32> to vector<128x256xf32>
    %64 = vector.broadcast %52 : vector<128x1xf32> to vector<128x256xf32>
    %65 = arith.mulf %63, %64 : vector<128x256xf32>
    %66 = arith.addf %62, %65 : vector<128x256xf32>
    %67 = vector.broadcast %59 : vector<128x1xf32> to vector<128x256xf32>
    %68 = arith.subf %67, %66 : vector<128x256xf32>
    %cst_18 = arith.constant dense<0x7F800000> : vector<256xf32>
    %69 = vector.multi_reduction <minimumf>, %68, %cst_18 [0] : vector<128x256xf32> to vector<256xf32>
    %70 = vector.shape_cast %69 : vector<256xf32> to vector<1x256xf32>
    %71 = vector.broadcast %70 : vector<1x256xf32> to vector<128x256xf32>
    %72 = arith.cmpf ole, %68, %71 : vector<128x256xf32>
    %cst_19 = arith.constant 1.280000e+02 : f32
    %73 = vector.shape_cast %14 : vector<128x1xf32> to vector<128x1xf32>
    %74 = vector.broadcast %73 : vector<128x1xf32> to vector<128x256xf32>
    %75 = vector.broadcast %cst_19 : f32 to vector<128x256xf32>
    %76 = arith.select %72, %74, %75 : vector<128x256xi1>, vector<128x256xf32>
    %cst_20 = arith.constant dense<0x7F800000> : vector<256xf32>
    %77 = vector.multi_reduction <minimumf>, %76, %cst_20 [0] : vector<128x256xf32> to vector<256xf32>
    %78 = vector.shape_cast %77 : vector<256xf32> to vector<1x256xf32>
    %79 = vector.broadcast %16 : f32 to vector<1x256xf32>
    %80 = arith.addf %78, %79 : vector<1x256xf32>
    %81 = vector.extract_strided_slice %9 {offsets = [0, 4], sizes = [128, 1], strides = [1, 1]} : vector<128x16xf32> to vector<128x1xf32>
    %82 = vector.extract_strided_slice %9 {offsets = [0, 5], sizes = [128, 1], strides = [1, 1]} : vector<128x16xf32> to vector<128x1xf32>
    %83 = arith.mulf %81, %81 : vector<128x1xf32>
    %84 = arith.mulf %82, %82 : vector<128x1xf32>
    %85 = arith.addf %83, %84 : vector<128x1xf32>
    %cst_21 = arith.constant 5.000000e-01 : f32
    %86 = vector.broadcast %cst_21 : f32 to vector<128x1xf32>
    %87 = arith.mulf %86, %85 : vector<128x1xf32>
    %cst_22 = arith.constant 1.000000e+09 : f32
    %88 = vector.broadcast %cst_22 : f32 to vector<128x1xf32>
    %89 = arith.select %20, %87, %88 : vector<128x1xi1>, vector<128x1xf32>
    %90 = vector.broadcast %7 : vector<1x256xf32> to vector<128x256xf32>
    %91 = vector.broadcast %81 : vector<128x1xf32> to vector<128x256xf32>
    %92 = arith.mulf %90, %91 : vector<128x256xf32>
    %93 = vector.broadcast %8 : vector<1x256xf32> to vector<128x256xf32>
    %94 = vector.broadcast %82 : vector<128x1xf32> to vector<128x256xf32>
    %95 = arith.mulf %93, %94 : vector<128x256xf32>
    %96 = arith.addf %92, %95 : vector<128x256xf32>
    %97 = vector.broadcast %89 : vector<128x1xf32> to vector<128x256xf32>
    %98 = arith.subf %97, %96 : vector<128x256xf32>
    %cst_23 = arith.constant dense<0x7F800000> : vector<256xf32>
    %99 = vector.multi_reduction <minimumf>, %98, %cst_23 [0] : vector<128x256xf32> to vector<256xf32>
    %100 = vector.shape_cast %99 : vector<256xf32> to vector<1x256xf32>
    %101 = vector.broadcast %100 : vector<1x256xf32> to vector<128x256xf32>
    %102 = arith.cmpf ole, %98, %101 : vector<128x256xf32>
    %cst_24 = arith.constant 1.280000e+02 : f32
    %103 = vector.shape_cast %14 : vector<128x1xf32> to vector<128x1xf32>
    %104 = vector.broadcast %103 : vector<128x1xf32> to vector<128x256xf32>
    %105 = vector.broadcast %cst_24 : f32 to vector<128x256xf32>
    %106 = arith.select %102, %104, %105 : vector<128x256xi1>, vector<128x256xf32>
    %cst_25 = arith.constant dense<0x7F800000> : vector<256xf32>
    %107 = vector.multi_reduction <minimumf>, %106, %cst_25 [0] : vector<128x256xf32> to vector<256xf32>
    %108 = vector.shape_cast %107 : vector<256xf32> to vector<1x256xf32>
    %109 = vector.broadcast %16 : f32 to vector<1x256xf32>
    %110 = arith.addf %108, %109 : vector<1x256xf32>
    %111 = vector.extract_strided_slice %9 {offsets = [0, 6], sizes = [128, 1], strides = [1, 1]} : vector<128x16xf32> to vector<128x1xf32>
    %112 = vector.extract_strided_slice %9 {offsets = [0, 7], sizes = [128, 1], strides = [1, 1]} : vector<128x16xf32> to vector<128x1xf32>
    %113 = arith.mulf %111, %111 : vector<128x1xf32>
    %114 = arith.mulf %112, %112 : vector<128x1xf32>
    %115 = arith.addf %113, %114 : vector<128x1xf32>
    %cst_26 = arith.constant 5.000000e-01 : f32
    %116 = vector.broadcast %cst_26 : f32 to vector<128x1xf32>
    %117 = arith.mulf %116, %115 : vector<128x1xf32>
    %cst_27 = arith.constant 1.000000e+09 : f32
    %118 = vector.broadcast %cst_27 : f32 to vector<128x1xf32>
    %119 = arith.select %20, %117, %118 : vector<128x1xi1>, vector<128x1xf32>
    %120 = vector.broadcast %7 : vector<1x256xf32> to vector<128x256xf32>
    %121 = vector.broadcast %111 : vector<128x1xf32> to vector<128x256xf32>
    %122 = arith.mulf %120, %121 : vector<128x256xf32>
    %123 = vector.broadcast %8 : vector<1x256xf32> to vector<128x256xf32>
    %124 = vector.broadcast %112 : vector<128x1xf32> to vector<128x256xf32>
    %125 = arith.mulf %123, %124 : vector<128x256xf32>
    %126 = arith.addf %122, %125 : vector<128x256xf32>
    %127 = vector.broadcast %119 : vector<128x1xf32> to vector<128x256xf32>
    %128 = arith.subf %127, %126 : vector<128x256xf32>
    %cst_28 = arith.constant dense<0x7F800000> : vector<256xf32>
    %129 = vector.multi_reduction <minimumf>, %128, %cst_28 [0] : vector<128x256xf32> to vector<256xf32>
    %130 = vector.shape_cast %129 : vector<256xf32> to vector<1x256xf32>
    %131 = vector.broadcast %130 : vector<1x256xf32> to vector<128x256xf32>
    %132 = arith.cmpf ole, %128, %131 : vector<128x256xf32>
    %cst_29 = arith.constant 1.280000e+02 : f32
    %133 = vector.shape_cast %14 : vector<128x1xf32> to vector<128x1xf32>
    %134 = vector.broadcast %133 : vector<128x1xf32> to vector<128x256xf32>
    %135 = vector.broadcast %cst_29 : f32 to vector<128x256xf32>
    %136 = arith.select %132, %134, %135 : vector<128x256xi1>, vector<128x256xf32>
    %cst_30 = arith.constant dense<0x7F800000> : vector<256xf32>
    %137 = vector.multi_reduction <minimumf>, %136, %cst_30 [0] : vector<128x256xf32> to vector<256xf32>
    %138 = vector.shape_cast %137 : vector<256xf32> to vector<1x256xf32>
    %139 = vector.broadcast %16 : f32 to vector<1x256xf32>
    %140 = arith.addf %138, %139 : vector<1x256xf32>
    %141 = vector.extract_strided_slice %9 {offsets = [0, 8], sizes = [128, 1], strides = [1, 1]} : vector<128x16xf32> to vector<128x1xf32>
    %142 = vector.extract_strided_slice %9 {offsets = [0, 9], sizes = [128, 1], strides = [1, 1]} : vector<128x16xf32> to vector<128x1xf32>
    %143 = arith.mulf %141, %141 : vector<128x1xf32>
    %144 = arith.mulf %142, %142 : vector<128x1xf32>
    %145 = arith.addf %143, %144 : vector<128x1xf32>
    %cst_31 = arith.constant 5.000000e-01 : f32
    %146 = vector.broadcast %cst_31 : f32 to vector<128x1xf32>
    %147 = arith.mulf %146, %145 : vector<128x1xf32>
    %cst_32 = arith.constant 1.000000e+09 : f32
    %148 = vector.broadcast %cst_32 : f32 to vector<128x1xf32>
    %149 = arith.select %20, %147, %148 : vector<128x1xi1>, vector<128x1xf32>
    %150 = vector.broadcast %7 : vector<1x256xf32> to vector<128x256xf32>
    %151 = vector.broadcast %141 : vector<128x1xf32> to vector<128x256xf32>
    %152 = arith.mulf %150, %151 : vector<128x256xf32>
    %153 = vector.broadcast %8 : vector<1x256xf32> to vector<128x256xf32>
    %154 = vector.broadcast %142 : vector<128x1xf32> to vector<128x256xf32>
    %155 = arith.mulf %153, %154 : vector<128x256xf32>
    %156 = arith.addf %152, %155 : vector<128x256xf32>
    %157 = vector.broadcast %149 : vector<128x1xf32> to vector<128x256xf32>
    %158 = arith.subf %157, %156 : vector<128x256xf32>
    %cst_33 = arith.constant dense<0x7F800000> : vector<256xf32>
    %159 = vector.multi_reduction <minimumf>, %158, %cst_33 [0] : vector<128x256xf32> to vector<256xf32>
    %160 = vector.shape_cast %159 : vector<256xf32> to vector<1x256xf32>
    %161 = vector.broadcast %160 : vector<1x256xf32> to vector<128x256xf32>
    %162 = arith.cmpf ole, %158, %161 : vector<128x256xf32>
    %cst_34 = arith.constant 1.280000e+02 : f32
    %163 = vector.shape_cast %14 : vector<128x1xf32> to vector<128x1xf32>
    %164 = vector.broadcast %163 : vector<128x1xf32> to vector<128x256xf32>
    %165 = vector.broadcast %cst_34 : f32 to vector<128x256xf32>
    %166 = arith.select %162, %164, %165 : vector<128x256xi1>, vector<128x256xf32>
    %cst_35 = arith.constant dense<0x7F800000> : vector<256xf32>
    %167 = vector.multi_reduction <minimumf>, %166, %cst_35 [0] : vector<128x256xf32> to vector<256xf32>
    %168 = vector.shape_cast %167 : vector<256xf32> to vector<1x256xf32>
    %169 = vector.broadcast %16 : f32 to vector<1x256xf32>
    %170 = arith.addf %168, %169 : vector<1x256xf32>
    %171 = vector.extract_strided_slice %9 {offsets = [0, 10], sizes = [128, 1], strides = [1, 1]} : vector<128x16xf32> to vector<128x1xf32>
    %172 = vector.extract_strided_slice %9 {offsets = [0, 11], sizes = [128, 1], strides = [1, 1]} : vector<128x16xf32> to vector<128x1xf32>
    %173 = arith.mulf %171, %171 : vector<128x1xf32>
    %174 = arith.mulf %172, %172 : vector<128x1xf32>
    %175 = arith.addf %173, %174 : vector<128x1xf32>
    %cst_36 = arith.constant 5.000000e-01 : f32
    %176 = vector.broadcast %cst_36 : f32 to vector<128x1xf32>
    %177 = arith.mulf %176, %175 : vector<128x1xf32>
    %cst_37 = arith.constant 1.000000e+09 : f32
    %178 = vector.broadcast %cst_37 : f32 to vector<128x1xf32>
    %179 = arith.select %20, %177, %178 : vector<128x1xi1>, vector<128x1xf32>
    %180 = vector.broadcast %7 : vector<1x256xf32> to vector<128x256xf32>
    %181 = vector.broadcast %171 : vector<128x1xf32> to vector<128x256xf32>
    %182 = arith.mulf %180, %181 : vector<128x256xf32>
    %183 = vector.broadcast %8 : vector<1x256xf32> to vector<128x256xf32>
    %184 = vector.broadcast %172 : vector<128x1xf32> to vector<128x256xf32>
    %185 = arith.mulf %183, %184 : vector<128x256xf32>
    %186 = arith.addf %182, %185 : vector<128x256xf32>
    %187 = vector.broadcast %179 : vector<128x1xf32> to vector<128x256xf32>
    %188 = arith.subf %187, %186 : vector<128x256xf32>
    %cst_38 = arith.constant dense<0x7F800000> : vector<256xf32>
    %189 = vector.multi_reduction <minimumf>, %188, %cst_38 [0] : vector<128x256xf32> to vector<256xf32>
    %190 = vector.shape_cast %189 : vector<256xf32> to vector<1x256xf32>
    %191 = vector.broadcast %190 : vector<1x256xf32> to vector<128x256xf32>
    %192 = arith.cmpf ole, %188, %191 : vector<128x256xf32>
    %cst_39 = arith.constant 1.280000e+02 : f32
    %193 = vector.shape_cast %14 : vector<128x1xf32> to vector<128x1xf32>
    %194 = vector.broadcast %193 : vector<128x1xf32> to vector<128x256xf32>
    %195 = vector.broadcast %cst_39 : f32 to vector<128x256xf32>
    %196 = arith.select %192, %194, %195 : vector<128x256xi1>, vector<128x256xf32>
    %cst_40 = arith.constant dense<0x7F800000> : vector<256xf32>
    %197 = vector.multi_reduction <minimumf>, %196, %cst_40 [0] : vector<128x256xf32> to vector<256xf32>
    %198 = vector.shape_cast %197 : vector<256xf32> to vector<1x256xf32>
    %199 = vector.broadcast %16 : f32 to vector<1x256xf32>
    %200 = arith.addf %198, %199 : vector<1x256xf32>
    %201 = vector.extract_strided_slice %9 {offsets = [0, 12], sizes = [128, 1], strides = [1, 1]} : vector<128x16xf32> to vector<128x1xf32>
    %202 = vector.extract_strided_slice %9 {offsets = [0, 13], sizes = [128, 1], strides = [1, 1]} : vector<128x16xf32> to vector<128x1xf32>
    %203 = arith.mulf %201, %201 : vector<128x1xf32>
    %204 = arith.mulf %202, %202 : vector<128x1xf32>
    %205 = arith.addf %203, %204 : vector<128x1xf32>
    %cst_41 = arith.constant 5.000000e-01 : f32
    %206 = vector.broadcast %cst_41 : f32 to vector<128x1xf32>
    %207 = arith.mulf %206, %205 : vector<128x1xf32>
    %cst_42 = arith.constant 1.000000e+09 : f32
    %208 = vector.broadcast %cst_42 : f32 to vector<128x1xf32>
    %209 = arith.select %20, %207, %208 : vector<128x1xi1>, vector<128x1xf32>
    %210 = vector.broadcast %7 : vector<1x256xf32> to vector<128x256xf32>
    %211 = vector.broadcast %201 : vector<128x1xf32> to vector<128x256xf32>
    %212 = arith.mulf %210, %211 : vector<128x256xf32>
    %213 = vector.broadcast %8 : vector<1x256xf32> to vector<128x256xf32>
    %214 = vector.broadcast %202 : vector<128x1xf32> to vector<128x256xf32>
    %215 = arith.mulf %213, %214 : vector<128x256xf32>
    %216 = arith.addf %212, %215 : vector<128x256xf32>
    %217 = vector.broadcast %209 : vector<128x1xf32> to vector<128x256xf32>
    %218 = arith.subf %217, %216 : vector<128x256xf32>
    %cst_43 = arith.constant dense<0x7F800000> : vector<256xf32>
    %219 = vector.multi_reduction <minimumf>, %218, %cst_43 [0] : vector<128x256xf32> to vector<256xf32>
    %220 = vector.shape_cast %219 : vector<256xf32> to vector<1x256xf32>
    %221 = vector.broadcast %220 : vector<1x256xf32> to vector<128x256xf32>
    %222 = arith.cmpf ole, %218, %221 : vector<128x256xf32>
    %cst_44 = arith.constant 1.280000e+02 : f32
    %223 = vector.shape_cast %14 : vector<128x1xf32> to vector<128x1xf32>
    %224 = vector.broadcast %223 : vector<128x1xf32> to vector<128x256xf32>
    %225 = vector.broadcast %cst_44 : f32 to vector<128x256xf32>
    %226 = arith.select %222, %224, %225 : vector<128x256xi1>, vector<128x256xf32>
    %cst_45 = arith.constant dense<0x7F800000> : vector<256xf32>
    %227 = vector.multi_reduction <minimumf>, %226, %cst_45 [0] : vector<128x256xf32> to vector<256xf32>
    %228 = vector.shape_cast %227 : vector<256xf32> to vector<1x256xf32>
    %229 = vector.broadcast %16 : f32 to vector<1x256xf32>
    %230 = arith.addf %228, %229 : vector<1x256xf32>
    %231 = vector.extract_strided_slice %9 {offsets = [0, 14], sizes = [128, 1], strides = [1, 1]} : vector<128x16xf32> to vector<128x1xf32>
    %232 = vector.extract_strided_slice %9 {offsets = [0, 15], sizes = [128, 1], strides = [1, 1]} : vector<128x16xf32> to vector<128x1xf32>
    %233 = arith.mulf %231, %231 : vector<128x1xf32>
    %234 = arith.mulf %232, %232 : vector<128x1xf32>
    %235 = arith.addf %233, %234 : vector<128x1xf32>
    %cst_46 = arith.constant 5.000000e-01 : f32
    %236 = vector.broadcast %cst_46 : f32 to vector<128x1xf32>
    %237 = arith.mulf %236, %235 : vector<128x1xf32>
    %cst_47 = arith.constant 1.000000e+09 : f32
    %238 = vector.broadcast %cst_47 : f32 to vector<128x1xf32>
    %239 = arith.select %20, %237, %238 : vector<128x1xi1>, vector<128x1xf32>
    %240 = vector.broadcast %7 : vector<1x256xf32> to vector<128x256xf32>
    %241 = vector.broadcast %231 : vector<128x1xf32> to vector<128x256xf32>
    %242 = arith.mulf %240, %241 : vector<128x256xf32>
    %243 = vector.broadcast %8 : vector<1x256xf32> to vector<128x256xf32>
    %244 = vector.broadcast %232 : vector<128x1xf32> to vector<128x256xf32>
    %245 = arith.mulf %243, %244 : vector<128x256xf32>
    %246 = arith.addf %242, %245 : vector<128x256xf32>
    %247 = vector.broadcast %239 : vector<128x1xf32> to vector<128x256xf32>
    %248 = arith.subf %247, %246 : vector<128x256xf32>
    %cst_48 = arith.constant dense<0x7F800000> : vector<256xf32>
    %249 = vector.multi_reduction <minimumf>, %248, %cst_48 [0] : vector<128x256xf32> to vector<256xf32>
    %250 = vector.shape_cast %249 : vector<256xf32> to vector<1x256xf32>
    %251 = vector.broadcast %250 : vector<1x256xf32> to vector<128x256xf32>
    %252 = arith.cmpf ole, %248, %251 : vector<128x256xf32>
    %cst_49 = arith.constant 1.280000e+02 : f32
    %253 = vector.shape_cast %14 : vector<128x1xf32> to vector<128x1xf32>
    %254 = vector.broadcast %253 : vector<128x1xf32> to vector<128x256xf32>
    %255 = vector.broadcast %cst_49 : f32 to vector<128x256xf32>
    %256 = arith.select %252, %254, %255 : vector<128x256xi1>, vector<128x256xf32>
    %cst_50 = arith.constant dense<0x7F800000> : vector<256xf32>
    %257 = vector.multi_reduction <minimumf>, %256, %cst_50 [0] : vector<128x256xf32> to vector<256xf32>
    %258 = vector.shape_cast %257 : vector<256xf32> to vector<1x256xf32>
    %259 = vector.broadcast %16 : f32 to vector<1x256xf32>
    %260 = arith.addf %258, %259 : vector<1x256xf32>
    %261 = tpu.concatenate %40, %70, %100, %130, %160, %190, %220, %250 in 0 : vector<1x256xf32>, vector<1x256xf32>, vector<1x256xf32>, vector<1x256xf32>, vector<1x256xf32>, vector<1x256xf32>, vector<1x256xf32>, vector<1x256xf32> -> vector<8x256xf32>
    %262 = tpu.concatenate %50, %80, %110, %140, %170, %200, %230, %260 in 0 : vector<1x256xf32>, vector<1x256xf32>, vector<1x256xf32>, vector<1x256xf32>, vector<1x256xf32>, vector<1x256xf32>, vector<1x256xf32>, vector<1x256xf32> -> vector<8x256xf32>
    %c0_51 = arith.constant 0 : index
    %c0_52 = arith.constant 0 : index
    %263 = vector.load %arg7[%c0_51, %c0_52] : memref<8x256xf32, #tpu.memory_space<vmem>>, vector<8x256xf32>
    %c0_53 = arith.constant 0 : index
    %c0_54 = arith.constant 0 : index
    %264 = vector.load %arg8[%c0_53, %c0_54] : memref<8x256xf32, #tpu.memory_space<vmem>>, vector<8x256xf32>
    %265 = arith.cmpf olt, %261, %263 : vector<8x256xf32>
    %266 = arith.select %265, %261, %263 : vector<8x256xi1>, vector<8x256xf32>
    %c0_55 = arith.constant 0 : index
    %c0_56 = arith.constant 0 : index
    %267 = vector.load %arg7[%c0_55, %c0_56] : memref<8x256xf32, #tpu.memory_space<vmem>>, vector<8x256xf32>
    tpu.vector_store %arg7[%c0_55, %c0_56], %266 {strides = array<i32>} : memref<8x256xf32, #tpu.memory_space<vmem>>, vector<8x256xf32>,
    %268 = arith.select %265, %262, %264 : vector<8x256xi1>, vector<8x256xf32>
    %c0_57 = arith.constant 0 : index
    %c0_58 = arith.constant 0 : index
    %269 = vector.load %arg8[%c0_57, %c0_58] : memref<8x256xf32, #tpu.memory_space<vmem>>, vector<8x256xf32>
    tpu.vector_store %arg8[%c0_57, %c0_58], %268 {strides = array<i32>} : memref<8x256xf32, #tpu.memory_space<vmem>>, vector<8x256xf32>,
    %c0_i32_59 = arith.constant 0 : i32
    %270 = arith.cmpi eq, %arg1, %c0_i32_59 : i32
    %271 = arith.extui %270 : i1 to i32
    %c0_i32_60 = arith.constant 0 : i32
    %272 = arith.cmpi ne, %271, %c0_i32_60 : i32
    scf.if %272 {
      %c0_61 = arith.constant 0 : index
      %c0_62 = arith.constant 0 : index
      %273 = vector.load %arg8[%c0_61, %c0_62] : memref<8x256xf32, #tpu.memory_space<vmem>>, vector<8x256xf32>
      %cst_63 = arith.constant 8.000000e+00 : f32
      %274 = vector.broadcast %cst_63 : f32 to vector<8x256xf32>
      %275 = arith.divf %273, %274 : vector<8x256xf32>
      %276 = math.floor %275 : vector<8x256xf32>
      %cst_64 = arith.constant 8.000000e+00 : f32
      %277 = vector.broadcast %cst_64 : f32 to vector<8x256xf32>
      %278 = arith.mulf %277, %276 : vector<8x256xf32>
      %279 = arith.subf %273, %278 : vector<8x256xf32>
      %cst_65 = arith.constant 0.285714298 : f32
      %280 = vector.broadcast %cst_65 : f32 to vector<8x256xf32>
      %281 = arith.mulf %279, %280 : vector<8x256xf32>
      %cst_66 = arith.constant 1.000000e+00 : f32
      %282 = vector.broadcast %cst_66 : f32 to vector<8x256xf32>
      %283 = arith.subf %281, %282 : vector<8x256xf32>
      %c0_67 = arith.constant 0 : index
      %c0_68 = arith.constant 0 : index
      %c0_69 = arith.constant 0 : index
      %284 = vector.load %arg6[%c0_67, %c0_68, %c0_69] : memref<2x8x256xf32, #tpu.memory_space<vmem>>, vector<1x8x256xf32>
      %285 = vector.shape_cast %284 : vector<1x8x256xf32> to vector<8x256xf32>
      %286 = vector.shape_cast %283 : vector<8x256xf32> to vector<1x8x256xf32>
      tpu.vector_store %arg6[%c0_67, %c0_68, %c0_69], %286 {strides = array<i32>} : memref<2x8x256xf32, #tpu.memory_space<vmem>>, vector<1x8x256xf32>,
      %cst_70 = arith.constant 0.285714298 : f32
      %287 = vector.broadcast %cst_70 : f32 to vector<8x256xf32>
      %288 = arith.mulf %276, %287 : vector<8x256xf32>
      %cst_71 = arith.constant 1.000000e+00 : f32
      %289 = vector.broadcast %cst_71 : f32 to vector<8x256xf32>
      %290 = arith.subf %288, %289 : vector<8x256xf32>
      %c1 = arith.constant 1 : index
      %c0_72 = arith.constant 0 : index
      %c0_73 = arith.constant 0 : index
      %291 = vector.load %arg6[%c1, %c0_72, %c0_73] : memref<2x8x256xf32, #tpu.memory_space<vmem>>, vector<1x8x256xf32>
      %292 = vector.shape_cast %291 : vector<1x8x256xf32> to vector<8x256xf32>
      %293 = vector.shape_cast %290 : vector<8x256xf32> to vector<1x8x256xf32>
      tpu.vector_store %arg6[%c1, %c0_72, %c0_73], %293 {strides = array<i32>} : memref<2x8x256xf32, #tpu.memory_space<vmem>>, vector<1x8x256xf32>,
    } else {
    }
    return
  }
  func.func @transform_0(%arg0: i32, %arg1: i32) -> (i32, i32, i32) {
    %c0_i32 = arith.constant 0 : i32
    %c0_i32_0 = arith.constant 0 : i32
    %c0_i32_1 = arith.constant 0 : i32
    return %arg0, %c0_i32, %c0_i32_0 : i32, i32, i32
  }
  func.func @transform_1(%arg0: i32, %arg1: i32) -> (i32, i32) {
    %c0_i32 = arith.constant 0 : i32
    %c0_i32_0 = arith.constant 0 : i32
    return %arg1, %c0_i32 : i32, i32
  }
  func.func @transform_2(%arg0: i32, %arg1: i32) -> (i32, i32) {
    %c0_i32 = arith.constant 0 : i32
    %c0_i32_0 = arith.constant 0 : i32
    %c0_i32_1 = arith.constant 0 : i32
    return %c0_i32, %c0_i32_0 : i32, i32
  }
  func.func @transform_3(%arg0: i32, %arg1: i32) -> (i32, i32, i32) {
    %c0_i32 = arith.constant 0 : i32
    %c0_i32_0 = arith.constant 0 : i32
    return %arg0, %arg1, %c0_i32 : i32, i32, i32
  }
  func.func @transform_4(%arg0: i32, %arg1: i32) -> (i32, i32, i32) {
    %c0_i32 = arith.constant 0 : i32
    %c0_i32_0 = arith.constant 0 : i32
    %c0_i32_1 = arith.constant 0 : i32
    return %c0_i32, %arg0, %c0_i32_0 : i32, i32, i32
  }
}

</mosaic_0001>

<bundles_post_ra>
// kernel: tpu_custom_call.1
= control target key start
LH: loop header
LB: loop body
LE: loop exit
PB: predicated region body
PF: predicated region fallthrough
CT: control target
= control target key end

     0   :  { %10 = vsyncpa [#allocation5], 0  ;;  %s10974_s0 = inlined_call_operand.vmem [shape: f32[2,4,16], index: 0, kind: input, shape index: {}]   ;;  %s10975_s1 = inlined_call_operand.vmem [shape: f32[128,4], index: 1, kind: input, shape index: {}]   ;;  %s10976_s2 = inlined_call_operand.vmem [shape: f32[2,256], index: 2, kind: input, shape index: {}]   ;;  %s10977_s3 = inlined_call_operand.vmem [shape: f32[2,128,16], index: 3, kind: output, shape index: {0}]   ;;  %s10978_s4 = inlined_call_operand.hbm [shape: f32[2,16,256], index: 4, kind: output, shape index: {1}]  }
   0x1   :  { %12 = vsyncpa [#allocation5 + $0x1], 0  ;;  %s4998_s15 = smov 0   ;;  %s5000_s16 = smov 0  }
   0x2   :  { %s5002_s17 = smov 0   ;;  %s5004_s18 = smov 0  }
   0x3   :  { %s5006_s19 = smov 0   ;;  %s5008_s20 = smov 0  }
   0x4 LB: > { %s4645_s21 = sadd.s32 4294967295, %s4950_s20   ;;  %s4646_s22 = sadd.s32 4294967294, %s4950_s20   ;;  %s4950_s20 = sphi %s5008_s20, %s18_s20   ;;  %s4946_s19 = sphi %s5006_s19, %s13090_s19   ;;  %s4942_s18 = sphi %s5004_s18, %s13089_s18   ;;  %s4938_s17 = sphi %s5002_s17, %s13088_s17   ;;  %s4934_s16 = sphi %s5000_s16, %s13087_s16   ;;  %s4930_s15 = sphi %s4998_s15, %s13086_s15  }
   0x5   : > { %s30_s23 = sadd.s32 1, %s4946_s19  ;;  %s138_s24 = sadd.s32 1, %s4938_s17 }
   0x6   : > { %p32_p0 = scmp.ge.s32.totalorder %s30_s23, 2  ;;  %p148_p1 = scmp.ne.s32.totalorder %s4938_s17, %s4934_s16 }
   0x7   : > { %p149_p2 = scmp.eq.s32.totalorder %s4645_s21, 1  ;;  %p154_p3 = scmp.ne.s32.totalorder %s4934_s16, %s4930_s15 }
   0x8   : > { %s13092_s23 = smov (%p32_p0, %s30_s23), 0  ;;  %p155_p5 = scmp.eq.s32.totalorder %s4646_s22, 1 }
   0x9   : > { %p5038_p4 = por %p149_p2, %p148_p1  ;;  %s135_s26 = ssub.s32 %s4946_s19, %s13092_s23 }
   0xa   : > { %p4650_p6 = scmp.ge.s32.totalorder %s4950_s20, 1  ;;  %p136_p7 = scmp.eq.s32.totalorder %s135_s26, 0 }
   0xb   : > { %p5045_p8 = por %p155_p5, %p154_p3  ;;  %p192_p9 = scmp.lt.s32.totalorder %s4950_s20, 3 }
   0xc   : > { %s5051_s28 = scalar_select %p136_p7, %s4938_s17, %s138_s24  }
   0xd   : > { %p193_p10 = pnand %p4650_p6, %p192_p9 }
   0xf   : > { %196 = sbr.rel (%p193_p10) target bundleno = 1567 (0x61f), region = 32 }
  0x14   : > { %p231_p11 = scmp.lt.s32.totalorder %s4942_s18, 1  ;;  %v4952_v0 = vmov 1   ;;  %v10979_v1 = vmov 0   ;;  %vm11535_vm0 = vcmask 1043456   ;;  %v260_v2 = vld [vmem:[%s10975_s1] sm:$0xff]  ;;  %vm277_vm1 = vcmask 31744  }
  0x15   : > { %4766 = vset.pattern.permute.xlu0 %v4952_v0  ;;  %4765 = vset.pattern.permute.xlu2 %v10979_v1  ;;  %v264_v3 = vld [vmem:[%s10975_s1 + $0x20] sm:$0xff]  ;;  %v265_v7 = vld [vmem:[%s10975_s1 + $0x28] sm:$0xff]  ;;  %v262_v11 = vld [vmem:[%s10975_s1 + $0x10] sm:$0xff]  ;;  %vm395_vm2 = vcmask 130048   ;;  %v10988_v24 = vmov 2   ;;  %v10981_v52 = vmov 3  }
  0x16   : > { %s5055_s29 = scalar_select %p231_p11, %s4942_s18, 1  ;;  %4764 = vset.pattern.permute.xlu1 %v10979_v1  ;;  %v268_v5 = vld [vmem:[%s10975_s1 + $0x40] sm:$0xff]  ;;  %v261_v8 = vld [vmem:[%s10975_s1 + $0x8] sm:$0xff]  ;;  %v266_v12 = vld [vmem:[%s10975_s1 + $0x30] sm:$0xff] }
  0x17   : > { %v272_v6 = vld [vmem:[%s10975_s1 + $0x60] sm:$0xff]  ;;  %v269_v9 = vld [vmem:[%s10975_s1 + $0x48] sm:$0xff]  ;;  %v274_v13 = vld [vmem:[%s10975_s1 + $0x70] sm:$0xff]  ;;  %s228_s22 = sand.u32 1, %s4934_s16   ;;  %s4684_s24 = sshll.u32 %s4942_s18, 4 }
  0x18   : > { %s4652_s30 = sshll.u32 %s5055_s29, 2  ;;  %v273_v10 = vld [vmem:[%s10975_s1 + $0x68] sm:$0xff]  ;;  %v270_v14 = vld [vmem:[%s10975_s1 + $0x50] sm:$0xff]  ;;  %v267_v15 = vld [vmem:[%s10975_s1 + $0x38] sm:$0xff]  ;;  %s4683_s10 = sshll.u32 %s5055_s29, 7 }
  0x19   : > { %s234_s7 = scalar_lea.vmem %s10974_s0, %s4652_s30  ;;  %v263_v16 = vld [vmem:[%s10975_s1 + $0x18] sm:$0xff]  ;;  %s5136_s13 = scalar_lea.vmem %s10977_s3, %s4683_s10 }
  0x1a   : > { %v259_v4 = vld [vmem:[%s234_s7] sm:$0xf]  ;;  %v271_v17 = vld [vmem:[%s10975_s1 + $0x58] sm:$0xff]  ;;  %s4954_s29 = smov 127   ;;  %s4651_s26 = sshll.u32 %s228_s22, 5 }
  0x1b   : > { %4655 = vmatpush.msk.msra.mxu0 %vm11535_vm0, %v259_v4  ;;  %4685 = vmatpush.msk.msra.mxu1 %vm11535_vm0, %v259_v4  ;;  %v275_v18 = vld [vmem:[%s10975_s1 + $0x78] sm:$0xff]  ;;  %s4519_s6 = scalar_lea.hbm %s10978_s4, %s4684_s24  ;;  %s230_s7 = scalar_lea.vmem [#allocation4], %s4651_s26 }
  0x1c   : > { %4656 = vmatmul.msk.f32.vlgmr.msra.gmra.mxu0 %vm277_vm1, %v260_v2  ;;  %4660 = vmatmul.msk.f32.vlgmr.msra.gmra.mxu1 %vm277_vm1, %v264_v3  ;;  %s4520_s8 = sshll.u32 %s230_s7, 4  ;;  %s4522_s18 = sshll.u32 %s4519_s6, 4  ;;  %s4521_s8 = int_to_ptr.vmem [resolvable:$true] %s4520_s8  ;;  %s4523_s18 = int_to_ptr.hbm [resolvable:$true] %s4522_s18 }
  0x1d   : > { %4686 = vmatpush.msk.msra.mxu2 %vm11535_vm0, %v259_v4  ;;  %4687 = vmatpush.msk.msra.mxu3 %vm11535_vm0, %v259_v4  ;;  %s4504_s9 = scalar_lea.sflag [#allocation5], %s228_s22  ;;  %s4886_s10 = sshra.s32 %s4523_s18, 4  ;;  %s4887_s10 = int_to_ptr.hbm [resolvable:$true] %s4886_s10 }
  0x1e   : > { %4664 = vmatmul.msk.f32.vlgmr.msra.gmra.mxu2 %vm277_vm1, %v268_v5  ;;  %4668 = vmatmul.msk.f32.vlgmr.msra.gmra.mxu3 %vm277_vm1, %v272_v6  ;;  %s4888_s11 = scalar_lea.hbm %s4887_s10, 32  ;;  %p4893_p1 = scmp.lt.s32.totalorder %s4887_s10, %s10978_s4 }
  0x1f   : > { %p4889_p12 = scmp.ne.s32.totalorder %s4887_s10, %s4888_s11 }
  0x21   : > { %p4890_p13 = pnand %p4889_p12, %p5038_p4 }
  0x23   : > { %p4891_p0 = pneg %p4890_p13 }
  0x24   : > { %4661 = vmatmul.msk.f32.gmra.mxu1 %vm277_vm1, %v265_v7  ;;  %4657 = vmatmul.msk.f32.gmra.mxu0 %vm277_vm1, %v261_v8 }
  0x26   : > { %4665 = vmatmul.msk.f32.gmra.mxu2 %vm277_vm1, %v269_v9  ;;  %4669 = vmatmul.msk.f32.gmra.mxu3 %vm277_vm1, %v273_v10 }
  0x2c   : > { %4658 = vmatmul.msk.f32.gmra.mxu0 %vm277_vm1, %v262_v11  ;;  %4662 = vmatmul.msk.f32.gmra.mxu1 %vm277_vm1, %v266_v12 }
  0x2e   : > { %4670 = vmatmul.msk.f32.gmra.mxu3 %vm277_vm1, %v274_v13  ;;  %4666 = vmatmul.msk.f32.gmra.mxu2 %vm277_vm1, %v270_v14 }
  0x34   : > { %4663 = vmatmul.msk.f32.gmra.mxu1 %vm277_vm1, %v267_v15  ;;  %4659 = vmatmul.msk.f32.gmra.mxu0 %vm277_vm1, %v263_v16 }
  0x36   : > { %4667 = vmatmul.msk.f32.gmra.mxu2 %vm277_vm1, %v271_v17  ;;  %4671 = vmatmul.msk.f32.gmra.mxu3 %vm277_vm1, %v275_v18 }
  0x99   : > { %v5138_v19 = vpop.f32.mrf.mxu0  ;;  %v5140_v20 = vpop.f32.mrf.mxu1 }
  0x9a   : > { %11719 = vst [vmem:[#allocation7_spill] sm:$0xff] %v5138_v19  ;;  %637 = vperm.xlu2 %4765, %v5140_v20   ;;  %734 = vperm.xlu0 %4766, %v5138_v19   ;;  %v5153_v21 = vmul.f32 %v5138_v19, %v5138_v19  ;;  %v5197_v29 = vmul.f32 %v5140_v20, %v5140_v20 }
  0x9b   : > { %11720 = vst [vmem:[#allocation8_spill] sm:$0xff] %v5140_v20  ;;  %617 = vperm.xlu1 %4764, %v5138_v19  }
  0x9c   : > { %396 = vst.msk [vmem:[%s5136_s13] sm:$0xff] %vm395_vm2, %v5138_v19 }
  0x9d   : > { %400 = vst.msk [vmem:[%s5136_s13 + $0x20] sm:$0xff] %vm395_vm2, %v5140_v20 }
  0xa1   : > { %v5155_v22 = vpop.f32.mrf.mxu2  ;;  %v5163_v23 = vpop.f32.mrf.mxu3 }
  0xa2   : > { %11721 = vst [vmem:[#allocation9_spill] sm:$0xff] %v5155_v22  ;;  %4767 = vset.pattern.permute.xlu2 %v4952_v0  ;;  %512 = vrot.lane.b32.xlu0 %v5153_v21, %s4954_s29  ;;  %v5170_v25 = vpop.f32.mrf.mxu1  ;;  %v5176_v26 = vpop.f32.mrf.mxu0  ;;  %v5193_v28 = vmul.f32 %v5163_v23, %v5163_v23  ;;  %v5235_v35 = vmul.f32 %v5155_v22, %v5155_v22 }
  0xa3   : > { %404 = vst.msk [vmem:[%s5136_s13 + $0x40] sm:$0xff] %vm395_vm2, %v5155_v22  ;;  %4768 = vset.pattern.permute.xlu1 %v10988_v24  ;;  %750 = vperm.xlu2 %4767, %v5140_v20   ;;  %v5226_v33 = vmul.f32 %v5176_v26, %v5176_v26  ;;  %v5277_v40 = vmul.f32 %v5170_v25, %v5170_v25 }
  0xa4   : > { %11722 = vst [vmem:[#allocation10_spill] sm:$0xff] %v5163_v23  ;;  %1124 = vperm.xlu1 %4768, %v5138_v19  }
  0xa5   : > { %408 = vst.msk [vmem:[%s5136_s13 + $0x60] sm:$0xff] %vm395_vm2, %v5163_v23 }
  0xa6   : > { %11723 = vst [vmem:[#allocation11_spill] sm:$0xff] %v5170_v25 }
  0xa7   : > { %401 = vst.msk [vmem:[%s5136_s13 + $0x28] sm:$0xff] %vm395_vm2, %v5170_v25 }
  0xa8   : > { %11724 = vst [vmem:[#allocation12_spill] sm:$0xff] %v5176_v26 }
  0xa9   : > { %397 = vst.msk [vmem:[%s5136_s13 + $0x8] sm:$0xff] %vm395_vm2, %v5176_v26  ;;  %v5181_v27 = vpop.f32.mrf.mxu2  ;;  %v5216_v32 = vpop.f32.mrf.mxu3 }
  0xaa   : > { %11725 = vst [vmem:[#allocation13_spill] sm:$0xff] %v5181_v27  ;;  %766 = vperm.xlu0 %4766, %v5155_v22   ;;  %v5199_v30 = vpop.f32.mrf.mxu0  ;;  %v5210_v31 = vpop.f32.mrf.mxu1  ;;  %v5247_v37 = vmul.f32 %v5181_v27, %v5181_v27  ;;  %v5294_v42 = vmul.f32 %v5216_v32, %v5216_v32 }
  0xab   : > { %405 = vst.msk [vmem:[%s5136_s13 + $0x48] sm:$0xff] %vm395_vm2, %v5181_v27  ;;  %4769 = vset.pattern.permute.xlu2 %v10988_v24  ;;  %v5269_v39 = vmul.f32 %v5210_v31, %v5210_v31  ;;  %v5315_v45 = vmul.f32 %v5199_v30, %v5199_v30 }
  0xac   : > { %4770 = vset.pattern.permute.xlu1 %v10979_v1  ;;  %1140 = vperm.xlu2 %4769, %v5140_v20   ;;  %11726 = vst [vmem:[#allocation14_spill] sm:$0xff] %v5199_v30 }
  0xad   : > { %657 = vperm.xlu1 %4770, %v5155_v22   ;;  %398 = vst.msk [vmem:[%s5136_s13 + $0x10] sm:$0xff] %vm395_vm2, %v5199_v30 }
  0xae   : > { %11727 = vst [vmem:[#allocation15_spill] sm:$0xff] %v5210_v31 }
  0xaf   : > { %402 = vst.msk [vmem:[%s5136_s13 + $0x30] sm:$0xff] %vm395_vm2, %v5210_v31 }
  0xb0   : > { %11728 = vst [vmem:[#allocation16_spill] sm:$0xff] %v5216_v32 }
  0xb1   : > { %409 = vst.msk [vmem:[%s5136_s13 + $0x68] sm:$0xff] %vm395_vm2, %v5216_v32  ;;  %v5229_v34 = vpop.f32.mrf.mxu3  ;;  %v5243_v36 = vpop.f32.mrf.mxu2 }
  0xb2   : > { %536 = vrot.lane.b32.xlu0 %v5193_v28, %s4954_s29  ;;  %11729 = vst [vmem:[#allocation17_spill] sm:$0xff] %v5229_v34  ;;  %v5257_v38 = vpop.f32.mrf.mxu1  ;;  %v5302_v43 = vpop.f32.mrf.mxu0  ;;  %v5338_v49 = vmul.f32 %v5243_v36, %v5243_v36  ;;  %v5375_v60 = vmul.f32 %v5229_v34, %v5229_v34 }
  0xb3   : > { %410 = vst.msk [vmem:[%s5136_s13 + $0x70] sm:$0xff] %vm395_vm2, %v5229_v34  ;;  %v5394_v3 = vmul.f32 %v5302_v43, %v5302_v43  ;;  %v5408_v7 = vmul.f32 %v5257_v38, %v5257_v38 }
  0xb4   : > { %520 = vrot.lane.b32.xlu2 %v5197_v29, %s4954_s29  ;;  %11730 = vst [vmem:[#allocation18_spill] sm:$0xff] %v5243_v36 }
  0xb5   : > { %4772 = vset.pattern.permute.xlu1 %v4952_v0  ;;  %4771 = vset.pattern.permute.xlu2 %v10979_v1  ;;  %406 = vst.msk [vmem:[%s5136_s13 + $0x50] sm:$0xff] %vm395_vm2, %v5243_v36 }
  0xb6   : > { %782 = vperm.xlu1 %4772, %v5163_v23   ;;  %11731 = vst [vmem:[#allocation19_spill] sm:$0xff] %v5257_v38 }
  0xb7   : > { %403 = vst.msk [vmem:[%s5136_s13 + $0x38] sm:$0xff] %vm395_vm2, %v5257_v38 }
  0xb8   : > { %11733 = vst [vmem:[#allocation21_spill] sm:$0xff] %v5302_v43 }
  0xb9   : > { %v5280_v41 = vpop.f32.mrf.mxu2  ;;  %399 = vst.msk [vmem:[%s5136_s13 + $0x18] sm:$0xff] %vm395_vm2, %v5302_v43  ;;  %v5327_v47 = vpop.f32.mrf.mxu3 }
  0xba   : > { %754 = vperm.xlu0 %4766, %v5170_v25   ;;  %11732 = vst [vmem:[#allocation20_spill] sm:$0xff] %v5280_v41  ;;  %v5379_v61 = vmul.f32 %v5327_v47, %v5327_v47  ;;  %v5430_v14 = vmul.f32 %v5280_v41, %v5280_v41 }
  0xbb   : > { %407 = vst.msk [vmem:[%s5136_s13 + $0x58] sm:$0xff] %vm395_vm2, %v5280_v41 }
  0xbc   : > { %677 = vperm.xlu2 %4771, %v5163_v23   ;;  %11734 = vst [vmem:[#allocation22_spill] sm:$0xff] %v5327_v47 }
  0xbd   : > { %411 = vst.msk [vmem:[%s5136_s13 + $0x78] sm:$0xff] %vm395_vm2, %v5327_v47 }
  0xbe   : > { %4773 = vset.pattern.permute.xlu1 %v10988_v24 }
  0xbf   : > { %1156 = vperm.xlu1 %4773, %v5155_v22  }
  0xc2   : > { %514 = vrot.lane.b32.xlu0 %v5226_v33, %s4954_s29 }
  0xc3   : > { %4784 = vset.pattern.permute.xlu0 %v10988_v24 }
  0xc4   : > { %528 = vrot.lane.b32.xlu2 %v5235_v35, %s4954_s29 }
  0xc7   : > { %4774 = vset.pattern.permute.xlu1 %v10979_v1 }
  0xc8   : > { %642 = vperm.xlu1 %4774, %v5170_v25  }
  0xca   : > { %530 = vrot.lane.b32.xlu0 %v5247_v37, %s4954_s29 }
  0xcc   : > { %622 = vperm.xlu2 %4771, %v5176_v26  }
  0xd0   : > { %4775 = vset.pattern.permute.xlu1 %v4952_v0 }
  0xd1   : > { %738 = vperm.xlu1 %4775, %v5176_v26  }
  0xd2   : > { %1132 = vperm.xlu0 %4784, %v5199_v30  }
  0xd4   : > { %4776 = vset.pattern.permute.xlu2 %v10988_v24 }
  0xd5   : > { %1128 = vperm.xlu2 %4776, %v5176_v26  }
  0xd9   : > { %4777 = vset.pattern.permute.xlu1 %v10988_v24 }
  0xda   : > { %1144 = vperm.xlu1 %4777, %v5170_v25   ;;  %524 = vrot.lane.b32.xlu0 %v5269_v39, %s4954_s29 }
  0xdb   : > { %4788 = vset.pattern.permute.xlu0 %v4952_v0 }
  0xdd   : > { %522 = vrot.lane.b32.xlu2 %v5277_v40, %s4954_s29 }
  0xde   : > { %4778 = vset.pattern.permute.xlu2 %v10979_v1 }
  0xe2   : > { %4779 = vset.pattern.permute.xlu1 %v4952_v0  ;;  %790 = vperm.xlu0 %4788, %v5229_v34  }
  0xe3   : > { %770 = vperm.xlu1 %4779, %v5181_v27  }
  0xe5   : > { %662 = vperm.xlu2 %4778, %v5181_v27  }
  0xea   : > { %4789 = vset.pattern.permute.xlu0 %v10988_v24 }
  0xeb   : > { %538 = vrot.lane.b32.xlu1 %v5294_v42, %s4954_s29  ;;  %1164 = vperm.xlu0 %4789, %v5243_v36  }
  0xed   : > { %4780 = vset.pattern.permute.xlu2 %v4952_v0 }
  0xee   : > { %786 = vperm.xlu2 %4780, %v5216_v32  }
  0xf3   : > { %758 = vperm.xlu1 %4779, %v5210_v31   ;;  %1152 = vperm.xlu0 %4789, %v5257_v38  }
  0xf4   : > { %v5309_v44 = vpop.permute.xlu2 %637 }
  0xf6   : > { %4781 = vset.pattern.permute.xlu2 %v10988_v24 }
  0xf7   : > { %1160 = vperm.xlu2 %4781, %v5181_v27  }
  0xfb   : > { %516 = vrot.lane.b32.xlu1 %v5315_v45, %s4954_s29  ;;  %4794 = vset.pattern.permute.xlu0 %v4952_v0 }
  0xfc   : > { %778 = vperm.xlu0 %4794, %v5280_v41   ;;  %4786 = vset.pattern.permute.xlu1 %v10979_v1 }
  0xfd   : > { %v5322_v46 = vpop.permute.xlu2 %750 }
  0xff   : > { %4782 = vset.pattern.permute.xlu2 %v10979_v1 }
 0x100   : > { %647 = vperm.xlu2 %4782, %v5210_v31  }
 0x103   : > { %687 = vperm.xlu1 %4786, %v5229_v34  }
 0x104   : > { %4798 = vset.pattern.permute.xlu0 %v10988_v24 }
 0x105   : > { %1176 = vperm.xlu0 %4798, %v5216_v32  }
 0x106   : > { %v5334_v48 = vpop.permute.xlu2 %1140 }
 0x108   : > { %4783 = vset.pattern.permute.xlu2 %v4952_v0 }
 0x109   : > { %742 = vperm.xlu2 %4783, %v5199_v30  }
 0x10b   : > { %532 = vrot.lane.b32.xlu1 %v5338_v49, %s4954_s29 }
 0x10c   : > { %v5344_v50 = vpop.permute.xlu0 %734 }
 0x10d   : > { %v5346_v51 = vpop.permute.xlu1 %617  ;;  %4799 = vset.pattern.permute.xlu0 %v10981_v52 }
 0x10e   : > { %v5349_v53 = vpop.permute.xlu2 %520  ;;  %1220 = vperm.xlu0 %4799, %v5138_v19  }
 0x111   : > { %4785 = vset.pattern.permute.xlu2 %v10988_v24 }
 0x112   : > { %1148 = vperm.xlu2 %4785, %v5210_v31  }
 0x113   : > { %632 = vperm.xlu1 %4786, %v5302_v43  }
 0x114   : > { %v5355_v54 = vpop.permute.xlu0 %512 }
 0x116   : > { %v5357_v55 = vpop.permute.xlu1 %1124  ;;  %v5359_v56 = vpop.permute.xlu2 %677  ;;  %1240 = vperm.xlu0 %4799, %v5170_v25  }
 0x11a   : > { %4787 = vset.pattern.permute.xlu2 %v4952_v0 }
 0x11b   : > { %4790 = vset.pattern.permute.xlu1 %v4952_v0  ;;  %774 = vperm.xlu2 %4787, %v5243_v36  }
 0x11c   : > { %746 = vperm.xlu1 %4790, %v5302_v43   ;;  %v5366_v57 = vpop.permute.xlu0 %766 }
 0x11e   : > { %v5368_v58 = vpop.permute.xlu2 %528  ;;  %1252 = vperm.xlu0 %4799, %v5155_v22  }
 0x11f   : > { %v5371_v59 = vpop.permute.xlu1 %657 }
 0x123   : > { %540 = vrot.lane.b32.xlu2 %v5375_v60, %s4954_s29 }
 0x124   : > { %4791 = vset.pattern.permute.xlu1 %v10988_v24  ;;  %v537_v62 = vpop.permute.xlu0 %536 }
 0x125   : > { %1136 = vperm.xlu1 %4791, %v5302_v43  }
 0x126   : > { %542 = vrot.lane.b32.xlu0 %v5379_v61, %s4954_s29  ;;  %v5387_v63 = vpop.permute.xlu2 %622 }
 0x127   : > { %11735 = vst [vmem:[#allocation23_spill] sm:$0xff] %v5387_v63 }
 0x128   : > { %v5389_v2 = vpop.permute.xlu1 %782 }
 0x12b   : > { %762 = vperm.xlu2 %4787, %v5257_v38  }
 0x12c   : > { %v5396_v4 = vpop.permute.xlu0 %754 }
 0x12d   : > { %518 = vrot.lane.b32.xlu1 %v5394_v3, %s4954_s29 }
 0x12e   : > { %1264 = vperm.xlu0 %4799, %v5280_v41   ;;  %4792 = vset.pattern.permute.xlu1 %v10979_v1 }
 0x12f   : > { %v5402_v5 = vpop.permute.xlu2 %1128 }
 0x130   : > { %11736 = vst [vmem:[#allocation24_spill] sm:$0xff] %v5402_v5 }
 0x131   : > { %v5404_v6 = vpop.permute.xlu1 %1156 }
 0x132   : > { %11737 = vst [vmem:[#allocation25_spill] sm:$0xff] %v5404_v6 }
 0x133   : > { %4793 = vset.pattern.permute.xlu2 %v10979_v1 }
 0x134   : > { %v515_v8 = vpop.permute.xlu0 %514  ;;  %692 = vperm.xlu2 %4793, %v5327_v47  }
 0x135   : > { %526 = vrot.lane.b32.xlu1 %v5408_v7, %s4954_s29 }
 0x136   : > { %1276 = vperm.xlu0 %4799, %v5229_v34  }
 0x137   : > { %v5415_v9 = vpop.permute.xlu2 %522 }
 0x13a   : > { %v5417_v10 = vpop.permute.xlu1 %642 }
 0x13c   : > { %v531_v11 = vpop.permute.xlu0 %530  ;;  %4797 = vset.pattern.permute.xlu2 %v10988_v24 }
 0x13d   : > { %672 = vperm.xlu1 %4792, %v5280_v41   ;;  %1172 = vperm.xlu2 %4797, %v5163_v23  }
 0x13e   : > { %4802 = vset.pattern.permute.xlu0 %v10979_v1  ;;  %v412_v1 = vlaneseq }
 0x13f   : > { %v5423_v12 = vpop.permute.xlu2 %662  ;;  %627 = vperm.xlu0 %4802, %v5199_v30  }
 0x140   : > { %11738 = vst [vmem:[#allocation26_spill] sm:$0xff] %v5423_v12  ;;  %v572_v12 = vadd.f32 %v537_v62, %v5193_v28  ;;  %v561_v62 = vadd.f32 %v515_v8, %v5226_v33 }
 0x143   : > { %v5426_v13 = vpop.permute.xlu1 %738 }
 0x144   : > { %v5432_v15 = vpop.permute.xlu0 %1132 }
 0x145   : > { %11739 = vst [vmem:[#allocation27_spill] sm:$0xff] %v5432_v15  ;;  %4795 = vset.pattern.permute.xlu1 %v4952_v0  ;;  %534 = vrot.lane.b32.xlu2 %v5430_v14, %s4954_s29  ;;  %v5447_v0 = vshrl.u32 %v412_v1, 7  ;;  %v588_v1 = vmul.f32 0.5, %v572_v12  ;;  %v577_v12 = vmul.f32 0.5, %v561_v62  ;;  %s4892_s29 = scalar_lea.hbm %s10978_s4, 64 }
 0x146   : > { %794 = vperm.xlu1 %4795, %v5327_v47   ;;  %p4894_p2 = scmp.lt.s32.totalorder %s4892_s29, %s4888_s11 }
 0x147   : > { %652 = vperm.xlu0 %4802, %v5257_v38   ;;  %v425_v6 = vadd.s32 96, %v5447_v0 }
 0x148   : > { %v5439_v16 = vpop.permute.xlu2 %786  ;;  %p4895_p3 = por %p4894_p2, %p4893_p1 }
 0x149   : > { %11740 = vst [vmem:[#allocation28_spill] sm:$0xff] %v5439_v16 }
 0x14a   : > { %p4896_p5 = pnand %p4895_p3, %p4891_p0 }
 0x14c   : > { %v5441_v17 = vpop.permute.xlu1 %1144  ;;  %v525_v18 = vpop.permute.xlu0 %524 }
 0x14d   : > { %11741 = vst [vmem:[#allocation29_spill] sm:$0xff] %v5441_v17  ;;  %1184 = vperm.xlu2 %4797, %v5327_v47   ;;  %v11745_v17 = vmov 3  }
 0x14e   : > { %4796 = vset.pattern.permute.xlu1 %v10988_v24  ;;  %v5459_v24 = vcvt.s32.f32 %v425_v6 }
 0x14f   : > { %1168 = vperm.xlu1 %4796, %v5280_v41   ;;  %667 = vperm.xlu0 %4802, %v5243_v36  }
 0x150   : > { %11746 = vst [vmem:[#allocation33_spill] sm:$0xff] %v5459_v24  ;;  %vm476_vm3 = vcmp.lt.f32.partialorder %v5459_v24, 64.0 }
 0x151   : > { %v5449_v52 = vpop.permute.xlu2 %1160  ;;  %v5471_v28 = vsel %vm476_vm3, %v588_v1, 1e+09 }
 0x152   : > { %11742 = vst [vmem:[#allocation30_spill] sm:$0xff] %v5449_v52 }
 0x153   : > { %11749 = vst [vmem:[#allocation36_spill] sm:$0xff] %v5471_v28 }
 0x154   : > { %v5452_v15 = vpop.permute.xlu0 %790 }
 0x155   : > { %11743 = vst [vmem:[#allocation31_spill] sm:$0xff] %v5452_v15  ;;  %v5454_v16 = vpop.permute.xlu1 %770  ;;  %4801 = vset.pattern.permute.xlu2 %v11745_v17  ;;  %v414_v15 = vadd.s32 8, %v5447_v0 }
 0x156   : > { %11744 = vst [vmem:[#allocation32_spill] sm:$0xff] %v5454_v16  ;;  %1228 = vperm.xlu2 %4801, %v5199_v30  }
 0x157   : > { %1180 = vperm.xlu1 %4796, %v5229_v34   ;;  %682 = vperm.xlu0 %4802, %v5216_v32   ;;  %v5475_v6 = vcvt.s32.f32 %v414_v15  ;;  %v422_v15 = vadd.s32 72, %v5447_v0 }
 0x159   : > { %11750 = vst [vmem:[#allocation37_spill] sm:$0xff] %v5475_v6  ;;  %vm465_vm4 = vcmp.lt.f32.partialorder %v5475_v6, 64.0  ;;  %v11757_v6 = vmov 2  }
 0x15a   : > { %v5463_v52 = vpop.permute.xlu2 %647  ;;  %v5487_v33 = vsel %vm465_vm4, %v577_v12, 1e+09  ;;  %v569_v12 = vadd.f32 %v531_v11, %v5247_v37  ;;  %v5516_v37 = vcvt.s32.f32 %v5447_v0 }
 0x15b   : > { %11747 = vst [vmem:[#allocation34_spill] sm:$0xff] %v5463_v52 }
 0x15c   : > { %11754 = vst [vmem:[#allocation41_spill] sm:$0xff] %v5487_v33  ;;  %vm464_vm6 = vcmp.lt.f32.partialorder %v5516_v37, 64.0 }
 0x15d   : > { %v5467_v16 = vpop.permute.xlu1 %538  ;;  %v5469_v5 = vpop.permute.xlu0 %1164  ;;  %11761 = vst [vmem:[#allocation47_spill] sm:$0xff] %v5516_v37 }
 0x15e   : > { %11748 = vst [vmem:[#allocation35_spill] sm:$0xff] %v5469_v5  ;;  %1236 = vperm.xlu2 %4801, %v5140_v20  }
 0x15f   : > { %4800 = vset.pattern.permute.xlu1 %v11745_v17  ;;  %923 = vperm.xlu0 %4802, %v5471_v28  }
 0x160   : > { %1224 = vperm.xlu1 %4800, %v5176_v26  }
 0x163   : > { %v5481_v24 = vpop.permute.xlu2 %742 }
 0x164   : > { %11751 = vst [vmem:[#allocation38_spill] sm:$0xff] %v5481_v24  ;;  %v585_v24 = vmul.f32 0.5, %v569_v12  ;;  %v566_v12 = vadd.f32 %v525_v18, %v5269_v39 }
 0x165   : > { %v5483_v5 = vpop.permute.xlu1 %758  ;;  %v5485_v1 = vpop.permute.xlu0 %1152 }
 0x166   : > { %11752 = vst [vmem:[#allocation39_spill] sm:$0xff] %v5483_v5  ;;  %1248 = vperm.xlu2 %4801, %v5257_v38  }
 0x167   : > { %11753 = vst [vmem:[#allocation40_spill] sm:$0xff] %v5485_v1  ;;  %868 = vperm.xlu0 %4802, %v5487_v33   ;;  %v5504_v1 = vcvt.s32.f32 %v422_v15 }
 0x168   : > { %1232 = vperm.xlu1 %4800, %v5302_v43  }
 0x169   : > { %11758 = vst [vmem:[#allocation44_spill] sm:$0xff] %v5504_v1  ;;  %vm473_vm5 = vcmp.lt.f32.partialorder %v5504_v1, 64.0  ;;  %v11764_v1 = vmov 0  }
 0x16a   : > { %v5520_v15 = vsel %vm473_vm5, %v585_v24, 1e+09 }
 0x16b   : > { %11763 = vst [vmem:[#allocation49_spill] sm:$0xff] %v5520_v15 }
 0x16c   : > { %v5492_v8 = vpop.permute.xlu2 %1148 }
 0x16d   : > { %11755 = vst [vmem:[#allocation42_spill] sm:$0xff] %v5492_v8  ;;  %v5495_v17 = vpop.permute.xlu1 %516  ;;  %v419_v8 = vadd.s32 48, %v5447_v0 }
 0x16e   : > { %1260 = vperm.xlu2 %4801, %v5243_v36   ;;  %v5498_v62 = vpop.permute.xlu0 %778 }
 0x16f   : > { %11756 = vst [vmem:[#allocation43_spill] sm:$0xff] %v5498_v62  ;;  %4808 = vset.pattern.permute.xlu0 %v11757_v6  ;;  %v560_v62 = vadd.f32 %v5355_v54, %v5153_v21  ;;  %v582_v54 = vmul.f32 0.5, %v566_v12 }
 0x170   : > { %1244 = vperm.xlu1 %4800, %v5210_v31   ;;  %1352 = vperm.xlu0 %4808, %v5487_v33  }
 0x171   : > { %v576_v21 = vmul.f32 0.5, %v560_v62  ;;  %v421_v62 = vadd.s32 64, %v5447_v0 }
 0x173   : > { %v5561_v63 = vcvt.s32.f32 %v421_v62 }
 0x175   : > { %v5508_v52 = vpop.permute.xlu1 %687  ;;  %v5510_v5 = vpop.permute.xlu2 %774  ;;  %11773 = vst [vmem:[#allocation58_spill] sm:$0xff] %v5561_v63  ;;  %vm472_vm9 = vcmp.lt.f32.partialorder %v5561_v63, 64.0 }
 0x176   : > { %11759 = vst [vmem:[#allocation45_spill] sm:$0xff] %v5508_v52  ;;  %1272 = vperm.xlu2 %4801, %v5216_v32   ;;  %v5525_v52 = vcvt.s32.f32 %v419_v8  ;;  %v417_v8 = vadd.s32 32, %v5447_v0 }
 0x177   : > { %11760 = vst [vmem:[#allocation46_spill] sm:$0xff] %v5510_v5  ;;  %v5518_v11 = vpop.permute.xlu0 %1176 }
 0x178   : > { %11762 = vst [vmem:[#allocation48_spill] sm:$0xff] %v5518_v11  ;;  %1256 = vperm.xlu1 %4800, %v5181_v27   ;;  %4810 = vset.pattern.permute.xlu0 %v11764_v1  ;;  %vm470_vm7 = vcmp.lt.f32.partialorder %v5525_v52, 64.0  ;;  %v5534_v11 = vsel %vm464_vm6, %v576_v21, 1e+09 }
 0x179   : > { %11765 = vst [vmem:[#allocation50_spill] sm:$0xff] %v5525_v52  ;;  %908 = vperm.xlu0 %4810, %v5520_v15   ;;  %v5538_v39 = vsel %vm470_vm7, %v582_v54, 1e+09  ;;  %v564_v54 = vadd.f32 %v5349_v53, %v5197_v29  ;;  %v568_v52 = vadd.f32 %v5368_v58, %v5235_v35  ;;  %v418_v29 = vadd.s32 40, %v5447_v0 }
 0x17a   : > { %11766 = vst [vmem:[#allocation51_spill] sm:$0xff] %v5534_v11 }
 0x17b   : > { %11767 = vst [vmem:[#allocation52_spill] sm:$0xff] %v5538_v39  ;;  %v5580_v62 = vcvt.s32.f32 %v418_v29 }
 0x17d   : > { %v5530_v5 = vpop.permute.xlu1 %532  ;;  %v5532_v24 = vpop.permute.xlu2 %540  ;;  %11777 = vst [vmem:[#allocation62_spill] sm:$0xff] %v5580_v62  ;;  %vm469_vm10 = vcmp.lt.f32.partialorder %v5580_v62, 64.0 }
 0x17e   : > { %4803 = vset.pattern.permute.xlu2 %v11764_v1 }
 0x17f   : > { %863 = vperm.xlu2 %4803, %v5534_v11  }
 0x180   : > { %1268 = vperm.xlu1 %4800, %v5163_v23   ;;  %v5541_v18 = vpop.permute.xlu0 %1220 }
 0x181   : > { %11768 = vst [vmem:[#allocation53_spill] sm:$0xff] %v5541_v18  ;;  %893 = vperm.xlu0 %4810, %v5538_v39   ;;  %v5559_v18 = vcvt.s32.f32 %v417_v8  ;;  %v565_v8 = vadd.f32 %v5415_v9, %v5277_v40  ;;  %v426_v40 = vadd.s32 104, %v5447_v0 }
 0x183   : > { %11772 = vst [vmem:[#allocation57_spill] sm:$0xff] %v5559_v18  ;;  %vm468_vm8 = vcmp.lt.f32.partialorder %v5559_v18, 64.0 }
 0x185   : > { %v5546_v12 = vpop.permute.xlu1 %632  ;;  %v5548_v21 = vpop.permute.xlu2 %762 }
 0x186   : > { %11769 = vst [vmem:[#allocation54_spill] sm:$0xff] %v5546_v12  ;;  %v580_v12 = vmul.f32 0.5, %v564_v54  ;;  %v581_v54 = vmul.f32 0.5, %v565_v8  ;;  %v573_v8 = vadd.f32 %v5467_v16, %v5294_v42 }
 0x187   : > { %11770 = vst [vmem:[#allocation55_spill] sm:$0xff] %v5548_v21  ;;  %4805 = vset.pattern.permute.xlu2 %v11757_v6  ;;  %v584_v21 = vmul.f32 0.5, %v568_v52 }
 0x188   : > { %1280 = vperm.xlu1 %4800, %v5327_v47   ;;  %v5556_v37 = vpop.permute.xlu0 %1240  ;;  %1348 = vperm.xlu2 %4805, %v5534_v11   ;;  %v5570_v58 = vsel %vm468_vm8, %v580_v12, 1e+09  ;;  %v428_v12 = vadd.s32 120, %v5447_v0  ;;  %v5593_v18 = vsel %vm469_vm10, %v581_v54, 1e+09  ;;  %v589_v54 = vmul.f32 0.5, %v573_v8 }
 0x189   : > { %11771 = vst [vmem:[#allocation56_spill] sm:$0xff] %v5556_v37  ;;  %v5572_v37 = vsel %vm472_vm9, %v584_v21, 1e+09 }
 0x18a   : > { %11774 = vst [vmem:[#allocation59_spill] sm:$0xff] %v5570_v58  ;;  %v5586_v21 = vcvt.s32.f32 %v428_v12  ;;  %v5602_v12 = vcvt.s32.f32 %v426_v40 }
 0x18b   : > { %11775 = vst [vmem:[#allocation60_spill] sm:$0xff] %v5572_v37 }
 0x18c   : > { %11778 = vst [vmem:[#allocation63_spill] sm:$0xff] %v5586_v21  ;;  %vm479_vm11 = vcmp.lt.f32.partialorder %v5586_v21, 64.0  ;;  %vm477_vm12 = vcmp.lt.f32.partialorder %v5602_v12, 64.0 }
 0x18d   : > { %11781 = vst [vmem:[#allocation66_spill] sm:$0xff] %v5593_v18  ;;  %v5611_v16 = vsel %vm477_vm12, %v589_v54, 1e+09 }
 0x18e   : > { %v5566_v53 = vpop.permute.xlu1 %746  ;;  %v5568_v35 = vpop.permute.xlu2 %692  ;;  %11782 = vst [vmem:[#allocation67_spill] sm:$0xff] %v5602_v12 }
 0x18f   : > { %11784 = vst [vmem:[#allocation69_spill] sm:$0xff] %v5611_v16 }
 0x190   : > { %4804 = vset.pattern.permute.xlu1 %v11764_v1  ;;  %v5577_v52 = vpop.permute.xlu0 %1252  ;;  %4807 = vset.pattern.permute.xlu2 %v11764_v1 }
 0x191   : > { %11776 = vst [vmem:[#allocation61_spill] sm:$0xff] %v5577_v52  ;;  %883 = vperm.xlu1 %4804, %v5570_v58   ;;  %903 = vperm.xlu2 %4807, %v5572_v37  }
 0x197   : > { %v5589_v9 = vpop.permute.xlu1 %1136  ;;  %v5591_v63 = vpop.permute.xlu2 %1172 }
 0x198   : > { %11779 = vst [vmem:[#allocation64_spill] sm:$0xff] %v5589_v9  ;;  %v543_v29 = vpop.permute.xlu0 %542 }
 0x199   : > { %11780 = vst [vmem:[#allocation65_spill] sm:$0xff] %v5591_v63  ;;  %v575_v52 = vadd.f32 %v543_v29, %v5379_v61  ;;  %4806 = vset.pattern.permute.xlu1 %v11757_v6  ;;  %888 = vperm.xlu2 %4807, %v5593_v18   ;;  %v415_v61 = vadd.s32 16, %v5447_v0  ;;  %v427_v29 = vadd.s32 112, %v5447_v0 }
 0x19a   : > { %1364 = vperm.xlu1 %4806, %v5570_v58  }
 0x19b   : > { %v591_v62 = vmul.f32 0.5, %v575_v52  ;;  %v562_v52 = vadd.f32 %v5495_v17, %v5315_v45  ;;  %v5619_v40 = vcvt.s32.f32 %v415_v61  ;;  %v5621_v8 = vcvt.s32.f32 %v427_v29 }
 0x19c   : > { %v416_v45 = vadd.s32 24, %v5447_v0 }
 0x19d   : > { %v5604_v63 = vsel %vm479_vm11, %v591_v62, 1e+09  ;;  %v574_v62 = vadd.f32 %v5532_v24, %v5375_v60  ;;  %11785 = vst [vmem:[#allocation70_spill] sm:$0xff] %v5619_v40  ;;  %v578_v54 = vmul.f32 0.5, %v562_v52  ;;  %vm466_vm13 = vcmp.lt.f32.partialorder %v5619_v40, 64.0 }
 0x19e   : > { %11783 = vst [vmem:[#allocation68_spill] sm:$0xff] %v5604_v63  ;;  %938 = vperm.xlu0 %4810, %v5604_v63   ;;  %vm478_vm14 = vcmp.lt.f32.partialorder %v5621_v8, 64.0  ;;  %v5639_v52 = vcvt.s32.f32 %v416_v45 }
 0x19f   : > { %v519_v9 = vpop.permute.xlu1 %518  ;;  %v535_v42 = vpop.permute.xlu2 %534  ;;  %11786 = vst [vmem:[#allocation71_spill] sm:$0xff] %v5621_v8  ;;  %v590_v12 = vmul.f32 0.5, %v574_v62  ;;  %v5633_v24 = vsel %vm466_vm13, %v578_v54, 1e+09  ;;  %v570_v54 = vadd.f32 %v5530_v5, %v5338_v49 }
 0x1a0   : > { %v5623_v21 = vpop.permute.xlu0 %1264  ;;  %11789 = vst [vmem:[#allocation74_spill] sm:$0xff] %v5633_v24  ;;  %v563_v29 = vadd.f32 %v519_v9, %v5394_v3  ;;  %vm467_vm15 = vcmp.lt.f32.partialorder %v5639_v52, 64.0  ;;  %v423_v3 = vadd.s32 80, %v5447_v0  ;;  %v571_v5 = vadd.f32 %v535_v42, %v5430_v14 }
 0x1a1   : > { %4809 = vset.pattern.permute.xlu2 %v11757_v6  ;;  %11787 = vst [vmem:[#allocation72_spill] sm:$0xff] %v5623_v21  ;;  %v5635_v61 = vsel %vm478_vm14, %v590_v12, 1e+09  ;;  %v420_v21 = vadd.s32 56, %v5447_v0 }
 0x1a2   : > { %4811 = vset.pattern.permute.xlu1 %v11764_v1  ;;  %1368 = vperm.xlu2 %4809, %v5593_v18   ;;  %11790 = vst [vmem:[#allocation75_spill] sm:$0xff] %v5635_v61  ;;  %v579_v8 = vmul.f32 0.5, %v563_v29  ;;  %v5659_v45 = vcvt.s32.f32 %v423_v3 }
 0x1a3   : > { %928 = vperm.xlu1 %4811, %v5611_v16   ;;  %11791 = vst [vmem:[#allocation76_spill] sm:$0xff] %v5639_v52  ;;  %v586_v52 = vmul.f32 0.5, %v570_v54 }
 0x1a4   : > { %v5652_v9 = vsel %vm467_vm15, %v579_v8, 1e+09  ;;  %11795 = vst [vmem:[#allocation80_spill] sm:$0xff] %v5659_v45  ;;  %vm474_vm1 = vcmp.lt.f32.partialorder %v5659_v45, 64.0 }
 0x1a5   : > { %11794 = vst [vmem:[#allocation79_spill] sm:$0xff] %v5652_v9  ;;  %v5672_v49 = vsel %vm474_vm1, %v586_v52, 1e+09 }
 0x1a6   : > { %4817 = vset.pattern.permute.xlu0 %v11757_v6  ;;  %11798 = vst [vmem:[#allocation83_spill] sm:$0xff] %v5672_v49 }
 0x1a7   : > { %v527_v60 = vpop.permute.xlu1 %526  ;;  %1372 = vperm.xlu0 %4817, %v5538_v39   ;;  %v5631_v17 = vpop.permute.xlu2 %1184 }
 0x1a8   : > { %11788 = vst [vmem:[#allocation73_spill] sm:$0xff] %v5631_v17  ;;  %v5643_v62 = vpop.permute.xlu0 %1276  ;;  %v424_v17 = vadd.s32 88, %v5447_v0  ;;  %v567_v3 = vadd.f32 %v527_v60, %v5408_v7  ;;  %v587_v0 = vmul.f32 0.5, %v571_v5  ;;  %v11044_v60 = vmov 5  }
 0x1a9   : > { %11792 = vst [vmem:[#allocation77_spill] sm:$0xff] %v5643_v62 }
 0x1aa   : > { %4814 = vset.pattern.permute.xlu2 %v11764_v1  ;;  %v5678_v54 = vcvt.s32.f32 %v424_v17  ;;  %v583_v45 = vmul.f32 0.5, %v567_v3 }
 0x1ab   : > { %873 = vperm.xlu1 %4811, %v5633_v24   ;;  %933 = vperm.xlu2 %4814, %v5635_v61  }
 0x1ac   : > { %11799 = vst [vmem:[#allocation84_spill] sm:$0xff] %v5678_v54  ;;  %vm475_vm2 = vcmp.lt.f32.partialorder %v5678_v54, 64.0 }
 0x1ad   : > { %v5692_v42 = vsel %vm475_vm2, %v587_v0, 1e+09 }
 0x1ae   : > { %11804 = vst [vmem:[#allocation89_spill] sm:$0xff] %v5692_v42 }
 0x1af   : > { %v5646_v40 = vpop.permute.xlu1 %672  ;;  %1384 = vperm.xlu0 %4817, %v5520_v15  }
 0x1b0   : > { %v5649_v12 = vpop.permute.xlu2 %1228 }
 0x1b1   : > { %11793 = vst [vmem:[#allocation78_spill] sm:$0xff] %v5649_v12  ;;  %v5661_v29 = vpop.permute.xlu0 %627 }
 0x1b3   : > { %4812 = vset.pattern.permute.xlu1 %v11757_v6  ;;  %878 = vperm.xlu2 %4814, %v5652_v9  }
 0x1b4   : > { %1356 = vperm.xlu1 %4812, %v5633_v24  }
 0x1b7   : > { %1396 = vperm.xlu0 %4817, %v5471_v28  }
 0x1b8   : > { %v5664_v62 = vpop.permute.xlu1 %794  ;;  %v5666_v8 = vpop.permute.xlu2 %1236 }
 0x1b9   : > { %11796 = vst [vmem:[#allocation81_spill] sm:$0xff] %v5664_v62  ;;  %v5690_v14 = vpop.permute.xlu0 %652  ;;  %v11826_v62 = vmov 5  }
 0x1ba   : > { %11797 = vst [vmem:[#allocation82_spill] sm:$0xff] %v5666_v8  ;;  %v5680_v8 = vcvt.s32.f32 %v420_v21 }
 0x1bb   : > { %4815 = vset.pattern.permute.xlu2 %v11757_v6  ;;  %11803 = vst [vmem:[#allocation88_spill] sm:$0xff] %v5690_v14 }
 0x1bc   : > { %4813 = vset.pattern.permute.xlu1 %v11764_v1  ;;  %1360 = vperm.xlu2 %4815, %v5652_v9   ;;  %11800 = vst [vmem:[#allocation85_spill] sm:$0xff] %v5680_v8  ;;  %vm471_vm3 = vcmp.lt.f32.partialorder %v5680_v8, 64.0 }
 0x1bd   : > { %913 = vperm.xlu1 %4813, %v5672_v49   ;;  %v5694_v21 = vsel %vm471_vm3, %v583_v45, 1e+09 }
 0x1be   : > { %11805 = vst [vmem:[#allocation90_spill] sm:$0xff] %v5694_v21 }
 0x1bf   : > { %1408 = vperm.xlu0 %4817, %v5604_v63  }
 0x1c0   : > { %v5684_v52 = vpop.permute.xlu2 %1248 }
 0x1c1   : > { %11801 = vst [vmem:[#allocation86_spill] sm:$0xff] %v5684_v52  ;;  %v5688_v7 = vpop.permute.xlu1 %1168  ;;  %v5705_v3 = vpop.permute.xlu0 %667 }
 0x1c2   : > { %11802 = vst [vmem:[#allocation87_spill] sm:$0xff] %v5688_v7 }
 0x1c3   : > { %11808 = vst [vmem:[#allocation93_spill] sm:$0xff] %v5705_v3 }
 0x1c4   : > { %4816 = vset.pattern.permute.xlu2 %v11764_v1 }
 0x1c5   : > { %898 = vperm.xlu1 %4813, %v5694_v21   ;;  %918 = vperm.xlu2 %4816, %v5692_v42  }
 0x1c7   : > { %4822 = vset.pattern.permute.xlu0 %v11044_v60 }
 0x1c8   : > { %1690 = vperm.xlu0 %4822, %v5138_v19   ;;  %v5701_v17 = vpop.permute.xlu2 %1260 }
 0x1c9   : > { %11806 = vst [vmem:[#allocation91_spill] sm:$0xff] %v5701_v17  ;;  %v5703_v5 = vpop.permute.xlu1 %1180  ;;  %v5716_v0 = vpop.permute.xlu0 %682  ;;  %v11061_v17 = vmov 4  }
 0x1ca   : > { %11807 = vst [vmem:[#allocation92_spill] sm:$0xff] %v5703_v5 }
 0x1cb   : > { %11811 = vst [vmem:[#allocation96_spill] sm:$0xff] %v5716_v0 }
 0x1cd   : > { %4818 = vset.pattern.permute.xlu1 %v11757_v6  ;;  %4819 = vset.pattern.permute.xlu2 %v11757_v6 }
 0x1ce   : > { %1376 = vperm.xlu1 %4818, %v5694_v21   ;;  %1380 = vperm.xlu2 %4819, %v5572_v37  }
 0x1d0   : > { %1710 = vperm.xlu0 %4822, %v5170_v25   ;;  %v5712_v1 = vpop.permute.xlu2 %1272 }
 0x1d1   : > { %11809 = vst [vmem:[#allocation94_spill] sm:$0xff] %v5712_v1  ;;  %v5727_v54 = vpop.permute.xlu0 %923 }
 0x1d2   : > { %v5714_v45 = vpop.permute.xlu1 %1224 }
 0x1d3   : > { %11810 = vst [vmem:[#allocation95_spill] sm:$0xff] %v5714_v45 }
 0x1d6   : > { %1388 = vperm.xlu1 %4818, %v5672_v49   ;;  %1392 = vperm.xlu2 %4819, %v5692_v42  }
 0x1d8   : > { %1722 = vperm.xlu0 %4822, %v5155_v22  }
 0x1d9   : > { %v5721_v60 = vpop.permute.xlu2 %863  ;;  %v5739_v52 = vpop.permute.xlu0 %868 }
 0x1da   : > { %v5723_v6 = vpop.permute.xlu1 %1232 }
 0x1db   : > { %11812 = vst [vmem:[#allocation97_spill] sm:$0xff] %v5723_v6 }
 0x1de   : > { %1400 = vperm.xlu1 %4818, %v5611_v16   ;;  %1404 = vperm.xlu2 %4819, %v5635_v61  }
 0x1e0   : > { %1734 = vperm.xlu0 %4822, %v5280_v41  }
 0x1e2   : > { %v5730_v8 = vpop.permute.xlu1 %1244  ;;  %v5732_v1 = vpop.permute.xlu2 %1348 }
 0x1e3   : > { %11813 = vst [vmem:[#allocation98_spill] sm:$0xff] %v5730_v8  ;;  %v5753_v6 = vpop.permute.xlu0 %1352 }
 0x1e4   : > { %11814 = vst [vmem:[#allocation99_spill] sm:$0xff] %v5732_v1 }
 0x1e5   : > { %11817 = vst [vmem:[#allocation102_spill] sm:$0xff] %v5753_v6 }
 0x1e6   : > { %4820 = vset.pattern.permute.xlu1 %v11061_v17  ;;  %4821 = vset.pattern.permute.xlu2 %v11061_v17 }
 0x1e7   : > { %1594 = vperm.xlu1 %4820, %v5138_v19   ;;  %1598 = vperm.xlu2 %4821, %v5176_v26  }
 0x1e8   : > { %1746 = vperm.xlu0 %4822, %v5229_v34  }
 0x1ea   : > { %v5741_v5 = vpop.permute.xlu1 %1256 }
 0x1eb   : > { %11815 = vst [vmem:[#allocation100_spill] sm:$0xff] %v5741_v5  ;;  %v5743_v7 = vpop.permute.xlu2 %903  ;;  %v5762_v3 = vpop.permute.xlu0 %908 }
 0x1ef   : > { %1606 = vperm.xlu1 %4820, %v5302_v43   ;;  %1610 = vperm.xlu2 %4821, %v5140_v20  }
 0x1f0   : > { %4825 = vset.pattern.permute.xlu0 %v11061_v17 }
 0x1f1   : > { %1602 = vperm.xlu0 %4825, %v5199_v30  }
 0x1f2   : > { %v5749_v8 = vpop.permute.xlu1 %1268 }
 0x1f3   : > { %11816 = vst [vmem:[#allocation101_spill] sm:$0xff] %v5749_v8  ;;  %v5751_v1 = vpop.permute.xlu2 %888  ;;  %v5773_v6 = vpop.permute.xlu0 %893 }
 0x1f7   : > { %1614 = vperm.xlu1 %4820, %v5170_v25   ;;  %1618 = vperm.xlu2 %4821, %v5210_v31  }
 0x1f9   : > { %1622 = vperm.xlu0 %4825, %v5257_v38  }
 0x1fa   : > { %v5758_v5 = vpop.permute.xlu1 %1280 }
 0x1fb   : > { %11818 = vst [vmem:[#allocation103_spill] sm:$0xff] %v5758_v5 }
 0x1fc   : > { %v5760_v45 = vpop.permute.xlu2 %1368 }
 0x1fd   : > { %11819 = vst [vmem:[#allocation104_spill] sm:$0xff] %v5760_v45 }
 0x1ff   : > { %1626 = vperm.xlu1 %4820, %v5155_v22   ;;  %1630 = vperm.xlu2 %4821, %v5181_v27  }
 0x201   : > { %1634 = vperm.xlu0 %4825, %v5243_v36  }
 0x203   : > { %v5767_v17 = vpop.permute.xlu1 %883 }
 0x205   : > { %v5769_v8 = vpop.permute.xlu2 %933 }
 0x206   : > { %11820 = vst [vmem:[#allocation105_spill] sm:$0xff] %v5769_v8 }
 0x207   : > { %1638 = vperm.xlu1 %4820, %v5280_v41   ;;  %1642 = vperm.xlu2 %4821, %v5163_v23  }
 0x209   : > { %1646 = vperm.xlu0 %4825, %v5216_v32  }
 0x20c   : > { %v5776_v5 = vpop.permute.xlu1 %1364 }
 0x20d   : > { %11821 = vst [vmem:[#allocation106_spill] sm:$0xff] %v5776_v5  ;;  %v5778_v45 = vpop.permute.xlu2 %878 }
 0x20e   : > { %11822 = vst [vmem:[#allocation107_spill] sm:$0xff] %v5778_v45 }
 0x20f   : > { %1650 = vperm.xlu1 %4820, %v5229_v34   ;;  %1654 = vperm.xlu2 %4821, %v5327_v47  }
 0x210   : > { %v5782_v0 = vpop.permute.xlu0 %938 }
 0x211   : > { %11823 = vst [vmem:[#allocation108_spill] sm:$0xff] %v5782_v0  ;;  %1822 = vperm.xlu0 %4825, %v5487_v33  }
 0x215   : > { %v5785_v14 = vpop.permute.xlu1 %928 }
 0x216   : > { %11824 = vst [vmem:[#allocation109_spill] sm:$0xff] %v5785_v14  ;;  %v5787_v8 = vpop.permute.xlu2 %1360 }
 0x217   : > { %11825 = vst [vmem:[#allocation110_spill] sm:$0xff] %v5787_v8  ;;  %4823 = vset.pattern.permute.xlu1 %v11826_v62  ;;  %4824 = vset.pattern.permute.xlu2 %v11826_v62 }
 0x218   : > { %1694 = vperm.xlu1 %4823, %v5176_v26   ;;  %1698 = vperm.xlu2 %4824, %v5199_v30  }
 0x219   : > { %1842 = vperm.xlu0 %4825, %v5538_v39   ;;  %v5794_v5 = vpop.permute.xlu0 %1372 }
 0x21a   : > { %11827 = vst [vmem:[#allocation111_spill] sm:$0xff] %v5794_v5 }
 0x21d   : > { %v5796_v45 = vpop.permute.xlu1 %873 }
 0x21e   : > { %11828 = vst [vmem:[#allocation112_spill] sm:$0xff] %v5796_v45 }
 0x21f   : > { %v5798_v0 = vpop.permute.xlu2 %918 }
 0x220   : > { %11829 = vst [vmem:[#allocation113_spill] sm:$0xff] %v5798_v0  ;;  %1702 = vperm.xlu1 %4823, %v5302_v43   ;;  %1706 = vperm.xlu2 %4824, %v5140_v20  }
 0x221   : > { %1854 = vperm.xlu0 %4825, %v5520_v15   ;;  %v5803_v8 = vpop.permute.xlu0 %1384 }
 0x222   : > { %11830 = vst [vmem:[#allocation114_spill] sm:$0xff] %v5803_v8 }
 0x226   : > { %v5805_v62 = vpop.permute.xlu1 %1356 }
 0x227   : > { %11831 = vst [vmem:[#allocation115_spill] sm:$0xff] %v5805_v62 }
 0x228   : > { %1714 = vperm.xlu1 %4823, %v5210_v31   ;;  %v5808_v14 = vpop.permute.xlu2 %1380  ;;  %1718 = vperm.xlu2 %4824, %v5257_v38  }
 0x229   : > { %11832 = vst [vmem:[#allocation116_spill] sm:$0xff] %v5808_v14  ;;  %1866 = vperm.xlu0 %4825, %v5471_v28   ;;  %v5812_v5 = vpop.permute.xlu0 %1396 }
 0x22a   : > { %11833 = vst [vmem:[#allocation117_spill] sm:$0xff] %v5812_v5  ;;  %v11088_v5 = vmov 7  }
 0x22f   : > { %v5814_v0 = vpop.permute.xlu1 %913 }
 0x230   : > { %11834 = vst [vmem:[#allocation118_spill] sm:$0xff] %v5814_v0  ;;  %1726 = vperm.xlu1 %4823, %v5181_v27   ;;  %v5817_v45 = vpop.permute.xlu2 %1392  ;;  %1730 = vperm.xlu2 %4824, %v5243_v36  }
 0x231   : > { %11835 = vst [vmem:[#allocation119_spill] sm:$0xff] %v5817_v45  ;;  %1878 = vperm.xlu0 %4825, %v5604_v63   ;;  %v5821_v62 = vpop.permute.xlu0 %1408 }
 0x232   : > { %11836 = vst [vmem:[#allocation120_spill] sm:$0xff] %v5821_v62  ;;  %v11841_v62 = vmov 4  }
 0x237   : > { %v5823_v8 = vpop.permute.xlu1 %898 }
 0x238   : > { %11837 = vst [vmem:[#allocation121_spill] sm:$0xff] %v5823_v8  ;;  %1738 = vperm.xlu1 %4823, %v5163_v23   ;;  %v5826_v14 = vpop.permute.xlu2 %1404  ;;  %1742 = vperm.xlu2 %4824, %v5216_v32  }
 0x239   : > { %11838 = vst [vmem:[#allocation122_spill] sm:$0xff] %v5826_v14  ;;  %4830 = vset.pattern.permute.xlu0 %v11088_v5 }
 0x23a   : > { %2160 = vperm.xlu0 %4830, %v5138_v19   ;;  %v5831_v45 = vpop.permute.xlu0 %1690 }
 0x23b   : > { %11839 = vst [vmem:[#allocation123_spill] sm:$0xff] %v5831_v45 }
 0x240   : > { %1750 = vperm.xlu1 %4823, %v5327_v47   ;;  %v5834_v0 = vpop.permute.xlu1 %1376  ;;  %4826 = vset.pattern.permute.xlu2 %v11841_v62 }
 0x241   : > { %11840 = vst [vmem:[#allocation124_spill] sm:$0xff] %v5834_v0  ;;  %v5837_v8 = vpop.permute.xlu2 %1598  ;;  %1818 = vperm.xlu2 %4826, %v5534_v11  }
 0x242   : > { %11842 = vst [vmem:[#allocation125_spill] sm:$0xff] %v5837_v8  ;;  %2180 = vperm.xlu0 %4830, %v5170_v25   ;;  %v5841_v14 = vpop.permute.xlu0 %1710 }
 0x243   : > { %11843 = vst [vmem:[#allocation126_spill] sm:$0xff] %v5841_v14 }
 0x248   : > { %4827 = vset.pattern.permute.xlu1 %v11841_v62  ;;  %v5844_v5 = vpop.permute.xlu1 %1388 }
 0x249   : > { %11844 = vst [vmem:[#allocation127_spill] sm:$0xff] %v5844_v5  ;;  %1826 = vperm.xlu1 %4827, %v5633_v24   ;;  %v5847_v45 = vpop.permute.xlu2 %1610  ;;  %1830 = vperm.xlu2 %4826, %v5652_v9   ;;  %v11109_v5 = vmov 6  }
 0x24a   : > { %11845 = vst [vmem:[#allocation128_spill] sm:$0xff] %v5847_v45  ;;  %2192 = vperm.xlu0 %4830, %v5155_v22   ;;  %v5856_v12 = vpop.permute.xlu0 %1722 }
 0x24b   : > { %11848 = vst [vmem:[#allocation131_spill] sm:$0xff] %v5856_v12 }
 0x250   : > { %v5851_v0 = vpop.permute.xlu1 %1400 }
 0x251   : > { %11846 = vst [vmem:[#allocation129_spill] sm:$0xff] %v5851_v0  ;;  %1834 = vperm.xlu1 %4827, %v5570_v58   ;;  %v5854_v8 = vpop.permute.xlu2 %1618  ;;  %1838 = vperm.xlu2 %4826, %v5593_v18  }
 0x252   : > { %11847 = vst [vmem:[#allocation130_spill] sm:$0xff] %v5854_v8  ;;  %2204 = vperm.xlu0 %4830, %v5280_v41   ;;  %v5867_v14 = vpop.permute.xlu0 %1734 }
 0x253   : > { %11851 = vst [vmem:[#allocation134_spill] sm:$0xff] %v5867_v14 }
 0x259   : > { %1846 = vperm.xlu1 %4827, %v5694_v21   ;;  %v5861_v62 = vpop.permute.xlu1 %1594  ;;  %v5863_v45 = vpop.permute.xlu2 %1630  ;;  %1850 = vperm.xlu2 %4826, %v5572_v37  }
 0x25a   : > { %11849 = vst [vmem:[#allocation132_spill] sm:$0xff] %v5861_v62  ;;  %2216 = vperm.xlu0 %4830, %v5229_v34   ;;  %v5875_v0 = vpop.permute.xlu0 %1746 }
 0x25b   : > { %11850 = vst [vmem:[#allocation133_spill] sm:$0xff] %v5863_v45 }
 0x25c   : > { %11854 = vst [vmem:[#allocation137_spill] sm:$0xff] %v5875_v0 }
 0x261   : > { %1858 = vperm.xlu1 %4827, %v5672_v49   ;;  %v5870_v8 = vpop.permute.xlu1 %1606  ;;  %v5872_v12 = vpop.permute.xlu2 %1642  ;;  %1862 = vperm.xlu2 %4826, %v5692_v42  }
 0x262   : > { %11852 = vst [vmem:[#allocation135_spill] sm:$0xff] %v5870_v8  ;;  %4833 = vset.pattern.permute.xlu0 %v11109_v5 }
 0x263   : > { %11853 = vst [vmem:[#allocation136_spill] sm:$0xff] %v5872_v12  ;;  %2072 = vperm.xlu0 %4833, %v5199_v30   ;;  %v5885_v8 = vpop.permute.xlu0 %1602 }
 0x264   : > { %11857 = vst [vmem:[#allocation140_spill] sm:$0xff] %v5885_v8 }
 0x269   : > { %1870 = vperm.xlu1 %4827, %v5611_v16   ;;  %v5879_v45 = vpop.permute.xlu1 %1614  ;;  %v5881_v62 = vpop.permute.xlu2 %1654  ;;  %1874 = vperm.xlu2 %4826, %v5635_v61  }
 0x26a   : > { %11855 = vst [vmem:[#allocation138_spill] sm:$0xff] %v5879_v45 }
 0x26b   : > { %11856 = vst [vmem:[#allocation139_spill] sm:$0xff] %v5881_v62  ;;  %2092 = vperm.xlu0 %4833, %v5257_v38   ;;  %v5898_v45 = vpop.permute.xlu0 %1622 }
 0x26c   : > { %11861 = vst [vmem:[#allocation144_spill] sm:$0xff] %v5898_v45 }
 0x271   : > { %4828 = vset.pattern.permute.xlu1 %v11109_v5  ;;  %v5888_v12 = vpop.permute.xlu1 %1626  ;;  %4829 = vset.pattern.permute.xlu2 %v11109_v5 }
 0x272   : > { %11858 = vst [vmem:[#allocation141_spill] sm:$0xff] %v5888_v12  ;;  %v5891_v0 = vpop.permute.xlu2 %1698  ;;  %2064 = vperm.xlu1 %4828, %v5138_v19   ;;  %2068 = vperm.xlu2 %4829, %v5176_v26  }
 0x273   : > { %11859 = vst [vmem:[#allocation142_spill] sm:$0xff] %v5891_v0  ;;  %2104 = vperm.xlu0 %4833, %v5243_v36   ;;  %v5910_v0 = vpop.permute.xlu0 %1634 }
 0x274   : > { %11865 = vst [vmem:[#allocation148_spill] sm:$0xff] %v5910_v0 }
 0x279   : > { %v5896_v62 = vpop.permute.xlu1 %1638 }
 0x27a   : > { %11860 = vst [vmem:[#allocation143_spill] sm:$0xff] %v5896_v62  ;;  %v5901_v8 = vpop.permute.xlu2 %1706  ;;  %2076 = vperm.xlu1 %4828, %v5302_v43   ;;  %2080 = vperm.xlu2 %4829, %v5140_v20  }
 0x27b   : > { %11862 = vst [vmem:[#allocation145_spill] sm:$0xff] %v5901_v8  ;;  %2116 = vperm.xlu0 %4833, %v5216_v32  }
 0x281   : > { %v5905_v12 = vpop.permute.xlu1 %1650 }
 0x282   : > { %11863 = vst [vmem:[#allocation146_spill] sm:$0xff] %v5905_v12  ;;  %v5908_v5 = vpop.permute.xlu2 %1718  ;;  %2084 = vperm.xlu1 %4828, %v5170_v25   ;;  %2088 = vperm.xlu2 %4829, %v5210_v31   ;;  %v5921_v12 = vpop.permute.xlu0 %1646 }
 0x283   : > { %11864 = vst [vmem:[#allocation147_spill] sm:$0xff] %v5908_v5  ;;  %2292 = vperm.xlu0 %4833, %v5487_v33  }
 0x284   : > { %11868 = vst [vmem:[#allocation151_spill] sm:$0xff] %v5921_v12 }
 0x28a   : > { %v5915_v62 = vpop.permute.xlu1 %1694  ;;  %v5917_v8 = vpop.permute.xlu2 %1730  ;;  %2096 = vperm.xlu1 %4828, %v5155_v22   ;;  %2100 = vperm.xlu2 %4829, %v5181_v27  }
 0x28b   : > { %11866 = vst [vmem:[#allocation149_spill] sm:$0xff] %v5915_v62  ;;  %2312 = vperm.xlu0 %4833, %v5538_v39   ;;  %v5930_v45 = vpop.permute.xlu0 %1822 }
 0x28c   : > { %11867 = vst [vmem:[#allocation150_spill] sm:$0xff] %v5917_v8 }
 0x28d   : > { %11871 = vst [vmem:[#allocation154_spill] sm:$0xff] %v5930_v45 }
 0x292   : > { %v5924_v5 = vpop.permute.xlu1 %1702  ;;  %v5926_v0 = vpop.permute.xlu2 %1742  ;;  %2108 = vperm.xlu1 %4828, %v5280_v41   ;;  %2112 = vperm.xlu2 %4829, %v5163_v23  }
 0x293   : > { %11869 = vst [vmem:[#allocation152_spill] sm:$0xff] %v5924_v5  ;;  %2324 = vperm.xlu0 %4833, %v5520_v15   ;;  %v5939_v12 = vpop.permute.xlu0 %1842  ;;  %v11876_v5 = vmov 7  }
 0x294   : > { %11870 = vst [vmem:[#allocation153_spill] sm:$0xff] %v5926_v0 }
 0x295   : > { %11874 = vst [vmem:[#allocation157_spill] sm:$0xff] %v5939_v12 }
 0x29a   : > { %v5933_v8 = vpop.permute.xlu1 %1714  ;;  %2120 = vperm.xlu1 %4828, %v5229_v34   ;;  %2124 = vperm.xlu2 %4829, %v5327_v47  }
 0x29b   : > { %11872 = vst [vmem:[#allocation155_spill] sm:$0xff] %v5933_v8  ;;  %v5936_v62 = vpop.permute.xlu2 %1818  ;;  %2336 = vperm.xlu0 %4833, %v5471_v28   ;;  %v5953_v45 = vpop.permute.xlu0 %1854 }
 0x29c   : > { %11873 = vst [vmem:[#allocation156_spill] sm:$0xff] %v5936_v62 }
 0x29d   : > { %11879 = vst [vmem:[#allocation161_spill] sm:$0xff] %v5953_v45 }
 0x2a2   : > { %v5942_v0 = vpop.permute.xlu1 %1726  ;;  %4831 = vset.pattern.permute.xlu1 %v11876_v5  ;;  %4832 = vset.pattern.permute.xlu2 %v11876_v5 }
 0x2a3   : > { %11875 = vst [vmem:[#allocation158_spill] sm:$0xff] %v5942_v0  ;;  %v5945_v14 = vpop.permute.xlu2 %1830  ;;  %2164 = vperm.xlu1 %4831, %v5176_v26   ;;  %2168 = vperm.xlu2 %4832, %v5199_v30   ;;  %v11131_v0 = vmov 9  }
 0x2a4   : > { %11877 = vst [vmem:[#allocation159_spill] sm:$0xff] %v5945_v14  ;;  %2348 = vperm.xlu0 %4833, %v5604_v63   ;;  %v5964_v14 = vpop.permute.xlu0 %1866 }
 0x2a5   : > { %11882 = vst [vmem:[#allocation164_spill] sm:$0xff] %v5964_v14 }
 0x2aa   : > { %v5951_v62 = vpop.permute.xlu1 %1738 }
 0x2ab   : > { %11878 = vst [vmem:[#allocation160_spill] sm:$0xff] %v5951_v62  ;;  %2172 = vperm.xlu1 %4831, %v5302_v43   ;;  %v5956_v12 = vpop.permute.xlu2 %1838  ;;  %2176 = vperm.xlu2 %4832, %v5140_v20  }
 0x2ac   : > { %11880 = vst [vmem:[#allocation162_spill] sm:$0xff] %v5956_v12  ;;  %4838 = vset.pattern.permute.xlu0 %v11131_v0  ;;  %v5974_v0 = vpop.permute.xlu0 %1878 }
 0x2ad   : > { %2630 = vperm.xlu0 %4838, %v5138_v19   ;;  %11885 = vst [vmem:[#allocation167_spill] sm:$0xff] %v5974_v0 }
 0x2b2   : > { %v5961_v5 = vpop.permute.xlu1 %1750 }
 0x2b3   : > { %11881 = vst [vmem:[#allocation163_spill] sm:$0xff] %v5961_v5  ;;  %2184 = vperm.xlu1 %4831, %v5210_v31   ;;  %2188 = vperm.xlu2 %4832, %v5257_v38   ;;  %v5967_v45 = vpop.permute.xlu2 %1850 }
 0x2b4   : > { %11883 = vst [vmem:[#allocation165_spill] sm:$0xff] %v5967_v45  ;;  %v5983_v45 = vpop.permute.xlu0 %2160 }
 0x2b5   : > { %2650 = vperm.xlu0 %4838, %v5170_v25   ;;  %11888 = vst [vmem:[#allocation170_spill] sm:$0xff] %v5983_v45  ;;  %v11145_v45 = vmov 8  }
 0x2bb   : > { %2196 = vperm.xlu1 %4831, %v5181_v27   ;;  %v5971_v62 = vpop.permute.xlu1 %1826  ;;  %2200 = vperm.xlu2 %4832, %v5243_v36   ;;  %v5976_v12 = vpop.permute.xlu2 %1862 }
 0x2bc   : > { %11884 = vst [vmem:[#allocation166_spill] sm:$0xff] %v5971_v62  ;;  %v11890_v62 = vmov 6  }
 0x2bd   : > { %11886 = vst [vmem:[#allocation168_spill] sm:$0xff] %v5976_v12  ;;  %2662 = vperm.xlu0 %4838, %v5155_v22   ;;  %v5994_v12 = vpop.permute.xlu0 %2180 }
 0x2be   : > { %11892 = vst [vmem:[#allocation173_spill] sm:$0xff] %v5994_v12 }
 0x2c3   : > { %2208 = vperm.xlu1 %4831, %v5163_v23   ;;  %2212 = vperm.xlu2 %4832, %v5216_v32   ;;  %v5981_v14 = vpop.permute.xlu1 %1834  ;;  %v5985_v5 = vpop.permute.xlu2 %1874 }
 0x2c4   : > { %11887 = vst [vmem:[#allocation169_spill] sm:$0xff] %v5981_v14  ;;  %v11906_v14 = vmov 8  }
 0x2c5   : > { %11889 = vst [vmem:[#allocation171_spill] sm:$0xff] %v5985_v5  ;;  %2674 = vperm.xlu0 %4838, %v5280_v41  }
 0x2cb   : > { %2220 = vperm.xlu1 %4831, %v5327_v47   ;;  %4834 = vset.pattern.permute.xlu2 %v11890_v62  ;;  %v5991_v0 = vpop.permute.xlu1 %1846 }
 0x2cc   : > { %2288 = vperm.xlu2 %4834, %v5534_v11   ;;  %11891 = vst [vmem:[#allocation172_spill] sm:$0xff] %v5991_v0  ;;  %v5996_v8 = vpop.permute.xlu2 %2068  ;;  %v6005_v0 = vpop.permute.xlu0 %2192 }
 0x2cd   : > { %2686 = vperm.xlu0 %4838, %v5229_v34   ;;  %11893 = vst [vmem:[#allocation174_spill] sm:$0xff] %v5996_v8 }
 0x2ce   : > { %11895 = vst [vmem:[#allocation176_spill] sm:$0xff] %v6005_v0 }
 0x2d3   : > { %4835 = vset.pattern.permute.xlu1 %v11890_v62  ;;  %v6002_v5 = vpop.permute.xlu1 %1858 }
 0x2d4   : > { %2296 = vperm.xlu1 %4835, %v5633_v24   ;;  %2300 = vperm.xlu2 %4834, %v5652_v9   ;;  %11894 = vst [vmem:[#allocation175_spill] sm:$0xff] %v6002_v5  ;;  %v6008_v12 = vpop.permute.xlu2 %2080 }
 0x2d5   : > { %4841 = vset.pattern.permute.xlu0 %v11145_v45  ;;  %11896 = vst [vmem:[#allocation177_spill] sm:$0xff] %v6008_v12  ;;  %v6016_v45 = vpop.permute.xlu0 %2204 }
 0x2d6   : > { %2542 = vperm.xlu0 %4841, %v5199_v30   ;;  %11898 = vst [vmem:[#allocation179_spill] sm:$0xff] %v6016_v45 }
 0x2db   : > { %v6012_v62 = vpop.permute.xlu1 %1870 }
 0x2dc   : > { %2304 = vperm.xlu1 %4835, %v5570_v58   ;;  %2308 = vperm.xlu2 %4834, %v5593_v18   ;;  %11897 = vst [vmem:[#allocation178_spill] sm:$0xff] %v6012_v62  ;;  %v6018_v8 = vpop.permute.xlu2 %2088 }
 0x2dd   : > { %11899 = vst [vmem:[#allocation180_spill] sm:$0xff] %v6018_v8  ;;  %v6027_v5 = vpop.permute.xlu0 %2216 }
 0x2de   : > { %2562 = vperm.xlu0 %4841, %v5257_v38   ;;  %11902 = vst [vmem:[#allocation183_spill] sm:$0xff] %v6027_v5 }
 0x2e4   : > { %2316 = vperm.xlu1 %4835, %v5694_v21   ;;  %2320 = vperm.xlu2 %4834, %v5572_v37   ;;  %v6023_v12 = vpop.permute.xlu1 %2064  ;;  %v6025_v0 = vpop.permute.xlu2 %2100 }
 0x2e5   : > { %11900 = vst [vmem:[#allocation181_spill] sm:$0xff] %v6023_v12  ;;  %v6036_v62 = vpop.permute.xlu0 %2072 }
 0x2e6   : > { %2574 = vperm.xlu0 %4841, %v5243_v36   ;;  %11901 = vst [vmem:[#allocation182_spill] sm:$0xff] %v6025_v0 }
 0x2e7   : > { %11905 = vst [vmem:[#allocation186_spill] sm:$0xff] %v6036_v62 }
 0x2ec   : > { %2328 = vperm.xlu1 %4835, %v5672_v49   ;;  %2332 = vperm.xlu2 %4834, %v5692_v42   ;;  %v6032_v45 = vpop.permute.xlu1 %2076  ;;  %v6034_v8 = vpop.permute.xlu2 %2112 }
 0x2ed   : > { %11903 = vst [vmem:[#allocation184_spill] sm:$0xff] %v6032_v45  ;;  %v6048_v45 = vpop.permute.xlu0 %2092 }
 0x2ee   : > { %2586 = vperm.xlu0 %4841, %v5216_v32   ;;  %11904 = vst [vmem:[#allocation185_spill] sm:$0xff] %v6034_v8  ;;  %v276_v8 = vld [vmem:[%s10976_s2] sm:$0xf] }
 0x2ef   : > { %11909 = vst [vmem:[#allocation189_spill] sm:$0xff] %v6048_v45 }
 0x2f4   : > { %2340 = vperm.xlu1 %4835, %v5611_v16   ;;  %2344 = vperm.xlu2 %4834, %v5635_v61   ;;  %v6042_v0 = vpop.permute.xlu1 %2084  ;;  %v6045_v12 = vpop.permute.xlu2 %2124  ;;  %v727_v61 = vperm.slane %v276_v8, 1  ;;  %v610_v16 = vperm.slane %v276_v8, 2 }
 0x2f5   : > { %11907 = vst [vmem:[#allocation187_spill] sm:$0xff] %v6042_v0  ;;  %v609_v0 = vperm.slane %v276_v8, 0 }
 0x2f6   : > { %2762 = vperm.xlu0 %4841, %v5487_v33   ;;  %11908 = vst [vmem:[#allocation188_spill] sm:$0xff] %v6045_v12  ;;  %v728_v12 = vperm.slane %v276_v8, 3  ;;  %v6062_v45 = vperm.slane %v727_v61, 1  ;;  %v6064_v49 = vperm.slane %v610_v16, 0 }
 0x2f7   : > { %v6060_v42 = vperm.slane %v609_v0, 0 }
 0x2f8   : > { %11913 = vst [vmem:[#allocation193_spill] sm:$0xff] %v6062_v45  ;;  %v704_v0 = vmul.f32 %v5309_v44, %v6064_v49  ;;  %v805_v16 = vmul.f32 %v5322_v46, %v6062_v45  ;;  %v6103_v21 = vmul.f32 %v5334_v48, %v6064_v49  ;;  %v6145_v58 = vmul.f32 %v5357_v55, %v6064_v49 }
 0x2f9   : > { %11912 = vst [vmem:[#allocation192_spill] sm:$0xff] %v6060_v42  ;;  %v703_v8 = vmul.f32 %v5309_v44, %v6060_v42  ;;  %v696_v44 = vmul.f32 %v5346_v51, %v6064_v49 }
 0x2fa   : > { %11914 = vst [vmem:[#allocation194_spill] sm:$0xff] %v6064_v49 }
 0x2fc   : > { %4836 = vset.pattern.permute.xlu1 %v11906_v14  ;;  %4837 = vset.pattern.permute.xlu2 %v11906_v14  ;;  %v6054_v62 = vpop.permute.xlu1 %2096 }
 0x2fd   : > { %2534 = vperm.xlu1 %4836, %v5138_v19   ;;  %2538 = vperm.xlu2 %4837, %v5176_v26   ;;  %11910 = vst [vmem:[#allocation190_spill] sm:$0xff] %v6054_v62  ;;  %v6057_v5 = vpop.permute.xlu2 %2168  ;;  %v6069_v62 = vpop.permute.xlu0 %2104 }
 0x2fe   : > { %2782 = vperm.xlu0 %4841, %v5538_v39   ;;  %11911 = vst [vmem:[#allocation191_spill] sm:$0xff] %v6057_v5  ;;  %v6066_v39 = vperm.slane %v728_v12, 1  ;;  %v797_v5 = vmul.f32 %v5344_v50, %v6062_v45 }
 0x2ff   : > { %11916 = vst [vmem:[#allocation196_spill] sm:$0xff] %v6069_v62 }
 0x300   : > { %11915 = vst [vmem:[#allocation195_spill] sm:$0xff] %v6066_v39  ;;  %v806_v61 = vmul.f32 %v5322_v46, %v6066_v39  ;;  %v798_v62 = vmul.f32 %v5344_v50, %v6066_v39  ;;  %v6097_v46 = vadd.f32 %v805_v16, %v703_v8  ;;  %v813_v50 = vmul.f32 %v5366_v57, %v6062_v45 }
 0x301   : > { %v712_v8 = vmul.f32 %v5371_v59, %v6064_v49  ;;  %v800_v9 = vmul.f32 %v5426_v13, %v6066_v39 }
 0x302   : > { %v6117_v16 = vadd.f32 %v798_v62, %v696_v44  ;;  %v719_v62 = vmul.f32 %v5359_v56, %v6060_v42  ;;  %v706_v44 = vmul.f32 %v5417_v10, %v6064_v49 }
 0x304   : > { %v6071_v37 = vpop.permute.xlu1 %2108 }
 0x305   : > { %2546 = vperm.xlu1 %4836, %v5302_v43   ;;  %2550 = vperm.xlu2 %4837, %v5140_v20   ;;  %11917 = vst [vmem:[#allocation197_spill] sm:$0xff] %v6071_v37  ;;  %v6082_v12 = vpop.permute.xlu2 %2176  ;;  %v695_v37 = vmul.f32 %v5346_v51, %v6060_v42  ;;  %v711_v51 = vmul.f32 %v5371_v59, %v6060_v42 }
 0x306   : > { %2794 = vperm.xlu0 %4841, %v5520_v15   ;;  %11918 = vst [vmem:[#allocation198_spill] sm:$0xff] %v6082_v12  ;;  %v6095_v15 = vmul.f32 %v5334_v48, %v6060_v42  ;;  %v6099_v12 = vadd.f32 %v806_v61, %v704_v0  ;;  %v821_v0 = vmul.f32 %v5389_v2, %v6062_v45 }
 0x307   : > { %v6109_v33 = vadd.f32 %v797_v5, %v695_v37  ;;  %v6122_v48 = vmul.f32 %v5357_v55, %v6060_v42  ;;  %v822_v37 = vmul.f32 %v5389_v2, %v6066_v39  ;;  %v705_v59 = vmul.f32 %v5417_v10, %v6060_v42  ;;  %v11922_v10 = vld [vmem:[#allocation23_spill] sm:$0xff]  ;;  %v11923_v55 = vld [vmem:[#allocation24_spill] sm:$0xff] }
 0x308   : > { %v808_v61 = vmul.f32 %v5396_v4, %v6066_v39  ;;  %v799_v2 = vmul.f32 %v5426_v13, %v6062_v45  ;;  %v6151_v24 = vadd.f32 %v813_v50, %v711_v51  ;;  %v697_v11 = vmul.f32 %v11922_v10, %v6060_v42  ;;  %v11925_v51 = vld [vmem:[#allocation26_spill] sm:$0xff] }
 0x309   : > { %v853_v14 = vadd.f32 %v821_v0, %v719_v62  ;;  %v6163_v36 = vmul.f32 %v11923_v55, %v6060_v42  ;;  %v11926_v62 = vld [vmem:[#allocation27_spill] sm:$0xff] }
 0x30a   : > { %v6176_v0 = vadd.f32 %v808_v61, %v706_v44 }
 0x30c   : > { %v6130_v5 = vpop.permute.xlu1 %2120 }
 0x30d   : > { %2554 = vperm.xlu1 %4836, %v5170_v25   ;;  %2558 = vperm.xlu2 %4837, %v5210_v31   ;;  %11919 = vst [vmem:[#allocation199_spill] sm:$0xff] %v6130_v5  ;;  %v6141_v18 = vpop.permute.xlu2 %2188  ;;  %v720_v5 = vmul.f32 %v5359_v56, %v6064_v49  ;;  %v6167_v56 = vmul.f32 %v11923_v55, %v6064_v49 }
 0x30e   : > { %2806 = vperm.xlu0 %4841, %v5471_v28   ;;  %v814_v28 = vmul.f32 %v5366_v57, %v6066_v39  ;;  %v807_v57 = vmul.f32 %v5396_v4, %v6062_v45  ;;  %11920 = vst [vmem:[#allocation200_spill] sm:$0xff] %v6141_v18  ;;  %v6153_v4 = vpop.permute.xlu0 %2116  ;;  %v698_v18 = vmul.f32 %v11922_v10, %v6064_v49 }
 0x30f   : > { %11921 = vst [vmem:[#allocation201_spill] sm:$0xff] %v6153_v4  ;;  %v854_v13 = vadd.f32 %v822_v37, %v720_v5  ;;  %v713_v4 = vmul.f32 %v11925_v51, %v6060_v42  ;;  %v6180_v10 = vmul.f32 %v11926_v62, %v6060_v42  ;;  %v6184_v37 = vmul.f32 %v11926_v62, %v6064_v49 }
 0x310   : > { %v6159_v32 = vadd.f32 %v814_v28, %v712_v8  ;;  %11924 = vst [vmem:[#allocation23_spill] sm:$0xff] %v6167_v56  ;;  %v6169_v50 = vadd.f32 %v807_v57, %v705_v59  ;;  %v714_v28 = vmul.f32 %v11925_v51, %v6064_v49  ;;  %v831_v8 = vadd.f32 %v799_v2, %v697_v11  ;;  %v11929_v57 = vld [vmem:[#allocation28_spill] sm:$0xff]  ;;  %v11933_v51 = vld [vmem:[#allocation29_spill] sm:$0xff] }
 0x311   : > { %11927 = vst [vmem:[#allocation24_spill] sm:$0xff] %v6180_v10  ;;  %v6188_v59 = vmul.f32 %v11929_v57, %v6062_v45  ;;  %v832_v5 = vadd.f32 %v800_v9, %v698_v18  ;;  %v6192_v55 = vmul.f32 %v11929_v57, %v6066_v39  ;;  %v11931_v11 = vld [vmem:[#allocation32_spill] sm:$0xff]  ;;  %v6204_v62 = vmul.f32 %v11933_v51, %v6060_v42  ;;  %v11934_v9 = vld [vmem:[#allocation30_spill] sm:$0xff] }
 0x312   : > { %11928 = vst [vmem:[#allocation26_spill] sm:$0xff] %v6184_v37  ;;  %v815_v61 = vmul.f32 %v11931_v11, %v6062_v45  ;;  %v816_v44 = vmul.f32 %v11931_v11, %v6066_v39  ;;  %v6199_v2 = vsub.f32 %v5739_v52, %v831_v8  ;;  %v6208_v18 = vmul.f32 %v11933_v51, %v6064_v49 }
 0x313   : > { %11930 = vst [vmem:[#allocation27_spill] sm:$0xff] %v6192_v55  ;;  %v6212_v57 = vmul.f32 %v11934_v9, %v6060_v42  ;;  %v6221_v8 = vmul.f32 %v11934_v9, %v6064_v49  ;;  %v6226_v51 = vsub.f32 %v5727_v54, %v853_v14  ;;  %v6237_v9 = vsub.f32 %v5739_v52, %v832_v5  ;;  %v11944_v55 = vld [vmem:[#allocation38_spill] sm:$0xff] }
 0x314   : > { %11932 = vst [vmem:[#allocation28_spill] sm:$0xff] %v6199_v2  ;;  %v6245_v56 = vmul.f32 %v11944_v55, %v6062_v45 }
 0x315   : > { %2566 = vperm.xlu1 %4836, %v5155_v22   ;;  %2570 = vperm.xlu2 %4837, %v5181_v27   ;;  %11935 = vst [vmem:[#allocation32_spill] sm:$0xff] %v6212_v57  ;;  %v6216_v37 = vpop.permute.xlu1 %2164  ;;  %v6228_v27 = vpop.permute.xlu2 %2200  ;;  %v11941_v57 = vld [vmem:[#allocation31_spill] sm:$0xff]  ;;  %v974_v14 = vmin.f32 %v6199_v2, %v6226_v51 }
 0x316   : > { %2818 = vperm.xlu0 %4841, %v5604_v63   ;;  %v11936_v63 = vld [vmem:[#allocation39_spill] sm:$0xff]  ;;  %11937 = vst [vmem:[#allocation29_spill] sm:$0xff] %v6216_v37  ;;  %v825_v38 = vmul.f32 %v11941_v57, %v6062_v45  ;;  %v826_v37 = vmul.f32 %v11941_v57, %v6066_v39  ;;  %v6249_v57 = vmul.f32 %v11944_v55, %v6066_v39  ;;  %v6254_v5 = vpop.permute.xlu0 %2292 }
 0x317   : > { %v809_v11 = vmul.f32 %v11936_v63, %v6062_v45  ;;  %11938 = vst [vmem:[#allocation30_spill] sm:$0xff] %v6221_v8  ;;  %v810_v10 = vmul.f32 %v11936_v63, %v6066_v39  ;;  %v847_v8 = vadd.f32 %v815_v61, %v713_v4  ;;  %v11947_v4 = vld [vmem:[#allocation45_spill] sm:$0xff]  ;;  %v6261_v61 = vsub.f32 %v5721_v60, %v6109_v33 }
 0x318   : > { %11939 = vst [vmem:[#allocation39_spill] sm:$0xff] %v6226_v51 }
 0x319   : > { %11940 = vst [vmem:[#allocation202_spill] sm:$0xff] %v6228_v27  ;;  %v848_v27 = vadd.f32 %v816_v44, %v714_v28  ;;  %v723_v28 = vmul.f32 %v11947_v4, %v6060_v42  ;;  %v6264_v44 = vsub.f32 %v5762_v3, %v847_v8 }
 0x31a   : > { %11943 = vst [vmem:[#allocation31_spill] sm:$0xff] %v6237_v9 }
 0x31b   : > { %11946 = vst [vmem:[#allocation38_spill] sm:$0xff] %v6254_v5 }
 0x31c   : > { %11948 = vst [vmem:[#allocation45_spill] sm:$0xff] %v6261_v61 }
 0x31d   : > { %2578 = vperm.xlu1 %4836, %v5280_v41   ;;  %2582 = vperm.xlu2 %4837, %v5163_v23   ;;  %v11942_v23 = vld [vmem:[#allocation34_spill] sm:$0xff]  ;;  %v6252_v41 = vsub.f32 %v5727_v54, %v854_v13  ;;  %11949 = vst [vmem:[#allocation203_spill] sm:$0xff] %v6264_v44  ;;  %v724_v13 = vmul.f32 %v11947_v4, %v6064_v49  ;;  %v6302_v2 = vpop.permute.xlu1 %2172 }
 0x31e   : > { %v707_v31 = vmul.f32 %v11942_v23, %v6060_v42  ;;  %v708_v63 = vmul.f32 %v11942_v23, %v6064_v49  ;;  %v11221_v23 = vmov 11  }
 0x31f   : > { %11945 = vst [vmem:[#allocation34_spill] sm:$0xff] %v6252_v41  ;;  %4846 = vset.pattern.permute.xlu0 %v11221_v23  ;;  %v995_v33 = vmin.f32 %v6237_v9, %v6252_v41  ;;  %v11955_v41 = vld [vmem:[#allocation46_spill] sm:$0xff]  ;;  %v6300_v9 = vsub.f32 %v5762_v3, %v848_v27 }
 0x320   : > { %v841_v52 = vadd.f32 %v809_v11, %v707_v31  ;;  %v842_v55 = vadd.f32 %v810_v10, %v708_v63  ;;  %3100 = vperm.xlu0 %4846, %v5138_v19   ;;  %v11950_v31 = vld [vmem:[#allocation42_spill] sm:$0xff]  ;;  %v11952_v11 = vld [vmem:[#allocation53_spill] sm:$0xff]  ;;  %v11954_v10 = vld [vmem:[#allocation43_spill] sm:$0xff]  ;;  %v973_v19 = vmin.f32 %v6261_v61, %v974_v14  ;;  %v6293_v51 = vmul.f32 %v11955_v41, %v6062_v45 }
 0x321   : > { %v6269_v54 = vmul.f32 %v11950_v31, %v6060_v42  ;;  %v1283_v23 = vmul.f32 %v11952_v11, %v6062_v45  ;;  %v6279_v8 = vmul.f32 %v11950_v31, %v6064_v49  ;;  %v6283_v63 = vmul.f32 %v11954_v10, %v6062_v45  ;;  %11956 = vst [vmem:[#allocation43_spill] sm:$0xff] %v6300_v9 }
 0x322   : > { %v1284_v5 = vmul.f32 %v11952_v11, %v6066_v39  ;;  %v820_v4 = vmul.f32 %v11954_v10, %v6066_v39  ;;  %v6297_v31 = vsub.f32 %v5721_v60, %v6117_v16  ;;  %11957 = vst [vmem:[#allocation46_spill] sm:$0xff] %v6302_v2  ;;  %v6307_v14 = vmul.f32 %v11955_v41, %v6066_v39  ;;  %v11958_v11 = vld [vmem:[#allocation56_spill] sm:$0xff]  ;;  %v11960_v41 = vld [vmem:[#allocation54_spill] sm:$0xff] }
 0x323   : > { %11951 = vst [vmem:[#allocation42_spill] sm:$0xff] %v6269_v54  ;;  %v1293_v10 = vmul.f32 %v11958_v11, %v6062_v45  ;;  %v975_v61 = vmin.f32 %v973_v19, %v6264_v44  ;;  %v6312_v54 = vpop.permute.xlu2 %2212  ;;  %v1294_v27 = vmul.f32 %v11958_v11, %v6066_v39  ;;  %v6318_v3 = vadd.f32 %v1283_v23, %v6122_v48  ;;  %v11963_v48 = vld [vmem:[#allocation55_spill] sm:$0xff]  ;;  %v11976_v44 = vld [vmem:[#allocation105_spill] sm:$0xff] }
 0x324   : > { %11953 = vst [vmem:[#allocation53_spill] sm:$0xff] %v6279_v8  ;;  %v857_v8 = vadd.f32 %v825_v38, %v723_v28  ;;  %v994_v60 = vmin.f32 %v6297_v31, %v995_v33  ;;  %v6320_v16 = vadd.f32 %v826_v37, %v724_v13  ;;  %v701_v2 = vmul.f32 %v11960_v41, %v6060_v42 }
 0x325   : > { %2590 = vperm.xlu1 %4836, %v5229_v34   ;;  %2594 = vperm.xlu2 %4837, %v5327_v47   ;;  %11959 = vst [vmem:[#allocation56_spill] sm:$0xff] %v6312_v54  ;;  %v6325_v47 = vadd.f32 %v1284_v5, %v6145_v58  ;;  %v6329_v19 = vsub.f32 %v5743_v7, %v6151_v24 }
 0x326   : > { %v6332_v38 = vsub.f32 %v5773_v6, %v841_v52  ;;  %v702_v28 = vmul.f32 %v11960_v41, %v6064_v49  ;;  %v6338_v37 = vmul.f32 %v11963_v48, %v6062_v45  ;;  %v6342_v23 = vmul.f32 %v11963_v48, %v6066_v39 }
 0x327   : > { %11961 = vst [vmem:[#allocation54_spill] sm:$0xff] %v6329_v19  ;;  %v996_v58 = vmin.f32 %v994_v60, %v6300_v9  ;;  %v803_v24 = vmul.f32 %v5566_v53, %v6062_v45  ;;  %v804_v52 = vmul.f32 %v5566_v53, %v6066_v39  ;;  %v977_v5 = vmin.f32 %v975_v61, %v6329_v19  ;;  %v6366_v53 = vpop.permute.xlu0 %2312  ;;  %v11967_v61 = vld [vmem:[#allocation61_spill] sm:$0xff] }
 0x328   : > { %11962 = vst [vmem:[#allocation204_spill] sm:$0xff] %v6332_v38  ;;  %v6351_v13 = vadd.f32 %v1293_v10, %v6204_v62  ;;  %3120 = vperm.xlu0 %4846, %v5170_v25   ;;  %v725_v33 = vmul.f32 %v5568_v35, %v6060_v42  ;;  %v6358_v11 = vsub.f32 %v5743_v7, %v6159_v32  ;;  %v11968_v7 = vmov 9   ;;  %v11974_v25 = vld [vmem:[#allocation81_spill] sm:$0xff] }
 0x329   : > { %v6361_v60 = vsub.f32 %v5773_v6, %v842_v55  ;;  %v6364_v41 = vadd.f32 %v1294_v27, %v6208_v18  ;;  %11966 = vst [vmem:[#allocation206_spill] sm:$0xff] %v6366_v53  ;;  %v726_v62 = vmul.f32 %v5568_v35, %v6064_v49  ;;  %v6372_v10 = vmul.f32 %v11967_v61, %v6062_v45  ;;  %v6385_v55 = vpop.permute.xlu1 %2184 }
 0x32a   : > { %11964 = vst [vmem:[#allocation55_spill] sm:$0xff] %v6358_v11  ;;  %v6376_v48 = vmul.f32 %v11967_v61, %v6066_v39  ;;  %v979_v32 = vmin.f32 %v977_v5, %v6332_v38  ;;  %v717_v6 = vmul.f32 %v5646_v40, %v6060_v42  ;;  %v718_v18 = vmul.f32 %v5646_v40, %v6064_v49  ;;  %v11971_v40 = vld [vmem:[#allocation64_spill] sm:$0xff] }
 0x32b   : > { %11965 = vst [vmem:[#allocation205_spill] sm:$0xff] %v6361_v60  ;;  %v998_v35 = vmin.f32 %v996_v58, %v6358_v11  ;;  %v6391_v27 = vsub.f32 %v5751_v1, %v6169_v50  ;;  %v6395_v5 = vsub.f32 %v5767_v17, %v6097_v46  ;;  %v835_v61 = vadd.f32 %v803_v24, %v701_v2  ;;  %v6397_v54 = vpop.permute.xlu2 %2288  ;;  %v11972_v2 = vld [vmem:[#allocation78_spill] sm:$0xff]  ;;  %v11979_v11 = vld [vmem:[#allocation107_spill] sm:$0xff] }
 0x32c   : > { %11969 = vst [vmem:[#allocation61_spill] sm:$0xff] %v6385_v55  ;;  %v836_v53 = vadd.f32 %v804_v52, %v702_v28  ;;  %v6402_v58 = vmul.f32 %v11971_v40, %v6060_v42  ;;  %v700_v50 = vmul.f32 %v5661_v29, %v6064_v49  ;;  %v6411_v46 = vmul.f32 %v11971_v40, %v6064_v49 }
 0x32d   : > { %4839 = vset.pattern.permute.xlu1 %v11968_v7  ;;  %4840 = vset.pattern.permute.xlu2 %v11968_v7  ;;  %11970 = vst [vmem:[#allocation207_spill] sm:$0xff] %v6397_v54  ;;  %v699_v7 = vmul.f32 %v5661_v29, %v6060_v42  ;;  %v1000_v55 = vmin.f32 %v998_v35, %v6361_v60 }
 0x32e   : > { %2634 = vperm.xlu1 %4839, %v5176_v26   ;;  %2638 = vperm.xlu2 %4840, %v5199_v30   ;;  %v6415_v28 = vmul.f32 %v11972_v2, %v6062_v45  ;;  %v6419_v24 = vmul.f32 %v11972_v2, %v6066_v39  ;;  %v981_v52 = vmin.f32 %v979_v32, %v6391_v27  ;;  %v11975_v2 = vld [vmem:[#allocation82_spill] sm:$0xff] }
 0x32f   : > { %v6424_v54 = vsub.f32 %v5751_v1, %v6176_v0  ;;  %v6428_v29 = vsub.f32 %v5767_v17, %v6099_v12  ;;  %v6431_v35 = vadd.f32 %v6283_v63, %v717_v6  ;;  %v6433_v40 = vadd.f32 %v820_v4, %v718_v18  ;;  %v11977_v6 = vld [vmem:[#allocation88_spill] sm:$0xff] }
 0x330   : > { %v827_v26 = vmul.f32 %v11974_v25, %v6062_v45  ;;  %v1291_v9 = vmul.f32 %v11975_v2, %v6062_v45  ;;  %v983_v32 = vmin.f32 %v981_v52, %v6395_v5  ;;  %v6441_v1 = vsub.f32 %v11976_v44, %v857_v8  ;;  %3132 = vperm.xlu0 %4846, %v5155_v22   ;;  %v11978_v8 = vld [vmem:[#allocation96_spill] sm:$0xff] }
 0x331   : > { %11973 = vst [vmem:[#allocation64_spill] sm:$0xff] %v6424_v54  ;;  %v1292_v17 = vmul.f32 %v11975_v2, %v6066_v39  ;;  %v1002_v12 = vmin.f32 %v1000_v55, %v6424_v54  ;;  %v833_v0 = vadd.f32 %v6245_v56, %v699_v7  ;;  %v834_v63 = vadd.f32 %v6249_v57, %v700_v50  ;;  %v11980_v56 = vld [vmem:[#allocation93_spill] sm:$0xff]  ;;  %v6469_v7 = vpop.permute.xlu0 %2324  ;;  %v6471_v50 = vpop.permute.xlu1 %2196 }
 0x332   : > { %v828_v4 = vmul.f32 %v11974_v25, %v6066_v39  ;;  %v709_v18 = vmul.f32 %v11977_v6, %v6060_v42  ;;  %v721_v52 = vmul.f32 %v11978_v8, %v6060_v42  ;;  %v6456_v22 = vsub.f32 %v11979_v11, %v835_v61  ;;  %11982 = vst [vmem:[#allocation81_spill] sm:$0xff] %v6469_v7  ;;  %v11984_v61 = vld [vmem:[#allocation95_spill] sm:$0xff] }
 0x333   : > { %v6460_v2 = vmul.f32 %v11977_v6, %v6064_v49  ;;  %v715_v55 = vmul.f32 %v11980_v56, %v6060_v42  ;;  %v1004_v57 = vmin.f32 %v1002_v12, %v6428_v29  ;;  %v6467_v25 = vsub.f32 %v11976_v44, %v6320_v16  ;;  %11983 = vst [vmem:[#allocation82_spill] sm:$0xff] %v6471_v50  ;;  %v6478_v54 = vpop.permute.xlu2 %2300 }
 0x334   : > { %v1285_v19 = vmul.f32 %v11984_v61, %v6062_v45  ;;  %v985_v6 = vmin.f32 %v983_v32, %v6441_v1  ;;  %v1323_v60 = vadd.f32 %v1291_v9, %v6095_v15  ;;  %v859_v38 = vadd.f32 %v827_v26, %v725_v33  ;;  %11985 = vst [vmem:[#allocation105_spill] sm:$0xff] %v6478_v54  ;;  %v11986_v15 = vld [vmem:[#allocation108_spill] sm:$0xff] }
 0x335   : > { %11981 = vst [vmem:[#allocation78_spill] sm:$0xff] %v6467_v25  ;;  %v722_v44 = vmul.f32 %v11978_v8, %v6064_v49  ;;  %v1286_v16 = vmul.f32 %v11984_v61, %v6066_v39  ;;  %v1324_v12 = vadd.f32 %v1292_v17, %v6103_v21  ;;  %v6487_v7 = vsub.f32 %v11979_v11, %v836_v53  ;;  %v11988_v11 = vld [vmem:[#allocation97_spill] sm:$0xff] }
 0x336   : > { %2642 = vperm.xlu1 %4839, %v5302_v43   ;;  %2646 = vperm.xlu2 %4840, %v5140_v20   ;;  %v976_v32 = vmin.f32 %v6456_v22, %v985_v6  ;;  %v860_v50 = vadd.f32 %v828_v4, %v726_v62  ;;  %v6491_v26 = vsub.f32 %v11986_v15, %v859_v38  ;;  %v11989_v17 = vld [vmem:[#allocation109_spill] sm:$0xff] }
 0x337   : > { %v855_v9 = vadd.f32 %v6188_v59, %v721_v52  ;;  %v716_v33 = vmul.f32 %v11980_v56, %v6064_v49  ;;  %v1006_v8 = vmin.f32 %v1004_v57, %v6467_v25  ;;  %v849_v61 = vadd.f32 %v6293_v51, %v715_v55  ;;  %v11990_v59 = vld [vmem:[#allocation20_spill] sm:$0xff]  ;;  %v11991_v52 = vld [vmem:[#allocation23_spill] sm:$0xff]  ;;  %v11994_v55 = vld [vmem:[#allocation102_spill] sm:$0xff] }
 0x338   : > { %11987 = vst [vmem:[#allocation88_spill] sm:$0xff] %v6491_v26  ;;  %v843_v21 = vadd.f32 %v6338_v37, %v709_v18  ;;  %v1289_v53 = vmul.f32 %v11988_v11, %v6062_v45  ;;  %v1290_v62 = vmul.f32 %v11988_v11, %v6066_v39  ;;  %v1317_v38 = vadd.f32 %v1285_v19, %v6163_v36  ;;  %v11993_v37 = vld [vmem:[#allocation27_spill] sm:$0xff]  ;;  %v12017_v25 = vld [vmem:[#allocation42_spill] sm:$0xff] }
 0x339   : > { %v6505_v4 = vsub.f32 %v11989_v17, %v855_v9  ;;  %3144 = vperm.xlu0 %4846, %v11990_v59   ;;  %v1318_v56 = vadd.f32 %v1286_v16, %v11991_v52  ;;  %v997_v57 = vmin.f32 %v6487_v7, %v1006_v8  ;;  %v6511_v51 = vsub.f32 %v11986_v15, %v860_v50  ;;  %v11995_v11 = vld [vmem:[#allocation99_spill] sm:$0xff]  ;;  %v11996_v9 = vld [vmem:[#allocation112_spill] sm:$0xff]  ;;  %v6536_v8 = vpop.permute.xlu1 %2208  ;;  %v12018_v59 = vld [vmem:[#allocation53_spill] sm:$0xff] }
 0x33a   : > { %v856_v18 = vadd.f32 %v11993_v37, %v722_v44  ;;  %v6515_v6 = vsub.f32 %v11994_v55, %v1317_v38  ;;  %v6519_v36 = vsub.f32 %v11995_v11, %v6318_v3  ;;  %v978_v19 = vmin.f32 %v976_v32, %v6491_v26  ;;  %11999 = vst [vmem:[#allocation95_spill] sm:$0xff] %v6536_v8  ;;  %v12000_v3 = vld [vmem:[#allocation15_spill] sm:$0xff]  ;;  %v12001_v32 = vld [vmem:[#allocation104_spill] sm:$0xff] }
 0x33b   : > { %11992 = vst [vmem:[#allocation96_spill] sm:$0xff] %v6511_v51  ;;  %v6523_v54 = vsub.f32 %v11996_v9, %v833_v0  ;;  %v6526_v16 = vsub.f32 %v11994_v55, %v1318_v56  ;;  %v6530_v50 = vsub.f32 %v11995_v11, %v6325_v47  ;;  %v850_v15 = vadd.f32 %v6307_v14, %v716_v33  ;;  %v6546_v56 = vpop.permute.xlu2 %2308  ;;  %v12005_v14 = vld [vmem:[#allocation98_spill] sm:$0xff]  ;;  %v6559_v55 = vpop.permute.xlu0 %2336  ;;  %v12010_v11 = vld [vmem:[#allocation113_spill] sm:$0xff] }
 0x33c   : > { %v6533_v44 = vsub.f32 %v11989_v17, %v856_v18  ;;  %v6541_v0 = vsub.f32 %v12001_v32, %v6351_v13  ;;  %v980_v38 = vmin.f32 %v978_v19, %v6505_v4  ;;  %v1321_v52 = vadd.f32 %v1289_v53, %v6402_v58  ;;  %12003 = vst [vmem:[#allocation97_spill] sm:$0xff] %v6546_v56  ;;  %v12004_v17 = vld [vmem:[#allocation19_spill] sm:$0xff] }
 0x33d   : > { %11997 = vst [vmem:[#allocation107_spill] sm:$0xff] %v6526_v16  ;;  %v1322_v47 = vadd.f32 %v1290_v62, %v6411_v46  ;;  %v1295_v33 = vmul.f32 %v12005_v14, %v6062_v45  ;;  %v6553_v37 = vsub.f32 %v12001_v32, %v6364_v41  ;;  %v999_v13 = vmin.f32 %v997_v57, %v6511_v51  ;;  %v12008_v46 = vld [vmem:[#allocation106_spill] sm:$0xff]  ;;  %v12011_v57 = vld [vmem:[#allocation100_spill] sm:$0xff] }
 0x33e   : > { %11998 = vst [vmem:[#allocation93_spill] sm:$0xff] %v6530_v50  ;;  %2654 = vperm.xlu1 %4839, %v12000_v3   ;;  %2658 = vperm.xlu2 %4840, %v12004_v17   ;;  %v6557_v18 = vsub.f32 %v11996_v9, %v834_v63  ;;  %v1444_v58 = vmin.f32 %v6515_v6, %v6519_v36 }
 0x33f   : > { %12002 = vst [vmem:[#allocation108_spill] sm:$0xff] %v6541_v0  ;;  %v6564_v53 = vsub.f32 %v12008_v46, %v1323_v60  ;;  %v982_v62 = vmin.f32 %v980_v38, %v6523_v54  ;;  %v6569_v19 = vsub.f32 %v12010_v11, %v6431_v35  ;;  %v1296_v41 = vmul.f32 %v12005_v14, %v6066_v39  ;;  %v12013_v38 = vld [vmem:[#allocation110_spill] sm:$0xff] }
 0x340   : > { %12006 = vst [vmem:[#allocation109_spill] sm:$0xff] %v6553_v37  ;;  %v1465_v63 = vmin.f32 %v6526_v16, %v6530_v50  ;;  %v1301_v9 = vmul.f32 %v12011_v57, %v6062_v45  ;;  %v1001_v32 = vmin.f32 %v999_v13, %v6533_v44  ;;  %v1443_v60 = vmin.f32 %v6541_v0, %v1444_v58  ;;  %v12014_v35 = vld [vmem:[#allocation118_spill] sm:$0xff]  ;;  %v12067_v16 = vld [vmem:[#allocation120_spill] sm:$0xff] }
 0x341   : > { %12007 = vst [vmem:[#allocation23_spill] sm:$0xff] %v6559_v55  ;;  %v6580_v55 = vsub.f32 %v12008_v46, %v1324_v12  ;;  %v6583_v8 = vsub.f32 %v12013_v38, %v1321_v52  ;;  %v6586_v56 = vsub.f32 %v12014_v35, %v849_v61  ;;  %3156 = vperm.xlu0 %4846, %v5229_v34   ;;  %v12016_v46 = vld [vmem:[#allocation121_spill] sm:$0xff] }
 0x342   : > { %12009 = vst [vmem:[#allocation27_spill] sm:$0xff] %v6564_v53  ;;  %v1302_v14 = vmul.f32 %v12011_v57, %v6066_v39  ;;  %v1464_v51 = vmin.f32 %v6553_v37, %v1465_v63  ;;  %v1003_v13 = vmin.f32 %v1001_v32, %v6557_v18  ;;  %v6595_v58 = vsub.f32 %v12010_v11, %v6433_v40  ;;  %v6612_v11 = vpop.permute.xlu1 %2220 }
 0x343   : > { %12012 = vst [vmem:[#allocation102_spill] sm:$0xff] %v6580_v55  ;;  %v1445_v12 = vmin.f32 %v1443_v60, %v6564_v53  ;;  %v6599_v52 = vsub.f32 %v12013_v38, %v1322_v47  ;;  %v984_v61 = vmin.f32 %v982_v62, %v6569_v19  ;;  %v6603_v34 = vsub.f32 %v12016_v46, %v843_v21  ;;  %v12020_v60 = vld [vmem:[#allocation13_spill] sm:$0xff]  ;;  %v12021_v21 = vld [vmem:[#allocation32_spill] sm:$0xff]  ;;  %v12065_v53 = vld [vmem:[#allocation51_spill] sm:$0xff] }
 0x344   : > { %v1327_v57 = vadd.f32 %v1295_v33, %v12017_v25  ;;  %v1328_v63 = vadd.f32 %v1296_v41, %v12018_v59  ;;  %v6608_v32 = vsub.f32 %v12014_v35, %v850_v15  ;;  %v844_v40 = vadd.f32 %v6342_v23, %v6460_v2  ;;  %12019 = vst [vmem:[#allocation112_spill] sm:$0xff] %v6612_v11  ;;  %v6619_v33 = vpop.permute.xlu2 %2320  ;;  %v12023_v59 = vld [vmem:[#allocation18_spill] sm:$0xff]  ;;  %v12024_v15 = vld [vmem:[#allocation111_spill] sm:$0xff] }
 0x345   : > { %12015 = vst [vmem:[#allocation99_spill] sm:$0xff] %v6599_v52  ;;  %v1466_v47 = vmin.f32 %v1464_v51, %v6580_v55  ;;  %v1447_v62 = vmin.f32 %v1445_v12, %v6583_v8  ;;  %v1333_v38 = vadd.f32 %v1301_v9, %v12021_v21  ;;  %v986_v25 = vmin.f32 %v984_v61, %v6586_v56  ;;  %v12027_v9 = vld [vmem:[#allocation30_spill] sm:$0xff]  ;;  %v12028_v21 = vld [vmem:[#allocation25_spill] sm:$0xff] }
 0x346   : > { %2666 = vperm.xlu1 %4839, %v12020_v60   ;;  %12022 = vst [vmem:[#allocation104_spill] sm:$0xff] %v6619_v33  ;;  %2670 = vperm.xlu2 %4840, %v12023_v59   ;;  %v6623_v41 = vsub.f32 %v12024_v15, %v1327_v57  ;;  %v1005_v23 = vmin.f32 %v1003_v13, %v6595_v58  ;;  %v12029_v11 = vld [vmem:[#allocation114_spill] sm:$0xff]  ;;  %v12031_v60 = vld [vmem:[#allocation24_spill] sm:$0xff] }
 0x347   : > { %v6627_v2 = vsub.f32 %v12016_v46, %v844_v40  ;;  %v1468_v51 = vmin.f32 %v1466_v47, %v6599_v52  ;;  %v6631_v35 = vsub.f32 %v12024_v15, %v1328_v63  ;;  %v1334_v12 = vadd.f32 %v1302_v14, %v12027_v9  ;;  %v6643_v40 = vpop.permute.xlu0 %2348  ;;  %v12034_v47 = vld [vmem:[#allocation26_spill] sm:$0xff]  ;;  %v12035_v9 = vld [vmem:[#allocation115_spill] sm:$0xff] }
 0x348   : > { %12025 = vst [vmem:[#allocation98_spill] sm:$0xff] %v6623_v41  ;;  %v987_v61 = vmin.f32 %v6603_v34, %v986_v25  ;;  %v1203_v33 = vmul.f32 %v12028_v21, %v6060_v42  ;;  %v6638_v57 = vsub.f32 %v12029_v11, %v1333_v38  ;;  %v1319_v13 = vadd.f32 %v6415_v28, %v12031_v60 }
 0x349   : > { %12026 = vst [vmem:[#allocation106_spill] sm:$0xff] %v6631_v35  ;;  %v1007_v46 = vmin.f32 %v1005_v23, %v6608_v32  ;;  %v1204_v63 = vmul.f32 %v12028_v21, %v6064_v49  ;;  %v6648_v14 = vsub.f32 %v12029_v11, %v1334_v12  ;;  %v1320_v25 = vadd.f32 %v6419_v24, %v12034_v47  ;;  %v12037_v47 = vld [vmem:[#allocation65_spill] sm:$0xff] }
 0x34a   : > { %12030 = vst [vmem:[#allocation113_spill] sm:$0xff] %v6638_v57  ;;  %v11277_v15 = vmov 10   ;;  %v1449_v38 = vmin.f32 %v1447_v62, %v6623_v41  ;;  %v6655_v28 = vsub.f32 %v12035_v9, %v1319_v13  ;;  %v1331_v60 = vadd.f32 %v6372_v10, %v1203_v33  ;;  %v12038_v10 = vld [vmem:[#allocation101_spill] sm:$0xff] }
 0x34b   : > { %12032 = vst [vmem:[#allocation100_spill] sm:$0xff] %v6643_v40  ;;  %4849 = vset.pattern.permute.xlu0 %v11277_v15  ;;  %v1008_v23 = vmin.f32 %v6627_v2, %v1007_v46  ;;  %v1470_v11 = vmin.f32 %v1468_v51, %v6631_v35  ;;  %v6662_v12 = vsub.f32 %v12035_v9, %v1320_v25  ;;  %v988_v21 = vrot.slane %v987_v61, 4  ;;  %v6672_v15 = vpop.permute.xlu1 %2296  ;;  %v12040_v51 = vld [vmem:[#allocation10_spill] sm:$0xff]  ;;  %v12041_v25 = vld [vmem:[#allocation87_spill] sm:$0xff] }
 0x34c   : > { %12033 = vst [vmem:[#allocation110_spill] sm:$0xff] %v6648_v14  ;;  %3012 = vperm.xlu0 %4849, %v5199_v30   ;;  %v1332_v24 = vadd.f32 %v6376_v48, %v1204_v63  ;;  %v1211_v62 = vmul.f32 %v12037_v47, %v6060_v42  ;;  %v1212_v13 = vmul.f32 %v12037_v47, %v6064_v49  ;;  %v6682_v40 = vpop.permute.xlu2 %2332  ;;  %v12043_v30 = vld [vmem:[#allocation16_spill] sm:$0xff] }
 0x34d   : > { %12036 = vst [vmem:[#allocation118_spill] sm:$0xff] %v6662_v12  ;;  %v1307_v33 = vmul.f32 %v12038_v10, %v6062_v45  ;;  %v1446_v46 = vmin.f32 %v6638_v57, %v1449_v38  ;;  %v1209_v9 = vmul.f32 %v12041_v25, %v6060_v42  ;;  %v1210_v48 = vmul.f32 %v12041_v25, %v6064_v49  ;;  %v12044_v38 = vld [vmem:[#allocation72_spill] sm:$0xff] }
 0x34e   : > { %12039 = vst [vmem:[#allocation121_spill] sm:$0xff] %v6672_v15  ;;  %2678 = vperm.xlu1 %4839, %v12040_v51   ;;  %v1308_v63 = vmul.f32 %v12038_v10, %v6066_v39  ;;  %v1467_v47 = vmin.f32 %v6648_v14, %v1470_v11  ;;  %2682 = vperm.xlu2 %4840, %v12043_v30   ;;  %v12045_v57 = vld [vmem:[#allocation116_spill] sm:$0xff]  ;;  %v1009_v20 = vrot.slane %v1008_v23, 4  ;;  %v12048_v14 = vld [vmem:[#allocation35_spill] sm:$0xff] }
 0x34f   : > { %12042 = vst [vmem:[#allocation42_spill] sm:$0xff] %v6682_v40  ;;  %v1305_v15 = vmul.f32 %v12044_v38, %v6062_v45  ;;  %v1448_v51 = vmin.f32 %v1446_v46, %v6655_v28  ;;  %v6689_v3 = vsub.f32 %v12045_v57, %v1331_v60  ;;  %v1306_v25 = vmul.f32 %v12044_v38, %v6066_v39  ;;  %v12049_v60 = vld [vmem:[#allocation40_spill] sm:$0xff]  ;;  %v6713_v0 = vpop.permute.xlu0 %2630 }
 0x350   : > { %v1469_v10 = vmin.f32 %v1467_v47, %v6662_v12  ;;  %v6695_v11 = vsub.f32 %v12045_v57, %v1332_v24  ;;  %v989_v40 = vmin.f32 %v987_v61, %v988_v21  ;;  %v1207_v43 = vmul.f32 %v12048_v14, %v6060_v42  ;;  %v12050_v57 = vld [vmem:[#allocation103_spill] sm:$0xff]  ;;  %v12051_v21 = vld [vmem:[#allocation117_spill] sm:$0xff]  ;;  %12053 = vst [vmem:[#allocation30_spill] sm:$0xff] %v6713_v0 }
 0x351   : > { %12046 = vst [vmem:[#allocation53_spill] sm:$0xff] %v6689_v3  ;;  %v6701_v26 = vmul.f32 %v12048_v14, %v6064_v49  ;;  %v1201_v46 = vmul.f32 %v12049_v60, %v6060_v42  ;;  %v1339_v35 = vadd.f32 %v1307_v33, %v1211_v62  ;;  %v1202_v38 = vmul.f32 %v12049_v60, %v6064_v49  ;;  %v12059_v60 = vld [vmem:[#allocation22_spill] sm:$0xff] }
 0x352   : > { %12047 = vst [vmem:[#allocation32_spill] sm:$0xff] %v6695_v11  ;;  %v1340_v41 = vadd.f32 %v1308_v63, %v1212_v13  ;;  %v1337_v47 = vadd.f32 %v1305_v15, %v1209_v9  ;;  %v1338_v37 = vadd.f32 %v1306_v25, %v1210_v48  ;;  %v1313_v61 = vmul.f32 %v12050_v57, %v6062_v45  ;;  %v12055_v9 = vld [vmem:[#allocation73_spill] sm:$0xff]  ;;  %v12057_v48 = vld [vmem:[#allocation119_spill] sm:$0xff] }
 0x353   : > { %v1450_v24 = vmin.f32 %v1448_v51, %v6689_v3  ;;  %v6711_v55 = vsub.f32 %v12051_v21, %v1339_v35  ;;  %v1010_v14 = vmin.f32 %v1008_v23, %v1009_v20  ;;  %v1314_v62 = vmul.f32 %v12050_v57, %v6066_v39  ;;  %v12056_v20 = vld [vmem:[#allocation92_spill] sm:$0xff]  ;;  %v6731_v25 = vpop.permute.xlu1 %2304 }
 0x354   : > { %3032 = vperm.xlu0 %4849, %v12004_v17   ;;  %v1471_v13 = vmin.f32 %v1469_v10, %v6695_v11  ;;  %v6720_v15 = vsub.f32 %v12051_v21, %v1340_v41  ;;  %v990_v33 = vrot.slane %v989_v40, 2  ;;  %v1217_v51 = vmul.f32 %v12055_v9, %v6060_v42  ;;  %12058 = vst [vmem:[#allocation114_spill] sm:$0xff] %v6731_v25  ;;  %v12060_v41 = vld [vmem:[#allocation77_spill] sm:$0xff]  ;;  %v6743_v0 = vpop.permute.xlu2 %2344  ;;  %v12064_v25 = vld [vmem:[#allocation86_spill] sm:$0xff] }
 0x355   : > { %12052 = vst [vmem:[#allocation111_spill] sm:$0xff] %v6711_v55  ;;  %v1218_v35 = vmul.f32 %v12055_v9, %v6064_v49  ;;  %v1215_v23 = vmul.f32 %v12056_v20, %v6060_v42  ;;  %v6729_v63 = vsub.f32 %v12057_v48, %v1337_v47  ;;  %v1311_v10 = vmul.f32 %v12060_v41, %v6062_v45 }
 0x356   : > { %12054 = vst [vmem:[#allocation25_spill] sm:$0xff] %v6720_v15  ;;  %2690 = vperm.xlu1 %4839, %v12059_v60   ;;  %v1312_v57 = vmul.f32 %v12060_v41, %v6066_v39  ;;  %v1216_v21 = vmul.f32 %v12056_v20, %v6064_v49  ;;  %v6741_v9 = vsub.f32 %v12057_v48, %v1338_v37  ;;  %v12063_v47 = vmov 8  }
 0x357   : > { %12062 = vst [vmem:[#allocation26_spill] sm:$0xff] %v6743_v0  ;;  %4842 = vset.pattern.permute.xlu2 %v12063_v47  ;;  %v1297_v17 = vmul.f32 %v12064_v25, %v6062_v45  ;;  %v1451_v60 = vmin.f32 %v6711_v55, %v1450_v24  ;;  %v1345_v11 = vadd.f32 %v1313_v61, %v1217_v51  ;;  %v1011_v3 = vrot.slane %v1010_v14, 2  ;;  %v12066_v0 = vld [vmem:[#allocation91_spill] sm:$0xff] }
 0x358   : > { %12061 = vst [vmem:[#allocation24_spill] sm:$0xff] %v6741_v9  ;;  %2758 = vperm.xlu2 %4842, %v12065_v53   ;;  %v1298_v41 = vmul.f32 %v12064_v25, %v6066_v39  ;;  %v1472_v20 = vmin.f32 %v6720_v15, %v1471_v13  ;;  %v1346_v37 = vadd.f32 %v1314_v62, %v1218_v35  ;;  %v12071_v35 = vld [vmem:[#allocation122_spill] sm:$0xff]  ;;  %v12111_v15 = vld [vmem:[#allocation55_spill] sm:$0xff] }
 0x359   : > { %v991_v48 = vmin.f32 %v989_v40, %v990_v33  ;;  %v1303_v52 = vmul.f32 %v12066_v0, %v6062_v45  ;;  %v1453_v12 = vmin.f32 %v1451_v60, %v6729_v63  ;;  %v6757_v50 = vsub.f32 %v12067_v16, %v1345_v11  ;;  %v12070_v40 = vld [vmem:[#allocation94_spill] sm:$0xff]  ;;  %v12177_v55 = vld [vmem:[#allocation7_spill] sm:$0xff] }
 0x35a   : > { %v1343_v24 = vadd.f32 %v1311_v10, %v1215_v23  ;;  %v1304_v61 = vmul.f32 %v12066_v0, %v6066_v39  ;;  %v1474_v51 = vmin.f32 %v1472_v20, %v6741_v9  ;;  %v6763_v25 = vsub.f32 %v12067_v16, %v1346_v37  ;;  %v12074_v10 = vld [vmem:[#allocation48_spill] sm:$0xff] }
 0x35b   : > { %12068 = vst [vmem:[#allocation115_spill] sm:$0xff] %v6757_v50  ;;  %v1344_v13 = vadd.f32 %v1312_v57, %v1216_v21  ;;  %v1309_v62 = vmul.f32 %v12070_v40, %v6062_v45  ;;  %v1012_v33 = vmin.f32 %v1010_v14, %v1011_v3  ;;  %v1329_v60 = vadd.f32 %v1297_v17, %v1201_v46  ;;  %v12075_v3 = vld [vmem:[#allocation124_spill] sm:$0xff]  ;;  %v6782_v17 = vpop.permute.xlu0 %2650  ;;  %v6784_v46 = vpop.permute.xlu1 %2316 }
 0x35c   : > { %12069 = vst [vmem:[#allocation65_spill] sm:$0xff] %v6763_v25  ;;  %v6768_v53 = vsub.f32 %v12071_v35, %v1343_v24  ;;  %3044 = vperm.xlu0 %4849, %v12023_v59   ;;  %v1310_v11 = vmul.f32 %v12070_v40, %v6066_v39  ;;  %v992_v0 = vrot.slane %v991_v48, 1  ;;  %v1330_v16 = vadd.f32 %v1298_v41, %v1202_v38  ;;  %v6794_v24 = vpop.permute.xlu2 %2538  ;;  %v12080_v40 = vld [vmem:[#allocation127_spill] sm:$0xff] }
 0x35d   : > { %v6774_v23 = vsub.f32 %v12071_v35, %v1344_v13  ;;  %v1213_v57 = vmul.f32 %v12074_v10, %v6060_v42  ;;  %v1455_v21 = vmin.f32 %v1453_v12, %v6757_v50  ;;  %v6780_v14 = vsub.f32 %v12075_v3, %v1329_v60  ;;  %12076 = vst [vmem:[#allocation72_spill] sm:$0xff] %v6782_v17  ;;  %v12079_v13 = vld [vmem:[#allocation74_spill] sm:$0xff]  ;;  %v12081_v60 = vld [vmem:[#allocation79_spill] sm:$0xff] }
 0x35e   : > { %12072 = vst [vmem:[#allocation101_spill] sm:$0xff] %v6768_v53  ;;  %v1335_v20 = vadd.f32 %v1303_v52, %v1207_v43  ;;  %4843 = vset.pattern.permute.xlu1 %v12063_v47  ;;  %v1214_v37 = vmul.f32 %v12074_v10, %v6064_v49  ;;  %v1476_v38 = vmin.f32 %v1474_v51, %v6763_v25  ;;  %v1013_v43 = vrot.slane %v1012_v33, 1  ;;  %v12104_v25 = vld [vmem:[#allocation204_spill] sm:$0xff] }
 0x35f   : > { %12073 = vst [vmem:[#allocation87_spill] sm:$0xff] %v6774_v23  ;;  %v6791_v41 = vsub.f32 %v12075_v3, %v1330_v16  ;;  %v1336_v12 = vadd.f32 %v1304_v61, %v6701_v26  ;;  %2766 = vperm.xlu1 %4843, %v12079_v13   ;;  %v1452_v52 = vmin.f32 %v6768_v53, %v1455_v21  ;;  %v12083_v3 = vld [vmem:[#allocation129_spill] sm:$0xff]  ;;  %v12100_v13 = vld [vmem:[#allocation76_spill] sm:$0xff] }
 0x360   : > { %12077 = vst [vmem:[#allocation116_spill] sm:$0xff] %v6784_v46  ;;  %v6799_v35 = vsub.f32 %v12080_v40, %v1335_v20  ;;  %v1341_v47 = vadd.f32 %v1309_v62, %v1213_v57  ;;  %2770 = vperm.xlu2 %4842, %v12081_v60   ;;  %v6802_v10 = vmin.f32 %v991_v48, %v992_v0  ;;  %v12087_v0 = vld [vmem:[#allocation45_spill] sm:$0xff] }
 0x361   : > { %12078 = vst [vmem:[#allocation35_spill] sm:$0xff] %v6794_v24  ;;  %v1473_v51 = vmin.f32 %v6774_v23, %v1476_v38  ;;  %v6806_v16 = vsub.f32 %v12080_v40, %v1336_v12  ;;  %v1342_v26 = vadd.f32 %v1310_v11, %v1214_v37  ;;  %v1454_v61 = vmin.f32 %v1452_v52, %v6780_v14  ;;  %v12088_v11 = vld [vmem:[#allocation123_spill] sm:$0xff]  ;;  %v12089_v38 = vld [vmem:[#allocation28_spill] sm:$0xff]  ;;  %v12091_v52 = vld [vmem:[#allocation125_spill] sm:$0xff] }
 0x362   : > { %12082 = vst [vmem:[#allocation40_spill] sm:$0xff] %v6802_v10  ;;  %v6810_v46 = vsub.f32 %v12083_v3, %v1341_v47  ;;  %v6816_v62 = vmin.f32 %v1012_v33, %v1013_v43  ;;  %vm1015_vm4 = vcmp.le.f32.partialorder %v12087_v0, %v6802_v10  ;;  %v6824_v57 = vmul.f32 %v12088_v11, %v6062_v45  ;;  %v12101_v0 = vld [vmem:[#allocation126_spill] sm:$0xff] }
 0x363   : > { %v1475_v21 = vmin.f32 %v1473_v51, %v6791_v41  ;;  %v6814_v20 = vsub.f32 %v12083_v3, %v1342_v26  ;;  %v1456_v48 = vmin.f32 %v1454_v61, %v6799_v35  ;;  %vm1017_vm5 = vcmp.le.f32.partialorder %v12089_v38, %v6802_v10  ;;  %v6834_v12 = vpop.permute.xlu1 %2328  ;;  %v12092_v26 = vld [vmem:[#allocation59_spill] sm:$0xff]  ;;  %v6858_v3 = vpop.permute.xlu0 %2662 }
 0x364   : > { %12084 = vst [vmem:[#allocation103_spill] sm:$0xff] %v6810_v46  ;;  %3056 = vperm.xlu0 %4849, %v12043_v30   ;;  %vm1019_vm6 = vcmp.le.f32.partialorder %v6523_v54, %v6802_v10  ;;  %vm1021_vm7 = vcmp.le.f32.partialorder %v6456_v22, %v6802_v10  ;;  %v6838_v43 = vmul.f32 %v12088_v11, %v6066_v39  ;;  %v12093_v61 = vld [vmem:[#allocation31_spill] sm:$0xff] }
 0x365   : > { %12085 = vst [vmem:[#allocation117_spill] sm:$0xff] %v6814_v20  ;;  %v1477_v37 = vmin.f32 %v1475_v21, %v6806_v16  ;;  %v1457_v33 = vmin.f32 %v6810_v46, %v1456_v48  ;;  %v6842_v40 = vmul.f32 %v12091_v52, %v6060_v42  ;;  %v6846_v47 = vmul.f32 %v12091_v52, %v6064_v49  ;;  %v6860_v21 = vpop.permute.xlu2 %2550  ;;  %v12096_v48 = vld [vmem:[#allocation66_spill] sm:$0xff]  ;;  %v12097_v11 = vld [vmem:[#allocation47_spill] sm:$0xff]  ;;  %v12098_v52 = vld [vmem:[#allocation37_spill] sm:$0xff] }
 0x366   : > { %12086 = vst [vmem:[#allocation73_spill] sm:$0xff] %v6816_v62  ;;  %vm1016_vm8 = vcmp.le.f32.partialorder %v6297_v31, %v6816_v62  ;;  %vm1018_vm9 = vcmp.le.f32.partialorder %v12093_v61, %v6816_v62  ;;  %vm1020_vm10 = vcmp.le.f32.partialorder %v6557_v18, %v6816_v62  ;;  %vm1022_vm11 = vcmp.le.f32.partialorder %v6487_v7, %v6816_v62  ;;  %v12102_v31 = vld [vmem:[#allocation41_spill] sm:$0xff]  ;;  %v12103_v61 = vld [vmem:[#allocation64_spill] sm:$0xff]  ;;  %v12110_v46 = vld [vmem:[#allocation54_spill] sm:$0xff] }
 0x367   : > { %12090 = vst [vmem:[#allocation92_spill] sm:$0xff] %v6834_v12  ;;  %v1478_v51 = vmin.f32 %v6814_v20, %v1477_v37  ;;  %2774 = vperm.xlu1 %4843, %v12092_v26   ;;  %v1047_v37 = vsel %vm1015_vm4, %v12097_v11, 128.0  ;;  %v1049_v12 = vsel %vm1017_vm5, %v12098_v52, 128.0  ;;  %v12099_v26 = vld [vmem:[#allocation70_spill] sm:$0xff]  ;;  %vm1023_vm12 = vcmp.le.f32.partialorder %v6395_v5, %v6802_v10  ;;  %v12105_v18 = vld [vmem:[#allocation205_spill] sm:$0xff] }
 0x368   : > { %12094 = vst [vmem:[#allocation119_spill] sm:$0xff] %v6858_v3  ;;  %2778 = vperm.xlu2 %4842, %v12096_v48   ;;  %v1051_v60 = vsel %vm1019_vm6, %v12099_v26, 128.0  ;;  %v1053_v48 = vsel %vm1021_vm7, %v12100_v13, 128.0  ;;  %v6883_v30 = vmul.f32 %v12101_v0, %v6062_v45  ;;  %v6887_v38 = vmul.f32 %v12101_v0, %v6066_v39  ;;  %v12106_v7 = vld [vmem:[#allocation57_spill] sm:$0xff]  ;;  %v12109_v20 = vld [vmem:[#allocation90_spill] sm:$0xff] }
 0x369   : > { %12095 = vst [vmem:[#allocation77_spill] sm:$0xff] %v6860_v21  ;;  %v1458_v21 = vrot.slane %v1457_v33, 4  ;;  %vm1025_vm13 = vcmp.le.f32.partialorder %v6391_v27, %v6802_v10  ;;  %v1048_v22 = vsel %vm1016_vm8, %v12097_v11, 128.0  ;;  %v1050_v54 = vsel %vm1018_vm9, %v12098_v52, 128.0  ;;  %v12113_v27 = vld [vmem:[#allocation203_spill] sm:$0xff] }
 0x36a   : > { %v1479_v24 = vrot.slane %v1478_v51, 4  ;;  %v1052_v0 = vsel %vm1020_vm10, %v12099_v26, 128.0  ;;  %v1054_v3 = vsel %vm1022_vm11, %v12100_v13, 128.0  ;;  %v1079_v17 = vmin.f32 %v1047_v37, %v1051_v60 }
 0x36b   : > { %v1080_v59 = vmin.f32 %v1049_v12, %v1053_v48  ;;  %vm1024_vm14 = vcmp.le.f32.partialorder %v6428_v29, %v6816_v62  ;;  %vm1026_vm15 = vcmp.le.f32.partialorder %v12103_v61, %v6816_v62  ;;  %vm1027_vm1 = vcmp.le.f32.partialorder %v12104_v25, %v6802_v10  ;;  %v12107_v48 = vld [vmem:[#allocation62_spill] sm:$0xff]  ;;  %v6928_v53 = vpop.permute.xlu1 %2340 }
 0x36c   : > { %3232 = vperm.xlu0 %4849, %v12102_v31   ;;  %vm1028_vm2 = vcmp.le.f32.partialorder %v12105_v18, %v6816_v62  ;;  %vm1029_vm3 = vcmp.le.f32.partialorder %v6603_v34, %v6802_v10  ;;  %vm1030_vm4 = vcmp.le.f32.partialorder %v6627_v2, %v6816_v62  ;;  %v1055_v60 = vsel %vm1023_vm12, %v12106_v7, 128.0  ;;  %12108 = vst [vmem:[#allocation86_spill] sm:$0xff] %v6928_v53 }
 0x36d   : > { %v1459_v12 = vmin.f32 %v1457_v33, %v1458_v21  ;;  %v1057_v37 = vsel %vm1025_vm13, %v12107_v48, 128.0  ;;  %v1100_v31 = vmin.f32 %v1048_v22, %v1052_v0  ;;  %v1101_v50 = vmin.f32 %v1050_v54, %v1054_v3  ;;  %v12112_v21 = vld [vmem:[#allocation60_spill] sm:$0xff]  ;;  %v12114_v3 = vld [vmem:[#allocation43_spill] sm:$0xff]  ;;  %v6956_v54 = vpop.permute.xlu0 %2674  ;;  %v6958_v0 = vpop.permute.xlu2 %2558 }
 0x36e   : > { %v1480_v23 = vmin.f32 %v1478_v51, %v1479_v24  ;;  %vm1031_vm5 = vcmp.le.f32.partialorder %v12110_v46, %v6802_v10  ;;  %vm1032_vm6 = vcmp.le.f32.partialorder %v12111_v15, %v6816_v62  ;;  %v1081_v5 = vmin.f32 %v1079_v17, %v1055_v60  ;;  %v12115_v24 = vld [vmem:[#allocation50_spill] sm:$0xff]  ;;  %12116 = vst [vmem:[#allocation91_spill] sm:$0xff] %v6956_v54  ;;  %v12118_v60 = vld [vmem:[#allocation85_spill] sm:$0xff] }
 0x36f   : > { %2786 = vperm.xlu1 %4843, %v12109_v20   ;;  %v1082_v33 = vmin.f32 %v1080_v59, %v1057_v37  ;;  %vm1033_vm7 = vcmp.le.f32.partialorder %v12113_v27, %v6802_v10  ;;  %vm1034_vm8 = vcmp.le.f32.partialorder %v12114_v3, %v6816_v62  ;;  %vm1035_vm9 = vcmp.le.f32.partialorder %v6586_v56, %v6802_v10  ;;  %v12119_v20 = vld [vmem:[#allocation52_spill] sm:$0xff]  ;;  %v12121_v54 = vld [vmem:[#allocation34_spill] sm:$0xff]  ;;  %v12131_v56 = vld [vmem:[#allocation33_spill] sm:$0xff] }
 0x370   : > { %2790 = vperm.xlu2 %4842, %v12112_v21   ;;  %vm1036_vm10 = vcmp.le.f32.partialorder %v6608_v32, %v6816_v62  ;;  %v1056_v17 = vsel %vm1024_vm14, %v12106_v7, 128.0  ;;  %v1058_v59 = vsel %vm1026_vm15, %v12107_v48, 128.0  ;;  %v1059_v51 = vsel %vm1027_vm1, %v12115_v24, 128.0  ;;  %12117 = vst [vmem:[#allocation120_spill] sm:$0xff] %v6958_v0  ;;  %v12120_v0 = vld [vmem:[#allocation39_spill] sm:$0xff]  ;;  %v12128_v27 = vld [vmem:[#allocation84_spill] sm:$0xff] }
 0x371   : > { %v1460_v22 = vrot.slane %v1459_v12, 2  ;;  %v1061_v29 = vsel %vm1029_vm3, %v12118_v60, 128.0  ;;  %v1102_v37 = vmin.f32 %v1100_v31, %v1056_v17  ;;  %v1103_v53 = vmin.f32 %v1101_v50, %v1058_v59  ;;  %v12122_v31 = vld [vmem:[#allocation58_spill] sm:$0xff]  ;;  %v12123_v17 = vld [vmem:[#allocation44_spill] sm:$0xff] }
 0x372   : > { %v1481_v21 = vrot.slane %v1480_v23, 2  ;;  %vm1037_vm11 = vcmp.le.f32.partialorder %v6569_v19, %v6802_v10  ;;  %vm1038_vm12 = vcmp.le.f32.partialorder %v6595_v58, %v6816_v62  ;;  %v1083_v25 = vmin.f32 %v1081_v5, %v1059_v51 }
 0x373   : > { %v1084_v61 = vmin.f32 %v1082_v33, %v1061_v29  ;;  %vm1039_vm13 = vcmp.le.f32.partialorder %v12120_v0, %v6802_v10  ;;  %vm1040_vm14 = vcmp.le.f32.partialorder %v12121_v54, %v6816_v62  ;;  %vm1041_vm15 = vcmp.le.f32.partialorder %v6505_v4, %v6802_v10 }
 0x374   : > { %3252 = vperm.xlu0 %4849, %v12119_v20   ;;  %vm1042_vm1 = vcmp.le.f32.partialorder %v6533_v44, %v6816_v62  ;;  %v1060_v34 = vsel %vm1028_vm2, %v12115_v24, 128.0  ;;  %v1062_v50 = vsel %vm1030_vm4, %v12118_v60, 128.0  ;;  %v1063_v5 = vsel %vm1031_vm5, %v12122_v31, 128.0  ;;  %v12124_v20 = vld [vmem:[#allocation83_spill] sm:$0xff] }
 0x375   : > { %v1461_v33 = vmin.f32 %v1459_v12, %v1460_v22  ;;  %v1065_v59 = vsel %vm1033_vm7, %v12123_v17, 128.0  ;;  %v1104_v51 = vmin.f32 %v1102_v37, %v1060_v34  ;;  %v1105_v29 = vmin.f32 %v1103_v53, %v1062_v50  ;;  %v12125_v22 = vld [vmem:[#allocation89_spill] sm:$0xff]  ;;  %v7037_v34 = vpop.permute.xlu2 %2570  ;;  %v12134_v50 = vld [vmem:[#allocation67_spill] sm:$0xff] }
 0x376   : > { %v1482_v18 = vmin.f32 %v1480_v23, %v1481_v21  ;;  %vm1043_vm2 = vcmp.le.f32.partialorder %v6441_v1, %v6802_v10  ;;  %v1064_v2 = vsel %vm1032_vm6, %v12122_v31, 128.0  ;;  %v1085_v46 = vmin.f32 %v1083_v25, %v1063_v5  ;;  %v12126_v23 = vld [vmem:[#allocation80_spill] sm:$0xff]  ;;  %v7019_v25 = vpop.permute.xlu1 %2534  ;;  %12133 = vst [vmem:[#allocation127_spill] sm:$0xff] %v7037_v34 }
 0x377   : > { %2798 = vperm.xlu1 %4843, %v12124_v20   ;;  %v1086_v12 = vmin.f32 %v1084_v61, %v1065_v59  ;;  %v1066_v53 = vsel %vm1034_vm8, %v12123_v17, 128.0  ;;  %v1067_v21 = vsel %vm1035_vm9, %v12126_v23, 128.0  ;;  %v7013_v15 = vsel %vm1036_vm10, %v12126_v23, 128.0  ;;  %12129 = vst [vmem:[#allocation122_spill] sm:$0xff] %v7019_v25  ;;  %v7059_v25 = vpop.permute.xlu0 %2686  ;;  %v12178_v17 = vld [vmem:[#allocation98_spill] sm:$0xff] }
 0x378   : > { %2802 = vperm.xlu2 %4842, %v12125_v22   ;;  %12127 = vst [vmem:[#allocation94_spill] sm:$0xff] %v7013_v15  ;;  %v1069_v37 = vsel %vm1037_vm11, %v12128_v27, 128.0  ;;  %v7025_v3 = vsel %vm1038_vm12, %v12128_v27, 128.0  ;;  %v1071_v32 = vsel %vm1039_vm13, %v12131_v56, 128.0  ;;  %v7035_v61 = vsel %vm1040_vm14, %v12131_v56, 128.0  ;;  %v12138_v22 = vld [vmem:[#allocation71_spill] sm:$0xff] }
 0x379   : > { %12130 = vst [vmem:[#allocation48_spill] sm:$0xff] %v7025_v3  ;;  %v1462_v19 = vrot.slane %v1461_v33, 1  ;;  %v1073_v58 = vsel %vm1041_vm15, %v12134_v50, 128.0  ;;  %v7043_v5 = vmin.f32 %v1104_v51, %v1064_v2  ;;  %v7045_v59 = vmin.f32 %v1105_v29, %v1066_v53  ;;  %v12141_v51 = vld [vmem:[#allocation49_spill] sm:$0xff]  ;;  %v12142_v29 = vld [vmem:[#allocation128_spill] sm:$0xff]  ;;  %v12143_v53 = vld [vmem:[#allocation131_spill] sm:$0xff] }
 0x37a   : > { %12132 = vst [vmem:[#allocation124_spill] sm:$0xff] %v7035_v61  ;;  %v1483_v0 = vrot.slane %v1482_v18, 1  ;;  %v7051_v54 = vsel %vm1042_vm1, %v12134_v50, 128.0  ;;  %v7057_v20 = vsel %vm1043_vm2, %v12138_v22, 128.0  ;;  %v1087_v34 = vmin.f32 %v1085_v46, %v1067_v21  ;;  %v12151_v56 = vld [vmem:[#allocation132_spill] sm:$0xff]  ;;  %v12170_v61 = vld [vmem:[#allocation138_spill] sm:$0xff] }
 0x37b   : > { %12135 = vst [vmem:[#allocation129_spill] sm:$0xff] %v7043_v5  ;;  %v1088_v4 = vmin.f32 %v1086_v12, %v1069_v37  ;;  %v7064_v2 = vmul.f32 %v12142_v29, %v6060_v42  ;;  %v7068_v44 = vmul.f32 %v12142_v29, %v6064_v49  ;;  %v7072_v50 = vmul.f32 %v12143_v53, %v6062_v45  ;;  %v12145_v12 = vld [vmem:[#allocation130_spill] sm:$0xff] }
 0x37c   : > { %12136 = vst [vmem:[#allocation45_spill] sm:$0xff] %v7045_v59  ;;  %3264 = vperm.xlu0 %4849, %v12141_v51   ;;  %v7076_v1 = vmul.f32 %v12143_v53, %v6066_v39  ;;  %v7078_v46 = vmin.f32 %v1461_v33, %v1462_v19  ;;  %v7082_v21 = vmul.f32 %v12145_v12, %v6060_v42  ;;  %v12146_v29 = vld [vmem:[#allocation134_spill] sm:$0xff]  ;;  %v12159_v53 = vld [vmem:[#allocation93_spill] sm:$0xff] }
 0x37d   : > { %12137 = vst [vmem:[#allocation123_spill] sm:$0xff] %v7051_v54  ;;  %v7086_v37 = vmul.f32 %v12145_v12, %v6064_v49  ;;  %v7096_v33 = vmin.f32 %v1482_v18, %v1483_v0  ;;  %v7100_v19 = vmul.f32 %v12146_v29, %v6066_v39  ;;  %v7103_v12 = vmin.f32 %v1087_v34, %v1071_v32  ;;  %v12152_v18 = vld [vmem:[#allocation75_spill] sm:$0xff]  ;;  %v12153_v0 = vld [vmem:[#allocation133_spill] sm:$0xff] }
 0x37e   : > { %12139 = vst [vmem:[#allocation28_spill] sm:$0xff] %v7057_v20  ;;  %v12148_v20 = vld [vmem:[#allocation69_spill] sm:$0xff]  ;;  %v7105_v22 = vmin.f32 %v1088_v4, %v1073_v58  ;;  %v7109_v54 = vmul.f32 %v12151_v56, %v6060_v42  ;;  %v7113_v51 = vmul.f32 %v12151_v56, %v6064_v49  ;;  %v7122_v32 = vmul.f32 %v12153_v0, %v6064_v49  ;;  %v7132_v56 = vpop.permute.xlu1 %2546 }
 0x37f   : > { %12140 = vst [vmem:[#allocation125_spill] sm:$0xff] %v7059_v25  ;;  %v7090_v25 = vmul.f32 %v12146_v29, %v6062_v45  ;;  %2810 = vperm.xlu1 %4843, %v12148_v20   ;;  %v7118_v29 = vmul.f32 %v12153_v0, %v6060_v42  ;;  %v12154_v34 = vld [vmem:[#allocation137_spill] sm:$0xff]  ;;  %vm1485_vm3 = vcmp.le.f32.partialorder %v6519_v36, %v7078_v46  ;;  %v7142_v0 = vpop.permute.xlu2 %2582  ;;  %v12162_v36 = vld [vmem:[#allocation99_spill] sm:$0xff]  ;;  %v12164_v20 = vld [vmem:[#allocation136_spill] sm:$0xff] }
 0x380   : > { %12144 = vst [vmem:[#allocation31_spill] sm:$0xff] %v7078_v46  ;;  %2814 = vperm.xlu2 %4842, %v12152_v18   ;;  %v7126_v58 = vmul.f32 %v12154_v34, %v6062_v45  ;;  %v7130_v4 = vmul.f32 %v12154_v34, %v6066_v39  ;;  %vm1487_vm4 = vcmp.le.f32.partialorder %v6515_v6, %v7078_v46  ;;  %v12160_v34 = vld [vmem:[#allocation107_spill] sm:$0xff]  ;;  %v12161_v18 = vld [vmem:[#allocation118_spill] sm:$0xff] }
 0x381   : > { %12147 = vst [vmem:[#allocation126_spill] sm:$0xff] %v7096_v33  ;;  %vm1489_vm5 = vcmp.le.f32.partialorder %v6655_v28, %v7078_v46  ;;  %vm1491_vm6 = vcmp.le.f32.partialorder %v6583_v8, %v7078_v46  ;;  %vm1486_vm7 = vcmp.le.f32.partialorder %v12159_v53, %v7096_v33  ;;  %vm1488_vm8 = vcmp.le.f32.partialorder %v12160_v34, %v7096_v33  ;;  %v12163_v6 = vld [vmem:[#allocation135_spill] sm:$0xff] }
 0x382   : > { %12149 = vst [vmem:[#allocation64_spill] sm:$0xff] %v7103_v12  ;;  %vm1490_vm9 = vcmp.le.f32.partialorder %v12161_v18, %v7096_v33  ;;  %vm1492_vm10 = vcmp.le.f32.partialorder %v12162_v36, %v7096_v33  ;;  %v7154_v28 = vmul.f32 %v12163_v6, %v6060_v42  ;;  %v7158_v8 = vmul.f32 %v12163_v6, %v6064_v49  ;;  %v12167_v18 = vld [vmem:[#allocation36_spill] sm:$0xff] }
 0x383   : > { %12150 = vst [vmem:[#allocation204_spill] sm:$0xff] %v7105_v22  ;;  %v7162_v53 = vmul.f32 %v12164_v20, %v6060_v42  ;;  %v7166_v34 = vmul.f32 %v12164_v20, %v6064_v49  ;;  %v1517_v36 = vsel %vm1485_vm3, %v12097_v11, 128.0  ;;  %v1523_v22 = vsel %vm1491_vm6, %v12100_v13, 128.0  ;;  %v7177_v20 = vpop.permute.xlu0 %2542 }
 0x384   : > { %12155 = vst [vmem:[#allocation205_spill] sm:$0xff] %v7126_v58  ;;  %3276 = vperm.xlu0 %4849, %v12167_v18   ;;  %v1518_v6 = vsel %vm1486_vm7, %v12097_v11, 128.0  ;;  %v1520_v12 = vsel %vm1488_vm8, %v12098_v52, 128.0  ;;  %v1522_v3 = vsel %vm1490_vm9, %v12099_v26, 128.0  ;;  %v1524_v59 = vsel %vm1492_vm10, %v12100_v13, 128.0  ;;  %v12169_v18 = vld [vmem:[#allocation140_spill] sm:$0xff] }
 0x385   : > { %12156 = vst [vmem:[#allocation54_spill] sm:$0xff] %v7130_v4  ;;  %v7181_v15 = vmul.f32 %v12169_v18, %v6060_v42  ;;  %v7185_v5 = vmul.f32 %v12169_v18, %v6064_v49  ;;  %v7189_v27 = vmul.f32 %v12170_v61, %v6060_v42  ;;  %v12172_v13 = vld [vmem:[#allocation27_spill] sm:$0xff]  ;;  %v12173_v11 = vld [vmem:[#allocation108_spill] sm:$0xff]  ;;  %v12174_v18 = vld [vmem:[#allocation102_spill] sm:$0xff]  ;;  %v1571_v58 = vmin.f32 %v1520_v12, %v1524_v59 }
 0x386   : > { %12157 = vst [vmem:[#allocation55_spill] sm:$0xff] %v7132_v56  ;;  %v1521_v56 = vsel %vm1489_vm5, %v12099_v26, 128.0  ;;  %v12171_v26 = vmov 10   ;;  %vm1493_vm11 = vcmp.le.f32.partialorder %v12172_v13, %v7078_v46  ;;  %vm1495_vm12 = vcmp.le.f32.partialorder %v12173_v11, %v7078_v46  ;;  %v12175_v4 = vld [vmem:[#allocation109_spill] sm:$0xff]  ;;  %v7205_v62 = vpop.permute.xlu1 %2554  ;;  %v12184_v59 = vld [vmem:[#allocation12_spill] sm:$0xff] }
 0x387   : > { %12158 = vst [vmem:[#allocation203_spill] sm:$0xff] %v7142_v0  ;;  %v1519_v0 = vsel %vm1487_vm4, %v12098_v52, 128.0  ;;  %v7193_v52 = vmul.f32 %v12170_v61, %v6064_v49  ;;  %4844 = vset.pattern.permute.xlu1 %v12171_v26  ;;  %vm1494_vm13 = vcmp.le.f32.partialorder %v12174_v18, %v7096_v33  ;;  %vm1496_vm14 = vcmp.le.f32.partialorder %v12175_v4, %v7096_v33  ;;  %v12187_v13 = vld [vmem:[#allocation68_spill] sm:$0xff] }
 0x388   : > { %12165 = vst [vmem:[#allocation43_spill] sm:$0xff] %v7162_v53  ;;  %v1550_v23 = vmin.f32 %v1519_v0, %v1523_v22  ;;  %4845 = vset.pattern.permute.xlu2 %v12171_v26  ;;  %v1570_v61 = vmin.f32 %v1518_v6, %v1522_v3  ;;  %3004 = vperm.xlu1 %4844, %v12177_v55   ;;  %v12180_v22 = vld [vmem:[#allocation139_spill] sm:$0xff]  ;;  %v7220_v3 = vpop.permute.xlu2 %2594  ;;  %v1525_v12 = vsel %vm1493_vm11, %v12106_v7, 128.0  ;;  %v1527_v6 = vsel %vm1495_vm12, %v12107_v48, 128.0 }
 0x389   : > { %12166 = vst [vmem:[#allocation39_spill] sm:$0xff] %v7166_v34  ;;  %vm1497_vm15 = vcmp.le.f32.partialorder %v12178_v17, %v7078_v46  ;;  %v7214_v0 = vmul.f32 %v12180_v22, %v6060_v42  ;;  %3008 = vperm.xlu2 %4845, %v12184_v59   ;;  %vm1499_vm2 = vcmp.le.f32.partialorder %v6780_v14, %v7078_v46  ;;  %v1528_v14 = vsel %vm1496_vm14, %v12107_v48, 128.0 }
 0x38a   : > { %12168 = vst [vmem:[#allocation34_spill] sm:$0xff] %v7177_v20  ;;  %v1549_v20 = vmin.f32 %v1517_v36, %v1521_v56  ;;  %v12179_v56 = vld [vmem:[#allocation106_spill] sm:$0xff]  ;;  %v7218_v36 = vmul.f32 %v12180_v22, %v6064_v49  ;;  %vm1500_vm3 = vcmp.le.f32.partialorder %v6791_v41, %v7096_v33  ;;  %v1526_v22 = vsel %vm1494_vm13, %v12106_v7, 128.0 }
 0x38b   : > { %12176 = vst [vmem:[#allocation128_spill] sm:$0xff] %v7205_v62  ;;  %vm1498_vm1 = vcmp.le.f32.partialorder %v12179_v56, %v7096_v33  ;;  %v7248_v26 = vmin.f32 %v1570_v61, %v1526_v22  ;;  %v7250_v11 = vmin.f32 %v1571_v58, %v1528_v14  ;;  %v12190_v62 = vld [vmem:[#allocation144_spill] sm:$0xff]  ;;  %v7273_v4 = vsel %vm1499_vm2, %v12118_v60, 128.0  ;;  %v12196_v61 = vld [vmem:[#allocation141_spill] sm:$0xff] }
 0x38c   : > { %12181 = vst [vmem:[#allocation131_spill] sm:$0xff] %v7214_v0  ;;  %v7243_v41 = vmin.f32 %v1549_v20, %v1525_v12  ;;  %3288 = vperm.xlu0 %4849, %v12187_v13   ;;  %v7254_v59 = vmul.f32 %v12190_v62, %v6060_v42  ;;  %v7258_v18 = vmul.f32 %v12190_v62, %v6064_v49  ;;  %v7270_v58 = vsel %vm1498_vm1, %v12115_v24, 128.0  ;;  %v12195_v62 = vld [vmem:[#allocation88_spill] sm:$0xff]  ;;  %v12200_v14 = vld [vmem:[#allocation149_spill] sm:$0xff] }
 0x38d   : > { %12182 = vst [vmem:[#allocation130_spill] sm:$0xff] %v7218_v36  ;;  %v7276_v20 = vsel %vm1500_vm3, %v12118_v60, 128.0  ;;  %vm1045_vm4 = vcmp.le.f32.partialorder %v12195_v62, %v6802_v10  ;;  %v1673_v17 = vmul.f32 %v12196_v61, %v6060_v42  ;;  %v1674_v12 = vmul.f32 %v12196_v61, %v6064_v49  ;;  %v7300_v61 = vpop.permute.xlu0 %2562  ;;  %v12204_v13 = vld [vmem:[#allocation145_spill] sm:$0xff]  ;;  %v12210_v36 = vld [vmem:[#allocation147_spill] sm:$0xff]  ;;  %v12224_v62 = vld [vmem:[#allocation166_spill] sm:$0xff] }
 0x38e   : > { %12183 = vst [vmem:[#allocation134_spill] sm:$0xff] %v7220_v3  ;;  %v7245_v3 = vmin.f32 %v1550_v23, %v1527_v6  ;;  %v7264_v23 = vsel %vm1497_vm15, %v12115_v24, 128.0  ;;  %v12197_v6 = vld [vmem:[#allocation142_spill] sm:$0xff]  ;;  %v12198_v24 = vld [vmem:[#allocation148_spill] sm:$0xff]  ;;  %v1756_v60 = vmul.f32 %v12200_v14, %v6066_v39  ;;  %v1767_v0 = vmul.f32 %v12210_v36, %v6062_v45 }
 0x38f   : > { %12185 = vst [vmem:[#allocation132_spill] sm:$0xff] %v7243_v41  ;;  %v1757_v56 = vmul.f32 %v12197_v6, %v6062_v45  ;;  %v1758_v22 = vmul.f32 %v12197_v6, %v6066_v39  ;;  %v7294_v48 = vmul.f32 %v12198_v24, %v6060_v42  ;;  %v7298_v7 = vmul.f32 %v12198_v24, %v6064_v49  ;;  %v12203_v24 = vld [vmem:[#allocation143_spill] sm:$0xff] }
 0x390   : > { %12186 = vst [vmem:[#allocation133_spill] sm:$0xff] %v7245_v3  ;;  %v12202_v3 = vld [vmem:[#allocation21_spill] sm:$0xff]  ;;  %v1679_v41 = vmul.f32 %v12203_v24, %v6060_v42  ;;  %v1761_v6 = vmul.f32 %v12204_v13, %v6062_v45  ;;  %v1796_v9 = vadd.f32 %v6887_v38, %v7193_v52  ;;  %vm1505_vm9 = vcmp.le.f32.partialorder %v6799_v35, %v7078_v46 }
 0x391   : > { %12188 = vst [vmem:[#allocation137_spill] sm:$0xff] %v7248_v26  ;;  %3016 = vperm.xlu1 %4844, %v12202_v3   ;;  %vm1507_vm10 = vcmp.le.f32.partialorder %v6729_v63, %v7078_v46  ;;  %vm1506_vm11 = vcmp.le.f32.partialorder %v6806_v16, %v7096_v33 }
 0x392   : > { %12189 = vst [vmem:[#allocation93_spill] sm:$0xff] %v7250_v11  ;;  %v7323_v11 = vpop.permute.xlu2 %2638 }
 0x393   : > { %12191 = vst [vmem:[#allocation107_spill] sm:$0xff] %v7264_v23  ;;  %v1755_v23 = vmul.f32 %v12200_v14, %v6062_v45  ;;  %v12206_v14 = vld [vmem:[#allocation8_spill] sm:$0xff] }
 0x394   : > { %12192 = vst [vmem:[#allocation118_spill] sm:$0xff] %v7270_v58  ;;  %3020 = vperm.xlu2 %4845, %v12206_v14  }
 0x395   : > { %12193 = vst [vmem:[#allocation99_spill] sm:$0xff] %v7273_v4  ;;  %v7310_v4 = vpop.permute.xlu1 %2566 }
 0x396   : > { %12194 = vst [vmem:[#allocation135_spill] sm:$0xff] %v7276_v20  ;;  %v1762_v20 = vmul.f32 %v12204_v13, %v6066_v39  ;;  %v1768_v13 = vmul.f32 %v12210_v36, %v6066_v39  ;;  %v12212_v36 = vld [vmem:[#allocation150_spill] sm:$0xff] }
 0x397   : > { %12199 = vst [vmem:[#allocation136_spill] sm:$0xff] %v7300_v61  ;;  %v7317_v61 = vmul.f32 %v12203_v24, %v6064_v49  ;;  %v12208_v24 = vld [vmem:[#allocation146_spill] sm:$0xff]  ;;  %v1773_v53 = vmul.f32 %v12212_v36, %v6062_v45 }
 0x398   : > { %12201 = vst [vmem:[#allocation140_spill] sm:$0xff] %v7310_v4  ;;  %v12207_v4 = vld [vmem:[#allocation151_spill] sm:$0xff]  ;;  %v7336_v26 = vmul.f32 %v12208_v24, %v6060_v42  ;;  %v1795_v24 = vadd.f32 %v6883_v30, %v7189_v27  ;;  %v1789_v30 = vadd.f32 %v1757_v56, %v7181_v15  ;;  %v1793_v27 = vadd.f32 %v1761_v6, %v7064_v2 }
 0x399   : > { %12205 = vst [vmem:[#allocation138_spill] sm:$0xff] %v7323_v11  ;;  %v7328_v3 = vmul.f32 %v12207_v4, %v6060_v42  ;;  %v7332_v58 = vmul.f32 %v12207_v4, %v6064_v49  ;;  %v12211_v11 = vld [vmem:[#allocation152_spill] sm:$0xff]  ;;  %v1785_v4 = vadd.f32 %v6824_v57, %v7109_v54  ;;  %v1787_v49 = vadd.f32 %v1755_v23, %v6842_v40  ;;  %v12213_v40 = vld [vmem:[#allocation53_spill] sm:$0xff]  ;;  %v12227_v6 = vld [vmem:[#allocation15_spill] sm:$0xff] }
 0x39a   : > { %12209 = vst [vmem:[#allocation27_spill] sm:$0xff] %v7336_v26  ;;  %v1759_v14 = vmul.f32 %v12211_v11, %v6062_v45  ;;  %v1760_v34 = vmul.f32 %v12211_v11, %v6066_v39  ;;  %v1788_v42 = vadd.f32 %v1756_v60, %v6846_v47  ;;  %v1786_v26 = vadd.f32 %v6838_v43, %v7113_v51  ;;  %v12215_v51 = vld [vmem:[#allocation154_spill] sm:$0xff] }
 0x39b   : > { %v7359_v11 = vadd.f32 %v7072_v50, %v1673_v17  ;;  %v7362_v57 = vadd.f32 %v7076_v1, %v1674_v12  ;;  %vm1501_vm5 = vcmp.le.f32.partialorder %v12213_v40, %v7078_v46  ;;  %v1774_v43 = vmul.f32 %v12212_v36, %v6066_v39  ;;  %v12214_v50 = vld [vmem:[#allocation155_spill] sm:$0xff] }
 0x39c   : > { %v1790_v47 = vadd.f32 %v1758_v22, %v7185_v5  ;;  %v7371_v60 = vadd.f32 %v7090_v25, %v1679_v41  ;;  %v1791_v52 = vadd.f32 %v1759_v14, %v7154_v28  ;;  %v1792_v38 = vadd.f32 %v1760_v34, %v7158_v8  ;;  %v12219_v28 = vld [vmem:[#allocation63_spill] sm:$0xff]  ;;  %v7405_v41 = vpop.permute.xlu2 %2646  ;;  %3028 = vperm.xlu2 %4845, %v12227_v6   ;;  %v12228_v14 = vld [vmem:[#allocation156_spill] sm:$0xff] }
 0x39d   : > { %v1765_v54 = vmul.f32 %v12214_v50, %v6062_v45  ;;  %v7379_v1 = vsub.f32 %v12215_v51, %v1787_v49  ;;  %v7382_v23 = vsub.f32 %v12215_v51, %v1788_v42  ;;  %v1794_v15 = vadd.f32 %v1762_v20, %v7068_v44  ;;  %v7385_v5 = vpop.permute.xlu1 %2578  ;;  %v12220_v8 = vld [vmem:[#allocation159_spill] sm:$0xff]  ;;  %v7402_v44 = vpop.permute.xlu0 %2574 }
 0x39e   : > { %12218 = vst [vmem:[#allocation109_spill] sm:$0xff] %v7385_v5  ;;  %v11390_v25 = vmov 13   ;;  %v7392_v2 = vsel %vm1045_vm4, %v12219_v28, 128.0  ;;  %v1766_v49 = vmul.f32 %v12214_v50, %v6066_v39  ;;  %v7397_v34 = vsub.f32 %v12220_v8, %v1791_v52  ;;  %v12223_v20 = vld [vmem:[#allocation11_spill] sm:$0xff] }
 0x39f   : > { %12216 = vst [vmem:[#allocation108_spill] sm:$0xff] %v7379_v1  ;;  %4854 = vset.pattern.permute.xlu0 %v11390_v25  ;;  %v7400_v42 = vsub.f32 %v12220_v8, %v1792_v38  ;;  %3024 = vperm.xlu1 %4844, %v12223_v20   ;;  %v7409_v17 = vsub.f32 %v12224_v62, %v1789_v30  ;;  %v12230_v38 = vld [vmem:[#allocation158_spill] sm:$0xff] }
 0x3a0   : > { %12217 = vst [vmem:[#allocation102_spill] sm:$0xff] %v7382_v23  ;;  %3570 = vperm.xlu0 %4854, %v12177_v55   ;;  %v7412_v12 = vsub.f32 %v12224_v62, %v1790_v47  ;;  %v1799_v56 = vadd.f32 %v1767_v0, %v7254_v59  ;;  %v1800_v22 = vadd.f32 %v1768_v13, %v7258_v18  ;;  %v12231_v47 = vld [vmem:[#allocation162_spill] sm:$0xff]  ;;  %v12234_v59 = vld [vmem:[#allocation169_spill] sm:$0xff] }
 0x3a1   : > { %12221 = vst [vmem:[#allocation98_spill] sm:$0xff] %v7397_v34  ;;  %v7418_v36 = vsub.f32 %v12228_v14, %v1785_v4  ;;  %v7421_v52 = vsub.f32 %v12228_v14, %v1786_v26  ;;  %v1771_v50 = vmul.f32 %v12230_v38, %v6062_v45  ;;  %v1772_v30 = vmul.f32 %v12230_v38, %v6066_v39  ;;  %v12237_v62 = vld [vmem:[#allocation113_spill] sm:$0xff]  ;;  %v12243_v25 = vld [vmem:[#allocation110_spill] sm:$0xff] }
 0x3a2   : > { %12222 = vst [vmem:[#allocation106_spill] sm:$0xff] %v7400_v42  ;;  %v7428_v51 = vsub.f32 %v12231_v47, %v1795_v24  ;;  %v7431_v0 = vsub.f32 %v12231_v47, %v1796_v9  ;;  %v7434_v18 = vsub.f32 %v12234_v59, %v1793_v27  ;;  %v7437_v13 = vsub.f32 %v12234_v59, %v1794_v15  ;;  %v12238_v15 = vld [vmem:[#allocation172_spill] sm:$0xff]  ;;  %v12299_v55 = vld [vmem:[#allocation205_spill] sm:$0xff] }
 0x3a3   : > { %12225 = vst [vmem:[#allocation139_spill] sm:$0xff] %v7409_v17  ;;  %v1797_v26 = vadd.f32 %v1765_v54, %v7082_v21  ;;  %v1798_v4 = vadd.f32 %v1766_v49, %v7086_v37  ;;  %v1914_v8 = vmin.f32 %v7379_v1, %v7397_v34  ;;  %v1935_v24 = vmin.f32 %v7382_v23, %v7400_v42  ;;  %v12241_v37 = vld [vmem:[#allocation153_spill] sm:$0xff]  ;;  %v12242_v59 = vld [vmem:[#allocation32_spill] sm:$0xff] }
 0x3a4   : > { %12226 = vst [vmem:[#allocation144_spill] sm:$0xff] %v7412_v12  ;;  %vm1503_vm6 = vcmp.le.f32.partialorder %v12237_v62, %v7078_v46  ;;  %v1913_v9 = vmin.f32 %v7418_v36, %v7409_v17  ;;  %v1934_v27 = vmin.f32 %v7421_v52, %v7412_v12  ;;  %v7452_v14 = vsub.f32 %v12238_v15, %v1799_v56  ;;  %v12288_v34 = vld [vmem:[#allocation96_spill] sm:$0xff] }
 0x3a5   : > { %12229 = vst [vmem:[#allocation88_spill] sm:$0xff] %v7421_v52  ;;  %v7455_v21 = vsub.f32 %v12238_v15, %v1800_v22  ;;  %v1779_v54 = vmul.f32 %v12241_v37, %v6062_v45  ;;  %v1780_v49 = vmul.f32 %v12241_v37, %v6066_v39  ;;  %v1803_v38 = vadd.f32 %v1771_v50, %v7118_v29  ;;  %v7471_v42 = vpop.permute.xlu1 %2590  ;;  %v12425_v52 = vld [vmem:[#allocation55_spill] sm:$0xff] }
 0x3a6   : > { %12232 = vst [vmem:[#allocation141_spill] sm:$0xff] %v7428_v51  ;;  %v1804_v47 = vadd.f32 %v1772_v30, %v7122_v32  ;;  %vm1502_vm7 = vcmp.le.f32.partialorder %v12242_v59, %v7096_v33  ;;  %vm1504_vm8 = vcmp.le.f32.partialorder %v12243_v25, %v7096_v33  ;;  %v1916_v56 = vmin.f32 %v1914_v8, %v7428_v51  ;;  %v7482_v8 = vpop.permute.xlu2 %2658  ;;  %v12289_v59 = vld [vmem:[#allocation164_spill] sm:$0xff] }
 0x3a7   : > { %12233 = vst [vmem:[#allocation142_spill] sm:$0xff] %v7431_v0  ;;  %v1937_v22 = vmin.f32 %v1935_v24, %v7431_v0  ;;  %v1915_v15 = vmin.f32 %v1913_v9, %v7434_v18  ;;  %v1936_v10 = vmin.f32 %v1934_v27, %v7437_v13  ;;  %v1533_v29 = vsel %vm1501_vm5, %v12122_v31, 128.0  ;;  %v12245_v24 = vld [vmem:[#allocation9_spill] sm:$0xff]  ;;  %v7500_v0 = vpop.permute.xlu0 %2586 }
 0x3a8   : > { %12235 = vst [vmem:[#allocation148_spill] sm:$0xff] %v7434_v18  ;;  %v1808_v32 = vadd.f32 %v7100_v19, %v7317_v61  ;;  %v1805_v50 = vadd.f32 %v1773_v53, %v7294_v48  ;;  %v1806_v30 = vadd.f32 %v1774_v43, %v7298_v7  ;;  %3590 = vperm.xlu0 %4854, %v12223_v20   ;;  %v12246_v9 = vld [vmem:[#allocation157_spill] sm:$0xff]  ;;  %v12250_v7 = vld [vmem:[#allocation160_spill] sm:$0xff]  ;;  %v12287_v18 = vld [vmem:[#allocation78_spill] sm:$0xff] }
 0x3a9   : > { %12236 = vst [vmem:[#allocation149_spill] sm:$0xff] %v7437_v13  ;;  %3036 = vperm.xlu1 %4844, %v12245_v24   ;;  %v7486_v27 = vsub.f32 %v12246_v9, %v1797_v26  ;;  %v7489_v37 = vsub.f32 %v12246_v9, %v1798_v4  ;;  %v1918_v40 = vmin.f32 %v1916_v56, %v7452_v14  ;;  %v12249_v61 = vld [vmem:[#allocation13_spill] sm:$0xff]  ;;  %v12298_v20 = vld [vmem:[#allocation27_spill] sm:$0xff] }
 0x3aa   : > { %12239 = vst [vmem:[#allocation143_spill] sm:$0xff] %v7452_v14  ;;  %v1939_v19 = vmin.f32 %v1937_v22, %v7455_v21  ;;  %3040 = vperm.xlu2 %4845, %v12249_v61   ;;  %v1777_v48 = vmul.f32 %v12250_v7, %v6062_v45  ;;  %v1778_v53 = vmul.f32 %v12250_v7, %v6066_v39  ;;  %v12252_v4 = vld [vmem:[#allocation161_spill] sm:$0xff]  ;;  %v12263_v14 = vld [vmem:[#allocation43_spill] sm:$0xff] }
 0x3ab   : > { %12240 = vst [vmem:[#allocation145_spill] sm:$0xff] %v7455_v21  ;;  %v1811_v43 = vadd.f32 %v1779_v54, %v7328_v3  ;;  %v1812_v26 = vadd.f32 %v1780_v49, %v7332_v58  ;;  %v7507_v56 = vsub.f32 %v12252_v4, %v1803_v38  ;;  %v7510_v22 = vsub.f32 %v12252_v4, %v1804_v47  ;;  %v12255_v58 = vld [vmem:[#allocation163_spill] sm:$0xff]  ;;  %v12256_v7 = vld [vmem:[#allocation165_spill] sm:$0xff]  ;;  %v12259_v47 = vld [vmem:[#allocation24_spill] sm:$0xff] }
 0x3ac   : > { %12244 = vst [vmem:[#allocation151_spill] sm:$0xff] %v7471_v42  ;;  %v1917_v9 = vmin.f32 %v1915_v15, %v7486_v27  ;;  %v1938_v3 = vmin.f32 %v1936_v10, %v7489_v37  ;;  %v1783_v54 = vmul.f32 %v12255_v58, %v6062_v45  ;;  %v1784_v49 = vmul.f32 %v12255_v58, %v6066_v39  ;;  %v12260_v4 = vld [vmem:[#allocation175_spill] sm:$0xff]  ;;  %v12423_v42 = vld [vmem:[#allocation138_spill] sm:$0xff] }
 0x3ad   : > { %12247 = vst [vmem:[#allocation147_spill] sm:$0xff] %v7486_v27  ;;  %v7520_v21 = vsub.f32 %v12256_v7, %v7359_v11  ;;  %v7524_v38 = vsub.f32 %v12256_v7, %v7362_v57  ;;  %vm1508_vm12 = vcmp.le.f32.partialorder %v12259_v47, %v7096_v33  ;;  %v1920_v10 = vmin.f32 %v1918_v40, %v7507_v56  ;;  %v12264_v57 = vld [vmem:[#allocation39_spill] sm:$0xff]  ;;  %v12265_v27 = vld [vmem:[#allocation168_spill] sm:$0xff]  ;;  %v12316_v47 = vld [vmem:[#allocation94_spill] sm:$0xff] }
 0x3ae   : > { %12248 = vst [vmem:[#allocation152_spill] sm:$0xff] %v7489_v37  ;;  %v1941_v15 = vmin.f32 %v1939_v19, %v7510_v22  ;;  %v7533_v58 = vsub.f32 %v12260_v4, %v1805_v50  ;;  %v7536_v11 = vsub.f32 %v12260_v4, %v1806_v30  ;;  %v1809_v37 = vadd.f32 %v1777_v48, %v12263_v14  ;;  %v12268_v50 = vld [vmem:[#allocation178_spill] sm:$0xff]  ;;  %v7555_v14 = vpop.permute.xlu1 %2634  ;;  %v12271_v48 = vld [vmem:[#allocation44_spill] sm:$0xff]  ;;  %v12274_v4 = vld [vmem:[#allocation131_spill] sm:$0xff] }
 0x3af   : > { %12251 = vst [vmem:[#allocation150_spill] sm:$0xff] %v7500_v0  ;;  %v1810_v7 = vadd.f32 %v1778_v53, %v12264_v57  ;;  %v7542_v51 = vsub.f32 %v12265_v27, %v7371_v60  ;;  %v7545_v13 = vsub.f32 %v12265_v27, %v1808_v32  ;;  %v1919_v40 = vmin.f32 %v1917_v9, %v7520_v21  ;;  %v12272_v53 = vld [vmem:[#allocation194_spill] sm:$0xff]  ;;  %v7613_v23 = vpop.permute.xlu0 %2762 }
 0x3b0   : > { %12253 = vst [vmem:[#allocation53_spill] sm:$0xff] %v7507_v56  ;;  %v1940_v19 = vmin.f32 %v1938_v3, %v7524_v38  ;;  %v7553_v30 = vsub.f32 %v12268_v50, %v1812_v26  ;;  %v1535_v60 = vsel %vm1503_vm6, %v12271_v48, 128.0  ;;  %v12273_v32 = vld [vmem:[#allocation146_spill] sm:$0xff]  ;;  %v1815_v9 = vadd.f32 %v1783_v54, %v12274_v4  ;;  %3602 = vperm.xlu0 %4854, %v12245_v24   ;;  %v12276_v26 = vld [vmem:[#allocation20_spill] sm:$0xff]  ;;  %v12278_v56 = vld [vmem:[#allocation25_spill] sm:$0xff] }
 0x3b1   : > { %12254 = vst [vmem:[#allocation155_spill] sm:$0xff] %v7510_v22  ;;  %v7550_v22 = vsub.f32 %v12268_v50, %v1811_v43  ;;  %v1686_v27 = vmul.f32 %v12273_v32, %v12272_v53  ;;  %v12275_v57 = vld [vmem:[#allocation130_spill] sm:$0xff]  ;;  %v7566_v43 = vpop.permute.xlu2 %2670  ;;  %3048 = vperm.xlu1 %4844, %v12276_v26   ;;  %v12277_v50 = vld [vmem:[#allocation111_spill] sm:$0xff]  ;;  %vm1510_vm14 = vcmp.le.f32.partialorder %v12278_v56, %v7096_v33 }
 0x3b2   : > { %12257 = vst [vmem:[#allocation154_spill] sm:$0xff] %v7520_v21  ;;  %v1816_v3 = vadd.f32 %v1784_v49, %v12275_v57  ;;  %vm1509_vm13 = vcmp.le.f32.partialorder %v12277_v50, %v7078_v46  ;;  %v1921_v62 = vmin.f32 %v1919_v40, %v7533_v58  ;;  %v1942_v32 = vmin.f32 %v1940_v19, %v7536_v11  ;;  %v12279_v4 = vld [vmem:[#allocation10_spill] sm:$0xff]  ;;  %v12280_v21 = vld [vmem:[#allocation132_spill] sm:$0xff]  ;;  %v12281_v40 = vld [vmem:[#allocation107_spill] sm:$0xff] }
 0x3b3   : > { %12258 = vst [vmem:[#allocation159_spill] sm:$0xff] %v7524_v38  ;;  %v1922_v54 = vmin.f32 %v1920_v10, %v7542_v51  ;;  %v1943_v49 = vmin.f32 %v1941_v15, %v7545_v13  ;;  %3052 = vperm.xlu2 %4845, %v12279_v4   ;;  %v1534_v57 = vsel %vm1502_vm7, %v12122_v31, 128.0  ;;  %v1536_v38 = vsel %vm1504_vm8, %v12271_v48, 128.0  ;;  %v12284_v10 = vld [vmem:[#allocation99_spill] sm:$0xff] }
 0x3b4   : > { %12261 = vst [vmem:[#allocation166_spill] sm:$0xff] %v7533_v58  ;;  %v12282_v58 = vmin.f32 %v12280_v21, %v12281_v40  ;;  %v7597_v31 = vsub.f32 %v12289_v59, %v1809_v37  ;;  %v7600_v25 = vsub.f32 %v12289_v59, %v1810_v7  ;;  %v12296_v40 = vld [vmem:[#allocation135_spill] sm:$0xff]  ;;  %v1813_v12 = vadd.f32 %v12299_v55, %v12298_v20  ;;  %v12300_v37 = vld [vmem:[#allocation54_spill] sm:$0xff]  ;;  %v12306_v55 = vld [vmem:[#allocation80_spill] sm:$0xff] }
 0x3b5   : > { %12262 = vst [vmem:[#allocation156_spill] sm:$0xff] %v7536_v11  ;;  %v12283_v11 = vld [vmem:[#allocation133_spill] sm:$0xff]  ;;  %v1924_v48 = vmin.f32 %v1922_v54, %v7550_v22  ;;  %v1945_v21 = vmin.f32 %v1943_v49, %v7553_v30  ;;  %v1814_v17 = vadd.f32 %v12300_v37, %v1686_v27  ;;  %v12301_v7 = vld [vmem:[#allocation167_spill] sm:$0xff]  ;;  %v1537_v20 = vsel %vm1505_vm9, %v12306_v55, 128.0  ;;  %v12307_v27 = vld [vmem:[#allocation84_spill] sm:$0xff] }
 0x3b6   : > { %12266 = vst [vmem:[#allocation158_spill] sm:$0xff] %v7542_v51  ;;  %v1555_v19 = vmin.f32 %v12282_v58, %v1533_v29  ;;  %v12285_v51 = vmin.f32 %v12283_v11, %v12284_v10  ;;  %v12292_v29 = vld [vmem:[#allocation137_spill] sm:$0xff]  ;;  %v12293_v58 = vld [vmem:[#allocation118_spill] sm:$0xff]  ;;  %v7616_v59 = vsub.f32 %v12301_v7, %v1815_v9  ;;  %v7619_v54 = vsub.f32 %v12301_v7, %v1816_v3  ;;  %v12308_v3 = vld [vmem:[#allocation171_spill] sm:$0xff] }
 0x3b7   : > { %12267 = vst [vmem:[#allocation162_spill] sm:$0xff] %v7545_v13  ;;  %v12286_v13 = vld [vmem:[#allocation73_spill] sm:$0xff]  ;;  %v12294_v11 = vmin.f32 %v12292_v29, %v12293_v58  ;;  %v1923_v49 = vmin.f32 %v1921_v62, %v7597_v31  ;;  %v12304_v29 = vld [vmem:[#allocation103_spill] sm:$0xff]  ;;  %v1539_v9 = vsel %vm1507_vm10, %v12307_v27, 128.0  ;;  %v7636_v62 = vsub.f32 %v12308_v3, %v1813_v12  ;;  %v12313_v7 = vld [vmem:[#allocation22_spill] sm:$0xff] }
 0x3b8   : > { %12269 = vst [vmem:[#allocation169_spill] sm:$0xff] %v7550_v22  ;;  %v1556_v15 = vmin.f32 %v12285_v51, %v1535_v60  ;;  %vm1044_vm15 = vcmp.le.f32.partialorder %v12287_v18, %v12286_v13  ;;  %vm1046_vm1 = vcmp.le.f32.partialorder %v12288_v34, %v12286_v13  ;;  %v12295_v60 = vld [vmem:[#allocation93_spill] sm:$0xff]  ;;  %vm1511_vm2 = vcmp.le.f32.partialorder %v12304_v29, %v7078_v46 }
 0x3b9   : > { %12270 = vst [vmem:[#allocation113_spill] sm:$0xff] %v7553_v30  ;;  %v1576_v51 = vmin.f32 %v12294_v11, %v1534_v57  ;;  %v12297_v10 = vmin.f32 %v12295_v60, %v12296_v40  ;;  %v1944_v57 = vmin.f32 %v1942_v32, %v7600_v25  ;;  %v7639_v32 = vsub.f32 %v12308_v3, %v1814_v17  ;;  %v7643_v60 = vpop.permute.xlu1 %2642  ;;  %v7654_v17 = vpop.permute.xlu2 %2682  ;;  %v12314_v3 = vld [vmem:[#allocation124_spill] sm:$0xff]  ;;  %v12322_v22 = vld [vmem:[#allocation101_spill] sm:$0xff] }
 0x3ba   : > { %12290 = vst [vmem:[#allocation172_spill] sm:$0xff] %v7597_v31  ;;  %v1926_v58 = vmin.f32 %v1924_v48, %v7616_v59  ;;  %v1947_v11 = vmin.f32 %v1945_v21, %v7619_v54  ;;  %v1538_v35 = vsel %vm1506_vm11, %v12306_v55, 128.0  ;;  %v1540_v63 = vsel %vm1508_vm12, %v12307_v27, 128.0  ;;  %3614 = vperm.xlu0 %4854, %v12276_v26   ;;  %v12312_v48 = vld [vmem:[#allocation17_spill] sm:$0xff] }
 0x3bb   : > { %12291 = vst [vmem:[#allocation153_spill] sm:$0xff] %v7600_v25  ;;  %v1577_v24 = vmin.f32 %v12297_v10, %v1536_v38  ;;  %v12305_v38 = vld [vmem:[#allocation117_spill] sm:$0xff]  ;;  %v1557_v12 = vmin.f32 %v1555_v19, %v1537_v20  ;;  %v1558_v40 = vmin.f32 %v1556_v15, %v1539_v9  ;;  %3060 = vperm.xlu1 %4844, %v12312_v48   ;;  %v12318_v15 = vld [vmem:[#allocation123_spill] sm:$0xff]  ;;  %v12320_v9 = vld [vmem:[#allocation48_spill] sm:$0xff]  ;;  %v1078_v29 = vsel %vm1046_vm1, %v12219_v28, 128.0 }
 0x3bc   : > { %12302 = vst [vmem:[#allocation32_spill] sm:$0xff] %v7616_v59  ;;  %vm1512_vm3 = vcmp.le.f32.partialorder %v12305_v38, %v7096_v33  ;;  %v1578_v21 = vmin.f32 %v1576_v51, %v1538_v35  ;;  %v1925_v37 = vmin.f32 %v1923_v49, %v7636_v62  ;;  %v1946_v16 = vmin.f32 %v1944_v57, %v7639_v32  ;;  %v12319_v20 = vld [vmem:[#allocation45_spill] sm:$0xff]  ;;  %v12324_v51 = vld [vmem:[#allocation115_spill] sm:$0xff]  ;;  %v12331_v38 = vld [vmem:[#allocation204_spill] sm:$0xff] }
 0x3bd   : > { %12303 = vst [vmem:[#allocation110_spill] sm:$0xff] %v7619_v54  ;;  %v1579_v10 = vmin.f32 %v1577_v24, %v1540_v63  ;;  %3064 = vperm.xlu2 %4845, %v12313_v7   ;;  %v12315_v54 = vld [vmem:[#allocation129_spill] sm:$0xff]  ;;  %v12321_v30 = vmin.f32 %v12319_v20, %v12320_v9  ;;  %vm1513_vm4 = vcmp.le.f32.partialorder %v12322_v22, %v7078_v46  ;;  %v12323_v24 = vld [vmem:[#allocation87_spill] sm:$0xff]  ;;  %v12330_v20 = vld [vmem:[#allocation64_spill] sm:$0xff]  ;;  %v12332_v22 = vmov 11  }
 0x3be   : > { %12309 = vst [vmem:[#allocation157_spill] sm:$0xff] %v7636_v62  ;;  %v12317_v59 = vmin.f32 %v12315_v54, %v12316_v47  ;;  %vm1514_vm5 = vcmp.le.f32.partialorder %v12323_v24, %v7096_v33  ;;  %vm1515_vm6 = vcmp.le.f32.partialorder %v12324_v51, %v7078_v46  ;;  %v12325_v49 = vld [vmem:[#allocation65_spill] sm:$0xff]  ;;  %v1927_v57 = vmin.f32 %v1925_v37, %v1926_v58  ;;  %v12327_v63 = vld [vmem:[#allocation67_spill] sm:$0xff]  ;;  %v12334_v51 = vld [vmem:[#allocation14_spill] sm:$0xff] }
 0x3bf   : > { %12310 = vst [vmem:[#allocation160_spill] sm:$0xff] %v7639_v32  ;;  %v1111_v25 = vmin.f32 %v12321_v30, %v12318_v15  ;;  %vm1516_vm7 = vcmp.le.f32.partialorder %v12325_v49, %v7096_v33  ;;  %v1948_v54 = vmin.f32 %v1946_v16, %v1947_v11  ;;  %v1544_v58 = vsel %vm1512_vm3, %v12327_v63, 128.0  ;;  %v12328_v47 = vld [vmem:[#allocation71_spill] sm:$0xff]  ;;  %v12329_v15 = vld [vmem:[#allocation28_spill] sm:$0xff] }
 0x3c0   : > { %12311 = vst [vmem:[#allocation161_spill] sm:$0xff] %v7654_v17  ;;  %v1110_v19 = vmin.f32 %v12317_v59, %v12314_v3  ;;  %v12326_v59 = vld [vmem:[#allocation33_spill] sm:$0xff]  ;;  %v1543_v3 = vsel %vm1511_vm2, %v12327_v63, 128.0  ;;  %v1581_v50 = vmin.f32 %v1579_v10, %v1544_v58  ;;  %v1076_v56 = vsel %vm1044_vm15, %v12328_v47, 128.0 }
 0x3c1   : > { %v1541_v35 = vsel %vm1509_vm13, %v12326_v59, 128.0  ;;  %v1542_v30 = vsel %vm1510_vm14, %v12326_v59, 128.0  ;;  %v1560_v37 = vmin.f32 %v1558_v40, %v1543_v3  ;;  %v1091_v9 = vmin.f32 %v12330_v20, %v12329_v15 }
 0x3c2   : > { %v1559_v11 = vmin.f32 %v1557_v12, %v1541_v35  ;;  %v1580_v16 = vmin.f32 %v1578_v21, %v1542_v30  ;;  %v1092_v32 = vmin.f32 %v12331_v38, %v7392_v2  ;;  %v7704_v12 = vpop.permute.xlu0 %2782  ;;  %v1112_v40 = vmin.f32 %v1110_v19, %v1076_v56  ;;  %v7706_v30 = vpop.permute.xlu1 %2654  ;;  %3626 = vperm.xlu0 %4854, %v12312_v48  }
 0x3c3   : > { %v1113_v21 = vmin.f32 %v1111_v25, %v1078_v29  ;;  %v1928_v10 = vrot.slane %v1927_v57, 4  ;;  %v1949_v35 = vrot.slane %v1948_v54, 4  ;;  %v1545_v34 = vsel %vm1513_vm4, %v12328_v47, 128.0  ;;  %v7725_v19 = vpop.permute.xlu2 %2758  ;;  %4847 = vset.pattern.permute.xlu1 %v12332_v22  ;;  %v12333_v29 = vld [vmem:[#allocation12_spill] sm:$0xff] }
 0x3c4   : > { %v1546_v18 = vsel %vm1514_vm5, %v12328_v47, 128.0  ;;  %v1547_v2 = vsel %vm1515_vm6, %v12219_v28, 128.0  ;;  %v1548_v25 = vsel %vm1516_vm7, %v12219_v28, 128.0  ;;  %v1561_v3 = vmin.f32 %v1559_v11, %v1545_v34  ;;  %3104 = vperm.xlu1 %4847, %v12333_v29  }
 0x3c5   : > { %v1562_v58 = vmin.f32 %v1560_v37, %v1547_v2  ;;  %v1582_v24 = vmin.f32 %v1580_v16, %v1546_v18  ;;  %v1583_v56 = vmin.f32 %v1581_v50, %v1548_v25  ;;  %4848 = vset.pattern.permute.xlu2 %v12332_v22  ;;  %v1929_v15 = vmin.f32 %v1927_v57, %v1928_v10  ;;  %v12341_v25 = vld [vmem:[#allocation170_spill] sm:$0xff] }
 0x3c6   : > { %3108 = vperm.xlu2 %4848, %v12334_v51   ;;  %v1950_v20 = vmin.f32 %v1948_v54, %v1949_v35  ;;  %v1093_v49 = vmin.f32 %v1091_v9, %v1092_v32  ;;  %v1114_v38 = vmin.f32 %v1112_v40, %v1113_v21  ;;  %v11457_v50 = vmov 12   ;;  %v12335_v32 = vld [vmem:[#allocation21_spill] sm:$0xff]  ;;  %v12336_v54 = vld [vmem:[#allocation8_spill] sm:$0xff] }
 0x3c7   : > { %v1563_v13 = vmin.f32 %v1561_v3, %v1562_v58  ;;  %v1584_v33 = vmin.f32 %v1582_v24, %v1583_v56  ;;  %v1930_v46 = vrot.slane %v1929_v15, 2  ;;  %v2223_v22 = vmul.f32 %v12341_v25, %v6062_v45  ;;  %v12342_v58 = vld [vmem:[#allocation173_spill] sm:$0xff] }
 0x3c8   : > { %v1951_v62 = vrot.slane %v1950_v20, 2  ;;  %v1094_v11 = vrot.slane %v1093_v49, 4  ;;  %v1115_v37 = vrot.slane %v1114_v38, 4  ;;  %v2224_v3 = vmul.f32 %v12341_v25, %v6066_v39  ;;  %v12350_v25 = vld [vmem:[#allocation192_spill] sm:$0xff] }
 0x3c9   : > { %v1564_v18 = vrot.slane %v1563_v13, 4  ;;  %v1585_v57 = vrot.slane %v1584_v33, 4  ;;  %v1931_v9 = vmin.f32 %v1929_v15, %v1930_v46  ;;  %v2233_v24 = vmul.f32 %v12342_v58, %v6062_v45 }
 0x3ca   : > { %v7731_v31 = vpop.permute.xlu1 %2666  ;;  %v7733_v16 = vpop.permute.xlu0 %2794  ;;  %4857 = vset.pattern.permute.xlu0 %v11457_v50  ;;  %v1952_v40 = vmin.f32 %v1950_v20, %v1951_v62  ;;  %v7741_v21 = vmin.f32 %v1093_v49, %v1094_v11  ;;  %v7743_v10 = vmin.f32 %v1114_v38, %v1115_v37  ;;  %v2234_v46 = vmul.f32 %v12342_v58, %v6066_v39  ;;  %v12343_v62 = vld [vmem:[#allocation176_spill] sm:$0xff]  ;;  %v12347_v37 = vld [vmem:[#allocation183_spill] sm:$0xff]  ;;  %v12351_v58 = vld [vmem:[#allocation174_spill] sm:$0xff] }
 0x3cb   : > { %v7736_v34 = vpop.permute.xlu2 %2770  ;;  %3482 = vperm.xlu0 %4857, %v12334_v51   ;;  %v7745_v35 = vmin.f32 %v1563_v13, %v1564_v18  ;;  %v7747_v2 = vmin.f32 %v1584_v33, %v1585_v57  ;;  %v2239_v56 = vmul.f32 %v12343_v62, %v6062_v45  ;;  %v2240_v13 = vmul.f32 %v12343_v62, %v6066_v39  ;;  %v12344_v33 = vld [vmem:[#allocation179_spill] sm:$0xff] }
 0x3cc   : > { %3112 = vperm.xlu1 %4847, %v12335_v32   ;;  %12337 = vst [vmem:[#allocation163_spill] sm:$0xff] %v7741_v21  ;;  %v7763_v15 = vmul.f32 %v12344_v33, %v6062_v45  ;;  %v7767_v20 = vmul.f32 %v12344_v33, %v6066_v39  ;;  %v1932_v49 = vrot.slane %v1931_v9, 1  ;;  %v1953_v38 = vrot.slane %v1952_v40, 1  ;;  %v12359_v51 = vld [vmem:[#allocation19_spill] sm:$0xff]  ;;  %v12370_v32 = vld [vmem:[#allocation182_spill] sm:$0xff] }
 0x3cd   : > { %12338 = vst [vmem:[#allocation165_spill] sm:$0xff] %v7743_v10  ;;  %v7773_v18 = vmul.f32 %v12347_v37, %v6062_v45  ;;  %v7777_v57 = vmul.f32 %v12347_v37, %v6066_v39  ;;  %v7781_v62 = vmul.f32 %v12351_v58, %v12350_v25  ;;  %v7785_v33 = vmul.f32 %v12351_v58, %v12272_v53  ;;  %v12357_v37 = vld [vmem:[#allocation186_spill] sm:$0xff]  ;;  %v12360_v58 = vld [vmem:[#allocation180_spill] sm:$0xff] }
 0x3ce   : > { %3116 = vperm.xlu2 %4848, %v12336_v54   ;;  %12339 = vst [vmem:[#allocation24_spill] sm:$0xff] %v7745_v35  ;;  %v7806_v28 = vmul.f32 %v12360_v58, %v12350_v25  ;;  %v7810_v26 = vmul.f32 %v12360_v58, %v12272_v53  ;;  %v7822_v59 = vmin.f32 %v1952_v40, %v1953_v38  ;;  %v12369_v58 = vld [vmem:[#allocation181_spill] sm:$0xff]  ;;  %v12373_v40 = vld [vmem:[#allocation196_spill] sm:$0xff] }
 0x3cf   : > { %12340 = vst [vmem:[#allocation175_spill] sm:$0xff] %v7747_v2  ;;  %v12354_v2 = vld [vmem:[#allocation177_spill] sm:$0xff]  ;;  %v2127_v55 = vmul.f32 %v12369_v58, %v12350_v25  ;;  %v2128_v54 = vmul.f32 %v12369_v58, %v12272_v53  ;;  %v7834_v29 = vmul.f32 %v12370_v32, %v12350_v25  ;;  %v7846_v38 = vmul.f32 %v12373_v40, %v12272_v53 }
 0x3d0   : > { %12345 = vst [vmem:[#allocation43_spill] sm:$0xff] %v7763_v15  ;;  %v7791_v35 = vmul.f32 %v12354_v2, %v12350_v25  ;;  %v7795_v48 = vmul.f32 %v12354_v2, %v12272_v53  ;;  %v12363_v2 = vld [vmem:[#allocation189_spill] sm:$0xff]  ;;  %v2695_v1 = vmul.f32 %v7555_v14, %v6062_v45  ;;  %v2701_v17 = vmul.f32 %v7405_v41, %v6062_v45 }
 0x3d1   : > { %12346 = vst [vmem:[#allocation39_spill] sm:$0xff] %v7767_v20  ;;  %v7814_v47 = vmul.f32 %v12363_v2, %v12350_v25  ;;  %v7826_v27 = vmul.f32 %v12363_v2, %v12272_v53  ;;  %v12376_v2 = vld [vmem:[#allocation187_spill] sm:$0xff]  ;;  %v12419_v20 = vld [vmem:[#allocation120_spill] sm:$0xff] }
 0x3d2   : > { %v7769_v11 = vpop.permute.xlu1 %2678  ;;  %12348 = vst [vmem:[#allocation168_spill] sm:$0xff] %v7773_v18  ;;  %v7801_v18 = vmul.f32 %v12357_v37, %v12272_v53  ;;  %v7816_v63 = vpop.permute.xlu0 %2806  ;;  %v2138_v58 = vmul.f32 %v12376_v2, %v12272_v53  ;;  %v2609_v15 = vmul.f32 %v12419_v20, %v12350_v25 }
 0x3d3   : > { %12349 = vst [vmem:[#allocation178_spill] sm:$0xff] %v7777_v57  ;;  %v7787_v50 = vpop.permute.xlu2 %2778  ;;  %v2131_v57 = vmul.f32 %v12357_v37, %v12350_v25  ;;  %3502 = vperm.xlu0 %4857, %v12359_v51   ;;  %v7820_v37 = vmin.f32 %v1931_v9, %v1932_v49  ;;  %v7838_v9 = vmul.f32 %v12370_v32, %v12272_v53  ;;  %v12378_v32 = vld [vmem:[#allocation184_spill] sm:$0xff] }
 0x3d4   : > { %12352 = vst [vmem:[#allocation146_spill] sm:$0xff] %v7781_v62  ;;  %3124 = vperm.xlu1 %4847, %v12227_v6   ;;  %v7842_v49 = vmul.f32 %v12373_v40, %v12350_v25  ;;  %v12377_v6 = vld [vmem:[#allocation190_spill] sm:$0xff]  ;;  %v7904_v62 = vadd.f32 %v2234_v46, %v2138_v58  ;;  %v12406_v46 = vld [vmem:[#allocation119_spill] sm:$0xff] }
 0x3d5   : > { %12353 = vst [vmem:[#allocation131_spill] sm:$0xff] %v7785_v33  ;;  %v2144_v40 = vmul.f32 %v12377_v6, %v12272_v53  ;;  %v12411_v58 = vld [vmem:[#allocation34_spill] sm:$0xff]  ;;  %vm1955_vm8 = vcmp.le.f32.partialorder %v7418_v36, %v7820_v37 }
 0x3d6   : > { %12355 = vst [vmem:[#allocation130_spill] sm:$0xff] %v7791_v35  ;;  %3128 = vperm.xlu2 %4848, %v12359_v51   ;;  %v2137_v51 = vmul.f32 %v12376_v2, %v12350_v25 }
 0x3d7   : > { %12356 = vst [vmem:[#allocation111_spill] sm:$0xff] %v7795_v48 }
 0x3d8   : > { %12358 = vst [vmem:[#allocation25_spill] sm:$0xff] %v7801_v18  ;;  %v12420_v18 = vld [vmem:[#allocation127_spill] sm:$0xff] }
 0x3d9   : > { %12361 = vst [vmem:[#allocation132_spill] sm:$0xff] %v7806_v28  ;;  %v12382_v28 = vld [vmem:[#allocation185_spill] sm:$0xff] }
 0x3da   : > { %12362 = vst [vmem:[#allocation107_spill] sm:$0xff] %v7810_v26  ;;  %v7860_v26 = vmul.f32 %v12378_v32, %v12272_v53  ;;  %v7868_v2 = vmul.f32 %v12382_v28, %v12350_v25 }
 0x3db   : > { %12364 = vst [vmem:[#allocation133_spill] sm:$0xff] %v7814_v47 }
 0x3dc   : > { %12365 = vst [vmem:[#allocation99_spill] sm:$0xff] %v7816_v63  ;;  %3136 = vperm.xlu1 %4847, %v12249_v61  }
 0x3dd   : > { %12366 = vst [vmem:[#allocation78_spill] sm:$0xff] %v7820_v37 }
 0x3de   : > { %12367 = vst [vmem:[#allocation96_spill] sm:$0xff] %v7822_v59  ;;  %v2603_v59 = vmul.f32 %v12425_v52, %v12350_v25 }
 0x3df   : > { %12368 = vst [vmem:[#allocation164_spill] sm:$0xff] %v7826_v27  ;;  %v7872_v27 = vmul.f32 %v12382_v28, %v12272_v53 }
 0x3e0   : > { %12371 = vst [vmem:[#allocation137_spill] sm:$0xff] %v7834_v29  ;;  %v2143_v29 = vmul.f32 %v12377_v6, %v12350_v25  ;;  %v7882_v6 = vpop.permute.xlu1 %2690 }
 0x3e1   : > { %12372 = vst [vmem:[#allocation118_spill] sm:$0xff] %v7838_v9  ;;  %v7856_v9 = vmul.f32 %v12378_v32, %v12350_v25 }
 0x3e2   : > { %12374 = vst [vmem:[#allocation93_spill] sm:$0xff] %v7842_v49  ;;  %v7906_v48 = vadd.f32 %v2239_v56, %v2143_v29  ;;  %v7929_v56 = vmul.f32 %v12406_v46, %v6062_v45 }
 0x3e3   : > { %12375 = vst [vmem:[#allocation135_spill] sm:$0xff] %v7846_v38  ;;  %v12381_v38 = vld [vmem:[#allocation191_spill] sm:$0xff] }
 0x3e4   : > { %12379 = vst [vmem:[#allocation27_spill] sm:$0xff] %v7856_v9  ;;  %v2227_v49 = vmul.f32 %v12381_v38, %v6062_v45  ;;  %v12385_v9 = vld [vmem:[#allocation201_spill] sm:$0xff]  ;;  %v7894_v28 = vmul.f32 %v12381_v38, %v6066_v39  ;;  %v7913_v38 = vadd.f32 %v2240_v13, %v2144_v40  ;;  %v7933_v13 = vmul.f32 %v12406_v46, %v6066_v39 }
 0x3e5   : > { %12380 = vst [vmem:[#allocation205_spill] sm:$0xff] %v7860_v26  ;;  %v7876_v47 = vmul.f32 %v12385_v9, %v12350_v25  ;;  %v7880_v32 = vmul.f32 %v12385_v9, %v12272_v53  ;;  %v12389_v26 = vld [vmem:[#allocation188_spill] sm:$0xff]  ;;  %v7900_v9 = vadd.f32 %v2224_v3, %v2128_v54  ;;  %v2601_v40 = vmul.f32 %v12411_v58, %v12350_v25 }
 0x3e6   : > { %12383 = vst [vmem:[#allocation54_spill] sm:$0xff] %v7868_v2  ;;  %v7886_v33 = vmul.f32 %v12389_v26, %v12350_v25  ;;  %v7890_v2 = vmul.f32 %v12389_v26, %v12272_v53  ;;  %v12400_v26 = vld [vmem:[#allocation197_spill] sm:$0xff]  ;;  %3148 = vperm.xlu1 %4847, %v12279_v4   ;;  %v12426_v4 = vld [vmem:[#allocation203_spill] sm:$0xff] }
 0x3e7   : > { %12384 = vst [vmem:[#allocation167_spill] sm:$0xff] %v7872_v27  ;;  %v7896_v27 = vadd.f32 %v2223_v22, %v2127_v55  ;;  %v7915_v55 = vadd.f32 %v2227_v49, %v2131_v57  ;;  %v12405_v22 = vld [vmem:[#allocation72_spill] sm:$0xff]  ;;  %v12409_v57 = vld [vmem:[#allocation91_spill] sm:$0xff]  ;;  %v8012_v5 = vmul.f32 %v12426_v4, %v12350_v25 }
 0x3e8   : > { %12386 = vst [vmem:[#allocation103_spill] sm:$0xff] %v7876_v47  ;;  %v7898_v47 = vpop.permute.xlu2 %2790  ;;  %v2703_v3 = vmul.f32 %v12405_v22, %v6062_v45  ;;  %v7937_v49 = vmul.f32 %v12409_v57, %v6062_v45 }
 0x3e9   : > { %12387 = vst [vmem:[#allocation117_spill] sm:$0xff] %v7880_v32  ;;  %v7902_v32 = vadd.f32 %v2233_v24, %v2137_v51  ;;  %v12404_v51 = vld [vmem:[#allocation30_spill] sm:$0xff]  ;;  %v2704_v24 = vmul.f32 %v12405_v22, %v6066_v39  ;;  %v2602_v22 = vmul.f32 %v12411_v58, %v12272_v53  ;;  %v12417_v58 = vld [vmem:[#allocation35_spill] sm:$0xff] }
 0x3ea   : > { %12388 = vst [vmem:[#allocation171_spill] sm:$0xff] %v7882_v6  ;;  %v2693_v54 = vmul.f32 %v12404_v51, %v6062_v45  ;;  %v2694_v29 = vmul.f32 %v12404_v51, %v6066_v39  ;;  %v7941_v51 = vpop.permute.xlu0 %2818  ;;  %v12424_v6 = vld [vmem:[#allocation16_spill] sm:$0xff] }
 0x3eb   : > { %12390 = vst [vmem:[#allocation124_spill] sm:$0xff] %v7886_v33  ;;  %v12399_v33 = vld [vmem:[#allocation18_spill] sm:$0xff] }
 0x3ec   : > { %12391 = vst [vmem:[#allocation129_spill] sm:$0xff] %v7890_v2  ;;  %3514 = vperm.xlu0 %4857, %v12399_v33   ;;  %v7911_v2 = vmul.f32 %v12400_v26, %v12350_v25  ;;  %3140 = vperm.xlu2 %4848, %v12399_v33   ;;  %v12413_v33 = vld [vmem:[#allocation136_spill] sm:$0xff] }
 0x3ed   : > { %12392 = vst [vmem:[#allocation94_spill] sm:$0xff] %v7894_v28  ;;  %v7951_v46 = vmul.f32 %v12413_v33, %v12272_v53  ;;  %v2610_v28 = vmul.f32 %v12419_v20, %v12272_v53  ;;  %v12422_v26 = vld [vmem:[#allocation128_spill] sm:$0xff]  ;;  %v2697_v20 = vmul.f32 %v12423_v42, %v6062_v45 }
 0x3ee   : > { %12393 = vst [vmem:[#allocation123_spill] sm:$0xff] %v7896_v27  ;;  %3160 = vperm.xlu1 %4847, %v12313_v7  }
 0x3ef   : > { %12394 = vst [vmem:[#allocation45_spill] sm:$0xff] %v7898_v47  ;;  %v2729_v0 = vadd.f32 %v2697_v20, %v2601_v40 }
 0x3f0   : > { %12395 = vst [vmem:[#allocation48_spill] sm:$0xff] %v7900_v9  ;;  %v2600_v9 = vmul.f32 %v12417_v58, %v12272_v53 }
 0x3f1   : > { %12396 = vst [vmem:[#allocation101_spill] sm:$0xff] %v7902_v32  ;;  %v7961_v32 = vmul.f32 %v7402_v44, %v12272_v53 }
 0x3f2   : > { %12397 = vst [vmem:[#allocation87_spill] sm:$0xff] %v7904_v62  ;;  %v7957_v62 = vmul.f32 %v7402_v44, %v12350_v25  ;;  %v2767_v44 = vpop.permute.xlu1 %2766 }
 0x3f3   : > { %12398 = vst [vmem:[#allocation115_spill] sm:$0xff] %v7906_v48  ;;  %v12414_v48 = vld [vmem:[#allocation122_spill] sm:$0xff]  ;;  %v8052_v40 = vsub.f32 %v2767_v44, %v2729_v0  ;;  %v12436_v0 = vld [vmem:[#allocation51_spill] sm:$0xff] }
 0x3f4   : > { %12401 = vst [vmem:[#allocation65_spill] sm:$0xff] %v7911_v2  ;;  %v2597_v61 = vmul.f32 %v12414_v48, %v12350_v25  ;;  %v2598_v2 = vmul.f32 %v12414_v48, %v12272_v53  ;;  %v2608_v48 = vmul.f32 %v12422_v26, %v12272_v53  ;;  %3526 = vperm.xlu0 %4857, %v12424_v6  }
 0x3f5   : > { %12402 = vst [vmem:[#allocation28_spill] sm:$0xff] %v7913_v38  ;;  %v7947_v38 = vmul.f32 %v12413_v33, %v12350_v25  ;;  %v12418_v33 = vld [vmem:[#allocation77_spill] sm:$0xff]  ;;  %3152 = vperm.xlu2 %4848, %v12424_v6  }
 0x3f6   : > { %12403 = vst [vmem:[#allocation64_spill] sm:$0xff] %v7915_v55  ;;  %v2599_v55 = vmul.f32 %v12417_v58, %v12350_v25  ;;  %v2605_v27 = vmul.f32 %v12418_v33, %v12350_v25  ;;  %v2606_v35 = vmul.f32 %v12418_v33, %v12272_v53  ;;  %v2616_v58 = vmul.f32 %v12420_v18, %v12272_v53  ;;  %v7983_v33 = vpop.permute.xlu2 %2802 }
 0x3f7   : > { %12407 = vst [vmem:[#allocation204_spill] sm:$0xff] %v7929_v56  ;;  %v2725_v63 = vadd.f32 %v2693_v54, %v2597_v61  ;;  %v2699_v61 = vmul.f32 %v7643_v60, %v6062_v45  ;;  %v2700_v54 = vmul.f32 %v7643_v60, %v6066_v39  ;;  %v2708_v56 = vmul.f32 %v7482_v8, %v6066_v39 }
 0x3f8   : > { %12408 = vst [vmem:[#allocation170_spill] sm:$0xff] %v7933_v13  ;;  %v2727_v6 = vadd.f32 %v2695_v1, %v2599_v55  ;;  %v2733_v57 = vadd.f32 %v2701_v17, %v2605_v27  ;;  %v2711_v17 = vmul.f32 %v7731_v31, %v6062_v45 }
 0x3f9   : > { %12410 = vst [vmem:[#allocation173_spill] sm:$0xff] %v7937_v49  ;;  %v2607_v49 = vmul.f32 %v12422_v26, %v12350_v25  ;;  %v2702_v26 = vmul.f32 %v7405_v41, %v6066_v39  ;;  %v12428_v41 = vld [vmem:[#allocation140_spill] sm:$0xff]  ;;  %v2731_v1 = vadd.f32 %v2699_v61, %v2603_v59  ;;  %v2712_v59 = vmul.f32 %v7731_v31, %v6066_v39 }
 0x3fa   : > { %12412 = vst [vmem:[#allocation176_spill] sm:$0xff] %v7941_v51  ;;  %v2615_v51 = vmul.f32 %v12420_v18, %v12350_v25  ;;  %v2698_v18 = vmul.f32 %v12423_v42, %v6066_v39  ;;  %v2726_v42 = vadd.f32 %v2694_v29, %v2598_v2  ;;  %v8016_v47 = vmul.f32 %v12428_v41, %v12350_v25  ;;  %v8022_v29 = vpop.permute.xlu0 %3100  ;;  %v2775_v25 = vpop.permute.xlu1 %2774 }
 0x3fb   : > { %12415 = vst [vmem:[#allocation179_spill] sm:$0xff] %v7957_v62  ;;  %v2735_v60 = vadd.f32 %v2703_v3, %v2607_v49  ;;  %v2736_v2 = vadd.f32 %v2704_v24, %v2608_v48  ;;  %v2734_v13 = vadd.f32 %v2702_v26, %v2606_v35  ;;  %v2705_v3 = vmul.f32 %v7706_v30, %v6062_v45  ;;  %v12432_v49 = vld [vmem:[#allocation41_spill] sm:$0xff] }
 0x3fc   : > { %12416 = vst [vmem:[#allocation183_spill] sm:$0xff] %v7961_v32  ;;  %v8020_v32 = vmul.f32 %v12428_v41, %v12272_v53  ;;  %v2706_v24 = vmul.f32 %v7706_v30, %v6066_v39  ;;  %v8042_v35 = vsub.f32 %v7736_v34, %v2731_v1  ;;  %3702 = vperm.xlu0 %4857, %v12432_v49   ;;  %v12433_v31 = vmov 10   ;;  %v12456_v30 = vld [vmem:[#allocation109_spill] sm:$0xff] }
 0x3fd   : > { %12421 = vst [vmem:[#allocation174_spill] sm:$0xff] %v7983_v33  ;;  %v2696_v33 = vmul.f32 %v7555_v14, %v6066_v39  ;;  %v2604_v14 = vmul.f32 %v12425_v52, %v12272_v53  ;;  %v2730_v52 = vadd.f32 %v2698_v18, %v2602_v22  ;;  %4850 = vset.pattern.permute.xlu2 %v12433_v31 }
 0x3fe   : > { %12427 = vst [vmem:[#allocation177_spill] sm:$0xff] %v8012_v5  ;;  %v2707_v5 = vmul.f32 %v7482_v8, %v6062_v45  ;;  %v8035_v27 = vpop.permute.xlu2 %2814  ;;  %v8065_v48 = vsub.f32 %v7787_v50, %v2735_v60  ;;  %3228 = vperm.xlu2 %4850, %v12436_v0   ;;  %v8071_v20 = vsub.f32 %v2775_v25, %v2733_v57  ;;  %v12464_v0 = vld [vmem:[#allocation47_spill] sm:$0xff] }
 0x3ff   : > { %12429 = vst [vmem:[#allocation186_spill] sm:$0xff] %v8022_v29  ;;  %v2728_v62 = vadd.f32 %v2696_v33, %v2600_v9  ;;  %v2732_v55 = vadd.f32 %v2700_v54, %v2604_v14  ;;  %v8033_v9 = vsub.f32 %v7613_v23, %v2727_v6  ;;  %v8054_v22 = vsub.f32 %v2767_v44, %v2730_v52  ;;  %v12441_v52 = vld [vmem:[#allocation52_spill] sm:$0xff] }
 0x400   : > { %12430 = vst [vmem:[#allocation180_spill] sm:$0xff] %v8042_v35  ;;  %v8059_v33 = vsub.f32 %v7725_v19, %v2725_v63  ;;  %v2738_v44 = vadd.f32 %v2706_v24, %v2610_v28  ;;  %v8073_v18 = vsub.f32 %v2775_v25, %v2734_v13  ;;  %v2743_v26 = vadd.f32 %v2711_v17, %v2615_v51  ;;  %v12442_v17 = vld [vmem:[#allocation204_spill] sm:$0xff] }
 0x401   : > { %v8045_v8 = vsub.f32 %v7736_v34, %v2732_v55  ;;  %v8050_v6 = vsub.f32 %v7613_v23, %v2728_v62  ;;  %v8062_v34 = vsub.f32 %v7725_v19, %v2726_v42  ;;  %12434 = vst [vmem:[#allocation181_spill] sm:$0xff] %v8065_v48  ;;  %v8068_v23 = vsub.f32 %v7787_v50, %v2736_v2 }
 0x402   : > { %v2737_v62 = vadd.f32 %v2705_v3, %v2609_v15  ;;  %12437 = vst [vmem:[#allocation196_spill] sm:$0xff] %v8071_v20  ;;  %v2744_v63 = vadd.f32 %v2712_v59, %v2616_v58  ;;  %v2854_v19 = vmin.f32 %v8033_v9, %v8042_v35  ;;  %v2853_v50 = vmin.f32 %v8059_v33, %v8052_v40  ;;  %v2787_v58 = vpop.permute.xlu1 %2786  ;;  %v8093_v42 = vpop.permute.xlu0 %3120 }
 0x403   : > { %12431 = vst [vmem:[#allocation189_spill] sm:$0xff] %v8045_v8  ;;  %v2875_v61 = vmin.f32 %v8050_v6, %v8045_v8  ;;  %v2874_v54 = vmin.f32 %v8062_v34, %v8054_v22  ;;  %v2739_v15 = vadd.f32 %v2707_v5, %v7947_v38  ;;  %v2740_v28 = vadd.f32 %v2708_v56, %v7951_v46 }
 0x404   : > { %12435 = vst [vmem:[#allocation182_spill] sm:$0xff] %v8068_v23  ;;  %v2713_v25 = vmul.f32 %v7566_v43, %v6062_v45  ;;  %v2714_v13 = vmul.f32 %v7566_v43, %v6066_v39  ;;  %v2856_v57 = vmin.f32 %v2854_v19, %v8065_v48  ;;  %v2855_v5 = vmin.f32 %v2853_v50, %v8071_v20  ;;  %v12447_v50 = vld [vmem:[#allocation192_spill] sm:$0xff]  ;;  %v12511_v48 = vld [vmem:[#allocation37_spill] sm:$0xff] }
 0x405   : > { %12438 = vst [vmem:[#allocation187_spill] sm:$0xff] %v8073_v18  ;;  %v2877_v51 = vmin.f32 %v2875_v61, %v8068_v23  ;;  %v2876_v38 = vmin.f32 %v2874_v54, %v8073_v18  ;;  %v8097_v56 = vsub.f32 %v2787_v58, %v2739_v15  ;;  %v8099_v46 = vsub.f32 %v2787_v58, %v2740_v28  ;;  %v12448_v54 = vld [vmem:[#allocation150_spill] sm:$0xff]  ;;  %v12449_v15 = vld [vmem:[#allocation179_spill] sm:$0xff]  ;;  %v12451_v58 = vld [vmem:[#allocation177_spill] sm:$0xff] }
 0x406   : > { %12439 = vst [vmem:[#allocation190_spill] sm:$0xff] %v8093_v42  ;;  %v8101_v14 = vpop.permute.xlu2 %3008  ;;  %v8104_v43 = vsub.f32 %v7704_v12, %v2737_v62  ;;  %v8107_v41 = vsub.f32 %v7704_v12, %v2738_v44  ;;  %v8110_v60 = vsub.f32 %v7733_v16, %v2743_v26  ;;  %v8113_v2 = vsub.f32 %v7733_v16, %v2744_v63  ;;  %v12443_v62 = vld [vmem:[#allocation170_spill] sm:$0xff] }
 0x407   : > { %12440 = vst [vmem:[#allocation184_spill] sm:$0xff] %v8101_v14  ;;  %3722 = vperm.xlu0 %4857, %v12441_v52   ;;  %v2717_v1 = vmul.f32 %v7769_v11, %v6062_v45  ;;  %v2718_v55 = vmul.f32 %v7769_v11, %v6066_v39  ;;  %v2858_v3 = vmin.f32 %v2856_v57, %v8097_v56  ;;  %v12444_v26 = vld [vmem:[#allocation74_spill] sm:$0xff]  ;;  %v12445_v11 = vld [vmem:[#allocation79_spill] sm:$0xff]  ;;  %v12470_v14 = vld [vmem:[#allocation125_spill] sm:$0xff] }
 0x408   : > { %v2879_v24 = vmin.f32 %v2877_v51, %v8099_v46  ;;  %4851 = vset.pattern.permute.xlu1 %v12433_v31  ;;  %v2622_v16 = vmul.f32 %v12426_v4, %v12272_v53  ;;  %v2741_v59 = vadd.f32 %v12442_v17, %v8016_v47  ;;  %v2742_v44 = vadd.f32 %v12443_v62, %v8020_v32  ;;  %v12446_v4 = vld [vmem:[#allocation91_spill] sm:$0xff] }
 0x409   : > { %3236 = vperm.xlu1 %4851, %v12444_v26   ;;  %3240 = vperm.xlu2 %4850, %v12445_v11   ;;  %v2857_v63 = vmin.f32 %v2855_v5, %v8104_v43  ;;  %v2878_v19 = vmin.f32 %v2876_v38, %v8107_v41  ;;  %v8135_v31 = vmin.f32 %v2858_v3, %v8110_v60  ;;  %v12450_v57 = vld [vmem:[#allocation183_spill] sm:$0xff]  ;;  %v12452_v38 = vld [vmem:[#allocation45_spill] sm:$0xff] }
 0x40a   : > { %v8138_v61 = vmin.f32 %v2879_v24, %v8113_v2  ;;  %v2716_v47 = vmul.f32 %v12446_v4, %v6066_v39  ;;  %v2623_v32 = vmul.f32 %v12448_v54, %v12447_v50  ;;  %v2745_v28 = vadd.f32 %v2713_v25, %v12449_v15  ;;  %v12455_v4 = vld [vmem:[#allocation134_spill] sm:$0xff]  ;;  %v12461_v11 = vld [vmem:[#allocation49_spill] sm:$0xff] }
 0x40b   : > { %v2746_v51 = vadd.f32 %v2714_v13, %v12450_v57  ;;  %v2749_v5 = vadd.f32 %v2717_v1, %v12451_v58  ;;  %v2750_v17 = vadd.f32 %v2718_v55, %v2622_v16  ;;  %v8148_v62 = vsub.f32 %v12452_v38, %v2741_v59  ;;  %v2799_v1 = vpop.permute.xlu1 %2798  ;;  %v12457_v55 = vld [vmem:[#allocation96_spill] sm:$0xff]  ;;  %v12459_v57 = vld [vmem:[#allocation161_spill] sm:$0xff] }
 0x40c   : > { %v8151_v3 = vsub.f32 %v12452_v38, %v2742_v44  ;;  %v2624_v24 = vmul.f32 %v12448_v54, %v12272_v53  ;;  %v2627_v12 = vmul.f32 %v12455_v4, %v12447_v50  ;;  %v2619_v25 = vmul.f32 %v12456_v30, %v12447_v50  ;;  %v12458_v16 = vld [vmem:[#allocation88_spill] sm:$0xff] }
 0x40d   : > { %12453 = vst [vmem:[#allocation191_spill] sm:$0xff] %v8148_v62  ;;  %v2620_v13 = vmul.f32 %v12456_v30, %v12272_v53  ;;  %vm1956_vm9 = vcmp.le.f32.partialorder %v12458_v16, %v12457_v55  ;;  %v2859_v59 = vmin.f32 %v2857_v63, %v8148_v62  ;;  %v8165_v15 = vsub.f32 %v2799_v1, %v2745_v28  ;;  %v12460_v30 = vld [vmem:[#allocation171_spill] sm:$0xff] }
 0x40e   : > { %12454 = vst [vmem:[#allocation185_spill] sm:$0xff] %v8151_v3  ;;  %v2880_v44 = vmin.f32 %v2878_v19, %v8151_v3  ;;  %v8167_v54 = vsub.f32 %v2799_v1, %v2746_v51  ;;  %v2719_v58 = vmul.f32 %v12459_v57, %v6062_v45  ;;  %v2720_v38 = vmul.f32 %v12459_v57, %v6066_v39  ;;  %v8178_v63 = vpop.permute.xlu2 %3020  ;;  %v8180_v19 = vpop.permute.xlu0 %3132  ;;  %v12463_v28 = vld [vmem:[#allocation99_spill] sm:$0xff] }
 0x40f   : > { %v2723_v10 = vmul.f32 %v12460_v30, %v6062_v45  ;;  %v2724_v21 = vmul.f32 %v12460_v30, %v6066_v39  ;;  %3734 = vperm.xlu0 %4857, %v12461_v11   ;;  %12462 = vst [vmem:[#allocation201_spill] sm:$0xff] %v8178_v63  ;;  %v8183_v51 = vsub.f32 %v12463_v28, %v2749_v5  ;;  %v8194_v30 = vsel %vm1955_vm8, %v12464_v0, 128.0  ;;  %v12466_v63 = vld [vmem:[#allocation151_spill] sm:$0xff] }
 0x410   : > { %v8186_v1 = vsub.f32 %v12463_v28, %v2750_v17  ;;  %v2861_v57 = vmin.f32 %v2859_v59, %v8165_v15  ;;  %v2882_v26 = vmin.f32 %v2880_v44, %v8167_v54  ;;  %12465 = vst [vmem:[#allocation188_spill] sm:$0xff] %v8194_v30  ;;  %v2628_v11 = vmul.f32 %v12455_v4, %v12272_v53  ;;  %v12467_v28 = vld [vmem:[#allocation59_spill] sm:$0xff]  ;;  %v12468_v59 = vld [vmem:[#allocation66_spill] sm:$0xff]  ;;  %v12469_v44 = vld [vmem:[#allocation173_spill] sm:$0xff] }
 0x411   : > { %v2625_v5 = vmul.f32 %v12466_v63, %v12447_v50  ;;  %v2626_v17 = vmul.f32 %v12466_v63, %v12272_v53  ;;  %3244 = vperm.xlu1 %4851, %v12467_v28   ;;  %3248 = vperm.xlu2 %4850, %v12468_v59   ;;  %v2747_v52 = vadd.f32 %v12469_v44, %v2619_v25  ;;  %v12471_v63 = vld [vmem:[#allocation174_spill] sm:$0xff] }
 0x412   : > { %v2748_v49 = vadd.f32 %v2716_v47, %v2620_v13  ;;  %v2863_v36 = vmin.f32 %v2861_v57, %v8183_v51  ;;  %v2884_v42 = vmin.f32 %v2882_v26, %v8186_v1  ;;  %v2721_v4 = vmul.f32 %v12470_v14, %v6062_v45  ;;  %v12474_v13 = vld [vmem:[#allocation197_spill] sm:$0xff]  ;;  %v12475_v26 = vld [vmem:[#allocation198_spill] sm:$0xff] }
 0x413   : > { %v2722_v29 = vmul.f32 %v12470_v14, %v6066_v39  ;;  %v2755_v30 = vadd.f32 %v2723_v10, %v2627_v12  ;;  %v2756_v7 = vadd.f32 %v2724_v21, %v2628_v11  ;;  %v8212_v3 = vsub.f32 %v12471_v63, %v2747_v52  ;;  %v2811_v23 = vpop.permute.xlu1 %2810  ;;  %v12476_v10 = vld [vmem:[#allocation108_spill] sm:$0xff]  ;;  %v12477_v11 = vld [vmem:[#allocation29_spill] sm:$0xff] }
 0x414   : > { %v8215_v59 = vsub.f32 %v12471_v63, %v2748_v49  ;;  %v2751_v25 = vadd.f32 %v2719_v58, %v2623_v32  ;;  %v2752_v47 = vadd.f32 %v2720_v38, %v2624_v24  ;;  %v2150_v57 = vmul.f32 %v12474_v13, %v12272_v53  ;;  %v12478_v32 = vld [vmem:[#allocation176_spill] sm:$0xff]  ;;  %v12485_v63 = vld [vmem:[#allocation94_spill] sm:$0xff] }
 0x415   : > { %12472 = vst [vmem:[#allocation30_spill] sm:$0xff] %v8212_v3  ;;  %v2231_v44 = vmul.f32 %v12475_v26, %v6062_v45  ;;  %v2753_v28 = vadd.f32 %v2721_v4, %v2625_v5  ;;  %v2754_v62 = vadd.f32 %v2722_v29, %v2626_v17  ;;  %vm1957_vm10 = vcmp.le.f32.partialorder %v12476_v10, %v7820_v37  ;;  %v12484_v4 = vld [vmem:[#allocation25_spill] sm:$0xff]  ;;  %v12520_v10 = vld [vmem:[#allocation135_spill] sm:$0xff] }
 0x416   : > { %12473 = vst [vmem:[#allocation72_spill] sm:$0xff] %v8215_v59  ;;  %v2862_v21 = vmin.f32 %v8135_v31, %v8212_v3  ;;  %v2883_v49 = vmin.f32 %v8138_v61, %v8215_v59  ;;  %v8227_v14 = vsub.f32 %v2811_v23, %v2751_v25  ;;  %v8229_v52 = vsub.f32 %v2811_v23, %v2752_v47  ;;  %v12479_v31 = vld [vmem:[#allocation36_spill] sm:$0xff]  ;;  %v12487_v25 = vld [vmem:[#allocation90_spill] sm:$0xff]  ;;  %v8268_v13 = vpop.permute.xlu0 %3144 }
 0x417   : > { %v2232_v12 = vmul.f32 %v12475_v26, %v6066_v39  ;;  %v2225_v29 = vmul.f32 %v12477_v11, %v6062_v45  ;;  %v8236_v24 = vsub.f32 %v12478_v32, %v2755_v30  ;;  %v8239_v58 = vsub.f32 %v12478_v32, %v2756_v7  ;;  %3746 = vperm.xlu0 %4857, %v12479_v31   ;;  %v12483_v7 = vld [vmem:[#allocation200_spill] sm:$0xff]  ;;  %v12490_v32 = vld [vmem:[#allocation43_spill] sm:$0xff] }
 0x418   : > { %v8243_v61 = vsub.f32 %v8035_v27, %v2753_v28  ;;  %v8246_v23 = vsub.f32 %v8035_v27, %v2754_v62  ;;  %v2864_v38 = vmin.f32 %v2862_v21, %v8227_v14  ;;  %v2885_v5 = vmin.f32 %v2883_v49, %v8229_v52  ;;  %v8264_v62 = vpop.permute.xlu2 %3028  ;;  %v12488_v47 = vld [vmem:[#allocation60_spill] sm:$0xff] }
 0x419   : > { %v8254_v30 = vsel %vm1956_vm9, %v12464_v0, 128.0  ;;  %v2237_v17 = vmul.f32 %v12483_v7, %v6062_v45  ;;  %v2226_v28 = vmul.f32 %v12477_v11, %v6066_v39  ;;  %v8262_v27 = vadd.f32 %v12485_v63, %v12484_v4  ;;  %12486 = vst [vmem:[#allocation122_spill] sm:$0xff] %v8264_v62  ;;  %3256 = vperm.xlu1 %4851, %v12487_v25   ;;  %v12489_v11 = vld [vmem:[#allocation65_spill] sm:$0xff]  ;;  %v12492_v63 = vld [vmem:[#allocation39_spill] sm:$0xff]  ;;  %v12494_v25 = vld [vmem:[#allocation130_spill] sm:$0xff] }
 0x41a   : > { %12480 = vst [vmem:[#allocation119_spill] sm:$0xff] %v8243_v61  ;;  %3260 = vperm.xlu2 %4850, %v12488_v47   ;;  %v2865_v16 = vmin.f32 %v2863_v36, %v8243_v61  ;;  %v2886_v26 = vmin.f32 %v2884_v42, %v8246_v23  ;;  %v2866_v21 = vmin.f32 %v2864_v38, %v8236_v24  ;;  %v12495_v47 = vld [vmem:[#allocation111_spill] sm:$0xff]  ;;  %v12496_v42 = vld [vmem:[#allocation146_spill] sm:$0xff] }
 0x41b   : > { %12481 = vst [vmem:[#allocation34_spill] sm:$0xff] %v8246_v23  ;;  %v2887_v49 = vmin.f32 %v2885_v5, %v8239_v58  ;;  %v8276_v4 = vadd.f32 %v12490_v32, %v12489_v11  ;;  %v8279_v31 = vadd.f32 %v12492_v63, %v2150_v57  ;;  %v2263_v62 = vadd.f32 %v2231_v44, %v12494_v25  ;;  %v12497_v5 = vld [vmem:[#allocation199_spill] sm:$0xff]  ;;  %v12500_v57 = vld [vmem:[#allocation61_spill] sm:$0xff]  ;;  %v8319_v3 = vpop.permute.xlu1 %3004 }
 0x41c   : > { %12482 = vst [vmem:[#allocation136_spill] sm:$0xff] %v8254_v30  ;;  %v8283_v30 = vadd.f32 %v2232_v12, %v12495_v47  ;;  %v2238_v36 = vmul.f32 %v12483_v7, %v6066_v39  ;;  %v2257_v23 = vadd.f32 %v2225_v29, %v12496_v42  ;;  %v2867_v38 = vmin.f32 %v2865_v16, %v2866_v21  ;;  %v12499_v11 = vld [vmem:[#allocation131_spill] sm:$0xff]  ;;  %v12501_v44 = vld [vmem:[#allocation133_spill] sm:$0xff]  ;;  %v12502_v12 = vld [vmem:[#allocation102_spill] sm:$0xff] }
 0x41d   : > { %12491 = vst [vmem:[#allocation35_spill] sm:$0xff] %v8276_v4  ;;  %v2888_v61 = vmin.f32 %v2886_v26, %v2887_v49  ;;  %v8290_v59 = vmul.f32 %v12497_v5, %v12447_v50  ;;  %v2258_v32 = vadd.f32 %v2226_v28, %v12499_v11  ;;  %v2235_v63 = vmul.f32 %v12500_v57, %v6062_v45  ;;  %v12503_v7 = vld [vmem:[#allocation202_spill] sm:$0xff] }
 0x41e   : > { %12493 = vst [vmem:[#allocation77_spill] sm:$0xff] %v8279_v31  ;;  %v8296_v25 = vadd.f32 %v2237_v17, %v12501_v44  ;;  %vm1958_vm11 = vcmp.le.f32.partialorder %v12502_v12, %v12457_v55  ;;  %v2243_v29 = vmul.f32 %v12503_v7, %v6062_v45  ;;  %v2244_v47 = vmul.f32 %v12503_v7, %v6066_v39  ;;  %v12504_v21 = vld [vmem:[#allocation46_spill] sm:$0xff]  ;;  %v12505_v17 = vld [vmem:[#allocation56_spill] sm:$0xff] }
 0x41f   : > { %12498 = vst [vmem:[#allocation120_spill] sm:$0xff] %v8290_v59  ;;  %v2868_v16 = vrot.slane %v2867_v38, 4  ;;  %v2889_v26 = vrot.slane %v2888_v61, 4  ;;  %v2229_v28 = vmul.f32 %v12504_v21, %v6062_v45  ;;  %v2230_v49 = vmul.f32 %v12504_v21, %v6066_v39  ;;  %v12506_v44 = vld [vmem:[#allocation68_spill] sm:$0xff]  ;;  %v12507_v59 = vld [vmem:[#allocation38_spill] sm:$0xff] }
 0x420   : > { %v2249_v42 = vmul.f32 %v12505_v17, %v6062_v45  ;;  %v2250_v11 = vmul.f32 %v12505_v17, %v6066_v39  ;;  %3758 = vperm.xlu0 %4857, %v12506_v44   ;;  %v8314_v5 = vsub.f32 %v12507_v59, %v2257_v23  ;;  %v12509_v7 = vld [vmem:[#allocation164_spill] sm:$0xff]  ;;  %12510 = vst [vmem:[#allocation128_spill] sm:$0xff] %v8319_v3  ;;  %v8325_v21 = vsel %vm1957_vm10, %v12511_v48, 128.0 }
 0x421   : > { %v8317_v31 = vadd.f32 %v2238_v36, %v12509_v7  ;;  %v2869_v4 = vmin.f32 %v2867_v38, %v2868_v16  ;;  %v2890_v0 = vmin.f32 %v2888_v61, %v2889_v26  ;;  %12512 = vst [vmem:[#allocation138_spill] sm:$0xff] %v8325_v21  ;;  %v2236_v17 = vmul.f32 %v12500_v57, %v6066_v39  ;;  %v12513_v44 = vld [vmem:[#allocation132_spill] sm:$0xff]  ;;  %v8333_v36 = vpop.permute.xlu2 %3040  ;;  %v12516_v38 = vld [vmem:[#allocation83_spill] sm:$0xff]  ;;  %v12517_v61 = vld [vmem:[#allocation89_spill] sm:$0xff] }
 0x422   : > { %12508 = vst [vmem:[#allocation127_spill] sm:$0xff] %v8314_v5  ;;  %v2267_v18 = vadd.f32 %v2235_v63, %v12513_v44  ;;  %v8331_v23 = vsub.f32 %v12507_v59, %v2258_v32  ;;  %3268 = vperm.xlu1 %4851, %v12516_v38   ;;  %3272 = vperm.xlu2 %4850, %v12517_v61   ;;  %v12518_v16 = vld [vmem:[#allocation93_spill] sm:$0xff]  ;;  %v12522_v57 = vld [vmem:[#allocation27_spill] sm:$0xff] }
 0x423   : > { %12515 = vst [vmem:[#allocation203_spill] sm:$0xff] %v8333_v36  ;;  %v8338_v26 = vadd.f32 %v2243_v29, %v12518_v16  ;;  %v8341_v7 = vadd.f32 %v2244_v47, %v12520_v10  ;;  %v2870_v3 = vrot.slane %v2869_v4, 2  ;;  %v2891_v21 = vrot.slane %v2890_v0, 2  ;;  %v12523_v63 = vld [vmem:[#allocation205_spill] sm:$0xff]  ;;  %v12524_v59 = vld [vmem:[#allocation103_spill] sm:$0xff]  ;;  %v12531_v29 = vld [vmem:[#allocation48_spill] sm:$0xff]  ;;  %v8359_v16 = vpop.permute.xlu0 %3156 }
 0x424   : > { %12514 = vst [vmem:[#allocation55_spill] sm:$0xff] %v8331_v23  ;;  %v2261_v20 = vadd.f32 %v2229_v28, %v12522_v57  ;;  %v2262_v44 = vadd.f32 %v2230_v49, %v12523_v63  ;;  %v8346_v32 = vadd.f32 %v2249_v42, %v12524_v59  ;;  %v12526_v36 = vld [vmem:[#allocation117_spill] sm:$0xff]  ;;  %v12528_v38 = vld [vmem:[#allocation123_spill] sm:$0xff]  ;;  %v12534_v63 = vld [vmem:[#allocation206_spill] sm:$0xff] }
 0x425   : > { %12519 = vst [vmem:[#allocation140_spill] sm:$0xff] %v8338_v26  ;;  %v8349_v8 = vadd.f32 %v2250_v11, %v12526_v36  ;;  %v12529_v61 = vld [vmem:[#allocation207_spill] sm:$0xff]  ;;  %v2871_v10 = vmin.f32 %v2869_v4, %v2870_v3  ;;  %v2892_v28 = vmin.f32 %v2890_v0, %v2891_v21  ;;  %v8363_v42 = vsub.f32 %v12534_v63, %v2267_v18  ;;  %v12536_v11 = vld [vmem:[#allocation82_spill] sm:$0xff]  ;;  %v12537_v59 = vld [vmem:[#allocation105_spill] sm:$0xff] }
 0x426   : > { %12521 = vst [vmem:[#allocation204_spill] sm:$0xff] %v8341_v7  ;;  %v8353_v35 = vsub.f32 %v12529_v61, %v12528_v38  ;;  %v8357_v47 = vsub.f32 %v12529_v61, %v12531_v29  ;;  %v12533_v57 = vld [vmem:[#allocation107_spill] sm:$0xff]  ;;  %v2241_v36 = vmul.f32 %v12536_v11, %v6062_v45  ;;  %v8371_v38 = vsub.f32 %v12537_v59, %v2262_v44  ;;  %v12540_v61 = vld [vmem:[#allocation64_spill] sm:$0xff]  ;;  %v12541_v29 = vld [vmem:[#allocation121_spill] sm:$0xff] }
 0x427   : > { %12525 = vst [vmem:[#allocation170_spill] sm:$0xff] %v8346_v32  ;;  %v2268_v49 = vadd.f32 %v2236_v17, %v12533_v57  ;;  %v8375_v7 = vsub.f32 %v12541_v29, %v12540_v61  ;;  %v2872_v3 = vrot.slane %v2871_v10, 1  ;;  %v2893_v0 = vrot.slane %v2892_v28, 1  ;;  %v12543_v4 = vld [vmem:[#allocation139_spill] sm:$0xff]  ;;  %v12544_v21 = vld [vmem:[#allocation101_spill] sm:$0xff]  ;;  %v12550_v32 = vld [vmem:[#allocation114_spill] sm:$0xff] }
 0x428   : > { %12527 = vst [vmem:[#allocation91_spill] sm:$0xff] %v8349_v8  ;;  %v8368_v8 = vsub.f32 %v12537_v59, %v2261_v20  ;;  %vm1959_vm12 = vcmp.le.f32.partialorder %v12543_v4, %v7820_v37  ;;  %v2242_v18 = vmul.f32 %v12536_v11, %v6066_v39  ;;  %v12545_v17 = vld [vmem:[#allocation97_spill] sm:$0xff]  ;;  %v12547_v20 = vld [vmem:[#allocation87_spill] sm:$0xff]  ;;  %v12549_v59 = vld [vmem:[#allocation144_spill] sm:$0xff]  ;;  %v8393_v61 = vsub.f32 %v12541_v29, %v8262_v27 }
 0x429   : > { %12530 = vst [vmem:[#allocation150_spill] sm:$0xff] %v8353_v35  ;;  %v8383_v57 = vsub.f32 %v12545_v17, %v12544_v21  ;;  %v8387_v44 = vsub.f32 %v12545_v17, %v12547_v20  ;;  %vm1960_vm13 = vcmp.le.f32.partialorder %v12549_v59, %v12457_v55  ;;  %v8396_v26 = vsub.f32 %v12550_v32, %v2263_v62  ;;  %v12557_v62 = vld [vmem:[#allocation137_spill] sm:$0xff]  ;;  %v12584_v59 = vld [vmem:[#allocation196_spill] sm:$0xff] }
 0x42a   : > { %12532 = vst [vmem:[#allocation179_spill] sm:$0xff] %v8359_v16  ;;  %v8400_v11 = vmin.f32 %v2892_v28, %v2893_v0  ;;  %v11529_v21 = vmov 15   ;;  %v8403_v16 = vpop.permute.xlu1 %3016  ;;  %v8409_v17 = vsel %vm1958_vm11, %v12511_v48, 128.0  ;;  %v8412_v27 = vsub.f32 %v12534_v63, %v2268_v49  ;;  %v12559_v28 = vld [vmem:[#allocation7_spill] sm:$0xff]  ;;  %v12561_v0 = vld [vmem:[#allocation69_spill] sm:$0xff]  ;;  %v12563_v63 = vld [vmem:[#allocation118_spill] sm:$0xff] }
 0x42b   : > { %12535 = vst [vmem:[#allocation183_spill] sm:$0xff] %v8363_v42  ;;  %v8398_v42 = vmin.f32 %v2871_v10, %v2872_v3  ;;  %4862 = vset.pattern.permute.xlu0 %v11529_v21  ;;  %v8415_v29 = vadd.f32 %v2241_v36, %v12557_v62  ;;  %v2384_v10 = vmin.f32 %v8314_v5, %v8368_v8  ;;  %v8420_v3 = vpop.permute.xlu2 %3052  ;;  %v12562_v49 = vld [vmem:[#allocation75_spill] sm:$0xff] }
 0x42c   : > { %12538 = vst [vmem:[#allocation177_spill] sm:$0xff] %v8368_v8  ;;  %4040 = vperm.xlu0 %4862, %v12559_v28   ;;  %3280 = vperm.xlu1 %4851, %v12561_v0   ;;  %v2405_v12 = vmin.f32 %v8331_v23, %v8371_v38  ;;  %v2383_v20 = vmin.f32 %v8353_v35, %v8375_v7  ;;  %v12565_v62 = vld [vmem:[#allocation95_spill] sm:$0xff]  ;;  %v12579_v8 = vmov 12   ;;  %v12586_v35 = vld [vmem:[#allocation181_spill] sm:$0xff] }
 0x42d   : > { %12539 = vst [vmem:[#allocation45_spill] sm:$0xff] %v8371_v38  ;;  %vm2897_vm14 = vcmp.le.f32.partialorder %v8033_v9, %v8398_v42  ;;  %vm2898_vm15 = vcmp.le.f32.partialorder %v8050_v6, %v8400_v11  ;;  %3284 = vperm.xlu2 %4850, %v12562_v49   ;;  %v8433_v36 = vadd.f32 %v2242_v18, %v12563_v63  ;;  %v12585_v5 = vld [vmem:[#allocation187_spill] sm:$0xff]  ;;  %v12593_v6 = vld [vmem:[#allocation72_spill] sm:$0xff] }
 0x42e   : > { %12542 = vst [vmem:[#allocation134_spill] sm:$0xff] %v8375_v7  ;;  %v8437_v21 = vmul.f32 %v12565_v62, %v6062_v45  ;;  %v8441_v0 = vmul.f32 %v12565_v62, %v6066_v39  ;;  %v8444_v38 = vmin.f32 %v2384_v10, %v8383_v57  ;;  %v8447_v23 = vmin.f32 %v2405_v12, %v8387_v44  ;;  %v12571_v10 = vld [vmem:[#allocation116_spill] sm:$0xff] }
 0x42f   : > { %12546 = vst [vmem:[#allocation109_spill] sm:$0xff] %v8383_v57  ;;  %v8453_v18 = vsub.f32 %v12550_v32, %v8283_v30  ;;  %v8456_v63 = vmin.f32 %v2383_v20, %v8396_v26  ;;  %vm2907_vm1 = vcmp.le.f32.partialorder %v8104_v43, %v8398_v42  ;;  %v8468_v12 = vsub.f32 %v12571_v10, %v8296_v25  ;;  %v3013_v32 = vpop.permute.xlu0 %3012  ;;  %v12582_v7 = vld [vmem:[#allocation12_spill] sm:$0xff] }
 0x430   : > { %12548 = vst [vmem:[#allocation88_spill] sm:$0xff] %v8387_v44  ;;  %v8472_v30 = vsub.f32 %v12571_v10, %v8317_v31  ;;  %v8480_v20 = vmul.f32 %v8180_v19, %v6062_v45  ;;  %v8484_v62 = vmul.f32 %v8180_v19, %v6066_v39  ;;  %v8502_v31 = vmul.f32 %v8268_v13, %v6062_v45  ;;  %v12575_v10 = vld [vmem:[#allocation11_spill] sm:$0xff]  ;;  %v12577_v44 = vld [vmem:[#allocation70_spill] sm:$0xff] }
 0x431   : > { %12551 = vst [vmem:[#allocation161_spill] sm:$0xff] %v8396_v26  ;;  %v8505_v25 = vmul.f32 %v3013_v32, %v12447_v50  ;;  %v8518_v57 = vsel %vm1959_vm12, %v12577_v44, 128.0  ;;  %v8521_v26 = vmul.f32 %v3013_v32, %v12272_v53  ;;  %vm2895_vm0 = vcmp.le.f32.partialorder %v8059_v33, %v8398_v42  ;;  %v12581_v32 = vld [vmem:[#allocation180_spill] sm:$0xff] }
 0x432   : > { %12552 = vst [vmem:[#allocation171_spill] sm:$0xff] %v8398_v42  ;;  %v8498_v19 = vpop.permute.xlu1 %3024  ;;  %vm2896_vm9 = vcmp.le.f32.partialorder %v8062_v34, %v8400_v11  ;;  %v8533_v4 = vsel %vm1960_vm13, %v12577_v44, 128.0  ;;  %vm2899_vm12 = vcmp.le.f32.partialorder %v8052_v40, %v8398_v42  ;;  %vm2900_vm10 = vcmp.le.f32.partialorder %v8054_v22, %v8400_v11  ;;  %v12595_v40 = vld [vmem:[#allocation57_spill] sm:$0xff] }
 0x433   : > { %12553 = vst [vmem:[#allocation99_spill] sm:$0xff] %v8400_v11  ;;  %v8512_v49 = vpop.permute.xlu2 %3064  ;;  %vm2901_vm11 = vcmp.le.f32.partialorder %v12581_v32, %v8398_v42  ;;  %vm2903_vm13 = vcmp.le.f32.partialorder %v12584_v59, %v8398_v42  ;;  %vm2904_vm7 = vcmp.le.f32.partialorder %v12585_v5, %v8400_v11  ;;  %vm2905_vm6 = vcmp.le.f32.partialorder %v12586_v35, %v8398_v42  ;;  %v12597_v59 = vld [vmem:[#allocation50_spill] sm:$0xff] }
 0x434   : > { %12554 = vst [vmem:[#allocation151_spill] sm:$0xff] %v8403_v16  ;;  %4060 = vperm.xlu0 %4862, %v12575_v10   ;;  %4852 = vset.pattern.permute.xlu1 %v12579_v8  ;;  %v2931_v33 = vsel %vm2899_vm12, %v12577_v44, 128.0  ;;  %v2932_v34 = vsel %vm2900_vm10, %v12577_v44, 128.0  ;;  %v2936_v22 = vsel %vm2904_vm7, %v12595_v40, 128.0  ;;  %v12600_v35 = vld [vmem:[#allocation34_spill] sm:$0xff]  ;;  %vm12608_vm7 = vcmp.le.f32.partialorder %v8110_v60, %v8398_v42 }
 0x435   : > { %12555 = vst [vmem:[#allocation173_spill] sm:$0xff] %v8409_v17  ;;  %4853 = vset.pattern.permute.xlu2 %v12579_v8  ;;  %3474 = vperm.xlu1 %4852, %v12559_v28   ;;  %v12583_v8 = vld [vmem:[#allocation189_spill] sm:$0xff]  ;;  %v2929_v17 = vsel %vm2897_vm14, %v12511_v48, 128.0  ;;  %vm12616_vm10 = vcmp.le.f32.partialorder %v8186_v1, %v8400_v11  ;;  %vm12625_vm12 = vcmp.le.f32.partialorder %v8236_v24, %v8398_v42 }
 0x436   : > { %12556 = vst [vmem:[#allocation125_spill] sm:$0xff] %v8412_v27  ;;  %3478 = vperm.xlu2 %4853, %v12582_v7   ;;  %vm2902_vm8 = vcmp.le.f32.partialorder %v12583_v8, %v8400_v11  ;;  %v12589_v28 = vld [vmem:[#allocation185_spill] sm:$0xff]  ;;  %v12590_v8 = vld [vmem:[#allocation30_spill] sm:$0xff]  ;;  %v2939_v27 = vsel %vm2907_vm1, %v12597_v59, 128.0  ;;  %vm12603_vm1 = vcmp.le.f32.partialorder %v8099_v46, %v8400_v11  ;;  %v12607_v46 = vld [vmem:[#allocation44_spill] sm:$0xff] }
 0x437   : > { %12558 = vst [vmem:[#allocation174_spill] sm:$0xff] %v8415_v29  ;;  %vm2912_vm3 = vcmp.le.f32.partialorder %v12589_v28, %v8400_v11  ;;  %vm2917_vm2 = vcmp.le.f32.partialorder %v12590_v8, %v8398_v42  ;;  %v8600_v44 = vpop.permute.xlu0 %3032  ;;  %v12601_v29 = vld [vmem:[#allocation85_spill] sm:$0xff]  ;;  %v12610_v28 = vld [vmem:[#allocation80_spill] sm:$0xff] }
 0x438   : > { %12560 = vst [vmem:[#allocation197_spill] sm:$0xff] %v8420_v3  ;;  %v12588_v3 = vld [vmem:[#allocation191_spill] sm:$0xff] }
 0x439   : > { %12564 = vst [vmem:[#allocation198_spill] sm:$0xff] %v8433_v36  ;;  %vm2911_vm4 = vcmp.le.f32.partialorder %v12588_v3, %v8398_v42 }
 0x43a   : > { %12566 = vst [vmem:[#allocation108_spill] sm:$0xff] %v8437_v21  ;;  %v3037_v32 = vpop.permute.xlu1 %3036 }
 0x43b   : > { %12567 = vst [vmem:[#allocation29_spill] sm:$0xff] %v8441_v0  ;;  %v2935_v0 = vsel %vm2903_vm13, %v12595_v40, 128.0  ;;  %v12599_v40 = vld [vmem:[#allocation9_spill] sm:$0xff]  ;;  %vm12626_vm13 = vcmp.le.f32.partialorder %v8239_v58, %v8400_v11 }
 0x43c   : > { %12568 = vst [vmem:[#allocation176_spill] sm:$0xff] %v8447_v23  ;;  %4072 = vperm.xlu0 %4862, %v12599_v40   ;;  %v3109_v23 = vpop.permute.xlu2 %3108 }
 0x43d   : > { %12569 = vst [vmem:[#allocation200_spill] sm:$0xff] %v8453_v18 }
 0x43e   : > { %12570 = vst [vmem:[#allocation25_spill] sm:$0xff] %v8456_v63 }
 0x43f   : > { %12572 = vst [vmem:[#allocation94_spill] sm:$0xff] %v8468_v12 }
 0x440   : > { %12573 = vst [vmem:[#allocation65_spill] sm:$0xff] %v8472_v30 }
 0x441   : > { %12574 = vst [vmem:[#allocation43_spill] sm:$0xff] %v8498_v19  ;;  %v12591_v19 = vld [vmem:[#allocation47_spill] sm:$0xff] }
 0x442   : > { %12576 = vst [vmem:[#allocation39_spill] sm:$0xff] %v8512_v49  ;;  %v12587_v49 = vld [vmem:[#allocation182_spill] sm:$0xff]  ;;  %v2927_v16 = vsel %vm2895_vm0, %v12591_v19, 128.0  ;;  %v2928_v7 = vsel %vm2896_vm9, %v12591_v19, 128.0  ;;  %v12592_v19 = vld [vmem:[#allocation76_spill] sm:$0xff]  ;;  %vm2918_vm0 = vcmp.le.f32.partialorder %v12593_v6, %v8400_v11  ;;  %vm12615_vm9 = vcmp.le.f32.partialorder %v8183_v51, %v8398_v42 }
 0x443   : > { %12578 = vst [vmem:[#allocation130_spill] sm:$0xff] %v8518_v57  ;;  %vm2906_vm5 = vcmp.le.f32.partialorder %v12587_v49, %v8400_v11  ;;  %v2933_v9 = vsel %vm2901_vm11, %v12592_v19, 128.0  ;;  %v2934_v57 = vsel %vm2902_vm8, %v12592_v19, 128.0  ;;  %v12596_v19 = vld [vmem:[#allocation62_spill] sm:$0xff]  ;;  %v2959_v30 = vmin.f32 %v2927_v16, %v2931_v33  ;;  %v12605_v16 = vld [vmem:[#allocation21_spill] sm:$0xff]  ;;  %v12606_v33 = vld [vmem:[#allocation8_spill] sm:$0xff] }
 0x444   : > { %12580 = vst [vmem:[#allocation111_spill] sm:$0xff] %v8533_v4  ;;  %v2930_v4 = vsel %vm2898_vm15, %v12511_v48, 128.0  ;;  %v12594_v48 = vld [vmem:[#allocation119_spill] sm:$0xff]  ;;  %v2937_v21 = vsel %vm2905_vm6, %v12596_v19, 128.0  ;;  %v2938_v36 = vsel %vm2906_vm5, %v12596_v19, 128.0  ;;  %vm12598_vm15 = vcmp.le.f32.partialorder %v8107_v41, %v8400_v11  ;;  %3486 = vperm.xlu1 %4852, %v12605_v16   ;;  %3490 = vperm.xlu2 %4853, %v12606_v33  }
 0x445   : > { %vm2923_vm14 = vcmp.le.f32.partialorder %v12594_v48, %v8398_v42  ;;  %v2940_v5 = vsel %vm12598_vm15, %v12597_v59, 128.0  ;;  %vm2924_vm6 = vcmp.le.f32.partialorder %v12600_v35, %v8400_v11  ;;  %v2960_v63 = vmin.f32 %v2929_v17, %v2933_v9  ;;  %v12604_v59 = vld [vmem:[#allocation58_spill] sm:$0xff]  ;;  %v12614_v9 = vld [vmem:[#allocation33_spill] sm:$0xff] }
 0x446   : > { %v2980_v49 = vmin.f32 %v2928_v7, %v2932_v34  ;;  %v2981_v19 = vmin.f32 %v2930_v4, %v2934_v57  ;;  %vm12602_vm5 = vcmp.le.f32.partialorder %v8097_v56, %v8398_v42  ;;  %v2942_v41 = vsel %vm12603_vm1, %v12601_v29, 128.0 }
 0x447   : > { %v2941_v43 = vsel %vm12602_vm5, %v12601_v29, 128.0  ;;  %v2943_v55 = vsel %vm2911_vm4, %v12604_v59, 128.0  ;;  %v2944_v7 = vsel %vm2912_vm3, %v12604_v59, 128.0  ;;  %v2961_v57 = vmin.f32 %v2959_v30, %v2935_v0 }
 0x448   : > { %v2962_v56 = vmin.f32 %v2960_v63, %v2937_v21  ;;  %v2982_v17 = vmin.f32 %v2980_v49, %v2936_v22  ;;  %v2983_v4 = vmin.f32 %v2981_v19, %v2938_v36  ;;  %v2945_v34 = vsel %vm12608_vm7, %v12607_v46, 128.0  ;;  %v12613_v19 = vld [vmem:[#allocation84_spill] sm:$0xff] }
 0x449   : > { %vm12609_vm4 = vcmp.le.f32.partialorder %v8113_v2, %v8400_v11  ;;  %vm12611_vm3 = vcmp.le.f32.partialorder %v8165_v15, %v8398_v42  ;;  %vm12612_vm8 = vcmp.le.f32.partialorder %v8167_v54, %v8400_v11  ;;  %v2963_v36 = vmin.f32 %v2961_v57, %v2939_v27  ;;  %v12620_v57 = vld [vmem:[#allocation71_spill] sm:$0xff] }
 0x44a   : > { %v2946_v3 = vsel %vm12609_vm4, %v12607_v46, 128.0  ;;  %v2947_v0 = vsel %vm12611_vm3, %v12610_v28, 128.0  ;;  %v2948_v21 = vsel %vm12612_vm8, %v12610_v28, 128.0  ;;  %v2964_v63 = vmin.f32 %v2962_v56, %v2941_v43  ;;  %v3049_v43 = vpop.permute.xlu1 %3048  ;;  %v8685_v56 = vpop.permute.xlu2 %3116 }
 0x44b   : > { %v2984_v30 = vmin.f32 %v2982_v17, %v2940_v5  ;;  %v2985_v60 = vmin.f32 %v2983_v4, %v2942_v41  ;;  %v2949_v2 = vsel %vm2917_vm2, %v12613_v19, 128.0  ;;  %v2950_v15 = vsel %vm2918_vm0, %v12613_v19, 128.0  ;;  %v12617_v41 = vld [vmem:[#allocation67_spill] sm:$0xff]  ;;  %12622 = vst [vmem:[#allocation146_spill] sm:$0xff] %v8685_v56 }
 0x44c   : > { %v2951_v54 = vsel %vm12615_vm9, %v12614_v9, 128.0  ;;  %v2952_v27 = vsel %vm12616_vm10, %v12614_v9, 128.0  ;;  %v2965_v22 = vmin.f32 %v2963_v36, %v2943_v55  ;;  %v2966_v5 = vmin.f32 %v2964_v63, %v2945_v34  ;;  %3494 = vperm.xlu1 %4852, %v12575_v10  }
 0x44d   : > { %v2986_v49 = vmin.f32 %v2984_v30, %v2944_v7  ;;  %v2987_v8 = vmin.f32 %v2985_v60, %v2946_v3  ;;  %vm12618_vm2 = vcmp.le.f32.partialorder %v8227_v14, %v8398_v42  ;;  %vm12619_vm11 = vcmp.le.f32.partialorder %v8229_v52, %v8400_v11  ;;  %v12621_v7 = vld [vmem:[#allocation20_spill] sm:$0xff]  ;;  %v8687_v3 = vpop.permute.xlu0 %3044 }
 0x44e   : > { %v2953_v6 = vsel %vm12618_vm2, %v12617_v41, 128.0  ;;  %v2954_v51 = vsel %vm12619_vm11, %v12617_v41, 128.0  ;;  %v2955_v1 = vsel %vm2923_vm14, %v12620_v57, 128.0  ;;  %v3083_v55 = vmul.f32 %v3037_v32, %v12447_v50  ;;  %4084 = vperm.xlu0 %4862, %v12621_v7  }
 0x44f   : > { %v2967_v17 = vmin.f32 %v2965_v22, %v2947_v0  ;;  %v2968_v4 = vmin.f32 %v2966_v5, %v2949_v2  ;;  %v2988_v14 = vmin.f32 %v2986_v49, %v2948_v21  ;;  %v2989_v34 = vmin.f32 %v2987_v8, %v2950_v15  ;;  %v12623_v0 = vld [vmem:[#allocation15_spill] sm:$0xff] }
 0x450   : > { %v3084_v52 = vmul.f32 %v3037_v32, %v12272_v53  ;;  %v3167_v36 = vmul.f32 %v3109_v23, %v6062_v45  ;;  %v3168_v63 = vmul.f32 %v3109_v23, %v6066_v39  ;;  %v3089_v48 = vmul.f32 %v3049_v43, %v12447_v50  ;;  %3498 = vperm.xlu2 %4853, %v12623_v0   ;;  %v12624_v32 = vld [vmem:[#allocation63_spill] sm:$0xff] }
 0x451   : > { %v2969_v30 = vmin.f32 %v2967_v17, %v2951_v54  ;;  %v2970_v60 = vmin.f32 %v2968_v4, %v2953_v6  ;;  %v2990_v41 = vmin.f32 %v2988_v14, %v2952_v27  ;;  %v2991_v56 = vmin.f32 %v2989_v34, %v2954_v51  ;;  %v12636_v34 = vld [vmem:[#allocation98_spill] sm:$0xff] }
 0x452   : > { %v2956_v21 = vsel %vm2924_vm6, %v12620_v57, 128.0  ;;  %v2957_v23 = vsel %vm12625_vm12, %v12624_v32, 128.0  ;;  %v2958_v2 = vsel %vm12626_vm13, %v12624_v32, 128.0  ;;  %v3090_v15 = vmul.f32 %v3049_v43, %v12272_v53  ;;  %v3061_v43 = vpop.permute.xlu1 %3060 }
 0x453   : > { %v2971_v54 = vmin.f32 %v2969_v30, %v2955_v1  ;;  %v2972_v27 = vmin.f32 %v2970_v60, %v2957_v23  ;;  %v2992_v22 = vmin.f32 %v2990_v41, %v2956_v21  ;;  %v2993_v5 = vmin.f32 %v2991_v56, %v2958_v2  ;;  %v12639_v30 = vld [vmem:[#allocation106_spill] sm:$0xff]  ;;  %v12640_v60 = vld [vmem:[#allocation148_spill] sm:$0xff]  ;;  %v12642_v23 = vld [vmem:[#allocation81_spill] sm:$0xff] }
 0x454   : > { %v3186_v35 = vmul.f32 %v8268_v13, %v6066_v39  ;;  %v8711_v49 = vadd.f32 %v8480_v20, %v3083_v55  ;;  %v8714_v24 = vadd.f32 %v8484_v62, %v3084_v52  ;;  %v8717_v8 = vadd.f32 %v3167_v36, %v8505_v25  ;;  %v12632_v13 = vld [vmem:[#allocation179_spill] sm:$0xff]  ;;  %v12633_v25 = vld [vmem:[#allocation22_spill] sm:$0xff]  ;;  %v3129_v55 = vpop.permute.xlu2 %3128  ;;  %3506 = vperm.xlu1 %4852, %v12599_v40  }
 0x455   : > { %v8719_v58 = vmin.f32 %v2971_v54, %v2972_v27  ;;  %v8721_v6 = vmin.f32 %v2992_v22, %v2993_v5  ;;  %v8724_v41 = vadd.f32 %v3168_v63, %v8521_v26  ;;  %v8727_v51 = vadd.f32 %v8502_v31, %v3089_v48  ;;  %v12641_v21 = vld [vmem:[#allocation174_spill] sm:$0xff]  ;;  %v12645_v54 = vld [vmem:[#allocation183_spill] sm:$0xff]  ;;  %v12646_v27 = vld [vmem:[#allocation25_spill] sm:$0xff]  ;;  %v8778_v40 = vpop.permute.xlu0 %3056 }
 0x456   : > { %12627 = vst [vmem:[#allocation131_spill] sm:$0xff] %v8717_v8  ;;  %v3191_v20 = vmul.f32 %v12632_v13, %v6062_v45  ;;  %v3095_v62 = vmul.f32 %v3061_v43, %v12447_v50  ;;  %v3096_v1 = vmul.f32 %v3061_v43, %v12272_v53  ;;  %4100 = vperm.xlu0 %4862, %v12633_v25   ;;  %v12647_v5 = vld [vmem:[#allocation13_spill] sm:$0xff]  ;;  %v12690_v8 = vld [vmem:[#allocation10_spill] sm:$0xff] }
 0x457   : > { %12628 = vst [vmem:[#allocation61_spill] sm:$0xff] %v8719_v58  ;;  %v8734_v56 = vadd.f32 %v3186_v35, %v3090_v15  ;;  %v12635_v26 = vmin.f32 %v8357_v47, %v8393_v61  ;;  %v2388_v31 = vmin.f32 %v8444_v38, %v8468_v12  ;;  %v3192_v4 = vmul.f32 %v12632_v13, %v6066_v39  ;;  %v12638_v38 = vld [vmem:[#allocation96_spill] sm:$0xff]  ;;  %v12649_v43 = vld [vmem:[#allocation149_spill] sm:$0xff]  ;;  %v12650_v13 = vld [vmem:[#allocation115_spill] sm:$0xff] }
 0x458   : > { %12629 = vst [vmem:[#allocation133_spill] sm:$0xff] %v8721_v6  ;;  %v3081_v14 = vmul.f32 %v8600_v44, %v12447_v50  ;;  %vm1961_vm0 = vcmp.le.f32.partialorder %v12636_v34, %v7820_v37  ;;  %v3082_v52 = vmul.f32 %v8600_v44, %v12272_v53  ;;  %v3177_v36 = vmul.f32 %v3129_v55, %v6062_v45  ;;  %v12644_v44 = vld [vmem:[#allocation112_spill] sm:$0xff] }
 0x459   : > { %12630 = vst [vmem:[#allocation102_spill] sm:$0xff] %v8724_v41  ;;  %v2406_v17 = vmin.f32 %v12635_v26, %v8453_v18  ;;  %v3178_v63 = vmul.f32 %v3129_v55, %v6066_v39  ;;  %v8753_v48 = vadd.f32 %v3191_v20, %v3095_v62  ;;  %vm1962_vm14 = vcmp.le.f32.partialorder %v12639_v30, %v12638_v38  ;;  %v12651_v20 = vld [vmem:[#allocation104_spill] sm:$0xff]  ;;  %v12653_v55 = vld [vmem:[#allocation65_spill] sm:$0xff]  ;;  %v12737_v18 = vld [vmem:[#allocation158_spill] sm:$0xff] }
 0x45a   : > { %12631 = vst [vmem:[#allocation202_spill] sm:$0xff] %v8727_v51  ;;  %vm1963_vm15 = vcmp.le.f32.partialorder %v12640_v60, %v7820_v37  ;;  %v8761_v2 = vsub.f32 %v12642_v23, %v12641_v21  ;;  %v2253_v15 = vmul.f32 %v12644_v44, %v6062_v45  ;;  %v2387_v22 = vmin.f32 %v12646_v27, %v12645_v54  ;;  %v12654_v26 = vld [vmem:[#allocation176_spill] sm:$0xff]  ;;  %v12657_v27 = vld [vmem:[#allocation125_spill] sm:$0xff] }
 0x45b   : > { %12634 = vst [vmem:[#allocation46_spill] sm:$0xff] %v8734_v56  ;;  %3510 = vperm.xlu2 %4853, %v12647_v5   ;;  %v8768_v35 = vadd.f32 %v3192_v4, %v3096_v1  ;;  %vm1964_vm6 = vcmp.le.f32.partialorder %v12649_v43, %v12638_v38  ;;  %v8774_v62 = vsub.f32 %v12651_v20, %v12650_v13  ;;  %v12658_v4 = vld [vmem:[#allocation140_spill] sm:$0xff]  ;;  %v12665_v56 = vld [vmem:[#allocation167_spill] sm:$0xff]  ;;  %v11574_v51 = vmov 14   ;;  %v12707_v43 = vld [vmem:[#allocation178_spill] sm:$0xff] }
 0x45c   : > { %12637 = vst [vmem:[#allocation56_spill] sm:$0xff] %v8753_v48  ;;  %v2409_v21 = vmin.f32 %v12654_v26, %v12653_v55  ;;  %v8780_v10 = vadd.f32 %v3177_v36, %v3081_v14  ;;  %v8782_v11 = vadd.f32 %v3178_v63, %v3082_v52  ;;  %v2408_v42 = vmin.f32 %v2406_v17, %v12657_v27  ;;  %v12659_v6 = vld [vmem:[#allocation92_spill] sm:$0xff]  ;;  %v12663_v48 = vld [vmem:[#allocation54_spill] sm:$0xff]  ;;  %v12666_v14 = vld [vmem:[#allocation29_spill] sm:$0xff] }
 0x45d   : > { %12643 = vst [vmem:[#allocation38_spill] sm:$0xff] %v8761_v2  ;;  %v2390_v1 = vmin.f32 %v2388_v31, %v8761_v2  ;;  %v8788_v58 = vsub.f32 %v12659_v6, %v12658_v4  ;;  %v12664_v26 = vld [vmem:[#allocation108_spill] sm:$0xff]  ;;  %v2280_v36 = vadd.f32 %v12666_v14, %v12665_v56  ;;  %v2254_v52 = vmul.f32 %v12644_v44, %v6066_v39  ;;  %v12669_v63 = vld [vmem:[#allocation35_spill] sm:$0xff]  ;;  %v12670_v4 = vld [vmem:[#allocation42_spill] sm:$0xff] }
 0x45e   : > { %12648 = vst [vmem:[#allocation164_spill] sm:$0xff] %v8768_v35  ;;  %v12661_v35 = vld [vmem:[#allocation198_spill] sm:$0xff]  ;;  %v2279_v55 = vadd.f32 %v12664_v26, %v12663_v48  ;;  %v12667_v17 = vld [vmem:[#allocation28_spill] sm:$0xff]  ;;  %v8813_v48 = vpop.permute.xlu1 %3104  ;;  %v12676_v14 = vld [vmem:[#allocation77_spill] sm:$0xff]  ;;  %4868 = vset.pattern.permute.xlu0 %v11574_v51  ;;  %v3087_v51 = vmul.f32 %v8687_v3, %v12447_v50  ;;  %3518 = vperm.xlu1 %4852, %v12621_v7  }
 0x45f   : > { %12652 = vst [vmem:[#allocation132_spill] sm:$0xff] %v8774_v62  ;;  %v8792_v13 = vsub.f32 %v12642_v23, %v12661_v35  ;;  %v8802_v31 = vsub.f32 %v12651_v20, %v12667_v17  ;;  %v2389_v23 = vmin.f32 %v2387_v22, %v8774_v62  ;;  %v12672_v35 = vld [vmem:[#allocation170_spill] sm:$0xff]  ;;  %v12675_v56 = vld [vmem:[#allocation124_spill] sm:$0xff]  ;;  %v8818_v44 = vsub.f32 %v12670_v4, %v12676_v14  ;;  %v3141_v22 = vpop.permute.xlu2 %3140 }
 0x460   : > { %12655 = vst [vmem:[#allocation93_spill] sm:$0xff] %v8780_v10  ;;  %v12673_v10 = vld [vmem:[#allocation86_spill] sm:$0xff]  ;;  %v2285_v26 = vadd.f32 %v2253_v15, %v12675_v56  ;;  %v12678_v17 = vld [vmem:[#allocation204_spill] sm:$0xff]  ;;  %v12681_v56 = vld [vmem:[#allocation91_spill] sm:$0xff] }
 0x461   : > { %12656 = vst [vmem:[#allocation135_spill] sm:$0xff] %v8782_v11  ;;  %v8806_v11 = vsub.f32 %v12670_v4, %v12669_v63  ;;  %v8811_v2 = vsub.f32 %v12673_v10, %v12672_v35  ;;  %v2411_v20 = vmin.f32 %v2409_v21, %v8792_v13  ;;  %v8823_v63 = vsub.f32 %v12659_v6, %v12678_v17  ;;  %v12680_v35 = vld [vmem:[#allocation141_spill] sm:$0xff]  ;;  %v12683_v14 = vld [vmem:[#allocation14_spill] sm:$0xff]  ;;  %v12685_v17 = vld [vmem:[#allocation147_spill] sm:$0xff] }
 0x462   : > { %12660 = vst [vmem:[#allocation27_spill] sm:$0xff] %v8788_v58  ;;  %vm1965_vm5 = vcmp.le.f32.partialorder %v12680_v35, %v7820_v37  ;;  %v2410_v62 = vmin.f32 %v2408_v42, %v8802_v31  ;;  %v2391_v15 = vmin.f32 %v2389_v23, %v8788_v58  ;;  %v8833_v21 = vsub.f32 %v12673_v10, %v12681_v56  ;;  %v12684_v6 = vld [vmem:[#allocation142_spill] sm:$0xff]  ;;  %v12686_v10 = vld [vmem:[#allocation199_spill] sm:$0xff]  ;;  %v12693_v7 = vld [vmem:[#allocation76_spill] sm:$0xff] }
 0x463   : > { %12662 = vst [vmem:[#allocation205_spill] sm:$0xff] %v8792_v13  ;;  %v2392_v4 = vmin.f32 %v2390_v1, %v8806_v11  ;;  %3952 = vperm.xlu0 %4868, %v12683_v14   ;;  %vm1966_vm1 = vcmp.le.f32.partialorder %v12684_v6, %v12638_v38  ;;  %vm1967_vm7 = vcmp.le.f32.partialorder %v12685_v17, %v7820_v37  ;;  %v12689_v13 = vld [vmem:[#allocation129_spill] sm:$0xff]  ;;  %v12701_v30 = vld [vmem:[#allocation188_spill] sm:$0xff]  ;;  %v12723_v35 = vld [vmem:[#allocation186_spill] sm:$0xff] }
 0x464   : > { %12668 = vst [vmem:[#allocation103_spill] sm:$0xff] %v8802_v31  ;;  %v3088_v42 = vmul.f32 %v8687_v3, %v12272_v53  ;;  %v3183_v1 = vmul.f32 %v3141_v22, %v6062_v45  ;;  %v3184_v23 = vmul.f32 %v3141_v22, %v6066_v39  ;;  %v2156_v56 = vmul.f32 %v12686_v10, %v12272_v53  ;;  %v12694_v10 = vld [vmem:[#allocation100_spill] sm:$0xff] }
 0x465   : > { %12671 = vst [vmem:[#allocation117_spill] sm:$0xff] %v8806_v11  ;;  %v12687_v11 = vld [vmem:[#allocation23_spill] sm:$0xff]  ;;  %v2286_v31 = vadd.f32 %v2254_v52, %v12689_v13  ;;  %v2394_v41 = vmin.f32 %v2392_v4, %v8811_v2  ;;  %3522 = vperm.xlu2 %4853, %v12690_v8   ;;  %v2412_v3 = vmin.f32 %v2410_v62, %v8823_v63  ;;  %v12696_v13 = vld [vmem:[#allocation120_spill] sm:$0xff]  ;;  %v12698_v62 = vld [vmem:[#allocation57_spill] sm:$0xff] }
 0x466   : > { %12674 = vst [vmem:[#allocation123_spill] sm:$0xff] %v8811_v2  ;;  %v8850_v58 = vsub.f32 %v12687_v11, %v2279_v55  ;;  %v2413_v27 = vmin.f32 %v2411_v20, %v8818_v44  ;;  %v8857_v12 = vadd.f32 %v3183_v1, %v3087_v51  ;;  %v8859_v22 = vadd.f32 %v3184_v23, %v3088_v42  ;;  %v12697_v52 = vld [vmem:[#allocation168_spill] sm:$0xff]  ;;  %v8883_v42 = vpop.permute.xlu0 %3232  ;;  %v12700_v1 = vld [vmem:[#allocation130_spill] sm:$0xff] }
 0x467   : > { %12677 = vst [vmem:[#allocation207_spill] sm:$0xff] %v8818_v44  ;;  %v1993_v55 = vsel %vm1961_vm0, %v12693_v7, 128.0  ;;  %v8866_v54 = vsub.f32 %v12694_v10, %v2285_v26  ;;  %v2283_v4 = vadd.f32 %v12697_v52, %v12696_v13  ;;  %v1994_v51 = vsel %vm1962_vm14, %v12693_v7, 128.0  ;;  %v12702_v13 = vld [vmem:[#allocation26_spill] sm:$0xff] }
 0x468   : > { %12679 = vst [vmem:[#allocation48_spill] sm:$0xff] %v8823_v63  ;;  %v2393_v2 = vmin.f32 %v2391_v15, %v8850_v58  ;;  %v1995_v20 = vsel %vm1963_vm15, %v12698_v62, 128.0  ;;  %v8880_v34 = vsub.f32 %v12687_v11, %v2280_v36  ;;  %v2415_v26 = vmin.f32 %v2413_v27, %v8833_v21  ;;  %v12704_v11 = vld [vmem:[#allocation152_spill] sm:$0xff]  ;;  %v12705_v27 = vld [vmem:[#allocation138_spill] sm:$0xff] }
 0x469   : > { %12682 = vst [vmem:[#allocation107_spill] sm:$0xff] %v8833_v21  ;;  %v1996_v15 = vsel %vm1964_vm6, %v12698_v62, 128.0  ;;  %v2019_v23 = vmin.f32 %v12701_v30, %v12700_v1  ;;  %v8892_v52 = vsub.f32 %v12702_v13, %v2283_v4  ;;  %v2396_v60 = vmin.f32 %v2394_v41, %v8866_v54  ;;  %v3153_v1 = vpop.permute.xlu2 %3152  ;;  %v12708_v4 = vld [vmem:[#allocation143_spill] sm:$0xff]  ;;  %v12709_v41 = vld [vmem:[#allocation145_spill] sm:$0xff]  ;;  %v12710_v30 = vld [vmem:[#allocation154_spill] sm:$0xff] }
 0x46a   : > { %12688 = vst [vmem:[#allocation206_spill] sm:$0xff] %v8850_v58  ;;  %vm1968_vm4 = vcmp.le.f32.partialorder %v12704_v11, %v12638_v38  ;;  %v2020_v36 = vmin.f32 %v12705_v27, %v1993_v55  ;;  %v2284_v21 = vadd.f32 %v12707_v43, %v2156_v56  ;;  %v2414_v58 = vmin.f32 %v2412_v3, %v8880_v34  ;;  %v12712_v55 = vld [vmem:[#allocation111_spill] sm:$0xff]  ;;  %v12718_v62 = vld [vmem:[#allocation128_spill] sm:$0xff] }
 0x46b   : > { %12691 = vst [vmem:[#allocation82_spill] sm:$0xff] %v8857_v12  ;;  %v8901_v12 = vsub.f32 %v12694_v10, %v2286_v31  ;;  %vm1969_vm3 = vcmp.le.f32.partialorder %v12708_v4, %v7820_v37  ;;  %vm1970_vm8 = vcmp.le.f32.partialorder %v12709_v41, %v12638_v38  ;;  %vm1971_vm9 = vcmp.le.f32.partialorder %v12710_v30, %v7820_v37  ;;  %v12713_v31 = vld [vmem:[#allocation136_spill] sm:$0xff]  ;;  %v12714_v27 = vld [vmem:[#allocation19_spill] sm:$0xff] }
 0x46c   : > { %12692 = vst [vmem:[#allocation105_spill] sm:$0xff] %v8859_v22  ;;  %v8895_v22 = vpop.permute.xlu1 %3112  ;;  %v2040_v10 = vmin.f32 %v12713_v31, %v12712_v55  ;;  %v2395_v56 = vmin.f32 %v2393_v2, %v8892_v52  ;;  %3972 = vperm.xlu0 %4868, %v12714_v27   ;;  %v3189_v3 = vmul.f32 %v3153_v1, %v6062_v45  ;;  %v12716_v55 = vld [vmem:[#allocation17_spill] sm:$0xff]  ;;  %v2002_v11 = vsel %vm1970_vm8, %v12601_v29, 128.0  ;;  %v12740_v4 = vld [vmem:[#allocation151_spill] sm:$0xff] }
 0x46d   : > { %12695 = vst [vmem:[#allocation64_spill] sm:$0xff] %v8866_v54  ;;  %v12711_v54 = vld [vmem:[#allocation159_spill] sm:$0xff]  ;;  %v3190_v43 = vmul.f32 %v3153_v1, %v6066_v39  ;;  %v2417_v44 = vmin.f32 %v2415_v26, %v8901_v12  ;;  %v3093_v63 = vmul.f32 %v8778_v40, %v12447_v50  ;;  %v3094_v8 = vmul.f32 %v8778_v40, %v12272_v53  ;;  %v12717_v2 = vld [vmem:[#allocation173_spill] sm:$0xff]  ;;  %v12719_v26 = vld [vmem:[#allocation62_spill] sm:$0xff] }
 0x46e   : > { %12699 = vst [vmem:[#allocation121_spill] sm:$0xff] %v8880_v34  ;;  %vm1972_vm10 = vcmp.le.f32.partialorder %v12711_v54, %v12638_v38  ;;  %v8920_v34 = vsub.f32 %v12702_v13, %v2284_v21  ;;  %3530 = vperm.xlu1 %4852, %v12716_v55   ;;  %v2041_v31 = vmin.f32 %v12717_v2, %v1994_v51  ;;  %v1997_v13 = vsel %vm1965_vm5, %v12719_v26, 128.0 }
 0x46f   : > { %12703 = vst [vmem:[#allocation139_spill] sm:$0xff] %v8892_v52  ;;  %v2397_v52 = vmin.f32 %v2395_v56, %v2396_v60  ;;  %v3067_v7 = vmul.f32 %v12718_v62, %v12447_v50  ;;  %v3068_v21 = vmul.f32 %v12718_v62, %v12272_v53  ;;  %3534 = vperm.xlu2 %4853, %v12633_v25   ;;  %v1998_v51 = vsel %vm1966_vm1, %v12719_v26, 128.0  ;;  %v12722_v60 = vld [vmem:[#allocation50_spill] sm:$0xff] }
 0x470   : > { %12706 = vst [vmem:[#allocation101_spill] sm:$0xff] %v8901_v12  ;;  %v2416_v40 = vmin.f32 %v2414_v58, %v8920_v34  ;;  %v8939_v1 = vadd.f32 %v3189_v3, %v3093_v63  ;;  %v8941_v55 = vadd.f32 %v3190_v43, %v3094_v8  ;;  %v8951_v62 = vsel %vm1967_vm7, %v12722_v60, 128.0  ;;  %v8965_v12 = vpop.permute.xlu0 %3252 }
 0x471   : > { %12715 = vst [vmem:[#allocation97_spill] sm:$0xff] %v8920_v34  ;;  %v3163_v56 = vmul.f32 %v12723_v35, %v6062_v45  ;;  %v3164_v58 = vmul.f32 %v12723_v35, %v6066_v39  ;;  %v8957_v63 = vmin.f32 %v2019_v23, %v1995_v20  ;;  %v8959_v8 = vmin.f32 %v2020_v36, %v1997_v13  ;;  %v12725_v34 = vld [vmem:[#allocation122_spill] sm:$0xff]  ;;  %v3229_v36 = vpop.permute.xlu2 %3228  ;;  %v12733_v35 = vld [vmem:[#allocation184_spill] sm:$0xff] }
 0x472   : > { %12720 = vst [vmem:[#allocation87_spill] sm:$0xff] %v8939_v1  ;;  %v8961_v3 = vmin.f32 %v2040_v10, %v1996_v15  ;;  %v2418_v6 = vmin.f32 %v2416_v40, %v2417_v44  ;;  %v8963_v43 = vmin.f32 %v2041_v31, %v1998_v51  ;;  %v2398_v2 = vrot.slane %v2397_v52, 4  ;;  %v12726_v44 = vld [vmem:[#allocation53_spill] sm:$0xff]  ;;  %v12727_v10 = vld [vmem:[#allocation155_spill] sm:$0xff]  ;;  %v12729_v31 = vld [vmem:[#allocation156_spill] sm:$0xff] }
 0x473   : > { %12721 = vst [vmem:[#allocation144_spill] sm:$0xff] %v8941_v55  ;;  %v3195_v17 = vadd.f32 %v3163_v56, %v3067_v7  ;;  %v3196_v1 = vadd.f32 %v3164_v58, %v3068_v21  ;;  %v3079_v25 = vmul.f32 %v12725_v34, %v12447_v50  ;;  %v3080_v20 = vmul.f32 %v12725_v34, %v12272_v53  ;;  %v12728_v7 = vld [vmem:[#allocation166_spill] sm:$0xff] }
 0x474   : > { %v3125_v55 = vpop.permute.xlu1 %3124  ;;  %12724 = vst [vmem:[#allocation114_spill] sm:$0xff] %v8965_v12  ;;  %vm1973_vm2 = vcmp.le.f32.partialorder %v12726_v44, %v7820_v37  ;;  %vm1974_vm11 = vcmp.le.f32.partialorder %v12727_v10, %v12638_v38  ;;  %vm1975_vm12 = vcmp.le.f32.partialorder %v12728_v7, %v7820_v37  ;;  %vm1976_vm13 = vcmp.le.f32.partialorder %v12729_v31, %v12638_v38 }
 0x475   : > { %v3175_v23 = vmul.f32 %v3125_v55, %v6062_v45  ;;  %v3176_v15 = vmul.f32 %v3125_v55, %v6066_v39  ;;  %v3165_v34 = vmul.f32 %v8813_v48, %v6062_v45  ;;  %v3166_v21 = vmul.f32 %v8813_v48, %v6066_v39  ;;  %v12730_v55 = vld [vmem:[#allocation18_spill] sm:$0xff] }
 0x476   : > { %3984 = vperm.xlu0 %4868, %v12730_v55   ;;  %v8986_v13 = vsub.f32 %v3229_v36, %v3195_v17  ;;  %v8988_v40 = vsub.f32 %v3229_v36, %v3196_v1  ;;  %v2419_v51 = vrot.slane %v2418_v6, 4  ;;  %v3069_v56 = vmul.f32 %v12733_v35, %v12447_v50  ;;  %v12738_v48 = vld [vmem:[#allocation162_spill] sm:$0xff] }
 0x477   : > { %v8992_v58 = vadd.f32 %v3175_v23, %v3079_v25  ;;  %v8994_v12 = vadd.f32 %v3176_v15, %v3080_v20  ;;  %v12736_v26 = vmov 13   ;;  %vm1977_vm0 = vcmp.le.f32.partialorder %v12737_v18, %v7820_v37  ;;  %v12739_v23 = vld [vmem:[#allocation12_spill] sm:$0xff] }
 0x478   : > { %12731 = vst [vmem:[#allocation137_spill] sm:$0xff] %v8986_v13  ;;  %4855 = vset.pattern.permute.xlu1 %v12736_v26  ;;  %vm1978_vm14 = vcmp.le.f32.partialorder %v12738_v48, %v12638_v38  ;;  %v2000_v1 = vsel %vm1968_vm4, %v12722_v60, 128.0  ;;  %v3070_v17 = vmul.f32 %v12733_v35, %v12272_v53  ;;  %v3169_v25 = vmul.f32 %v8895_v22, %v6062_v45  ;;  %v12741_v13 = vld [vmem:[#allocation203_spill] sm:$0xff] }
 0x479   : > { %12732 = vst [vmem:[#allocation118_spill] sm:$0xff] %v8988_v40  ;;  %v3170_v20 = vmul.f32 %v8895_v22, %v6066_v39  ;;  %4856 = vset.pattern.permute.xlu2 %v12736_v26  ;;  %3574 = vperm.xlu1 %4855, %v12739_v23   ;;  %v2001_v15 = vsel %vm1969_vm3, %v12601_v29, 128.0  ;;  %v2003_v36 = vsel %vm1971_vm9, %v12604_v59, 128.0  ;;  %v2004_v22 = vsel %vm1972_vm10, %v12604_v59, 128.0 }
 0x47a   : > { %12734 = vst [vmem:[#allocation95_spill] sm:$0xff] %v8992_v58  ;;  %3578 = vperm.xlu2 %4856, %v12683_v14   ;;  %v3073_v26 = vmul.f32 %v12740_v4, %v12447_v50  ;;  %v3074_v35 = vmul.f32 %v12740_v4, %v12272_v53  ;;  %v3197_v41 = vadd.f32 %v3165_v34, %v3069_v56  ;;  %v2005_v4 = vsel %vm1973_vm2, %v12607_v46, 128.0 }
 0x47b   : > { %12735 = vst [vmem:[#allocation116_spill] sm:$0xff] %v8994_v12  ;;  %v3198_v23 = vadd.f32 %v3166_v21, %v3070_v17  ;;  %v2023_v12 = vmin.f32 %v8957_v63, %v8951_v62  ;;  %v2024_v30 = vmin.f32 %v8959_v8, %v2001_v15  ;;  %v2399_v58 = vmin.f32 %v2397_v52, %v2398_v2  ;;  %v3241_v63 = vpop.permute.xlu2 %3240  ;;  %v12742_v52 = vld [vmem:[#allocation172_spill] sm:$0xff]  ;;  %v12743_v8 = vld [vmem:[#allocation169_spill] sm:$0xff]  ;;  %v9064_v17 = vpop.permute.xlu0 %3264 }
 0x47c   : > { %v2420_v29 = vmin.f32 %v2418_v6, %v2419_v51  ;;  %v2044_v54 = vmin.f32 %v8961_v3, %v2000_v1  ;;  %v2045_v59 = vmin.f32 %v8963_v43, %v2002_v11  ;;  %v3137_v14 = vpop.permute.xlu1 %3136  ;;  %v3201_v60 = vadd.f32 %v3169_v25, %v3073_v26  ;;  %v12744_v3 = vld [vmem:[#allocation16_spill] sm:$0xff]  ;;  %v12750_v51 = vld [vmem:[#allocation113_spill] sm:$0xff] }
 0x47d   : > { %v3202_v40 = vadd.f32 %v3170_v20, %v3074_v35  ;;  %v3085_v55 = vmul.f32 %v12741_v13, %v12447_v50  ;;  %v3086_v34 = vmul.f32 %v12741_v13, %v12272_v53  ;;  %v3181_v21 = vmul.f32 %v3137_v14, %v6062_v45 }
 0x47e   : > { %v3182_v62 = vmul.f32 %v3137_v14, %v6066_v39  ;;  %vm1979_vm15 = vcmp.le.f32.partialorder %v12742_v52, %v7820_v37  ;;  %vm1981_vm6 = vcmp.le.f32.partialorder %v12743_v8, %v7820_v37  ;;  %3996 = vperm.xlu0 %4868, %v12744_v3   ;;  %v9051_v6 = vsub.f32 %v8883_v42, %v3197_v41  ;;  %v12749_v14 = vld [vmem:[#allocation153_spill] sm:$0xff] }
 0x47f   : > { %v9054_v43 = vsub.f32 %v8883_v42, %v3198_v23  ;;  %v9056_v2 = vsub.f32 %v3241_v63, %v3201_v60  ;;  %v9058_v13 = vsub.f32 %v3241_v63, %v3202_v40  ;;  %vm1980_vm5 = vcmp.le.f32.partialorder %v12749_v14, %v12638_v38  ;;  %v12751_v42 = vld [vmem:[#allocation157_spill] sm:$0xff]  ;;  %v12752_v60 = vld [vmem:[#allocation160_spill] sm:$0xff]  ;;  %v12753_v40 = vld [vmem:[#allocation43_spill] sm:$0xff] }
 0x480   : > { %12745 = vst [vmem:[#allocation180_spill] sm:$0xff] %v9051_v6  ;;  %vm1982_vm1 = vcmp.le.f32.partialorder %v12750_v51, %v12638_v38  ;;  %v2400_v56 = vrot.slane %v2399_v58, 2  ;;  %v2421_v1 = vrot.slane %v2420_v29, 2  ;;  %v9066_v25 = vadd.f32 %v3181_v21, %v3085_v55  ;;  %v12754_v21 = vld [vmem:[#allocation190_spill] sm:$0xff] }
 0x481   : > { %12746 = vst [vmem:[#allocation189_spill] sm:$0xff] %v9054_v43  ;;  %v9068_v20 = vadd.f32 %v3182_v62, %v3086_v34  ;;  %vm1983_vm7 = vcmp.le.f32.partialorder %v12751_v42, %v7820_v37  ;;  %vm1984_vm4 = vcmp.le.f32.partialorder %v12752_v60, %v12638_v38  ;;  %v3077_v23 = vmul.f32 %v12753_v40, %v12447_v50 }
 0x482   : > { %12747 = vst [vmem:[#allocation196_spill] sm:$0xff] %v9056_v2  ;;  %v3078_v15 = vmul.f32 %v12753_v40, %v12272_v53  ;;  %v3324_v11 = vmin.f32 %v9051_v6, %v9056_v2  ;;  %v3345_v55 = vmin.f32 %v9054_v43, %v9058_v13  ;;  %3582 = vperm.xlu1 %4855, %v12605_v16   ;;  %v2006_v26 = vsel %vm1974_vm11, %v12607_v46, 128.0  ;;  %v12755_v16 = vld [vmem:[#allocation197_spill] sm:$0xff] }
 0x483   : > { %12748 = vst [vmem:[#allocation187_spill] sm:$0xff] %v9058_v13  ;;  %v2007_v35 = vsel %vm1975_vm12, %v12610_v28, 128.0  ;;  %v2008_v41 = vsel %vm1976_vm13, %v12610_v28, 128.0  ;;  %3586 = vperm.xlu2 %4856, %v12606_v33   ;;  %v2025_v34 = vmin.f32 %v2023_v12, %v2003_v36  ;;  %v2026_v44 = vmin.f32 %v2024_v30, %v2005_v4  ;;  %v3249_v43 = vpop.permute.xlu2 %3248 }
 0x484   : > { %v3173_v62 = vmul.f32 %v12754_v21, %v6062_v45  ;;  %v3174_v10 = vmul.f32 %v12754_v21, %v6066_v39  ;;  %v2009_v7 = vsel %vm1977_vm0, %v12613_v19, 128.0  ;;  %v2010_v31 = vsel %vm1978_vm14, %v12613_v19, 128.0  ;;  %v3149_v30 = vpop.permute.xlu1 %3148 }
 0x485   : > { %v2046_v63 = vmin.f32 %v2044_v54, %v2004_v22  ;;  %v2047_v40 = vmin.f32 %v2045_v59, %v2006_v26  ;;  %v2401_v12 = vmin.f32 %v2399_v58, %v2400_v56  ;;  %v2422_v36 = vmin.f32 %v2420_v29, %v2421_v1  ;;  %v12756_v22 = vld [vmem:[#allocation41_spill] sm:$0xff] }
 0x486   : > { %v3205_v4 = vadd.f32 %v3173_v62, %v3077_v23  ;;  %v3206_v33 = vadd.f32 %v3174_v10, %v3078_v15  ;;  %v3091_v21 = vmul.f32 %v12755_v16, %v12447_v50  ;;  %v3092_v13 = vmul.f32 %v12755_v16, %v12272_v53  ;;  %4172 = vperm.xlu0 %4868, %v12756_v22   ;;  %v12786_v22 = vld [vmem:[#allocation94_spill] sm:$0xff] }
 0x487   : > { %v3187_v18 = vmul.f32 %v3149_v30, %v6062_v45  ;;  %v3188_v2 = vmul.f32 %v3149_v30, %v6066_v39  ;;  %v2027_v48 = vmin.f32 %v2025_v34, %v2007_v35  ;;  %v2028_v6 = vmin.f32 %v2026_v44, %v2009_v7  ;;  %v12761_v35 = vld [vmem:[#allocation32_spill] sm:$0xff] }
 0x488   : > { %v9119_v59 = vsub.f32 %v3249_v43, %v3205_v4  ;;  %v9121_v29 = vsub.f32 %v3249_v43, %v3206_v33  ;;  %v2048_v58 = vmin.f32 %v2046_v63, %v2008_v41  ;;  %v2049_v54 = vmin.f32 %v2047_v40, %v2010_v31  ;;  %v12762_v33 = vld [vmem:[#allocation110_spill] sm:$0xff]  ;;  %v12765_v31 = vld [vmem:[#allocation39_spill] sm:$0xff] }
 0x489   : > { %v9123_v56 = vadd.f32 %v3187_v18, %v3091_v21  ;;  %v9125_v1 = vadd.f32 %v3188_v2, %v3092_v13  ;;  %v2402_v16 = vrot.slane %v2401_v12, 1  ;;  %v2423_v23 = vrot.slane %v2422_v36, 1  ;;  %v12763_v2 = vld [vmem:[#allocation67_spill] sm:$0xff] }
 0x48a   : > { %12757 = vst [vmem:[#allocation181_spill] sm:$0xff] %v9119_v59  ;;  %v9128_v15 = vmin.f32 %v3324_v11, %v9119_v59  ;;  %v9131_v26 = vmin.f32 %v3345_v55, %v9121_v29  ;;  %3594 = vperm.xlu1 %4855, %v12623_v0   ;;  %vm1985_vm3 = vcmp.le.f32.partialorder %v12761_v35, %v7820_v37  ;;  %v2011_v43 = vsel %vm1979_vm15, %v12614_v9, 128.0  ;;  %v9146_v11 = vpop.permute.xlu0 %3276  ;;  %v12770_v35 = vld [vmem:[#allocation127_spill] sm:$0xff]  ;;  %v12793_v37 = vld [vmem:[#allocation202_spill] sm:$0xff] }
 0x48b   : > { %12758 = vst [vmem:[#allocation182_spill] sm:$0xff] %v9121_v29  ;;  %vm1986_vm8 = vcmp.le.f32.partialorder %v12762_v33, %v12638_v38  ;;  %v2013_v13 = vsel %vm1981_vm6, %v12763_v2, 128.0  ;;  %3598 = vperm.xlu2 %4856, %v12714_v27   ;;  %v2012_v55 = vsel %vm1980_vm5, %v12614_v9, 128.0  ;;  %v2014_v52 = vsel %vm1982_vm1, %v12763_v2, 128.0  ;;  %v3261_v4 = vpop.permute.xlu2 %3260  ;;  %v12773_v33 = vld [vmem:[#allocation55_spill] sm:$0xff]  ;;  %v12792_v38 = vld [vmem:[#allocation60_spill] sm:$0xff] }
 0x48c   : > { %12759 = vst [vmem:[#allocation191_spill] sm:$0xff] %v9123_v56  ;;  %v9157_v41 = vmin.f32 %v2027_v48, %v2011_v43  ;;  %v9159_v34 = vmin.f32 %v2028_v6, %v2013_v13  ;;  %v9165_v8 = vsel %vm1983_vm7, %v12620_v57, 128.0  ;;  %v9171_v14 = vsel %vm1984_vm4, %v12620_v57, 128.0  ;;  %v3161_v7 = vpop.permute.xlu1 %3160  ;;  %v12774_v43 = vld [vmem:[#allocation45_spill] sm:$0xff]  ;;  %v12775_v13 = vld [vmem:[#allocation18_spill] sm:$0xff] }
 0x48d   : > { %12760 = vst [vmem:[#allocation185_spill] sm:$0xff] %v9125_v1  ;;  %v9173_v44 = vmin.f32 %v2048_v58, %v2012_v55  ;;  %v9175_v51 = vmin.f32 %v2049_v54, %v2014_v52  ;;  %v9178_v62 = vsel %vm1985_vm3, %v12624_v32, 128.0  ;;  %v9181_v6 = vsel %vm1986_vm8, %v12624_v32, 128.0  ;;  %v12776_v55 = vld [vmem:[#allocation161_spill] sm:$0xff]  ;;  %v12777_v52 = vld [vmem:[#allocation200_spill] sm:$0xff]  ;;  %v12816_v32 = vld [vmem:[#allocation95_spill] sm:$0xff] }
 0x48e   : > { %12764 = vst [vmem:[#allocation30_spill] sm:$0xff] %v9146_v11  ;;  %v9183_v10 = vmin.f32 %v2401_v12, %v2402_v16  ;;  %v9185_v42 = vmin.f32 %v2422_v36, %v2423_v23  ;;  %v3097_v60 = vmul.f32 %v12765_v31, %v12447_v50  ;;  %v3098_v63 = vmul.f32 %v12765_v31, %v12272_v53  ;;  %v12766_v36 = vld [vmem:[#allocation52_spill] sm:$0xff]  ;;  %v12769_v23 = vld [vmem:[#allocation150_spill] sm:$0xff] }
 0x48f   : > { %v3193_v40 = vmul.f32 %v3161_v7, %v6062_v45  ;;  %v3194_v30 = vmul.f32 %v3161_v7, %v6066_v39  ;;  %4192 = vperm.xlu0 %4868, %v12766_v36   ;;  %v9199_v18 = vsub.f32 %v3261_v4, %v8711_v49  ;;  %v9202_v48 = vsub.f32 %v3261_v4, %v8714_v24  ;;  %v12771_v49 = vld [vmem:[#allocation134_spill] sm:$0xff]  ;;  %v12772_v24 = vld [vmem:[#allocation177_spill] sm:$0xff]  ;;  %v12779_v31 = vld [vmem:[#allocation88_spill] sm:$0xff] }
 0x490   : > { %vm2425_vm9 = vcmp.le.f32.partialorder %v12769_v23, %v9183_v10  ;;  %vm2427_vm10 = vcmp.le.f32.partialorder %v12770_v35, %v9183_v10  ;;  %vm2429_vm2 = vcmp.le.f32.partialorder %v12771_v49, %v9183_v10  ;;  %vm2431_vm11 = vcmp.le.f32.partialorder %v12772_v24, %v9183_v10  ;;  %v12778_v7 = vld [vmem:[#allocation109_spill] sm:$0xff]  ;;  %v12782_v4 = vld [vmem:[#allocation70_spill] sm:$0xff]  ;;  %v12783_v23 = vld [vmem:[#allocation76_spill] sm:$0xff] }
 0x491   : > { %v9208_v54 = vadd.f32 %v3193_v40, %v3097_v60  ;;  %v9210_v16 = vadd.f32 %v3194_v30, %v3098_v63  ;;  %vm2426_vm12 = vcmp.le.f32.partialorder %v8357_v47, %v9185_v42  ;;  %vm2428_vm13 = vcmp.le.f32.partialorder %v12773_v33, %v9185_v42  ;;  %v12780_v60 = vld [vmem:[#allocation47_spill] sm:$0xff]  ;;  %v12781_v40 = vld [vmem:[#allocation37_spill] sm:$0xff]  ;;  %v12815_v11 = vld [vmem:[#allocation164_spill] sm:$0xff] }
 0x492   : > { %3606 = vperm.xlu1 %4855, %v12647_v5   ;;  %vm2430_vm0 = vcmp.le.f32.partialorder %v8393_v61, %v9185_v42  ;;  %vm2432_vm14 = vcmp.le.f32.partialorder %v12774_v43, %v9185_v42  ;;  %vm2433_vm15 = vcmp.le.f32.partialorder %v12776_v55, %v9183_v10  ;;  %vm2434_vm6 = vcmp.le.f32.partialorder %v12777_v52, %v9185_v42  ;;  %v9242_v49 = vpop.permute.xlu0 %3288  ;;  %v12785_v24 = vld [vmem:[#allocation183_spill] sm:$0xff]  ;;  %v12794_v61 = vld [vmem:[#allocation46_spill] sm:$0xff] }
 0x493   : > { %12767 = vst [vmem:[#allocation72_spill] sm:$0xff] %v9208_v54  ;;  %3610 = vperm.xlu2 %4856, %v12775_v13   ;;  %vm2435_vm5 = vcmp.le.f32.partialorder %v12778_v7, %v9183_v10  ;;  %vm2436_vm1 = vcmp.le.f32.partialorder %v12779_v31, %v9185_v42  ;;  %v2457_v63 = vsel %vm2425_vm9, %v12780_v60, 128.0  ;;  %v2459_v30 = vsel %vm2427_vm10, %v12781_v40, 128.0  ;;  %v12787_v13 = vld [vmem:[#allocation125_spill] sm:$0xff]  ;;  %v12788_v5 = vld [vmem:[#allocation131_spill] sm:$0xff]  ;;  %v12795_v43 = vld [vmem:[#allocation146_spill] sm:$0xff] }
 0x494   : > { %12768 = vst [vmem:[#allocation119_spill] sm:$0xff] %v9210_v16  ;;  %v2461_v36 = vsel %vm2429_vm2, %v12782_v4, 128.0  ;;  %v2463_v35 = vsel %vm2431_vm11, %v12783_v23, 128.0  ;;  %vm2437_vm7 = vcmp.le.f32.partialorder %v12785_v24, %v9183_v10  ;;  %vm2439_vm4 = vcmp.le.f32.partialorder %v12786_v22, %v9183_v10  ;;  %v3237_v12 = vpop.permute.xlu1 %3236  ;;  %v12805_v55 = vld [vmem:[#allocation38_spill] sm:$0xff]  ;;  %v12806_v7 = vld [vmem:[#allocation205_spill] sm:$0xff]  ;;  %v12807_v54 = vld [vmem:[#allocation27_spill] sm:$0xff] }
 0x495   : > { %12784 = vst [vmem:[#allocation34_spill] sm:$0xff] %v9242_v49  ;;  %v2458_v58 = vsel %vm2426_vm12, %v12780_v60, 128.0  ;;  %v2460_v21 = vsel %vm2428_vm13, %v12781_v40, 128.0  ;;  %vm2438_vm3 = vcmp.le.f32.partialorder %v12787_v13, %v9185_v42  ;;  %v2462_v27 = vsel %vm2430_vm0, %v12782_v4, 128.0  ;;  %v12790_v60 = vld [vmem:[#allocation102_spill] sm:$0xff]  ;;  %v3273_v40 = vpop.permute.xlu2 %3272  ;;  %v12812_v52 = vld [vmem:[#allocation207_spill] sm:$0xff] }
 0x496   : > { %v2464_v47 = vsel %vm2432_vm14, %v12783_v23, 128.0  ;;  %v9267_v0 = vsub.f32 %v3237_v12, %v12788_v5  ;;  %v9270_v33 = vsub.f32 %v3237_v12, %v12790_v60  ;;  %v2489_v29 = vmin.f32 %v2457_v63, %v2461_v36  ;;  %v12796_v12 = vld [vmem:[#allocation137_spill] sm:$0xff]  ;;  %v12797_v63 = vld [vmem:[#allocation118_spill] sm:$0xff]  ;;  %v12813_v22 = vld [vmem:[#allocation75_spill] sm:$0xff] }
 0x497   : > { %v2490_v59 = vmin.f32 %v2459_v30, %v2463_v35  ;;  %4200 = vperm.xlu0 %4868, %v12792_v38   ;;  %v9274_v16 = vsub.f32 %v3273_v40, %v12793_v37  ;;  %v9277_v4 = vsub.f32 %v3273_v40, %v12794_v61  ;;  %v3171_v23 = vmul.f32 %v12795_v43, %v6062_v45  ;;  %v12798_v36 = vld [vmem:[#allocation65_spill] sm:$0xff]  ;;  %v12799_v37 = vld [vmem:[#allocation132_spill] sm:$0xff]  ;;  %v12801_v61 = vld [vmem:[#allocation62_spill] sm:$0xff] }
 0x498   : > { %12789 = vst [vmem:[#allocation179_spill] sm:$0xff] %v9267_v0  ;;  %v3172_v5 = vmul.f32 %v12795_v43, %v6066_v39  ;;  %v3323_v60 = vmin.f32 %v12796_v12, %v9267_v0  ;;  %v3344_v30 = vmin.f32 %v12797_v63, %v9270_v33  ;;  %vm2440_vm8 = vcmp.le.f32.partialorder %v12798_v36, %v9185_v42  ;;  %v12800_v40 = vld [vmem:[#allocation57_spill] sm:$0xff]  ;;  %v12802_v0 = vld [vmem:[#allocation10_spill] sm:$0xff] }
 0x499   : > { %12791 = vst [vmem:[#allocation98_spill] sm:$0xff] %v9270_v33  ;;  %vm2441_vm9 = vcmp.le.f32.partialorder %v12799_v37, %v9183_v10  ;;  %v2465_v35 = vsel %vm2433_vm15, %v12800_v40, 128.0  ;;  %v2467_v43 = vsel %vm2435_vm5, %v12801_v61, 128.0  ;;  %v12803_v33 = vld [vmem:[#allocation103_spill] sm:$0xff]  ;;  %v2510_v63 = vmin.f32 %v2458_v58, %v2462_v27  ;;  %v12804_v39 = vld [vmem:[#allocation201_spill] sm:$0xff] }
 0x49a   : > { %3618 = vperm.xlu1 %4855, %v12802_v0   ;;  %vm2442_vm10 = vcmp.le.f32.partialorder %v12803_v33, %v9185_v42  ;;  %v2511_v12 = vmin.f32 %v2460_v21, %v2464_v47  ;;  %v3075_v45 = vmul.f32 %v12804_v39, %v12447_v50  ;;  %v3076_v38 = vmul.f32 %v12804_v39, %v12272_v53  ;;  %v12808_v27 = vld [vmem:[#allocation117_spill] sm:$0xff]  ;;  %v12814_v50 = vld [vmem:[#allocation56_spill] sm:$0xff] }
 0x49b   : > { %3622 = vperm.xlu2 %4856, %v12744_v3   ;;  %vm2443_vm2 = vcmp.le.f32.partialorder %v12805_v55, %v9183_v10  ;;  %vm2444_vm11 = vcmp.le.f32.partialorder %v12806_v7, %v9185_v42  ;;  %v2491_v0 = vmin.f32 %v2489_v29, %v2465_v35  ;;  %v2492_v49 = vmin.f32 %v2490_v59, %v2467_v43  ;;  %v12809_v29 = vld [vmem:[#allocation50_spill] sm:$0xff]  ;;  %v12810_v35 = vld [vmem:[#allocation85_spill] sm:$0xff]  ;;  %v9335_v43 = vpop.permute.xlu0 %3570  ;;  %v12824_v55 = vld [vmem:[#allocation51_spill] sm:$0xff] }
 0x49c   : > { %vm2445_vm12 = vcmp.le.f32.partialorder %v12807_v54, %v9183_v10  ;;  %vm2447_vm13 = vcmp.le.f32.partialorder %v12808_v27, %v9183_v10  ;;  %v3203_v21 = vadd.f32 %v3171_v23, %v3075_v45  ;;  %v3204_v58 = vadd.f32 %v3172_v5, %v3076_v38  ;;  %v3245_v38 = vpop.permute.xlu1 %3244  ;;  %v12811_v23 = vld [vmem:[#allocation48_spill] sm:$0xff]  ;;  %v12823_v37 = vld [vmem:[#allocation121_spill] sm:$0xff] }
 0x49d   : > { %v2466_v39 = vsel %vm2434_vm6, %v12800_v40, 128.0  ;;  %v2468_v47 = vsel %vm2436_vm1, %v12801_v61, 128.0  ;;  %v2469_v59 = vsel %vm2437_vm7, %v12809_v29, 128.0  ;;  %v2471_v45 = vsel %vm2439_vm4, %v12810_v35, 128.0  ;;  %v3285_v61 = vpop.permute.xlu2 %3284  ;;  %v12827_v33 = vld [vmem:[#allocation93_spill] sm:$0xff]  ;;  %v12831_v54 = vld [vmem:[#allocation64_spill] sm:$0xff] }
 0x49e   : > { %vm2446_vm0 = vcmp.le.f32.partialorder %v12811_v23, %v9185_v42  ;;  %vm2448_vm14 = vcmp.le.f32.partialorder %v12812_v52, %v9185_v42  ;;  %v2512_v5 = vmin.f32 %v2510_v63, %v2466_v39  ;;  %v2513_v31 = vmin.f32 %v2511_v12, %v2468_v47  ;;  %v12817_v63 = vld [vmem:[#allocation114_spill] sm:$0xff]  ;;  %v12818_v39 = vld [vmem:[#allocation116_spill] sm:$0xff] }
 0x49f   : > { %v9337_v3 = vsub.f32 %v3245_v38, %v3203_v21  ;;  %v9339_v24 = vsub.f32 %v3245_v38, %v3204_v58  ;;  %v2493_v40 = vmin.f32 %v2491_v0, %v2469_v59  ;;  %v2494_v53 = vmin.f32 %v2492_v49, %v2471_v45  ;;  %4224 = vperm.xlu0 %4868, %v12813_v22   ;;  %v12822_v45 = vld [vmem:[#allocation206_spill] sm:$0xff] }
 0x4a0   : > { %v9343_v1 = vsub.f32 %v3285_v61, %v12814_v50  ;;  %v9346_v56 = vsub.f32 %v3285_v61, %v12815_v11  ;;  %v9350_v12 = vsub.f32 %v12817_v63, %v12816_v32  ;;  %v9354_v21 = vsub.f32 %v12817_v63, %v12818_v39  ;;  %v12819_v32 = vld [vmem:[#allocation58_spill] sm:$0xff]  ;;  %v12825_v39 = vld [vmem:[#allocation123_spill] sm:$0xff] }
 0x4a1   : > { %v3325_v58 = vmin.f32 %v3323_v60, %v9337_v3  ;;  %v3346_v0 = vmin.f32 %v3344_v30, %v9339_v24  ;;  %v2470_v50 = vsel %vm2438_vm3, %v12809_v29, 128.0  ;;  %v2472_v11 = vsel %vm2440_vm8, %v12810_v35, 128.0  ;;  %v12820_v30 = vld [vmem:[#allocation22_spill] sm:$0xff]  ;;  %v12867_v35 = vld [vmem:[#allocation31_spill] sm:$0xff] }
 0x4a2   : > { %v2473_v49 = vsel %vm2441_vm9, %v12819_v32, 128.0  ;;  %v2475_v60 = vsel %vm2443_vm2, %v12607_v46, 128.0  ;;  %3630 = vperm.xlu1 %4855, %v12820_v30   ;;  %v2514_v61 = vmin.f32 %v2512_v5, %v2470_v50  ;;  %v2515_v13 = vmin.f32 %v2513_v31, %v2472_v11  ;;  %v12826_v5 = vld [vmem:[#allocation107_spill] sm:$0xff]  ;;  %v12832_v52 = vld [vmem:[#allocation74_spill] sm:$0xff] }
 0x4a3   : > { %v3327_v47 = vmin.f32 %v3325_v58, %v9350_v12  ;;  %v3348_v59 = vmin.f32 %v3346_v0, %v9354_v21  ;;  %v12821_v36 = vmov 12   ;;  %vm2449_vm15 = vcmp.le.f32.partialorder %v12822_v45, %v9183_v10  ;;  %v12830_v30 = vld [vmem:[#allocation139_spill] sm:$0xff]  ;;  %v12869_v29 = vld [vmem:[#allocation126_spill] sm:$0xff] }
 0x4a4   : > { %4858 = vset.pattern.permute.xlu2 %v12821_v36  ;;  %vm2450_vm6 = vcmp.le.f32.partialorder %v12823_v37, %v9185_v42  ;;  %v2495_v38 = vmin.f32 %v2493_v40, %v2473_v49  ;;  %v2496_v63 = vmin.f32 %v2494_v53, %v2475_v60  ;;  %vm2451_vm5 = vcmp.le.f32.partialorder %v12825_v39, %v9183_v10  ;;  %v3257_v11 = vpop.permute.xlu1 %3256  ;;  %v12841_v37 = vld [vmem:[#allocation82_spill] sm:$0xff] }
 0x4a5   : > { %3698 = vperm.xlu2 %4858, %v12824_v55   ;;  %vm2452_vm1 = vcmp.le.f32.partialorder %v12826_v5, %v9185_v42  ;;  %v9388_v31 = vmin.f32 %v3327_v47, %v9199_v18  ;;  %v9391_v58 = vmin.f32 %v3348_v59, %v9202_v48  ;;  %v2474_v40 = vsel %vm2442_vm10, %v12819_v32, 128.0  ;;  %v12828_v59 = vld [vmem:[#allocation135_spill] sm:$0xff]  ;;  %v9415_v7 = vpop.permute.xlu2 %3478  ;;  %v9421_v32 = vpop.permute.xlu0 %3590 }
 0x4a6   : > { %v2476_v53 = vsel %vm2444_vm11, %v12607_v46, 128.0  ;;  %v2477_v0 = vsel %vm2445_vm12, %v12610_v28, 128.0  ;;  %v2479_v50 = vsel %vm2447_vm13, %v12613_v19, 128.0  ;;  %v2516_v49 = vmin.f32 %v2514_v61, %v2474_v40  ;;  %12829 = vst [vmem:[#allocation106_spill] sm:$0xff] %v9415_v7  ;;  %v12852_v7 = vld [vmem:[#allocation66_spill] sm:$0xff] }
 0x4a7   : > { %v2517_v60 = vmin.f32 %v2515_v13, %v2476_v53  ;;  %v9410_v47 = vsub.f32 %v3257_v11, %v12827_v33  ;;  %v9413_v55 = vsub.f32 %v3257_v11, %v12828_v59  ;;  %vm2453_vm7 = vcmp.le.f32.partialorder %v12830_v30, %v9183_v10  ;;  %v12837_v33 = vld [vmem:[#allocation79_spill] sm:$0xff]  ;;  %v12838_v59 = vld [vmem:[#allocation97_spill] sm:$0xff] }
 0x4a8   : > { %vm2455_vm4 = vcmp.le.f32.partialorder %v12831_v54, %v9183_v10  ;;  %v2497_v46 = vmin.f32 %v2495_v38, %v2477_v0  ;;  %v2498_v27 = vmin.f32 %v2496_v63, %v2479_v50  ;;  %v9425_v61 = vsub.f32 %v9064_v17, %v9066_v25  ;;  %v12846_v54 = vld [vmem:[#allocation185_spill] sm:$0xff] }
 0x4a9   : > { %v9429_v13 = vsub.f32 %v9064_v17, %v9068_v20  ;;  %v3328_v40 = vmin.f32 %v9128_v15, %v9410_v47  ;;  %v3349_v53 = vmin.f32 %v9131_v26, %v9413_v55  ;;  %v2478_v38 = vsel %vm2446_vm0, %v12610_v28, 128.0 }
 0x4aa   : > { %v2480_v25 = vsel %vm2448_vm14, %v12613_v19, 128.0  ;;  %v2481_v17 = vsel %vm2449_vm15, %v12614_v9, 128.0  ;;  %v2483_v20 = vsel %vm2451_vm5, %v12763_v2, 128.0  ;;  %4859 = vset.pattern.permute.xlu1 %v12821_v36  ;;  %v2518_v15 = vmin.f32 %v2516_v49, %v2478_v38  ;;  %v12842_v38 = vld [vmem:[#allocation105_spill] sm:$0xff] }
 0x4ab   : > { %v2519_v26 = vmin.f32 %v2517_v60, %v2480_v25  ;;  %v3330_v23 = vmin.f32 %v3328_v40, %v9425_v61  ;;  %v3351_v63 = vmin.f32 %v3349_v53, %v9429_v13  ;;  %3706 = vperm.xlu1 %4859, %v12832_v52   ;;  %v12833_v0 = vmin.f32 %v9159_v34, %v9178_v62  ;;  %v12839_v34 = vld [vmem:[#allocation101_spill] sm:$0xff] }
 0x4ac   : > { %v12834_v45 = vmin.f32 %v9157_v41, %v9165_v8  ;;  %v12835_v39 = vmin.f32 %v9175_v51, %v9181_v6  ;;  %v12836_v36 = vmin.f32 %v9173_v44, %v9171_v14  ;;  %v2499_v49 = vmin.f32 %v2497_v46, %v2481_v17  ;;  %v12840_v51 = vld [vmem:[#allocation63_spill] sm:$0xff]  ;;  %v3269_v6 = vpop.permute.xlu1 %3268 }
 0x4ad   : > { %v2500_v60 = vmin.f32 %v2498_v27, %v2483_v20  ;;  %3710 = vperm.xlu2 %4858, %v12837_v33   ;;  %vm2454_vm3 = vcmp.le.f32.partialorder %v12838_v59, %v9185_v42  ;;  %vm2456_vm8 = vcmp.le.f32.partialorder %v12839_v34, %v9185_v42  ;;  %v3332_v41 = vmin.f32 %v3330_v23, %v9274_v16  ;;  %v9496_v30 = vpop.permute.xlu2 %3490 }
 0x4ae   : > { %v2033_v50 = vmin.f32 %v12834_v45, %v12833_v0  ;;  %v2054_v11 = vmin.f32 %v12836_v36, %v12835_v39  ;;  %v3353_v8 = vmin.f32 %v3351_v63, %v9277_v4  ;;  %v2482_v14 = vsel %vm2450_vm6, %v12614_v9, 128.0  ;;  %12843 = vst [vmem:[#allocation148_spill] sm:$0xff] %v9496_v30  ;;  %v12844_v63 = vld [vmem:[#allocation191_spill] sm:$0xff]  ;;  %v12845_v0 = vld [vmem:[#allocation30_spill] sm:$0xff]  ;;  %v12847_v36 = vld [vmem:[#allocation24_spill] sm:$0xff] }
 0x4af   : > { %v2484_v46 = vsel %vm2452_vm1, %v12763_v2, 128.0  ;;  %v2485_v44 = vsel %vm2453_vm7, %v12620_v57, 128.0  ;;  %v2487_v62 = vsel %vm2455_vm4, %v12840_v51, 128.0  ;;  %v2520_v27 = vmin.f32 %v2518_v15, %v2482_v14  ;;  %v12863_v2 = vld [vmem:[#allocation60_spill] sm:$0xff] }
 0x4b0   : > { %v2521_v40 = vmin.f32 %v2519_v26, %v2484_v46  ;;  %v9491_v53 = vsub.f32 %v3269_v6, %v12841_v37  ;;  %v9494_v25 = vsub.f32 %v3269_v6, %v12842_v38  ;;  %v2034_v5 = vrot.slane %v2033_v50, 4  ;;  %v12849_v38 = vld [vmem:[#allocation59_spill] sm:$0xff] }
 0x4b1   : > { %v2055_v17 = vrot.slane %v2054_v11, 4  ;;  %v2501_v20 = vmin.f32 %v2499_v49, %v2485_v44  ;;  %v2502_v23 = vmin.f32 %v2500_v60, %v2487_v62  ;;  %v9500_v45 = vsub.f32 %v12845_v0, %v12844_v63  ;;  %v12848_v49 = vld [vmem:[#allocation175_spill] sm:$0xff] }
 0x4b2   : > { %v9504_v15 = vsub.f32 %v12845_v0, %v12846_v54  ;;  %v3331_v26 = vmin.f32 %v9388_v31, %v9491_v53  ;;  %v3352_v39 = vmin.f32 %v9391_v58, %v9494_v25  ;;  %v1566_v14 = vrot.slane %v12847_v36, 2  ;;  %v9520_v31 = vpop.permute.xlu0 %3602  ;;  %v12850_v63 = vld [vmem:[#allocation163_spill] sm:$0xff] }
 0x4b3   : > { %v1587_v60 = vrot.slane %v12848_v49, 2  ;;  %v2486_v46 = vsel %vm2454_vm3, %v12620_v57, 128.0  ;;  %v2488_v44 = vsel %vm2456_vm8, %v12840_v51, 128.0  ;;  %3714 = vperm.xlu1 %4859, %v12849_v38   ;;  %v12851_v0 = vrot.slane %v12850_v63, 2 }
 0x4b4   : > { %v2522_v62 = vmin.f32 %v2520_v27, %v2486_v46  ;;  %v2523_v6 = vmin.f32 %v2521_v40, %v2488_v44  ;;  %v3333_v58 = vmin.f32 %v3331_v26, %v9500_v45  ;;  %v3354_v37 = vmin.f32 %v3352_v39, %v9504_v15  ;;  %v12853_v40 = vld [vmem:[#allocation165_spill] sm:$0xff]  ;;  %v3281_v44 = vpop.permute.xlu1 %3280 }
 0x4b5   : > { %v1097_v59 = vmin.f32 %v12850_v63, %v12851_v0  ;;  %v2035_v54 = vmin.f32 %v2033_v50, %v2034_v5  ;;  %v2056_v33 = vmin.f32 %v2054_v11, %v2055_v17  ;;  %v2503_v52 = vmin.f32 %v2501_v20, %v2502_v23  ;;  %3718 = vperm.xlu2 %4858, %v12852_v7   ;;  %v12855_v63 = vld [vmem:[#allocation87_spill] sm:$0xff]  ;;  %v12856_v11 = vld [vmem:[#allocation144_spill] sm:$0xff]  ;;  %v12858_v0 = vld [vmem:[#allocation34_spill] sm:$0xff] }
 0x4b6   : > { %v3335_v34 = vmin.f32 %v3333_v58, %v9343_v1  ;;  %v3356_v27 = vmin.f32 %v3354_v37, %v9346_v56  ;;  %v12854_v46 = vrot.slane %v12853_v40, 2  ;;  %v1567_v39 = vmin.f32 %v12847_v36, %v1566_v14  ;;  %v12857_v37 = vld [vmem:[#allocation72_spill] sm:$0xff] }
 0x4b7   : > { %v1588_v38 = vmin.f32 %v12848_v49, %v1587_v60  ;;  %v2524_v51 = vmin.f32 %v2522_v62, %v2523_v6  ;;  %v9537_v50 = vsub.f32 %v3281_v44, %v12855_v63  ;;  %v9540_v5 = vsub.f32 %v3281_v44, %v12856_v11  ;;  %v9552_v6 = vpop.permute.xlu2 %3498 }
 0x4b8   : > { %v1118_v26 = vmin.f32 %v12853_v40, %v12854_v46  ;;  %v1098_v17 = vrot.slane %v1097_v59, 1  ;;  %v2036_v20 = vrot.slane %v2035_v54, 2  ;;  %v2057_v23 = vrot.slane %v2056_v33, 2  ;;  %v12859_v40 = vld [vmem:[#allocation119_spill] sm:$0xff]  ;;  %12861 = vst [vmem:[#allocation81_spill] sm:$0xff] %v9552_v6 }
 0x4b9   : > { %v2504_v58 = vrot.slane %v2503_v52, 4  ;;  %v9544_v7 = vsub.f32 %v12858_v0, %v12857_v37  ;;  %v9548_v36 = vsub.f32 %v12858_v0, %v12859_v40  ;;  %v3334_v14 = vmin.f32 %v3332_v41, %v9537_v50  ;;  %v12862_v37 = vld [vmem:[#allocation90_spill] sm:$0xff] }
 0x4ba   : > { %v3355_v49 = vmin.f32 %v3353_v8, %v9540_v5  ;;  %v1119_v60 = vrot.slane %v1118_v26, 1  ;;  %vm11677_vm9 = vcmask 1040384   ;;  %v1568_v62 = vrot.slane %v1567_v39, 1  ;;  %v3615_v8 = vpop.permute.xlu0 %3614 }
 0x4bb   : > { %12860 = vst [vmem:[#allocation174_spill] sm:$0xff] %v9548_v36  ;;  %v1589_v46 = vrot.slane %v1588_v38, 1  ;;  %v2525_v44 = vrot.slane %v2524_v51, 4  ;;  %v3336_v63 = vmin.f32 %v3334_v14, %v9544_v7  ;;  %3726 = vperm.xlu1 %4859, %v12862_v37   ;;  %v2037_v57 = vmin.f32 %v2035_v54, %v2036_v20  ;;  %v12868_v14 = vld [vmem:[#allocation40_spill] sm:$0xff]  ;;  %v12870_v37 = vld [vmem:[#allocation73_spill] sm:$0xff]  ;;  %v12873_v20 = vld [vmem:[#allocation195_spill] sm:$0xff] }
 0x4bc   : > { %v3357_v11 = vmin.f32 %v3355_v49, %v9548_v36  ;;  %v2058_v0 = vmin.f32 %v2056_v33, %v2057_v23  ;;  %v2505_v40 = vmin.f32 %v2503_v52, %v2504_v58  ;;  %v9558_v41 = vmin.f32 %v1097_v59, %v1098_v17  ;;  %v12872_v17 = vld [vmem:[#allocation193_spill] sm:$0xff] }
 0x4bd   : > { %3730 = vperm.xlu2 %4858, %v12863_v2   ;;  %v3337_v9 = vmin.f32 %v3335_v34, %v3336_v63  ;;  %v9560_v28 = vmin.f32 %v1118_v26, %v1119_v60  ;;  %v9562_v6 = vmin.f32 %v1567_v39, %v1568_v62  ;;  %v4414_v49 = vsel %vm11677_vm9, %v12868_v14, %v12867_v35  ;;  %v3475_v60 = vpop.permute.xlu1 %3474  ;;  %v12874_v62 = vld [vmem:[#allocation61_spill] sm:$0xff]  ;;  %v12877_v63 = vld [vmem:[#allocation194_spill] sm:$0xff] }
 0x4be   : > { %12864 = vst [vmem:[#allocation112_spill] sm:$0xff] %v9558_v41  ;;  %v3358_v19 = vmin.f32 %v3356_v27, %v3357_v11  ;;  %v4415_v33 = vsel %vm11677_vm9, %v12870_v37, %v12869_v29  ;;  %v9570_v52 = vmin.f32 %v1588_v38, %v1589_v46  ;;  %v2526_v2 = vmin.f32 %v2524_v51, %v2525_v44  ;;  %v12875_v38 = vld [vmem:[#allocation133_spill] sm:$0xff]  ;;  %v12876_v51 = vld [vmem:[#allocation192_spill] sm:$0xff]  ;;  %v12879_v41 = vld [vmem:[#allocation83_spill] sm:$0xff] }
 0x4bf   : > { %12865 = vst [vmem:[#allocation25_spill] sm:$0xff] %v9560_v28  ;;  %v3338_v59 = vrot.slane %v3337_v9, 4  ;;  %vm11676_vm10 = vcmask 1041408   ;;  %v2038_v34 = vrot.slane %v2037_v57, 1  ;;  %v2059_v27 = vrot.slane %v2058_v0, 1  ;;  %v9580_v37 = vpop.permute.xlu2 %3510 }
 0x4c0   : > { %12866 = vst [vmem:[#allocation149_spill] sm:$0xff] %v9562_v6  ;;  %v3359_v54 = vrot.slane %v3358_v19, 4  ;;  %v2506_v26 = vrot.slane %v2505_v40, 2  ;;  %v3633_v39 = vmul.f32 %v9335_v43, %v12872_v17  ;;  %v3634_v23 = vmul.f32 %v9335_v43, %v12873_v20  ;;  %v12880_v43 = vld [vmem:[#allocation78_spill] sm:$0xff] }
 0x4c1   : > { %12871 = vst [vmem:[#allocation115_spill] sm:$0xff] %v9570_v52  ;;  %v3339_v35 = vmin.f32 %v3337_v9, %v3338_v59  ;;  %v2974_v29 = vrot.slane %v12874_v62, 4  ;;  %v2995_v46 = vrot.slane %v12875_v38, 4  ;;  %v3537_v44 = vmul.f32 %v3475_v60, %v12876_v51  ;;  %v12882_v59 = vld [vmem:[#allocation89_spill] sm:$0xff] }
 0x4c2   : > { %v3360_v58 = vmin.f32 %v3358_v19, %v3359_v54  ;;  %v3538_v11 = vmul.f32 %v3475_v60, %v12877_v63  ;;  %12878 = vst [vmem:[#allocation104_spill] sm:$0xff] %v9580_v37  ;;  %vm11675_vm2 = vcmask 1042432   ;;  %v2527_v14 = vrot.slane %v2526_v2, 2  ;;  %v12886_v37 = vld [vmem:[#allocation96_spill] sm:$0xff] }
 0x4c3   : > { %v3340_v28 = vrot.slane %v3339_v35, 2  ;;  %3738 = vperm.xlu1 %4859, %v12879_v41   ;;  %v4417_v19 = vsel %vm11676_vm10, %v4414_v49, %v12880_v43  ;;  %v9585_v9 = vmin.f32 %v2505_v40, %v2506_v26  ;;  %v9588_v54 = vadd.f32 %v3633_v39, %v3537_v44  ;;  %v3627_v39 = vpop.permute.xlu0 %3626  ;;  %v12895_v44 = vld [vmem:[#allocation69_spill] sm:$0xff]  ;;  %v12901_v43 = vld [vmem:[#allocation182_spill] sm:$0xff] }
 0x4c4   : > { %v3361_v52 = vrot.slane %v3360_v58, 2  ;;  %v9590_v6 = vadd.f32 %v3634_v23, %v3538_v11  ;;  %v9592_v60 = vmin.f32 %v2037_v57, %v2038_v34  ;;  %v4418_v30 = vsel %vm11676_vm10, %v4415_v33, %v12886_v37  ;;  %v12898_v11 = vld [vmem:[#allocation196_spill] sm:$0xff]  ;;  %v12899_v37 = vld [vmem:[#allocation187_spill] sm:$0xff] }
 0x4c5   : > { %12881 = vst [vmem:[#allocation176_spill] sm:$0xff] %v9585_v9  ;;  %3742 = vperm.xlu2 %4858, %v12882_v59   ;;  %v3341_v63 = vmin.f32 %v3339_v35, %v3340_v28  ;;  %v9596_v36 = vmin.f32 %v2058_v0, %v2059_v27  ;;  %v2975_v41 = vmin.f32 %v12874_v62, %v2974_v29  ;;  %v9632_v23 = vpop.permute.xlu1 %3486  ;;  %v12891_v29 = vld [vmem:[#allocation137_spill] sm:$0xff]  ;;  %v12906_v59 = vmov 14  }
 0x4c6   : > { %12883 = vst [vmem:[#allocation140_spill] sm:$0xff] %v9588_v54  ;;  %v3362_v51 = vmin.f32 %v3360_v58, %v3361_v52  ;;  %v9600_v40 = vmin.f32 %v12875_v38, %v2995_v46  ;;  %v4420_v49 = vsel %vm11675_vm2, %v4417_v19, %v9183_v10  ;;  %v9604_v26 = vmin.f32 %v2526_v2, %v2527_v14  ;;  %v12892_v38 = vld [vmem:[#allocation118_spill] sm:$0xff]  ;;  %v12893_v46 = vld [vmem:[#allocation180_spill] sm:$0xff]  ;;  %v12900_v14 = vld [vmem:[#allocation181_spill] sm:$0xff] }
 0x4c7   : > { %12884 = vst [vmem:[#allocation92_spill] sm:$0xff] %v9590_v6  ;;  %v3342_v57 = vrot.slane %v3341_v63, 1  ;;  %v4421_v33 = vsel %vm11675_vm2, %v4418_v30, %v9185_v42  ;;  %v9611_v0 = vmul.f32 %v9421_v32, %v12872_v17  ;;  %v9615_v52 = vmul.f32 %v9421_v32, %v12873_v20  ;;  %v12909_v54 = vld [vmem:[#allocation99_spill] sm:$0xff] }
 0x4c8   : > { %12885 = vst [vmem:[#allocation198_spill] sm:$0xff] %v9592_v60  ;;  %v3363_v34 = vrot.slane %v3362_v51, 1  ;;  %v9619_v10 = vmul.f32 %v9520_v31, %v12872_v17  ;;  %v9623_v2 = vmul.f32 %v9520_v31, %v12873_v20  ;;  %v9626_v42 = vmul.f32 %v3615_v8, %v12872_v17  ;;  %v9641_v31 = vpop.permute.xlu2 %3522  ;;  %v12914_v60 = vld [vmem:[#allocation7_spill] sm:$0xff] }
 0x4c9   : > { %12887 = vst [vmem:[#allocation54_spill] sm:$0xff] %v9596_v36  ;;  %v9628_v30 = vmin.f32 %v3341_v63, %v3342_v57  ;;  %v2976_v35 = vrot.slane %v2975_v41, 2  ;;  %v2997_v32 = vrot.slane %v9600_v40, 2  ;;  %v9636_v58 = vmul.f32 %v3615_v8, %v12873_v20  ;;  %v12896_v8 = vld [vmem:[#allocation179_spill] sm:$0xff]  ;;  %v12897_v63 = vld [vmem:[#allocation98_spill] sm:$0xff] }
 0x4ca   : > { %12888 = vst [vmem:[#allocation108_spill] sm:$0xff] %v9604_v26  ;;  %v9630_v27 = vmin.f32 %v3362_v51, %v3363_v34  ;;  %v9639_v62 = vmul.f32 %v3627_v39, %v12872_v17  ;;  %v12894_v51 = vld [vmem:[#allocation189_spill] sm:$0xff]  ;;  %v12902_v57 = vld [vmem:[#allocation174_spill] sm:$0xff]  ;;  %vm12908_vm9 = vcmask 1043456  }
 0x4cb   : > { %12889 = vst [vmem:[#allocation167_spill] sm:$0xff] %v9632_v23  ;;  %vm3365_vm11 = vcmp.le.f32.partialorder %v12891_v29, %v9628_v30  ;;  %vm3367_vm13 = vcmp.le.f32.partialorder %v12893_v46, %v9628_v30  ;;  %3750 = vperm.xlu1 %4859, %v12895_v44   ;;  %vm3369_vm14 = vcmp.le.f32.partialorder %v12896_v8, %v9628_v30  ;;  %vm12910_vm7 = vmmov %vm12908_vm9 }
 0x4cc   : > { %12890 = vst [vmem:[#allocation29_spill] sm:$0xff] %v9641_v31  ;;  %vm3366_vm12 = vcmp.le.f32.partialorder %v12892_v38, %v9630_v27  ;;  %vm3368_vm0 = vcmp.le.f32.partialorder %v12894_v51, %v9630_v27  ;;  %vm3370_vm15 = vcmp.le.f32.partialorder %v12897_v63, %v9630_v27  ;;  %vm3371_vm6 = vcmp.le.f32.partialorder %v12898_v11, %v9628_v30  ;;  %v12907_v31 = vld [vmem:[#allocation171_spill] sm:$0xff] }
 0x4cd   : > { %vm3372_vm5 = vcmp.le.f32.partialorder %v12899_v37, %v9630_v27  ;;  %3754 = vperm.xlu2 %4858, %v12813_v22   ;;  %vm3373_vm1 = vcmp.le.f32.partialorder %v9337_v3, %v9628_v30  ;;  %vm3386_vm10 = vcmp.le.f32.partialorder %v9494_v25, %v9630_v27  ;;  %v3483_v22 = vpop.permute.xlu0 %3482  ;;  %vm3391_vm8 = vcmp.le.f32.partialorder %v9537_v50, %v9628_v30  ;;  %v9701_v19 = vpop.permute.xlu1 %3494 }
 0x4ce   : > { %vm3392_vm2 = vcmp.le.f32.partialorder %v9540_v5, %v9630_v27  ;;  %vm3395_vm4 = vcmp.le.f32.partialorder %v9544_v7, %v9628_v30  ;;  %vm3396_vm3 = vcmp.le.f32.partialorder %v12902_v57, %v9630_v27  ;;  %v9713_v28 = vmin.f32 %v2975_v41, %v2976_v35  ;;  %v12912_v41 = vld [vmem:[#allocation192_spill] sm:$0xff] }
 0x4cf   : > { %v9716_v44 = vmul.f32 %v3627_v39, %v12873_v20  ;;  %v9721_v6 = vsel %vm12908_vm9, %v4420_v49, %v12907_v31  ;;  %v9725_v23 = vsel %vm12910_vm7, %v4421_v33, %v12909_v54  ;;  %v9729_v36 = vmin.f32 %v9600_v40, %v2997_v32  ;;  %v12913_v39 = vld [vmem:[#allocation194_spill] sm:$0xff]  ;;  %v12915_v49 = vld [vmem:[#allocation148_spill] sm:$0xff]  ;;  %v12916_v40 = vld [vmem:[#allocation47_spill] sm:$0xff] }
 0x4d0   : > { %v9711_v34 = vpop.permute.xlu2 %3534  ;;  %12904 = vst [vmem:[#allocation35_spill] sm:$0xff] %v9713_v28  ;;  %v9732_v35 = vmul.f32 %v3483_v22, %v12912_v41  ;;  %v9741_v31 = vmul.f32 %v12915_v49, %v12912_v41  ;;  %v9745_v54 = vmul.f32 %v12915_v49, %v12913_v39  ;;  %v3397_v33 = vsel %vm3365_vm11, %v12916_v40, 128.0 }
 0x4d1   : > { %12903 = vst [vmem:[#allocation28_spill] sm:$0xff] %v9711_v34  ;;  %v9735_v34 = vmul.f32 %v3483_v22, %v12913_v39  ;;  %v3398_v32 = vsel %vm3366_vm12, %v12916_v40, 128.0  ;;  %v12917_v22 = vld [vmem:[#allocation12_spill] sm:$0xff]  ;;  %vm12922_vm9 = vcmp.le.f32.partialorder %v9339_v24, %v9630_v27  ;;  %vm12924_vm11 = vcmp.le.f32.partialorder %v12900_v14, %v9628_v30 }
 0x4d2   : > { %12905 = vst [vmem:[#allocation42_spill] sm:$0xff] %v9716_v44  ;;  %v12920_v40 = vld [vmem:[#allocation76_spill] sm:$0xff]  ;;  %vm12925_vm12 = vcmp.le.f32.partialorder %v12901_v43, %v9630_v27  ;;  %vm12937_vm7 = vcmp.le.f32.partialorder %v9429_v13, %v9630_v27 }
 0x4d3   : > { %4860 = vset.pattern.permute.xlu1 %v12906_v59  ;;  %12911 = vst [vmem:[#allocation170_spill] sm:$0xff] %v9729_v36  ;;  %v3403_v46 = vsel %vm3371_vm6, %v12920_v40, 128.0  ;;  %v3404_v51 = vsel %vm3372_vm5, %v12920_v40, 128.0  ;;  %v12926_v40 = vld [vmem:[#allocation50_spill] sm:$0xff]  ;;  %vm12933_vm6 = vcmp.le.f32.partialorder %v9199_v18, %v9628_v30  ;;  %vm12934_vm5 = vcmp.le.f32.partialorder %v9202_v48, %v9630_v27  ;;  %v12940_v44 = vld [vmem:[#allocation84_spill] sm:$0xff] }
 0x4d4   : > { %3944 = vperm.xlu1 %4860, %v12914_v60   ;;  %v12918_v60 = vld [vmem:[#allocation37_spill] sm:$0xff] }
 0x4d5   : > { %4861 = vset.pattern.permute.xlu2 %v12906_v59  ;;  %v3399_v9 = vsel %vm3367_vm13, %v12918_v60, 128.0  ;;  %v3400_v49 = vsel %vm3368_vm0, %v12918_v60, 128.0  ;;  %v12919_v59 = vld [vmem:[#allocation70_spill] sm:$0xff]  ;;  %v12921_v60 = vld [vmem:[#allocation57_spill] sm:$0xff]  ;;  %vm12927_vm13 = vcmp.le.f32.partialorder %v9350_v12, %v9628_v30  ;;  %vm12928_vm0 = vcmp.le.f32.partialorder %v9354_v21, %v9630_v27 }
 0x4d6   : > { %3948 = vperm.xlu2 %4861, %v12917_v22   ;;  %v3401_v29 = vsel %vm3369_vm14, %v12919_v59, 128.0  ;;  %v3402_v38 = vsel %vm3370_vm15, %v12919_v59, 128.0  ;;  %v3405_v8 = vsel %vm3373_vm1, %v12921_v60, 128.0  ;;  %v3406_v63 = vsel %vm12922_vm9, %v12921_v60, 128.0  ;;  %v12923_v59 = vld [vmem:[#allocation62_spill] sm:$0xff]  ;;  %v12929_v60 = vld [vmem:[#allocation85_spill] sm:$0xff] }
 0x4d7   : > { %v3407_v11 = vsel %vm12924_vm11, %v12923_v59, 128.0  ;;  %v3408_v37 = vsel %vm12925_vm12, %v12923_v59, 128.0  ;;  %v3409_v3 = vsel %vm12927_vm13, %v12926_v40, 128.0  ;;  %v3410_v24 = vsel %vm12928_vm0, %v12926_v40, 128.0  ;;  %v12932_v59 = vld [vmem:[#allocation58_spill] sm:$0xff]  ;;  %v3507_v40 = vpop.permute.xlu1 %3506  ;;  %v12935_v22 = vld [vmem:[#allocation44_spill] sm:$0xff] }
 0x4d8   : > { %vm12930_vm14 = vcmp.le.f32.partialorder %v9410_v47, %v9628_v30  ;;  %vm12931_vm15 = vcmp.le.f32.partialorder %v9413_v55, %v9630_v27  ;;  %v3413_v12 = vsel %vm12933_vm6, %v12932_v59, 128.0  ;;  %v3414_v21 = vsel %vm12934_vm5, %v12932_v59, 128.0  ;;  %v3579_v59 = vpop.permute.xlu2 %3578 }
 0x4d9   : > { %v3411_v14 = vsel %vm12930_vm14, %v12929_v60, 128.0  ;;  %v3412_v43 = vsel %vm12931_vm15, %v12929_v60, 128.0  ;;  %vm12936_vm1 = vcmp.le.f32.partialorder %v9425_v61, %v9628_v30  ;;  %v3416_v55 = vsel %vm12937_vm7, %v12935_v22, 128.0  ;;  %v12938_v60 = vld [vmem:[#allocation80_spill] sm:$0xff] }
 0x4da   : > { %v3415_v47 = vsel %vm12936_vm1, %v12935_v22, 128.0  ;;  %vm12939_vm9 = vcmp.le.f32.partialorder %v9491_v53, %v9628_v30  ;;  %v3418_v48 = vsel %vm3386_vm10, %v12938_v60, 128.0  ;;  %v3429_v26 = vmin.f32 %v3397_v33, %v3401_v29  ;;  %v12943_v22 = vld [vmem:[#allocation33_spill] sm:$0xff] }
 0x4db   : > { %v3417_v18 = vsel %vm12939_vm9, %v12938_v60, 128.0  ;;  %v3430_v36 = vmin.f32 %v3399_v9, %v3403_v46  ;;  %v3450_v61 = vmin.f32 %v3398_v32, %v3402_v38  ;;  %v3451_v28 = vmin.f32 %v3400_v49, %v3404_v51  ;;  %v12946_v33 = vld [vmem:[#allocation21_spill] sm:$0xff]  ;;  %v12947_v38 = vld [vmem:[#allocation8_spill] sm:$0xff] }
 0x4dc   : > { %vm12941_vm11 = vcmp.le.f32.partialorder %v9274_v16, %v9628_v30  ;;  %vm12942_vm12 = vcmp.le.f32.partialorder %v9277_v4, %v9630_v27  ;;  %vm12944_vm13 = vcmp.le.f32.partialorder %v9500_v45, %v9628_v30  ;;  %vm12945_vm10 = vcmp.le.f32.partialorder %v9504_v15, %v9630_v27  ;;  %3956 = vperm.xlu1 %4860, %v12946_v33   ;;  %v12948_v4 = vld [vmem:[#allocation67_spill] sm:$0xff] }
 0x4dd   : > { %v3419_v13 = vsel %vm12941_vm11, %v12940_v44, 128.0  ;;  %v3420_v53 = vsel %vm12942_vm12, %v12940_v44, 128.0  ;;  %v3421_v25 = vsel %vm12944_vm13, %v12943_v22, 128.0  ;;  %v3422_v9 = vsel %vm12945_vm10, %v12943_v22, 128.0  ;;  %v12949_v15 = vld [vmem:[#allocation71_spill] sm:$0xff] }
 0x4de   : > { %v3431_v32 = vmin.f32 %v3429_v26, %v3405_v8  ;;  %v3432_v16 = vmin.f32 %v3430_v36, %v3407_v11  ;;  %v3452_v49 = vmin.f32 %v3450_v61, %v3406_v63  ;;  %v3453_v29 = vmin.f32 %v3451_v28, %v3408_v37  ;;  %3960 = vperm.xlu2 %4861, %v12947_v38   ;;  %v12952_v63 = vld [vmem:[#allocation63_spill] sm:$0xff] }
 0x4df   : > { %v3423_v46 = vsel %vm3391_vm8, %v12948_v4, 128.0  ;;  %v3424_v45 = vsel %vm3392_vm2, %v12948_v4, 128.0  ;;  %vm12950_vm0 = vcmp.le.f32.partialorder %v9343_v1, %v9628_v30  ;;  %vm12951_vm14 = vcmp.le.f32.partialorder %v9346_v56, %v9630_v27 }
 0x4e0   : > { %v3425_v26 = vsel %vm12950_vm0, %v12949_v15, 128.0  ;;  %v3426_v36 = vsel %vm12951_vm14, %v12949_v15, 128.0  ;;  %vm4424_vm15 = vcmask 1044480   ;;  %v3433_v28 = vmin.f32 %v3431_v32, %v3409_v3 }
 0x4e1   : > { %v3434_v51 = vmin.f32 %v3432_v16, %v3411_v14  ;;  %v3454_v50 = vmin.f32 %v3452_v49, %v3410_v24  ;;  %v3455_v8 = vmin.f32 %v3453_v29, %v3412_v43  ;;  %v3427_v5 = vsel %vm3395_vm4, %v12952_v63, 128.0  ;;  %v3519_v43 = vpop.permute.xlu1 %3518  ;;  %v3587_v16 = vpop.permute.xlu2 %3586 }
 0x4e2   : > { %v3428_v1 = vsel %vm3396_vm3, %v12952_v63, 128.0  ;;  %v3547_v11 = vmul.f32 %v9701_v19, %v12912_v41  ;;  %v3548_v56 = vmul.f32 %v9701_v19, %v12913_v39  ;;  %v3435_v37 = vmin.f32 %v3433_v28, %v3413_v12  ;;  %v3503_v49 = vpop.permute.xlu0 %3502 }
 0x4e3   : > { %v3436_v3 = vmin.f32 %v3434_v51, %v3415_v47  ;;  %v3456_v24 = vmin.f32 %v3454_v50, %v3414_v21  ;;  %v3457_v14 = vmin.f32 %v3455_v8, %v3416_v55  ;;  %v3553_v61 = vmul.f32 %v3507_v40, %v12912_v41  ;;  %v12953_v55 = vld [vmem:[#allocation11_spill] sm:$0xff] }
 0x4e4   : > { %v3554_v7 = vmul.f32 %v3507_v40, %v12913_v39  ;;  %v3637_v32 = vmul.f32 %v3579_v59, %v12872_v17  ;;  %v3638_v57 = vmul.f32 %v3579_v59, %v12873_v20  ;;  %v3437_v29 = vmin.f32 %v3435_v37, %v3417_v18  ;;  %3964 = vperm.xlu1 %4860, %v12953_v55   ;;  %v12954_v50 = vld [vmem:[#allocation15_spill] sm:$0xff] }
 0x4e5   : > { %v3438_v63 = vmin.f32 %v3436_v3, %v3419_v13  ;;  %v3458_v15 = vmin.f32 %v3456_v24, %v3418_v48  ;;  %v3459_v4 = vmin.f32 %v3457_v14, %v3420_v53  ;;  %v3559_v19 = vmul.f32 %v3519_v43, %v12912_v41  ;;  %v12958_v24 = vld [vmem:[#allocation170_spill] sm:$0xff] }
 0x4e6   : > { %v3560_v12 = vmul.f32 %v3519_v43, %v12913_v39  ;;  %v3641_v21 = vmul.f32 %v3587_v16, %v12872_v17  ;;  %v3642_v47 = vmul.f32 %v3587_v16, %v12873_v20  ;;  %v3439_v40 = vmin.f32 %v3437_v29, %v3421_v25  ;;  %3968 = vperm.xlu2 %4861, %v12954_v50   ;;  %v12961_v29 = vld [vmem:[#allocation112_spill] sm:$0xff] }
 0x4e7   : > { %v3440_v28 = vmin.f32 %v3438_v63, %v3423_v46  ;;  %v3460_v51 = vmin.f32 %v3458_v15, %v3422_v9  ;;  %v3461_v59 = vmin.f32 %v3459_v4, %v3424_v45  ;;  %v9893_v18 = vadd.f32 %v9611_v0, %v3547_v11 }
 0x4e8   : > { %v9896_v48 = vadd.f32 %v9615_v52, %v3548_v56  ;;  %v9899_v13 = vadd.f32 %v9619_v10, %v3553_v61  ;;  %v9902_v53 = vadd.f32 %v9623_v2, %v3554_v7  ;;  %v3441_v8 = vmin.f32 %v3439_v40, %v3425_v26  ;;  %v12955_v56 = vld [vmem:[#allocation9_spill] sm:$0xff]  ;;  %v12966_v40 = vld [vmem:[#allocation198_spill] sm:$0xff] }
 0x4e9   : > { %v3442_v37 = vmin.f32 %v3440_v28, %v3427_v5  ;;  %v3462_v25 = vmin.f32 %v3460_v51, %v3426_v36  ;;  %v3463_v46 = vmin.f32 %v3461_v59, %v3428_v1  ;;  %v9905_v9 = vadd.f32 %v3637_v32, %v9732_v35  ;;  %v3531_v2 = vpop.permute.xlu1 %3530  ;;  %v3599_v36 = vpop.permute.xlu2 %3598  ;;  %v12959_v32 = vld [vmem:[#allocation13_spill] sm:$0xff]  ;;  %v12968_v51 = vld [vmem:[#allocation54_spill] sm:$0xff] }
 0x4ea   : > { %v9908_v4 = vadd.f32 %v3638_v57, %v9735_v34  ;;  %v9911_v0 = vadd.f32 %v9626_v42, %v3559_v19  ;;  %v9914_v52 = vadd.f32 %v9636_v58, %v3560_v12  ;;  %v9917_v15 = vadd.f32 %v3641_v21, %v9741_v31  ;;  %v3515_v43 = vpop.permute.xlu0 %3514  ;;  %v12963_v19 = vld [vmem:[#allocation115_spill] sm:$0xff]  ;;  %v12964_v12 = vld [vmem:[#allocation25_spill] sm:$0xff] }
 0x4eb   : > { %v3443_v10 = vmin.f32 %v3441_v8, %v3442_v37  ;;  %v3464_v45 = vmin.f32 %v3462_v25, %v3463_v46  ;;  %v9920_v26 = vadd.f32 %v3642_v47, %v9745_v54  ;;  %v3565_v35 = vmul.f32 %v3531_v2, %v12912_v41  ;;  %v12970_v8 = vld [vmem:[#allocation176_spill] sm:$0xff] }
 0x4ec   : > { %v3566_v34 = vmul.f32 %v3531_v2, %v12913_v39  ;;  %v9927_v42 = vsel %vm4424_vm15, %v9721_v6, %v9628_v30  ;;  %v9932_v58 = vsel %vm4424_vm15, %v9725_v23, %v9630_v27  ;;  %v3551_v31 = vmul.f32 %v3503_v49, %v12912_v41  ;;  %3976 = vperm.xlu1 %4860, %v12955_v56   ;;  %v12956_v30 = vld [vmem:[#allocation42_spill] sm:$0xff]  ;;  %v12957_v27 = vld [vmem:[#allocation35_spill] sm:$0xff]  ;;  %v12972_v46 = vld [vmem:[#allocation108_spill] sm:$0xff] }
 0x4ed   : > { %v3552_v54 = vmul.f32 %v3503_v49, %v12913_v39  ;;  %v3444_v63 = vrot.slane %v3443_v10, 4  ;;  %v3465_v5 = vrot.slane %v3464_v45, 4  ;;  %v3647_v1 = vmul.f32 %v3599_v36, %v12872_v17  ;;  %v12960_v49 = vld [vmem:[#allocation149_spill] sm:$0xff] }
 0x4ee   : > { %v3648_v11 = vmul.f32 %v3599_v36, %v12873_v20  ;;  %v9940_v6 = vadd.f32 %v9639_v62, %v3565_v35  ;;  %v9943_v3 = vadd.f32 %v12956_v30, %v3566_v34  ;;  %v2978_v23 = vrot.slane %v12957_v27, 1  ;;  %3980 = vperm.xlu2 %4861, %v12959_v32  }
 0x4ef   : > { %v2999_v14 = vrot.slane %v12958_v24, 1  ;;  %v3445_v61 = vmin.f32 %v3443_v10, %v3444_v63  ;;  %v3466_v7 = vmin.f32 %v3464_v45, %v3465_v5  ;;  %v9948_v57 = vadd.f32 %v3647_v1, %v3551_v31 }
 0x4f0   : > { %v9950_v16 = vadd.f32 %v3648_v11, %v3552_v54  ;;  %vm12962_vm2 = vcmask 1040384   ;;  %vm12967_vm3 = vcmask 1041408   ;;  %v12971_v37 = vrot.slane %v12970_v8, 1  ;;  %v12974_v54 = vld [vmem:[#allocation106_spill] sm:$0xff] }
 0x4f1   : > { %v4433_v62 = vsel %vm12962_vm2, %v12961_v29, %v12960_v49  ;;  %vm12965_vm4 = vmmov %vm12962_vm2  ;;  %v3446_v47 = vrot.slane %v3445_v61, 2  ;;  %v3467_v55 = vrot.slane %v3466_v7, 2  ;;  %v12973_v10 = vrot.slane %v12972_v46, 1  ;;  %v3575_v31 = vpop.permute.xlu1 %3574  ;;  %v3611_v56 = vpop.permute.xlu2 %3610  ;;  %v12975_v29 = vld [vmem:[#allocation20_spill] sm:$0xff] }
 0x4f2   : > { %v4434_v21 = vsel %vm12965_vm4, %v12964_v12, %v12963_v19  ;;  %v4435_v28 = vsel %vm12967_vm3, %v4433_v62, %v12966_v40  ;;  %vm12969_vm8 = vmmov %vm12967_vm3  ;;  %v2509_v25 = vmin.f32 %v12970_v8, %v12971_v37  ;;  %v2979_v2 = vmin.f32 %v12957_v27, %v2978_v23  ;;  %v3527_v8 = vpop.permute.xlu0 %3526 }
 0x4f3   : > { %v4436_v59 = vsel %vm12969_vm8, %v4434_v21, %v12968_v51  ;;  %v2530_v45 = vmin.f32 %v12972_v46, %v12973_v10  ;;  %v3000_v35 = vmin.f32 %v12958_v24, %v2999_v14  ;;  %v3447_v34 = vmin.f32 %v3445_v61, %v3446_v47  ;;  %v12978_v47 = vld [vmem:[#allocation10_spill] sm:$0xff] }
 0x4f4   : > { %v3468_v36 = vmin.f32 %v3466_v7, %v3467_v55  ;;  %v3539_v63 = vmul.f32 %v12974_v54, %v12912_v41  ;;  %v3540_v5 = vmul.f32 %v12974_v54, %v12913_v39  ;;  %v3635_v1 = vmul.f32 %v3575_v31, %v12872_v17  ;;  %3988 = vperm.xlu1 %4860, %v12975_v29  }
 0x4f5   : > { %v3636_v11 = vmul.f32 %v3575_v31, %v12873_v20  ;;  %v3557_v30 = vmul.f32 %v3515_v43, %v12912_v41  ;;  %v3558_v27 = vmul.f32 %v3515_v43, %v12913_v39  ;;  %v3448_v23 = vrot.slane %v3447_v34, 1 }
 0x4f6   : > { %v3469_v24 = vrot.slane %v3468_v36, 1  ;;  %v3667_v14 = vadd.f32 %v3635_v1, %v3539_v63  ;;  %v3653_v7 = vmul.f32 %v3611_v56, %v12872_v17  ;;  %v3654_v49 = vmul.f32 %v3611_v56, %v12873_v20  ;;  %3992 = vperm.xlu2 %4861, %v12978_v47   ;;  %v12984_v63 = vld [vmem:[#allocation17_spill] sm:$0xff] }
 0x4f7   : > { %v3668_v61 = vadd.f32 %v3636_v11, %v3540_v5  ;;  %vm12976_vm6 = vcmask 1042432   ;;  %v3449_v12 = vmin.f32 %v3447_v34, %v3448_v23  ;;  %vm12979_vm1 = vcmask 1043456   ;;  %v12985_v11 = vld [vmem:[#allocation22_spill] sm:$0xff] }
 0x4f8   : > { %v4437_v62 = vsel %vm12976_vm6, %v4435_v28, %v2509_v25  ;;  %vm12977_vm5 = vmmov %vm12976_vm6  ;;  %v3470_v21 = vmin.f32 %v3468_v36, %v3469_v24  ;;  %v9986_v40 = vadd.f32 %v3653_v7, %v3557_v30  ;;  %v9988_v51 = vadd.f32 %v3654_v49, %v3558_v27  ;;  %v12983_v25 = vld [vmem:[#allocation167_spill] sm:$0xff]  ;;  %v12986_v24 = vld [vmem:[#allocation81_spill] sm:$0xff] }
 0x4f9   : > { %v4438_v19 = vsel %vm12977_vm5, %v4436_v59, %v2530_v45  ;;  %v4439_v43 = vsel %vm12979_vm1, %v4437_v62, %v2979_v2  ;;  %vm12980_vm7 = vmmov %vm12979_vm1  ;;  %v3583_v59 = vpop.permute.xlu1 %3582  ;;  %v3543_v46 = vmul.f32 %v12983_v25, %v12912_v41  ;;  %v3544_v10 = vmul.f32 %v12983_v25, %v12913_v39 }
 0x4fa   : > { %v4440_v55 = vsel %vm12980_vm7, %v4438_v19, %v3000_v35  ;;  %v9991_v37 = vsel %vm4424_vm15, %v4439_v43, %v3449_v12  ;;  %v3639_v45 = vmul.f32 %v3583_v59, %v12872_v17  ;;  %v3640_v2 = vmul.f32 %v3583_v59, %v12873_v20  ;;  %v3623_v35 = vpop.permute.xlu2 %3622  ;;  %v3703_v27 = vpop.permute.xlu0 %3702  ;;  %v12987_v12 = vld [vmem:[#allocation140_spill] sm:$0xff] }
 0x4fb   : > { %12981 = vst [vmem:[#allocation86_spill] sm:$0xff] %v9991_v37  ;;  %v9994_v28 = vsel %vm4424_vm15, %v4440_v55, %v3470_v21  ;;  %v3659_v34 = vmul.f32 %v3623_v35, %v12872_v17  ;;  %v3660_v36 = vmul.f32 %v3623_v35, %v12873_v20  ;;  %v3563_v31 = vmul.f32 %v3527_v8, %v12912_v41  ;;  %v12988_v43 = vld [vmem:[#allocation92_spill] sm:$0xff] }
 0x4fc   : > { %12982 = vst [vmem:[#allocation124_spill] sm:$0xff] %v9994_v28  ;;  %v3564_v54 = vmul.f32 %v3527_v8, %v12913_v39  ;;  %4000 = vperm.xlu1 %4860, %v12984_v63   ;;  %v3671_v5 = vadd.f32 %v3639_v45, %v3543_v46  ;;  %v3672_v1 = vadd.f32 %v3640_v2, %v3544_v10  ;;  %v12989_v25 = vmov 15   ;;  %v12990_v46 = vld [vmem:[#allocation12_spill] sm:$0xff]  ;;  %v12991_v10 = vld [vmem:[#allocation14_spill] sm:$0xff] }
 0x4fd   : > { %v10008_v56 = vadd.f32 %v3659_v34, %v3563_v31  ;;  %v3549_v7 = vmul.f32 %v12986_v24, %v12912_v41  ;;  %v3550_v49 = vmul.f32 %v12986_v24, %v12913_v39  ;;  %v12992_v2 = vld [vmem:[#allocation104_spill] sm:$0xff]  ;;  %v10040_v24 = vsub.f32 %v3703_v27, %v3668_v61  ;;  %v12993_v61 = vld [vmem:[#allocation29_spill] sm:$0xff] }
 0x4fe   : > { %4004 = vperm.xlu2 %4861, %v12985_v11   ;;  %v10010_v30 = vadd.f32 %v3660_v36, %v3564_v54  ;;  %v3555_v35 = vmul.f32 %v12992_v2, %v12912_v41  ;;  %v3556_v34 = vmul.f32 %v12992_v2, %v12913_v39 }
 0x501   : > { %v3595_v23 = vpop.permute.xlu1 %3594 }
 0x502   : > { %v3645_v29 = vmul.f32 %v3595_v23, %v12872_v17  ;;  %v3646_v62 = vmul.f32 %v3595_v23, %v12873_v20  ;;  %v3699_v19 = vpop.permute.xlu2 %3698  ;;  %v3723_v11 = vpop.permute.xlu0 %3722  ;;  %v10038_v23 = vsub.f32 %v3703_v27, %v3667_v14 }
 0x503   : > { %v10019_v21 = vsub.f32 %v3699_v19, %v12987_v12  ;;  %v10022_v55 = vsub.f32 %v3699_v19, %v12988_v43 }
 0x504   : > { %v10024_v8 = vadd.f32 %v3645_v29, %v3549_v7  ;;  %v10026_v59 = vadd.f32 %v3646_v62, %v3550_v49  ;;  %4863 = vset.pattern.permute.xlu1 %v12989_v25 }
 0x505   : > { %4044 = vperm.xlu1 %4863, %v12990_v46  }
 0x506   : > { %4864 = vset.pattern.permute.xlu2 %v12989_v25 }
 0x507   : > { %4048 = vperm.xlu2 %4864, %v12991_v10  }
 0x509   : > { %v3607_v45 = vpop.permute.xlu1 %3606 }
 0x50a   : > { %v3651_v36 = vmul.f32 %v3607_v45, %v12872_v17  ;;  %v3652_v31 = vmul.f32 %v3607_v45, %v12873_v20  ;;  %v3711_v54 = vpop.permute.xlu2 %3710  ;;  %v3735_v2 = vpop.permute.xlu0 %3734 }
 0x50b   : > { %v10042_v7 = vsub.f32 %v3711_v54, %v3671_v5  ;;  %v10044_v49 = vsub.f32 %v3711_v54, %v3672_v1  ;;  %v3561_v5 = vmul.f32 %v12993_v61, %v12912_v41  ;;  %v3562_v1 = vmul.f32 %v12993_v61, %v12913_v39 }
 0x50c   : > { %v10046_v29 = vadd.f32 %v3651_v36, %v3555_v35  ;;  %v10048_v62 = vadd.f32 %v3652_v31, %v3556_v34  ;;  %v12994_v36 = vld [vmem:[#allocation19_spill] sm:$0xff] }
 0x50d   : > { %v3794_v19 = vmin.f32 %v10038_v23, %v10042_v7  ;;  %v3815_v12 = vmin.f32 %v10040_v24, %v10044_v49  ;;  %4052 = vperm.xlu1 %4863, %v12946_v33  }
 0x50f   : > { %4056 = vperm.xlu2 %4864, %v12947_v38  }
 0x511   : > { %v3619_v14 = vpop.permute.xlu1 %3618 }
 0x512   : > { %v3657_v27 = vmul.f32 %v3619_v14, %v12872_v17  ;;  %v3658_v43 = vmul.f32 %v3619_v14, %v12873_v20  ;;  %v3719_v46 = vpop.permute.xlu2 %3718 }
 0x513   : > { %v10063_v10 = vsub.f32 %v3719_v46, %v9893_v18  ;;  %v10066_v45 = vsub.f32 %v3719_v46, %v9896_v48  ;;  %v12995_v18 = vld [vmem:[#allocation28_spill] sm:$0xff] }
 0x514   : > { %v10068_v33 = vadd.f32 %v3657_v27, %v3561_v5  ;;  %v10070_v38 = vadd.f32 %v3658_v43, %v3562_v1  ;;  %v3567_v54 = vmul.f32 %v12995_v18, %v12912_v41  ;;  %v3568_v48 = vmul.f32 %v12995_v18, %v12913_v39  ;;  %v12996_v27 = vld [vmem:[#allocation18_spill] sm:$0xff]  ;;  %v3747_v43 = vpop.permute.xlu0 %3746 }
 0x515   : > { %v3796_v35 = vmin.f32 %v3794_v19, %v10063_v10  ;;  %v3817_v34 = vmin.f32 %v3815_v12, %v10066_v45  ;;  %4064 = vperm.xlu1 %4863, %v12954_v50  }
 0x517   : > { %4068 = vperm.xlu2 %4864, %v12994_v36  }
 0x519   : > { %v3631_v31 = vpop.permute.xlu1 %3630 }
 0x51a   : > { %v3663_v14 = vmul.f32 %v3631_v31, %v12872_v17  ;;  %v3664_v61 = vmul.f32 %v3631_v31, %v12873_v20  ;;  %v3731_v5 = vpop.permute.xlu2 %3730 }
 0x51b   : > { %v10083_v19 = vsub.f32 %v3731_v5, %v9899_v13  ;;  %v10086_v12 = vsub.f32 %v3731_v5, %v9902_v53 }
 0x51c   : > { %v10088_v50 = vadd.f32 %v3663_v14, %v3567_v54  ;;  %v10090_v1 = vadd.f32 %v3664_v61, %v3568_v48  ;;  %v12998_v48 = vld [vmem:[#allocation51_spill] sm:$0xff] }
 0x51d   : > { %4076 = vperm.xlu1 %4863, %v12959_v32  }
 0x51f   : > { %4080 = vperm.xlu2 %4864, %v12996_v27  }
 0x521   : > { %v3707_v46 = vpop.permute.xlu1 %3706 }
 0x522   : > { %v10095_v36 = vsub.f32 %v3707_v46, %v9905_v9  ;;  %v10098_v31 = vsub.f32 %v3707_v46, %v9908_v4  ;;  %v3743_v13 = vpop.permute.xlu2 %3742  ;;  %v12997_v9 = vmov 14   ;;  %v3759_v4 = vpop.permute.xlu0 %3758  ;;  %v10129_v46 = vsub.f32 %v3723_v11, %v10026_v59 }
 0x523   : > { %v10101_v53 = vsub.f32 %v3743_v13, %v9911_v0  ;;  %v10104_v18 = vsub.f32 %v3743_v13, %v9914_v52 }
 0x524   : > { %v3793_v32 = vmin.f32 %v10019_v21, %v10095_v36  ;;  %v3814_v54 = vmin.f32 %v10022_v55, %v10098_v31 }
 0x525   : > { %4088 = vperm.xlu1 %4863, %v12978_v47   ;;  %v10126_v47 = vsub.f32 %v3723_v11, %v10024_v8 }
 0x527   : > { %4865 = vset.pattern.permute.xlu2 %v12997_v9 }
 0x528   : > { %4168 = vperm.xlu2 %4865, %v12998_v48   ;;  %v12999_v48 = vld [vmem:[#allocation74_spill] sm:$0xff] }
 0x529   : > { %v3715_v14 = vpop.permute.xlu1 %3714 }
 0x52a   : > { %v10114_v0 = vsub.f32 %v3715_v14, %v9917_v15  ;;  %v10117_v52 = vsub.f32 %v3715_v14, %v9920_v26  ;;  %v3755_v61 = vpop.permute.xlu2 %3754 }
 0x52b   : > { %v10120_v5 = vsub.f32 %v3755_v61, %v9940_v6  ;;  %v10123_v27 = vsub.f32 %v3755_v61, %v9943_v3  ;;  %v13000_v3 = vld [vmem:[#allocation79_spill] sm:$0xff]  ;;  %v4041_v61 = vpop.permute.xlu0 %4040 }
 0x52c   : > { %v3795_v13 = vmin.f32 %v3793_v32, %v10114_v0  ;;  %v3816_v15 = vmin.f32 %v3814_v54, %v10117_v52 }
 0x52d   : > { %4866 = vset.pattern.permute.xlu1 %v12997_v9 }
 0x52e   : > { %v3797_v26 = vmin.f32 %v3795_v13, %v10126_v47  ;;  %v3818_v6 = vmin.f32 %v3816_v15, %v10129_v46  ;;  %4176 = vperm.xlu1 %4866, %v12999_v48   ;;  %v10149_v13 = vsub.f32 %v3735_v2, %v10046_v29  ;;  %v10152_v15 = vsub.f32 %v3735_v2, %v10048_v62 }
 0x530   : > { %4180 = vperm.xlu2 %4865, %v13000_v3   ;;  %v3799_v8 = vmin.f32 %v3797_v26, %v10083_v19  ;;  %v3820_v14 = vmin.f32 %v3818_v6, %v10086_v12  ;;  %v13002_v3 = vld [vmem:[#allocation59_spill] sm:$0xff] }
 0x531   : > { %v3727_v59 = vpop.permute.xlu1 %3726 }
 0x532   : > { %v10141_v11 = vsub.f32 %v3727_v59, %v9948_v57  ;;  %v10144_v32 = vsub.f32 %v3727_v59, %v9950_v16  ;;  %v10146_v54 = vpop.permute.xlu2 %3948  ;;  %v13003_v16 = vld [vmem:[#allocation66_spill] sm:$0xff] }
 0x533   : > { %13001 = vst [vmem:[#allocation77_spill] sm:$0xff] %v10146_v54 }
 0x534   : > { %v3798_v26 = vmin.f32 %v3796_v35, %v10141_v11  ;;  %v3819_v6 = vmin.f32 %v3817_v34, %v10144_v32  ;;  %v10171_v34 = vsub.f32 %v3747_v43, %v10068_v33 }
 0x536   : > { %v3800_v48 = vmin.f32 %v3798_v26, %v10149_v13  ;;  %v3821_v57 = vmin.f32 %v3819_v6, %v10152_v15  ;;  %4184 = vperm.xlu1 %4866, %v13002_v3   ;;  %v10174_v26 = vsub.f32 %v3747_v43, %v10070_v38  ;;  %v13006_v38 = vld [vmem:[#allocation16_spill] sm:$0xff] }
 0x538   : > { %4188 = vperm.xlu2 %4865, %v13003_v16   ;;  %v3802_v59 = vmin.f32 %v3800_v48, %v10101_v53  ;;  %v3823_v29 = vmin.f32 %v3821_v57, %v10104_v18  ;;  %v10178_v57 = vpop.permute.xlu0 %4060  ;;  %v10194_v16 = vsub.f32 %v3759_v4, %v10088_v50 }
 0x539   : > { %v3739_v28 = vpop.permute.xlu1 %3738 }
 0x53a   : > { %v10163_v62 = vsub.f32 %v3739_v28, %v9986_v40  ;;  %v10166_v2 = vsub.f32 %v3739_v28, %v9988_v51  ;;  %v10168_v35 = vpop.permute.xlu2 %3960  ;;  %v13005_v51 = vld [vmem:[#allocation90_spill] sm:$0xff] }
 0x53b   : > { %13004 = vst [vmem:[#allocation204_spill] sm:$0xff] %v10168_v35 }
 0x53c   : > { %v3801_v6 = vmin.f32 %v3799_v8, %v10163_v62  ;;  %v3822_v48 = vmin.f32 %v3820_v14, %v10166_v2 }
 0x53e   : > { %v3803_v40 = vmin.f32 %v3801_v6, %v10171_v34  ;;  %v3824_v3 = vmin.f32 %v3822_v48, %v10174_v26  ;;  %4196 = vperm.xlu1 %4866, %v13005_v51   ;;  %v10197_v6 = vsub.f32 %v3759_v4, %v10090_v1  ;;  %v13008_v51 = vld [vmem:[#allocation49_spill] sm:$0xff] }
 0x540   : > { %4867 = vset.pattern.permute.xlu2 %v12989_v25  ;;  %v3805_v28 = vmin.f32 %v3803_v40, %v10120_v5  ;;  %v3826_v33 = vmin.f32 %v3824_v3, %v10123_v27 }
 0x541   : > { %4092 = vperm.xlu2 %4867, %v13006_v38   ;;  %v3751_v43 = vpop.permute.xlu1 %3750 }
 0x542   : > { %v10188_v8 = vsub.f32 %v3751_v43, %v10008_v56  ;;  %v10191_v14 = vsub.f32 %v3751_v43, %v10010_v30  ;;  %v10201_v40 = vpop.permute.xlu2 %3968  ;;  %v10206_v30 = vpop.permute.xlu0 %4072 }
 0x543   : > { %13007 = vst [vmem:[#allocation141_spill] sm:$0xff] %v10201_v40  ;;  %v4104_v40 = vmul.f32 %v4041_v61, %v12873_v20 }
 0x544   : > { %v3804_v25 = vmin.f32 %v3802_v59, %v10188_v8  ;;  %v3825_v48 = vmin.f32 %v3823_v29, %v10191_v14  ;;  %v4103_v29 = vmul.f32 %v4041_v61, %v12872_v17  ;;  %v13013_v61 = vld [vmem:[#allocation89_spill] sm:$0xff] }
 0x546   : > { %v3806_v3 = vmin.f32 %v3804_v25, %v10194_v16  ;;  %v3827_v56 = vmin.f32 %v3825_v48, %v10197_v6  ;;  %4204 = vperm.xlu1 %4866, %v13008_v51  }
 0x548   : > { %v3807_v38 = vmin.f32 %v3805_v28, %v3806_v3  ;;  %v3828_v50 = vmin.f32 %v3826_v33, %v3827_v56  ;;  %v13010_v33 = vld [vmem:[#allocation83_spill] sm:$0xff] }
 0x549   : > { %4096 = vperm.xlu2 %4867, %v12984_v63   ;;  %v3945_v35 = vpop.permute.xlu1 %3944 }
 0x54a   : > { %v3808_v1 = vrot.slane %v3807_v38, 4  ;;  %v3829_v4 = vrot.slane %v3828_v50, 4  ;;  %v4007_v25 = vmul.f32 %v3945_v35, %v12912_v41  ;;  %v4008_v48 = vmul.f32 %v3945_v35, %v12913_v39  ;;  %v10213_v51 = vpop.permute.xlu2 %3980 }
 0x54b   : > { %13009 = vst [vmem:[#allocation91_spill] sm:$0xff] %v10213_v51 }
 0x54c   : > { %v3809_v43 = vmin.f32 %v3807_v38, %v3808_v1  ;;  %v3830_v59 = vmin.f32 %v3828_v50, %v3829_v4  ;;  %v10216_v63 = vadd.f32 %v4103_v29, %v4007_v25  ;;  %v10218_v3 = vadd.f32 %v4104_v40, %v4008_v48  ;;  %v4085_v50 = vpop.permute.xlu0 %4084  ;;  %v13019_v29 = vld [vmem:[#allocation68_spill] sm:$0xff] }
 0x54d   : > { %v10303_v25 = vmul.f32 %v10178_v57, %v12872_v17  ;;  %v10307_v48 = vmul.f32 %v10178_v57, %v12873_v20 }
 0x54e   : > { %v3810_v37 = vrot.slane %v3809_v43, 2  ;;  %v3831_v28 = vrot.slane %v3830_v59, 2  ;;  %4208 = vperm.xlu1 %4866, %v13010_v33   ;;  %13011 = vst [vmem:[#allocation142_spill] sm:$0xff] %v10216_v63  ;;  %v13038_v63 = vld [vmem:[#allocation44_spill] sm:$0xff] }
 0x54f   : > { %13012 = vst [vmem:[#allocation147_spill] sm:$0xff] %v10218_v3 }
 0x550   : > { %v3811_v56 = vmin.f32 %v3809_v43, %v3810_v37  ;;  %v3832_v38 = vmin.f32 %v3830_v59, %v3831_v28  ;;  %v13015_v37 = vld [vmem:[#allocation36_spill] sm:$0xff]  ;;  %v4119_v28 = vmul.f32 %v10206_v30, %v12872_v17 }
 0x551   : > { %4869 = vset.pattern.permute.xlu2 %v12997_v9  ;;  %v10226_v54 = vpop.permute.xlu1 %3956  ;;  %v13016_v9 = vld [vmem:[#allocation69_spill] sm:$0xff] }
 0x552   : > { %4212 = vperm.xlu2 %4869, %v13013_v61   ;;  %v3812_v1 = vrot.slane %v3811_v56, 1  ;;  %v3833_v4 = vrot.slane %v3832_v38, 1  ;;  %v10228_v33 = vpop.permute.xlu2 %3992  ;;  %v10317_v61 = vmul.f32 %v4085_v50, %v12873_v20 }
 0x553   : > { %13014 = vst [vmem:[#allocation199_spill] sm:$0xff] %v10228_v33 }
 0x554   : > { %v10222_v35 = vmin.f32 %v3811_v56, %v3812_v1  ;;  %v10224_v51 = vmin.f32 %v3832_v38, %v3833_v4  ;;  %v10272_v40 = vpop.permute.xlu0 %4100  ;;  %v4120_v56 = vmul.f32 %v10206_v30, %v12873_v20  ;;  %v10314_v38 = vmul.f32 %v4085_v50, %v12872_v17  ;;  %v13020_v1 = vld [vmem:[#allocation47_spill] sm:$0xff] }
 0x555   : > { %13017 = vst [vmem:[#allocation23_spill] sm:$0xff] %v10272_v40 }
 0x556   : > { %vm3835_vm9 = vcmp.le.f32.partialorder %v10019_v21, %v10222_v35  ;;  %vm3836_vm11 = vcmp.le.f32.partialorder %v10022_v55, %v10224_v51  ;;  %vm3837_vm12 = vcmp.le.f32.partialorder %v10038_v23, %v10222_v35  ;;  %vm3838_vm13 = vcmp.le.f32.partialorder %v10040_v24, %v10224_v51  ;;  %4216 = vperm.xlu1 %4866, %v13015_v37   ;;  %v13021_v37 = vld [vmem:[#allocation37_spill] sm:$0xff] }
 0x557   : > { %vm3839_vm10 = vcmp.le.f32.partialorder %v10095_v36, %v10222_v35  ;;  %vm3840_vm0 = vcmp.le.f32.partialorder %v10098_v31, %v10224_v51  ;;  %vm3841_vm14 = vcmp.le.f32.partialorder %v10042_v7, %v10222_v35  ;;  %vm3842_vm15 = vcmp.le.f32.partialorder %v10044_v49, %v10224_v51 }
 0x558   : > { %vm3843_vm2 = vcmp.le.f32.partialorder %v10114_v0, %v10222_v35  ;;  %vm3860_vm5 = vcmp.le.f32.partialorder %v10174_v26, %v10224_v51  ;;  %vm3861_vm4 = vcmp.le.f32.partialorder %v10188_v8, %v10222_v35  ;;  %vm3862_vm1 = vcmp.le.f32.partialorder %v10191_v14, %v10224_v51 }
 0x559   : > { %v3965_v43 = vpop.permute.xlu1 %3964  ;;  %vm3863_vm7 = vcmp.le.f32.partialorder %v10120_v5, %v10222_v35  ;;  %vm3864_vm3 = vcmp.le.f32.partialorder %v10123_v27, %v10224_v51  ;;  %vm3865_vm8 = vcmp.le.f32.partialorder %v10194_v16, %v10222_v35  ;;  %vm3866_vm6 = vcmp.le.f32.partialorder %v10197_v6, %v10224_v51 }
 0x55a   : > { %4220 = vperm.xlu2 %4869, %v13016_v9   ;;  %v10298_v59 = vpop.permute.xlu2 %4004  ;;  %v3867_v4 = vsel %vm3835_vm9, %v13020_v1, 128.0  ;;  %v3868_v57 = vsel %vm3836_vm11, %v13020_v1, 128.0  ;;  %v3869_v30 = vsel %vm3837_vm12, %v13021_v37, 128.0  ;;  %v3870_v50 = vsel %vm3838_vm13, %v13021_v37, 128.0  ;;  %v13022_v9 = vld [vmem:[#allocation70_spill] sm:$0xff]  ;;  %v13024_v37 = vld [vmem:[#allocation57_spill] sm:$0xff] }
 0x55b   : > { %13018 = vst [vmem:[#allocation129_spill] sm:$0xff] %v10298_v59  ;;  %v3871_v21 = vsel %vm3839_vm10, %v13022_v9, 128.0  ;;  %v3872_v55 = vsel %vm3840_vm0, %v13022_v9, 128.0  ;;  %v3875_v36 = vsel %vm3843_vm2, %v13024_v37, 128.0  ;;  %vm13025_vm9 = vcmp.le.f32.partialorder %v10117_v52, %v10224_v51  ;;  %v13026_v9 = vld [vmem:[#allocation62_spill] sm:$0xff] }
 0x55c   : > { %v3876_v31 = vsel %vm13025_vm9, %v13024_v37, 128.0  ;;  %vm13027_vm11 = vcmp.le.f32.partialorder %v10063_v10, %v10222_v35  ;;  %vm13028_vm12 = vcmp.le.f32.partialorder %v10066_v45, %v10224_v51  ;;  %vm13030_vm13 = vcmp.le.f32.partialorder %v10126_v47, %v10222_v35  ;;  %v10375_v1 = vpop.permute.xlu0 %3952  ;;  %v13032_v10 = vld [vmem:[#allocation85_spill] sm:$0xff]  ;;  %v13035_v47 = vld [vmem:[#allocation58_spill] sm:$0xff] }
 0x55d   : > { %v3877_v7 = vsel %vm13027_vm11, %v13026_v9, 128.0  ;;  %v3878_v49 = vsel %vm13028_vm12, %v13026_v9, 128.0  ;;  %vm13031_vm10 = vcmp.le.f32.partialorder %v10129_v46, %v10224_v51  ;;  %vm13033_vm0 = vcmp.le.f32.partialorder %v10141_v11, %v10222_v35 }
 0x55e   : > { %4228 = vperm.xlu1 %4866, %v13019_v29   ;;  %v13023_v29 = vld [vmem:[#allocation76_spill] sm:$0xff]  ;;  %v3881_v40 = vsel %vm13033_vm0, %v13032_v10, 128.0  ;;  %vm13037_vm2 = vcmp.le.f32.partialorder %v10086_v12, %v10224_v51  ;;  %v3899_v59 = vmin.f32 %v3867_v4, %v3871_v21  ;;  %v3920_v33 = vmin.f32 %v3868_v57, %v3872_v55 }
 0x55f   : > { %v3873_v23 = vsel %vm3841_vm14, %v13023_v29, 128.0  ;;  %v3874_v24 = vsel %vm3842_vm15, %v13023_v29, 128.0  ;;  %v13029_v29 = vld [vmem:[#allocation50_spill] sm:$0xff]  ;;  %vm13034_vm14 = vcmp.le.f32.partialorder %v10144_v32, %v10224_v51  ;;  %vm13036_vm15 = vcmp.le.f32.partialorder %v10083_v19, %v10222_v35 }
 0x560   : > { %v3879_v0 = vsel %vm13030_vm13, %v13029_v29, 128.0  ;;  %v3880_v52 = vsel %vm13031_vm10, %v13029_v29, 128.0  ;;  %v3882_v45 = vsel %vm13034_vm14, %v13032_v10, 128.0  ;;  %v3883_v9 = vsel %vm13036_vm15, %v13035_v47, 128.0 }
 0x561   : > { %v3977_v37 = vpop.permute.xlu1 %3976  ;;  %v3884_v46 = vsel %vm13037_vm2, %v13035_v47, 128.0  ;;  %v3900_v11 = vmin.f32 %v3869_v30, %v3873_v23  ;;  %v3921_v3 = vmin.f32 %v3870_v50, %v3874_v24  ;;  %vm13039_vm9 = vcmp.le.f32.partialorder %v10149_v13, %v10222_v35 }
 0x562   : > { %v10393_v29 = vpop.permute.xlu2 %4048  ;;  %v3885_v32 = vsel %vm13039_vm9, %v13038_v63, 128.0  ;;  %vm13040_vm11 = vcmp.le.f32.partialorder %v10152_v15, %v10224_v51  ;;  %vm13041_vm12 = vcmp.le.f32.partialorder %v10163_v62, %v10222_v35  ;;  %vm13042_vm13 = vcmp.le.f32.partialorder %v10166_v2, %v10224_v51 }
 0x563   : > { %v3886_v19 = vsel %vm13040_vm11, %v13038_v63, 128.0  ;;  %v3887_v12 = vsel %vm13041_vm12, %v12938_v60, 128.0  ;;  %v3888_v4 = vsel %vm13042_vm13, %v12938_v60, 128.0  ;;  %v3901_v57 = vmin.f32 %v3899_v59, %v3875_v36 }
 0x564   : > { %v3902_v30 = vmin.f32 %v3900_v11, %v3877_v7  ;;  %v3922_v50 = vmin.f32 %v3920_v33, %v3876_v31  ;;  %v3923_v13 = vmin.f32 %v3921_v3, %v3878_v49  ;;  %vm13043_vm10 = vcmp.le.f32.partialorder %v10101_v53, %v10222_v35 }
 0x565   : > { %v3889_v15 = vsel %vm13043_vm10, %v12940_v44, 128.0  ;;  %vm13044_vm0 = vcmp.le.f32.partialorder %v10104_v18, %v10224_v51  ;;  %v4023_v21 = vmul.f32 %v3977_v37, %v12912_v41  ;;  %v4024_v55 = vmul.f32 %v3977_v37, %v12913_v39 }
 0x566   : > { %v3890_v62 = vsel %vm13044_vm0, %v12940_v44, 128.0  ;;  %v3903_v2 = vmin.f32 %v3901_v57, %v3879_v0  ;;  %v3904_v23 = vmin.f32 %v3902_v30, %v3881_v40  ;;  %v3924_v59 = vmin.f32 %v3922_v50, %v3880_v52 }
 0x567   : > { %v3925_v24 = vmin.f32 %v3923_v13, %v3882_v45  ;;  %v4017_v3 = vmul.f32 %v3965_v43, %v12912_v41  ;;  %v4018_v33 = vmul.f32 %v3965_v43, %v12913_v39  ;;  %v10423_v36 = vadd.f32 %v4119_v28, %v4023_v21  ;;  %v13046_v43 = vld [vmem:[#allocation67_spill] sm:$0xff] }
 0x568   : > { %v10425_v53 = vadd.f32 %v4120_v56, %v4024_v55  ;;  %v3905_v31 = vmin.f32 %v3903_v2, %v3883_v9  ;;  %v3906_v7 = vmin.f32 %v3904_v23, %v3885_v32  ;;  %v3926_v18 = vmin.f32 %v3924_v59, %v3884_v46  ;;  %v10445_v46 = vpop.permute.xlu0 %3972 }
 0x569   : > { %v3927_v49 = vmin.f32 %v3925_v24, %v3886_v19  ;;  %v3989_v11 = vpop.permute.xlu1 %3988  ;;  %vm13045_vm14 = vcmp.le.f32.partialorder %v10171_v34, %v10222_v35  ;;  %v3892_v37 = vsel %vm3860_vm5, %v12943_v22, 128.0  ;;  %v3893_v28 = vsel %vm3861_vm4, %v13046_v43, 128.0 }
 0x56a   : > { %v3891_v40 = vsel %vm13045_vm14, %v12943_v22, 128.0  ;;  %v3894_v56 = vsel %vm3862_vm1, %v13046_v43, 128.0  ;;  %v10443_v9 = vpop.permute.xlu2 %4056  ;;  %v3907_v0 = vmin.f32 %v3905_v31, %v3887_v12  ;;  %v3908_v34 = vmin.f32 %v3906_v7, %v3889_v15  ;;  %v13047_v12 = vld [vmem:[#allocation71_spill] sm:$0xff] }
 0x56b   : > { %v3928_v52 = vmin.f32 %v3926_v18, %v3888_v4  ;;  %v3929_v45 = vmin.f32 %v3927_v49, %v3890_v62  ;;  %v4029_v26 = vmul.f32 %v3989_v11, %v12912_v41  ;;  %v4030_v32 = vmul.f32 %v3989_v11, %v12913_v39  ;;  %v13048_v15 = vld [vmem:[#allocation63_spill] sm:$0xff] }
 0x56c   : > { %v10450_v8 = vadd.f32 %v10303_v25, %v4017_v3  ;;  %v10453_v19 = vadd.f32 %v10307_v48, %v4018_v33  ;;  %v3909_v14 = vmin.f32 %v3907_v0, %v3891_v40  ;;  %v3910_v57 = vmin.f32 %v3908_v34, %v3893_v28  ;;  %v13049_v28 = vld [vmem:[#allocation77_spill] sm:$0xff] }
 0x56d   : > { %v3930_v30 = vmin.f32 %v3928_v52, %v3892_v37  ;;  %v3931_v50 = vmin.f32 %v3929_v45, %v3894_v56  ;;  %v3895_v4 = vsel %vm3863_vm7, %v13047_v12, 128.0  ;;  %v3896_v13 = vsel %vm3864_vm3, %v13047_v12, 128.0 }
 0x56e   : > { %v3897_v25 = vsel %vm3865_vm8, %v13048_v15, 128.0  ;;  %v3898_v48 = vsel %vm3866_vm6, %v13048_v15, 128.0  ;;  %v3911_v62 = vmin.f32 %v3909_v14, %v3895_v4  ;;  %v10472_v2 = vadd.f32 %v10314_v38, %v4029_v26  ;;  %v13050_v14 = vld [vmem:[#allocation86_spill] sm:$0xff] }
 0x56f   : > { %v3912_v21 = vmin.f32 %v3910_v57, %v3897_v25  ;;  %v3932_v55 = vmin.f32 %v3930_v30, %v3896_v13  ;;  %v3933_v5 = vmin.f32 %v3931_v50, %v3898_v48  ;;  %v10475_v27 = vadd.f32 %v10317_v61, %v4030_v32  ;;  %v13052_v30 = vld [vmem:[#allocation124_spill] sm:$0xff] }
 0x570   : > { %vm4427_vm4 = vcmask 1045504   ;;  %v10491_v7 = vpop.permute.xlu0 %3984  ;;  %v4013_v25 = vmul.f32 %v10226_v54, %v12912_v41  ;;  %v4014_v48 = vmul.f32 %v10226_v54, %v12913_v39  ;;  %vm4430_vm9 = vcmask 1046528  }
 0x571   : > { %v3913_v23 = vmin.f32 %v3911_v62, %v3912_v21  ;;  %v3934_v59 = vmin.f32 %v3932_v55, %v3933_v5  ;;  %v10477_v24 = vpop.permute.xlu1 %4000  ;;  %v10484_v6 = vsel %vm4427_vm4, %v9927_v42, %v10222_v35  ;;  %v10489_v38 = vsel %vm4427_vm4, %v9932_v58, %v10224_v51 }
 0x572   : > { %v10479_v16 = vpop.permute.xlu2 %4068  ;;  %v4009_v42 = vmul.f32 %v13049_v28, %v12912_v41  ;;  %v4010_v35 = vmul.f32 %v13049_v28, %v12913_v39 }
 0x573   : > { %v3914_v3 = vrot.slane %v3913_v23, 4  ;;  %v3935_v61 = vrot.slane %v3934_v59, 4 }
 0x575   : > { %v3915_v33 = vmin.f32 %v3913_v23, %v3914_v3  ;;  %v3936_v31 = vmin.f32 %v3934_v59, %v3935_v61 }
 0x577   : > { %v3916_v18 = vrot.slane %v3915_v33, 2  ;;  %v3937_v49 = vrot.slane %v3936_v31, 2 }
 0x578   : > { %v10509_v4 = vpop.permute.xlu0 %3996 }
 0x579   : > { %v3917_v11 = vmin.f32 %v3915_v33, %v3916_v18  ;;  %v3938_v40 = vmin.f32 %v3936_v31, %v3937_v49  ;;  %v4045_v37 = vpop.permute.xlu1 %4044 }
 0x57a   : > { %v4105_v58 = vmul.f32 %v4045_v37, %v12872_v17  ;;  %v4106_v51 = vmul.f32 %v4045_v37, %v12873_v20  ;;  %v10499_v56 = vpop.permute.xlu2 %4080 }
 0x57b   : > { %v3918_v0 = vrot.slane %v3917_v11, 1  ;;  %v3939_v34 = vrot.slane %v3938_v40, 1 }
 0x57c   : > { %v4137_v52 = vadd.f32 %v4105_v58, %v4009_v42  ;;  %v4138_v45 = vadd.f32 %v4106_v51, %v4010_v35 }
 0x57d   : > { %v3919_v26 = vmin.f32 %v3917_v11, %v3918_v0  ;;  %v3940_v32 = vmin.f32 %v3938_v40, %v3939_v34  ;;  %v4107_v0 = vmul.f32 %v10393_v29, %v12872_v17  ;;  %v4108_v34 = vmul.f32 %v10393_v29, %v12873_v20 }
 0x57f   : > { %v10503_v57 = vsel %vm4427_vm4, %v13050_v14, %v3919_v26  ;;  %v10507_v50 = vsel %vm4427_vm4, %v13052_v30, %v3940_v32  ;;  %v13054_v32 = vld [vmem:[#allocation142_spill] sm:$0xff]  ;;  %v13055_v30 = vld [vmem:[#allocation147_spill] sm:$0xff] }
 0x580   : > { %13051 = vst [vmem:[#allocation100_spill] sm:$0xff] %v10503_v57  ;;  %v4173_v3 = vpop.permute.xlu0 %4172 }
 0x581   : > { %13053 = vst [vmem:[#allocation120_spill] sm:$0xff] %v10507_v50  ;;  %v4053_v13 = vpop.permute.xlu1 %4052  ;;  %v10517_v33 = vsub.f32 %v4173_v3, %v4137_v52  ;;  %v10519_v31 = vsub.f32 %v4173_v3, %v4138_v45 }
 0x582   : > { %v4109_v62 = vmul.f32 %v4053_v13, %v12872_v17  ;;  %v4110_v21 = vmul.f32 %v4053_v13, %v12873_v20  ;;  %v4169_v55 = vpop.permute.xlu2 %4168 }
 0x583   : > { %v10552_v14 = vsub.f32 %v4169_v55, %v13054_v32  ;;  %v10555_v13 = vsub.f32 %v4169_v55, %v13055_v30 }
 0x584   : > { %v4141_v5 = vadd.f32 %v4109_v62, %v4013_v25  ;;  %v4142_v23 = vadd.f32 %v4110_v21, %v4014_v48  ;;  %v4111_v62 = vmul.f32 %v10443_v9, %v12872_v17 }
 0x588   : > { %v4193_v29 = vpop.permute.xlu0 %4192 }
 0x589   : > { %v4065_v59 = vpop.permute.xlu1 %4064 }
 0x58a   : > { %v4181_v61 = vpop.permute.xlu2 %4180  ;;  %v4115_v21 = vmul.f32 %v4065_v59, %v12872_v17 }
 0x58b   : > { %v10521_v18 = vsub.f32 %v4181_v61, %v4141_v5  ;;  %v10523_v49 = vsub.f32 %v4181_v61, %v4142_v23  ;;  %v4116_v5 = vmul.f32 %v4065_v59, %v12873_v20  ;;  %v13056_v61 = vld [vmem:[#allocation204_spill] sm:$0xff] }
 0x58d   : > { %v4264_v54 = vmin.f32 %v10517_v33, %v10521_v18  ;;  %v4285_v11 = vmin.f32 %v10519_v31, %v10523_v49 }
 0x590   : > { %v4201_v57 = vpop.permute.xlu0 %4200 }
 0x591   : > { %v4077_v40 = vpop.permute.xlu1 %4076 }
 0x592   : > { %v4189_v37 = vpop.permute.xlu2 %4188 }
 0x593   : > { %v10530_v28 = vsub.f32 %v4189_v37, %v10450_v8  ;;  %v10533_v42 = vsub.f32 %v4189_v37, %v10453_v19  ;;  %v4011_v8 = vmul.f32 %v10375_v1, %v12912_v41  ;;  %v4012_v19 = vmul.f32 %v10375_v1, %v12913_v39 }
 0x594   : > { %v4112_v1 = vmul.f32 %v10443_v9, %v12873_v20  ;;  %v13057_v9 = vld [vmem:[#allocation141_spill] sm:$0xff] }
 0x595   : > { %v10536_v35 = vmin.f32 %v4264_v54, %v10530_v28  ;;  %v10539_v58 = vmin.f32 %v4285_v11, %v10533_v42  ;;  %v4139_v52 = vadd.f32 %v4107_v0, %v4011_v8  ;;  %v4140_v45 = vadd.f32 %v4108_v34, %v4012_v19 }
 0x596   : > { %v4015_v54 = vmul.f32 %v13056_v61, %v12912_v41  ;;  %v4016_v11 = vmul.f32 %v13056_v61, %v12913_v39  ;;  %v4019_v37 = vmul.f32 %v13057_v9, %v12912_v41  ;;  %v4020_v59 = vmul.f32 %v13057_v9, %v12913_v39 }
 0x597   : > { %v10592_v9 = vsub.f32 %v4201_v57, %v10423_v36 }
 0x598   : > { %v4147_v0 = vadd.f32 %v4115_v21, %v4019_v37  ;;  %v4148_v34 = vadd.f32 %v4116_v5, %v4020_v59  ;;  %v4143_v8 = vadd.f32 %v4111_v62, %v4015_v54  ;;  %v4144_v19 = vadd.f32 %v4112_v1, %v4016_v11 }
 0x599   : > { %v10541_v51 = vpop.permute.xlu1 %4088  ;;  %v10595_v62 = vsub.f32 %v4201_v57, %v10425_v53  ;;  %v4021_v53 = vmul.f32 %v10445_v46, %v12912_v41  ;;  %v4022_v57 = vmul.f32 %v10445_v46, %v12913_v39  ;;  %v4122_v11 = vmul.f32 %v4077_v40, %v12873_v20 }
 0x59a   : > { %v10585_v32 = vsub.f32 %v4193_v29, %v4147_v0  ;;  %v10587_v30 = vsub.f32 %v4193_v29, %v4148_v34  ;;  %v4117_v29 = vmul.f32 %v10479_v16, %v12872_v17 }
 0x59b   : > { %v10571_v3 = vpop.permute.xlu2 %4092 }
 0x59c   : > { %v4149_v37 = vadd.f32 %v4117_v29, %v4021_v53 }
 0x5a1   : > { %v4177_v26 = vpop.permute.xlu1 %4176 }
 0x5a2   : > { %v10557_v25 = vsub.f32 %v4177_v26, %v4139_v52  ;;  %v10559_v48 = vsub.f32 %v4177_v26, %v4140_v45 }
 0x5a3   : > { %v4097_v5 = vpop.permute.xlu2 %4096 }
 0x5a4   : > { %v4263_v23 = vmin.f32 %v10552_v14, %v10557_v25  ;;  %v4284_v55 = vmin.f32 %v10555_v13, %v10559_v48 }
 0x5a9   : > { %v4185_v52 = vpop.permute.xlu1 %4184 }
 0x5aa   : > { %v10581_v45 = vsub.f32 %v4185_v52, %v4143_v8  ;;  %v10583_v26 = vsub.f32 %v4185_v52, %v4144_v19 }
 0x5ac   : > { %v4265_v61 = vmin.f32 %v4263_v23, %v10581_v45  ;;  %v4286_v50 = vmin.f32 %v4284_v55, %v10583_v26  ;;  %v4118_v23 = vmul.f32 %v10479_v16, %v12873_v20  ;;  %v13058_v16 = vld [vmem:[#allocation91_spill] sm:$0xff] }
 0x5ad   : > { %v4025_v0 = vmul.f32 %v13058_v16, %v12912_v41  ;;  %v4026_v34 = vmul.f32 %v13058_v16, %v12913_v39 }
 0x5ae   : > { %v4267_v1 = vmin.f32 %v4265_v61, %v10585_v32  ;;  %v4288_v21 = vmin.f32 %v4286_v50, %v10587_v30  ;;  %v4121_v50 = vmul.f32 %v4077_v40, %v12872_v17  ;;  %v4150_v59 = vadd.f32 %v4118_v23, %v4022_v57 }
 0x5af   : > { %v4154_v61 = vadd.f32 %v4122_v11, %v4026_v34  ;;  %v4127_v34 = vmul.f32 %v10541_v51, %v12872_v17 }
 0x5b0   : > { %v10604_v55 = vmin.f32 %v4267_v1, %v10592_v9  ;;  %v10607_v36 = vmin.f32 %v4288_v21, %v10595_v62  ;;  %v4153_v52 = vadd.f32 %v4121_v50, %v4025_v0  ;;  %v4213_v1 = vpop.permute.xlu2 %4212 }
 0x5b1   : > { %v4197_v54 = vpop.permute.xlu1 %4196  ;;  %v10632_v53 = vsub.f32 %v4213_v1, %v10472_v2  ;;  %v4027_v2 = vmul.f32 %v10491_v7, %v12912_v41 }
 0x5b2   : > { %v10619_v8 = vsub.f32 %v4197_v54, %v4149_v37  ;;  %v10621_v19 = vsub.f32 %v4197_v54, %v4150_v59  ;;  %v10635_v54 = vsub.f32 %v4213_v1, %v10475_v27  ;;  %v4124_v37 = vmul.f32 %v10499_v56, %v12873_v20 }
 0x5b3   : > { %v4028_v27 = vmul.f32 %v10491_v7, %v12913_v39  ;;  %v4132_v1 = vmul.f32 %v4097_v5, %v12873_v20  ;;  %v4035_v7 = vmul.f32 %v10477_v24, %v12912_v41 }
 0x5b4   : > { %v4268_v21 = vmin.f32 %v10536_v35, %v10619_v8  ;;  %v4289_v40 = vmin.f32 %v10539_v58, %v10621_v19  ;;  %v4123_v58 = vmul.f32 %v10499_v56, %v12872_v17  ;;  %v13059_v56 = vld [vmem:[#allocation199_spill] sm:$0xff] }
 0x5b5   : > { %v4156_v0 = vadd.f32 %v4124_v37, %v4028_v27  ;;  %v4130_v27 = vmul.f32 %v10571_v3, %v12873_v20 }
 0x5b6   : > { %v4155_v16 = vadd.f32 %v4123_v58, %v4027_v2  ;;  %v4129_v2 = vmul.f32 %v10571_v3, %v12872_v17  ;;  %v13060_v3 = vld [vmem:[#allocation129_spill] sm:$0xff] }
 0x5b9   : > { %v4205_v46 = vpop.permute.xlu1 %4204 }
 0x5ba   : > { %v10627_v29 = vsub.f32 %v4205_v46, %v4153_v52  ;;  %v10629_v23 = vsub.f32 %v4205_v46, %v4154_v61  ;;  %v4128_v52 = vmul.f32 %v10541_v51, %v12873_v20  ;;  %v4131_v61 = vmul.f32 %v4097_v5, %v12872_v17 }
 0x5bb   : > { %v4031_v46 = vmul.f32 %v13059_v56, %v12912_v41 }
 0x5bc   : > { %v4270_v57 = vmin.f32 %v4268_v21, %v10627_v29  ;;  %v4291_v50 = vmin.f32 %v4289_v40, %v10629_v23  ;;  %v4032_v21 = vmul.f32 %v13059_v56, %v12913_v39  ;;  %v4036_v40 = vmul.f32 %v10477_v24, %v12913_v39 }
 0x5bd   : > { %v4163_v51 = vadd.f32 %v4131_v61, %v4035_v7  ;;  %v4159_v37 = vadd.f32 %v4127_v34, %v4031_v46  ;;  %v4034_v34 = vmul.f32 %v10509_v4, %v12913_v39  ;;  %v4037_v61 = vmul.f32 %v13060_v3, %v12912_v41  ;;  %v13061_v7 = vld [vmem:[#allocation23_spill] sm:$0xff] }
 0x5be   : > { %v4272_v11 = vmin.f32 %v4270_v57, %v10632_v53  ;;  %v4293_v35 = vmin.f32 %v4291_v50, %v10635_v54  ;;  %v4164_v58 = vadd.f32 %v4132_v1, %v4036_v40  ;;  %v4160_v5 = vadd.f32 %v4128_v52, %v4032_v21  ;;  %v4225_v52 = vpop.permute.xlu0 %4224 }
 0x5bf   : > { %v10687_v1 = vsub.f32 %v4225_v52, %v4163_v51  ;;  %v4133_v40 = vmul.f32 %v13061_v7, %v12872_v17 }
 0x5c1   : > { %v4209_v59 = vpop.permute.xlu1 %4208 }
 0x5c2   : > { %v10663_v57 = vsub.f32 %v4209_v59, %v4155_v16  ;;  %v10665_v50 = vsub.f32 %v4209_v59, %v4156_v0  ;;  %v4033_v0 = vmul.f32 %v10509_v4, %v12912_v41  ;;  %v4134_v4 = vmul.f32 %v13061_v7, %v12873_v20 }
 0x5c3   : > { %v4162_v41 = vadd.f32 %v4130_v27, %v4034_v34 }
 0x5c4   : > { %v4271_v15 = vmin.f32 %v10604_v55, %v10663_v57  ;;  %v4292_v24 = vmin.f32 %v10607_v36, %v10665_v50  ;;  %v4038_v55 = vmul.f32 %v13060_v3, %v12913_v39  ;;  %v10689_v36 = vsub.f32 %v4225_v52, %v4164_v58 }
 0x5c6   : > { %v4166_v52 = vadd.f32 %v4134_v4, %v4038_v55 }
 0x5c9   : > { %v4217_v56 = vpop.permute.xlu1 %4216 }
 0x5ca   : > { %v10675_v16 = vsub.f32 %v4217_v56, %v4159_v37  ;;  %v10677_v59 = vsub.f32 %v4217_v56, %v4160_v5  ;;  %v4221_v37 = vpop.permute.xlu2 %4220  ;;  %v4161_v5 = vadd.f32 %v4129_v2, %v4033_v0 }
 0x5cb   : > { %v10701_v58 = vsub.f32 %v4221_v37, %v4162_v41 }
 0x5cc   : > { %v4273_v46 = vmin.f32 %v4271_v15, %v10675_v16  ;;  %v4294_v21 = vmin.f32 %v4292_v24, %v10677_v59  ;;  %v10699_v51 = vsub.f32 %v4221_v37, %v4161_v5  ;;  %v4165_v15 = vadd.f32 %v4133_v40, %v4037_v61 }
 0x5cd   : > { %v4295_v17 = vmin.f32 %v4293_v35, %v10701_v58 }
 0x5ce   : > { %v4275_v56 = vmin.f32 %v4273_v46, %v10687_v1  ;;  %v4296_v39 = vmin.f32 %v4294_v21, %v10689_v36  ;;  %v4274_v3 = vmin.f32 %v4272_v11, %v10699_v51 }
 0x5d1   : > { %v4229_v24 = vpop.permute.xlu1 %4228 }
 0x5d2   : > { %v10705_v12 = vsub.f32 %v4229_v24, %v4165_v15  ;;  %v10707_v20 = vsub.f32 %v4229_v24, %v4166_v52  ;;  %v4969_v15 = vmov 8.0   ;;  %v13062_v52 = vld [vmem:[#allocation47_spill] sm:$0xff] }
 0x5d3   : > { %4870 = vrcp.f32 %v4969_v15 }
 0x5d4   : > { %v4276_v2 = vmin.f32 %v4274_v3, %v10705_v12  ;;  %v4297_v27 = vmin.f32 %v4295_v17, %v10707_v20  ;;  %v13063_v17 = vld [vmem:[#allocation37_spill] sm:$0xff] }
 0x5d6   : > { %v4277_v0 = vmin.f32 %v4275_v56, %v4276_v2  ;;  %v4298_v34 = vmin.f32 %v4296_v39, %v4297_v27 }
 0x5d8   : > { %v4278_v46 = vrot.slane %v4277_v0, 4  ;;  %v4299_v21 = vrot.slane %v4298_v34, 4 }
 0x5d9   : > { %v10751_v56 = vpop.eup %4870 }
 0x5da   : > { %v4279_v7 = vmin.f32 %v4277_v0, %v4278_v46  ;;  %v4300_v61 = vmin.f32 %v4298_v34, %v4299_v21  ;;  %v10770_v39 = vmul.f32 8.0, %v10751_v56  ;;  %v13064_v0 = vld [vmem:[#allocation70_spill] sm:$0xff]  ;;  %v13065_v34 = vld [vmem:[#allocation76_spill] sm:$0xff] }
 0x5dc   : > { %v4280_v55 = vrot.slane %v4279_v7, 2  ;;  %v4301_v40 = vrot.slane %v4300_v61, 2 }
 0x5de   : > { %v4281_v4 = vmin.f32 %v4279_v7, %v4280_v55  ;;  %v4302_v11 = vmin.f32 %v4300_v61, %v4301_v40  ;;  %v13069_v61 = vld [vmem:[#allocation62_spill] sm:$0xff] }
 0x5e0   : > { %v4282_v37 = vrot.slane %v4281_v4, 1  ;;  %v4303_v35 = vrot.slane %v4302_v11, 1 }
 0x5e2   : > { %v10711_v5 = vmin.f32 %v4281_v4, %v4282_v37  ;;  %v10713_v41 = vmin.f32 %v4302_v11, %v4303_v35  ;;  %v13072_v35 = vld [vmem:[#allocation50_spill] sm:$0xff] }
 0x5e4   : > { %vm4305_vm3 = vcmp.le.f32.partialorder %v10552_v14, %v10711_v5  ;;  %vm4306_vm8 = vcmp.le.f32.partialorder %v10555_v13, %v10713_v41  ;;  %vm4307_vm6 = vcmp.le.f32.partialorder %v10517_v33, %v10711_v5  ;;  %vm4308_vm5 = vcmp.le.f32.partialorder %v10519_v31, %v10713_v41 }
 0x5e5   : > { %vm4309_vm1 = vcmp.le.f32.partialorder %v10557_v25, %v10711_v5  ;;  %vm4310_vm7 = vcmp.le.f32.partialorder %v10559_v48, %v10713_v41  ;;  %vm4311_vm15 = vcmp.le.f32.partialorder %v10521_v18, %v10711_v5  ;;  %vm4312_vm2 = vcmp.le.f32.partialorder %v10523_v49, %v10713_v41  ;;  %v13066_v18 = vld [vmem:[#allocation57_spill] sm:$0xff] }
 0x5e6   : > { %vm4328_vm0 = vcmp.le.f32.partialorder %v10635_v54, %v10713_v41  ;;  %vm4329_vm14 = vcmp.le.f32.partialorder %v10675_v16, %v10711_v5  ;;  %vm4330_vm4 = vcmp.le.f32.partialorder %v10677_v59, %v10713_v41  ;;  %vm4333_vm11 = vcmp.le.f32.partialorder %v10687_v1, %v10711_v5 }
 0x5e7   : > { %vm4334_vm12 = vcmp.le.f32.partialorder %v10689_v36, %v10713_v41  ;;  %v4337_v24 = vsel %vm4305_vm3, %v13062_v52, 128.0  ;;  %v4338_v3 = vsel %vm4306_vm8, %v13062_v52, 128.0  ;;  %v4339_v2 = vsel %vm4307_vm6, %v13063_v17, 128.0 }
 0x5e8   : > { %v4340_v27 = vsel %vm4308_vm5, %v13063_v17, 128.0  ;;  %v4341_v14 = vsel %vm4309_vm1, %v13064_v0, 128.0  ;;  %v4342_v13 = vsel %vm4310_vm7, %v13064_v0, 128.0  ;;  %v4343_v33 = vsel %vm4311_vm15, %v13065_v34, 128.0 }
 0x5e9   : > { %v4344_v31 = vsel %vm4312_vm2, %v13065_v34, 128.0  ;;  %vm4319_vm3 = vcmp.le.f32.partialorder %v10619_v8, %v10711_v5  ;;  %vm4320_vm8 = vcmp.le.f32.partialorder %v10621_v19, %v10713_v41  ;;  %vm4325_vm6 = vcmp.le.f32.partialorder %v10663_v57, %v10711_v5 }
 0x5ea   : > { %vm4326_vm5 = vcmp.le.f32.partialorder %v10665_v50, %v10713_v41  ;;  %vm4331_vm1 = vcmp.le.f32.partialorder %v10699_v51, %v10711_v5  ;;  %vm4332_vm7 = vcmp.le.f32.partialorder %v10701_v58, %v10713_v41  ;;  %vm13067_vm15 = vcmp.le.f32.partialorder %v10581_v45, %v10711_v5  ;;  %v13081_v51 = vld [vmem:[#allocation63_spill] sm:$0xff] }
 0x5eb   : > { %v4345_v49 = vsel %vm13067_vm15, %v13066_v18, 128.0  ;;  %vm13068_vm2 = vcmp.le.f32.partialorder %v10583_v26, %v10713_v41  ;;  %v4369_v48 = vmin.f32 %v4337_v24, %v4341_v14  ;;  %v4370_v46 = vmin.f32 %v4339_v2, %v4343_v33  ;;  %v13080_v33 = vld [vmem:[#allocation71_spill] sm:$0xff] }
 0x5ec   : > { %v4346_v25 = vsel %vm13068_vm2, %v13066_v18, 128.0  ;;  %v4390_v21 = vmin.f32 %v4338_v3, %v4342_v13  ;;  %v4391_v7 = vmin.f32 %v4340_v27, %v4344_v31  ;;  %vm13070_vm10 = vcmp.le.f32.partialorder %v10530_v28, %v10711_v5 }
 0x5ed   : > { %v4347_v55 = vsel %vm13070_vm10, %v13069_v61, 128.0  ;;  %vm13071_vm13 = vcmp.le.f32.partialorder %v10533_v42, %v10713_v41  ;;  %v10835_v40 = vsel %vm4430_vm9, %v10484_v6, %v10711_v5  ;;  %v10840_v26 = vsel %vm4430_vm9, %v10489_v38, %v10713_v41 }
 0x5ee   : > { %v4348_v45 = vsel %vm13071_vm13, %v13069_v61, 128.0  ;;  %v4371_v4 = vmin.f32 %v4369_v48, %v4345_v49  ;;  %v4372_v11 = vmin.f32 %v4370_v46, %v4347_v55  ;;  %v4392_v37 = vmin.f32 %v4390_v21, %v4346_v25 }
 0x5ef   : > { %v4393_v28 = vmin.f32 %v4391_v7, %v4348_v45  ;;  %vm13073_vm10 = vcmp.le.f32.partialorder %v10585_v32, %v10711_v5  ;;  %vm13074_vm13 = vcmp.le.f32.partialorder %v10587_v30, %v10713_v41  ;;  %v4351_v38 = vsel %vm4319_vm3, %v13032_v10, 128.0 }
 0x5f0   : > { %v4349_v42 = vsel %vm13073_vm10, %v13072_v35, 128.0  ;;  %v4350_v6 = vsel %vm13074_vm13, %v13072_v35, 128.0  ;;  %v4352_v15 = vsel %vm4320_vm8, %v13032_v10, 128.0  ;;  %v4374_v24 = vmin.f32 %v4372_v11, %v4351_v38  ;;  %v13084_v35 = vld [vmem:[#allocation100_spill] sm:$0xff] }
 0x5f1   : > { %v4373_v52 = vmin.f32 %v4371_v4, %v4349_v42  ;;  %v4394_v3 = vmin.f32 %v4392_v37, %v4350_v6  ;;  %v4395_v32 = vmin.f32 %v4393_v28, %v4352_v15  ;;  %vm13075_vm15 = vcmp.le.f32.partialorder %v10592_v9, %v10711_v5  ;;  %v13085_v6 = vld [vmem:[#allocation120_spill] sm:$0xff] }
 0x5f2   : > { %v4353_v30 = vsel %vm13075_vm15, %v13035_v47, 128.0  ;;  %vm13076_vm2 = vcmp.le.f32.partialorder %v10595_v62, %v10713_v41  ;;  %vm13077_vm3 = vcmp.le.f32.partialorder %v10627_v29, %v10711_v5  ;;  %vm13078_vm8 = vcmp.le.f32.partialorder %v10629_v23, %v10713_v41 }
 0x5f3   : > { %v4354_v8 = vsel %vm13076_vm2, %v13035_v47, 128.0  ;;  %v4355_v19 = vsel %vm13077_vm3, %v13038_v63, 128.0  ;;  %v4356_v10 = vsel %vm13078_vm8, %v13038_v63, 128.0  ;;  %v4375_v17 = vmin.f32 %v4373_v52, %v4353_v30 }
 0x5f4   : > { %v4376_v2 = vmin.f32 %v4374_v24, %v4355_v19  ;;  %v4396_v27 = vmin.f32 %v4394_v3, %v4354_v8  ;;  %v4397_v9 = vmin.f32 %v4395_v32, %v4356_v10  ;;  %v4357_v62 = vsel %vm4325_vm6, %v12938_v60, 128.0 }
 0x5f5   : > { %v4358_v47 = vsel %vm4326_vm5, %v12938_v60, 128.0  ;;  %vm13079_vm10 = vcmp.le.f32.partialorder %v10632_v53, %v10711_v5  ;;  %v4360_v63 = vsel %vm4328_vm0, %v12940_v44, 128.0  ;;  %v4377_v23 = vmin.f32 %v4375_v17, %v4357_v62 }
 0x5f6   : > { %v4359_v29 = vsel %vm13079_vm10, %v12940_v44, 128.0  ;;  %v4398_v14 = vmin.f32 %v4396_v27, %v4358_v47  ;;  %v4399_v57 = vmin.f32 %v4397_v9, %v4360_v63  ;;  %v4361_v50 = vsel %vm4329_vm14, %v12943_v22, 128.0 }
 0x5f7   : > { %v4378_v0 = vmin.f32 %v4376_v2, %v4359_v29  ;;  %v4362_v60 = vsel %vm4330_vm4, %v12943_v22, 128.0  ;;  %v4363_v53 = vsel %vm4331_vm1, %v13046_v43, 128.0  ;;  %v4364_v44 = vsel %vm4332_vm7, %v13046_v43, 128.0 }
 0x5f8   : > { %v4379_v54 = vmin.f32 %v4377_v23, %v4361_v50  ;;  %v4400_v34 = vmin.f32 %v4398_v14, %v4362_v60  ;;  %v4401_v16 = vmin.f32 %v4399_v57, %v4364_v44  ;;  %v4365_v59 = vsel %vm4333_vm11, %v13080_v33, 128.0 }
 0x5f9   : > { %v4380_v13 = vmin.f32 %v4378_v0, %v4363_v53  ;;  %v4366_v22 = vsel %vm4334_vm12, %v13080_v33, 128.0  ;;  %vm13082_vm0 = vcmp.le.f32.partialorder %v10705_v12, %v10711_v5  ;;  %vm13083_vm14 = vcmp.le.f32.partialorder %v10707_v20, %v10713_v41 }
 0x5fa   : > { %v4367_v58 = vsel %vm13082_vm0, %v13081_v51, 128.0  ;;  %v4368_v43 = vsel %vm13083_vm14, %v13081_v51, 128.0  ;;  %v4381_v31 = vmin.f32 %v4379_v54, %v4365_v59  ;;  %v4402_v49 = vmin.f32 %v4400_v34, %v4366_v22 }
 0x5fb   : > { %v4382_v18 = vmin.f32 %v4380_v13, %v4367_v58  ;;  %v4403_v1 = vmin.f32 %v4401_v16, %v4368_v43  ;;  %v4468_v46 = vsub.f32 1.0, %v10770_v39  ;;  %vm4471_vm11 = vweird.f32 %v10751_v56 }
 0x5fc   : > { %vm4451_vm12 = vcmp.lt.f32.partialorder %v10835_v40, inf  ;;  %vm4452_vm4 = vcmp.lt.f32.partialorder %v10840_v26, inf }
 0x5fd   : > { %v4383_v25 = vmin.f32 %v4381_v31, %v4382_v18  ;;  %v4404_v48 = vmin.f32 %v4402_v49, %v4403_v1  ;;  %v4469_v12 = vmul.f32 %v10751_v56, %v4468_v46 }
 0x5ff   : > { %v4384_v36 = vrot.slane %v4383_v25, 4  ;;  %v4405_v21 = vrot.slane %v4404_v48, 4  ;;  %v4470_v41 = vadd.f32 %v10751_v56, %v4469_v12 }
 0x601   : > { %v4385_v7 = vmin.f32 %v4383_v25, %v4384_v36  ;;  %v4406_v61 = vmin.f32 %v4404_v48, %v4405_v21  ;;  %v4472_v28 = vsel %vm4471_vm11, %v10751_v56, %v4470_v41 }
 0x603   : > { %v4386_v5 = vrot.slane %v4385_v7, 2  ;;  %v4407_v55 = vrot.slane %v4406_v61, 2 }
 0x605   : > { %v4387_v45 = vmin.f32 %v4385_v7, %v4386_v5  ;;  %v4408_v20 = vmin.f32 %v4406_v61, %v4407_v55 }
 0x607   : > { %v4388_v4 = vrot.slane %v4387_v45, 1  ;;  %v4409_v11 = vrot.slane %v4408_v20, 1 }
 0x609   : > { %v4389_v39 = vmin.f32 %v4387_v45, %v4388_v4  ;;  %v4410_v37 = vmin.f32 %v4408_v20, %v4409_v11 }
 0x60b   : > { %v4445_v42 = vsel %vm4430_vm9, %v13084_v35, %v4389_v39  ;;  %v4446_v38 = vsel %vm4430_vm9, %v13085_v6, %v4410_v37 }
 0x60c   : > { %v4457_v15 = vsel %vm4451_vm12, %v4445_v42, 0.0  ;;  %v4458_v52 = vsel %vm4452_vm4, %v4446_v38, 0.0 }
 0x60d   : > { %v4473_v24 = vmul.f32 %v4472_v28, %v4457_v15  ;;  %v4474_v3 = vmul.f32 %v4472_v28, %v4458_v52 }
 0x60f   : > { %v4475_v32 = vfloor.f32 %v4473_v24  ;;  %v4476_v56 = vfloor.f32 %v4474_v3 }
 0x611   : > { %v4477_v30 = vmul.f32 8.0, %v4475_v32  ;;  %v4478_v8 = vmul.f32 8.0, %v4476_v56  ;;  %v4487_v19 = vmul.f32 0.2857143, %v4475_v32  ;;  %v4488_v10 = vmul.f32 0.2857143, %v4476_v56 }
 0x613   : > { %v4479_v40 = vsub.f32 %v4457_v15, %v4477_v30  ;;  %v4480_v26 = vsub.f32 %v4458_v52, %v4478_v8  ;;  %v4674_v17 = vadd.f32 -1.0, %v4487_v19  ;;  %v4675_v2 = vadd.f32 -1.0, %v4488_v10 }
 0x615   : > { %v4481_v27 = vmul.f32 0.2857143, %v4479_v40  ;;  %v4482_v9 = vmul.f32 0.2857143, %v4480_v26  ;;  %4676 = vst [vmem:[%s230_s7 + $0x10] sm:$0xff] %v4674_v17 }
 0x616   : > { %4677 = vst [vmem:[%s230_s7 + $0x18] sm:$0xff] %v4675_v2 }
 0x617   : > { %v4672_v62 = vadd.f32 -1.0, %v4481_v27  ;;  %v4673_v47 = vadd.f32 -1.0, %v4482_v9 }
 0x619   : > { %4485 = vst [vmem:[%s230_s7] sm:$0xff] %v4672_v62 }
 0x61a   : > { %4486 = vst [vmem:[%s230_s7 + $0x8] sm:$0xff] %v4673_v47 }
 0x61b   : > { %4899 = shalt.err (!%p4896_p5)
}
 0x61c   : > { %s4970_s22 = smov 256   ;;  %s4971_s24 = smov 512  }
 0x61d   : > { %s4972_s26 = smov 16  }
 0x61e   : > { %4688 = dma.vmem_to_hbm [thread:$0]  (%p5038_p4), %s4521_s8, 512, %s4523_s18, %s4504_s9, %s4970_s22, %s4971_s24, %s4972_s26  }
 0x61f PF: > { %p4694_p6 = scmp.ge.s32.totalorder %s4950_s20, 2  ;;  %s4549_s30 = sand.u32 1, %s4930_s15  }
 0x620   : > { %s4550_s5 = scalar_lea.sflag [#allocation5], %s4549_s30 }
 0x621   : > { %p4691_p7 = pnand %p4694_p6, %p5045_p8 }
 0x623   : > { %p4692_p9 = pneg %p4691_p7 }
 0x625   : > { %4925 = dma.done.wait (%p4692_p9), %s4550_s5, 512  }
 0x626   : > { %4927 = vsyncadd (%p4692_p9), %s4550_s5, 4294966784  ;;  %s18_s20 = sadd.s32 1, %s4950_s20   ;;  %s13086_s15 = smov %s4934_s16 }
 0x627   : > { %p15_p10 = scmp.ge.s32.totalorder %s18_s20, 4   ;;  %s13087_s16 = smov %s4938_s17 }
 0x628   : > { %s13088_s17 = smov %s5051_s28  ;;  %s13089_s18 = smov %s4946_s19 }
 0x629   : > { %s13090_s19 = smov %s13092_s23  ;;  %17 = sbr.rel (!%p15_p10) target bundleno = 4 (0x4), region = 91 }
 0x62e   :  { %4556 = vsyncpa [#allocation5], 1 }
 0x62f   :  { %4558 = vsyncpa [#allocation5 + $0x1], 1 }

</bundles_post_ra>
